<compile_context>
chip_gen: v7x
topology: tpu7x:2x2x1
jax: 0.10.0
libtpu: 0.0.40
codegen_flags: <defaults>
</compile_context>

<pallas_src>
import math

import jax
import jax.numpy as jnp
from jax.experimental import pallas as pl
from jax.experimental.pallas import tpu as pltpu

# ----------------------------- model configuration -----------------------------
VOCAB = 50
EMBED_DIM = 32            # config.embedding.embed_dim
HIDDEN = 128              # config.encoder.hidden_dimension (== linear_map out_features)
INTERMEDIATE = 3072       # hard-coded in SelfAttentionBlock
NUM_HEADS = 4
HEAD_DIM = HIDDEN // NUM_HEADS
MAX_POS = 128             # positional_embedding length
NUM_LAYERS = 2
LN_EPS = 1e-12
PAD_INDEX = 0
FFN_CHUNK = 1024          # 3072 / 1024 = 3 chunks over the intermediate dim

# CompilerParams name hedge (newer jax: CompilerParams, older: TPUCompilerParams)
_CompilerParams = getattr(pltpu, "CompilerParams", None) or getattr(pltpu, "TPUCompilerParams")


# ----------------------------- in-kernel math helpers ---------------------------
def _gelu(x):
    # tanh-approximation GELU: one EUP tanh + a few VALU ops (vs ~10 VALU + exp for erf).
    # Matches the erf-based reference gelu to ~1e-3 absolute.
    c = math.sqrt(2.0 / math.pi)
    return 0.5 * x * (1.0 + jnp.tanh(c * (x + 0.044715 * (x * x * x))))


def _layernorm(x, gamma, beta):
    # torch.nn.LayerNorm over last dim, biased variance, eps=1e-12
    mu = jnp.mean(x, axis=-1, keepdims=True)
    var = jnp.mean((x - mu) ** 2, axis=-1, keepdims=True)
    return (x - mu) * jax.lax.rsqrt(var + LN_EPS) * gamma + beta


# -------------------------- fused encoder kernel (per batch) --------------------
def _encoder_kernel(x_ref, mask_ref,
                    wlin_ref, blin_ref,
                    wqkv_ref, bqkv_ref, wo_ref, bo_ref, ln1g_ref, ln1b_ref,
                    w1_ref, b1_ref, w2_ref, b2_ref, ln2g_ref, ln2b_ref,
                    o_ref):
    x = x_ref[0]                               # (S, E) f32, one batch element
    add_mask = mask_ref[0]                     # (1, S) additive mask (0 or -1000)
    S = x.shape[0]

    # ---- linear_map + tanh ----
    h = jnp.tanh(
        jnp.dot(x.astype(jnp.bfloat16), wlin_ref[...],
                preferred_element_type=jnp.float32) + blin_ref[...])       # (S, H) f32

    inv_sqrt_d = 1.0 / math.sqrt(HEAD_DIM)

    for l in range(NUM_LAYERS):                # static unroll over the 2 layers
        # ======================= self-attention + LayerNorm ======================
        h16 = h.astype(jnp.bfloat16)
        qkv = jnp.dot(h16, wqkv_ref[l], preferred_element_type=jnp.float32) \
              + bqkv_ref[l]                                                # (S, 3H) f32
        q = qkv[:, 0:HIDDEN]
        k = qkv[:, HIDDEN:2 * HIDDEN]
        v = qkv[:, 2 * HIDDEN:3 * HIDDEN]

        # head-batched layout (NUM_HEADS, S, HEAD_DIM)
        qh = jnp.stack([q[:, i * HEAD_DIM:(i + 1) * HEAD_DIM] for i in range(NUM_HEADS)], 0)
        kh = jnp.stack([k[:, i * HEAD_DIM:(i + 1) * HEAD_DIM] for i in range(NUM_HEADS)], 0)
        vh = jnp.stack([v[:, i * HEAD_DIM:(i + 1) * HEAD_DIM] for i in range(NUM_HEADS)], 0)

        s = jnp.einsum('hqd,hkd->hqk',
                       qh.astype(jnp.bfloat16), kh.astype(jnp.bfloat16),
                       preferred_element_type=jnp.float32) * inv_sqrt_d    # (NH, S, S)
        s = s + add_mask[None, :, :]                                       # broadcast (1,1,S)

        m = jnp.max(s, axis=-1, keepdims=True)
        e = jnp.exp(s - m)
        p = e / jnp.sum(e, axis=-1, keepdims=True)                         # softmax, f32

        ctx_h = jnp.einsum('hqk,hkd->hqd',
                           p.astype(jnp.bfloat16), vh.astype(jnp.bfloat16),
                           preferred_element_type=jnp.float32)             # (NH, S, HD)
        ctx = jnp.concatenate([ctx_h[i] for i in range(NUM_HEADS)], axis=-1)  # (S, H)

        attn = jnp.dot(ctx.astype(jnp.bfloat16), wo_ref[l],
                       preferred_element_type=jnp.float32) + bo_ref[l]
        h = _layernorm(attn + h, ln1g_ref[l], ln1b_ref[l])                 # (S, H) f32

        # ================= FFN (intermediate + output + LayerNorm) ===============
        h16 = h.astype(jnp.bfloat16)
        acc = jnp.zeros((S, HIDDEN), jnp.float32)
        for c in range(INTERMEDIATE // FFN_CHUNK):                         # static, 3 chunks
            c0 = c * FFN_CHUNK
            w1c = w1_ref[l, :, c0:c0 + FFN_CHUNK]                          # (H, CK) bf16
            b1c = b1_ref[l, :, c0:c0 + FFN_CHUNK]                          # (1, CK) f32
            t = jnp.dot(h16, w1c, preferred_element_type=jnp.float32) + b1c
            t = _gelu(t)                                                   # (S, CK) f32
            w2c = w2_ref[l, c0:c0 + FFN_CHUNK, :]                          # (CK, H) bf16
            acc = acc + jnp.dot(t.astype(jnp.bfloat16), w2c,
                                preferred_element_type=jnp.float32)
        h = _layernorm(acc + b2_ref[l] + h, ln2g_ref[l], ln2b_ref[l])

    o_ref[0] = h.astype(o_ref.dtype)


def pallas_encoder(x, attn_mask, w):
    B, S, E = x.shape
    const2 = lambda shp: pl.BlockSpec(shp, lambda b: (0, 0))
    const3 = lambda shp: pl.BlockSpec(shp, lambda b: (0, 0, 0))
    return pl.pallas_call(
        _encoder_kernel,
        out_shape=jax.ShapeDtypeStruct((B, S, HIDDEN), jnp.float32),
        grid=(B,),
        in_specs=[
            pl.BlockSpec((1, S, E), lambda b: (b, 0, 0)),        # x (per batch)
            pl.BlockSpec((1, 1, S), lambda b: (b, 0, 0)),        # additive attn mask
            const2((EMBED_DIM, HIDDEN)), const2((1, HIDDEN)),    # linear_map
            const3((NUM_LAYERS, HIDDEN, 3 * HIDDEN)),            # fused Wqkv
            const3((NUM_LAYERS, 1, 3 * HIDDEN)),                 # fused bqkv
            const3((NUM_LAYERS, HIDDEN, HIDDEN)),                # Wo
            const3((NUM_LAYERS, 1, HIDDEN)),                     # bo
            const3((NUM_LAYERS, 1, HIDDEN)),                     # ln1 gamma
            const3((NUM_LAYERS, 1, HIDDEN)),                     # ln1 beta
            const3((NUM_LAYERS, HIDDEN, INTERMEDIATE)),          # W1
            const3((NUM_LAYERS, 1, INTERMEDIATE)),               # b1
            const3((NUM_LAYERS, INTERMEDIATE, HIDDEN)),          # W2
            const3((NUM_LAYERS, 1, HIDDEN)),                     # b2
            const3((NUM_LAYERS, 1, HIDDEN)),                     # ln2 gamma
            const3((NUM_LAYERS, 1, HIDDEN)),                     # ln2 beta
        ],
        out_specs=pl.BlockSpec((1, S, HIDDEN), lambda b: (b, 0, 0)),
        compiler_params=_CompilerParams(dimension_semantics=("parallel",)),
    )(x, attn_mask,
      w["wlin"], w["blin"],
      w["wqkv"], w["bqkv"], w["wo"], w["bo"], w["ln1g"], w["ln1b"],
      w["w1"], w["b1"], w["w2"], w["b2"], w["ln2g"], w["ln2b"])


# ----------------------------- parameter initialization -------------------------
def init_params(key):
    keys = jax.random.split(key, 64)
    ki = iter(keys)

    def nrm(shape, std=0.02):
        return (std * jax.random.normal(next(ki), shape)).astype(jnp.float32)

    zeros = lambda n: jnp.zeros((n,), jnp.float32)
    ones = lambda n: jnp.ones((n,), jnp.float32)

    emb = nrm((VOCAB, EMBED_DIM)).at[PAD_INDEX].set(0.0)   # padding row = 0
    params = {
        "token_embedding": emb,
        "positional_embedding": nrm((1, MAX_POS, EMBED_DIM), std=0.01),
        "linear_map_w": nrm((EMBED_DIM, HIDDEN)),
        "linear_map_b": zeros(HIDDEN),
        "layers": [],
    }
    for _ in range(NUM_LAYERS):
        layer = {
            "attn": {
                "wq": nrm((HIDDEN, HIDDEN)), "bq": zeros(HIDDEN),
                "wk": nrm((HIDDEN, HIDDEN)), "bk": zeros(HIDDEN),
                "wv": nrm((HIDDEN, HIDDEN)), "bv": zeros(HIDDEN),
                "wo": nrm((HIDDEN, HIDDEN)), "bo": zeros(HIDDEN),
                "ln_g": ones(HIDDEN), "ln_b": zeros(HIDDEN),
            },
            "ffn": {
                "w1": nrm((HIDDEN, INTERMEDIATE)), "b1": zeros(INTERMEDIATE),
                "w2": nrm((INTERMEDIATE, HIDDEN)), "b2": zeros(HIDDEN),
                "ln_g": ones(HIDDEN), "ln_b": zeros(HIDDEN),
            },
        }
        params["layers"].append(layer)
    return params


def pack_params(params):
    """Stack per-layer weights (leading layer dim), fuse Wq|Wk|Wv, cast matmul weights to bf16."""
    att = [params["layers"][l]["attn"] for l in range(NUM_LAYERS)]
    ffn = [params["layers"][l]["ffn"] for l in range(NUM_LAYERS)]
    bf16 = lambda a: a.astype(jnp.bfloat16)
    return {
        "wlin": bf16(params["linear_map_w"]),
        "blin": params["linear_map_b"].reshape(1, HIDDEN),
        "wqkv": bf16(jnp.stack([jnp.concatenate([a["wq"], a["wk"], a["wv"]], axis=1) for a in att])),
        "bqkv": jnp.stack([jnp.concatenate([a["bq"], a["bk"], a["bv"]]).reshape(1, 3 * HIDDEN)
                           for a in att]),
        "wo": bf16(jnp.stack([a["wo"] for a in att])),
        "bo": jnp.stack([a["bo"].reshape(1, HIDDEN) for a in att]),
        "ln1g": jnp.stack([a["ln_g"].reshape(1, HIDDEN) for a in att]),
        "ln1b": jnp.stack([a["ln_b"].reshape(1, HIDDEN) for a in att]),
        "w1": bf16(jnp.stack([f["w1"] for f in ffn])),
        "b1": jnp.stack([f["b1"].reshape(1, INTERMEDIATE) for f in ffn]),
        "w2": bf16(jnp.stack([f["w2"] for f in ffn])),
        "b2": jnp.stack([f["b2"].reshape(1, HIDDEN) for f in ffn]),
        "ln2g": jnp.stack([f["ln_g"].reshape(1, HIDDEN) for f in ffn]),
        "ln2b": jnp.stack([f["ln_b"].reshape(1, HIDDEN) for f in ffn]),
    }


# ----------------------------- full forward pass --------------------------------
def text_bert_encoder_forward(params, tokens, input_length):
    B, S = tokens.shape

    # token embedding + positional embedding (glue, left to XLA)
    x = jnp.take(params["token_embedding"], tokens, axis=0)          # (B, S, E)
    x = x + params["positional_embedding"][:, :S, :]

    # generate_seq_mask + get_self_attn_mask
    pos = jnp.arange(S, dtype=jnp.int32)[None, :]
    unpadding_mask = (pos < input_length[:, None]).astype(jnp.float32)        # (B, S)
    attn_mask = ((1.0 - unpadding_mask) * -1000.0).reshape(B, 1, S)           # additive

    # fused encoder: linear_map+tanh, 2x (self-attn + FFN), all in one Pallas kernel
    w = pack_params(params)
    out = pallas_encoder(x, attn_mask, w)                            # (B, S, H)
    return out, unpadding_mask


# --------------------------------------- main -----------------------------------
if __name__ == "__main__":
    key = jax.random.PRNGKey(0)
    pkey, dkey = jax.random.split(key)
    params = init_params(pkey)

    B, S = 2, 8
    tokens = jax.random.randint(dkey, (B, S), 1, VOCAB, dtype=jnp.int32)
    input_length = jnp.array([8, 5], dtype=jnp.int32)

    fwd = jax.jit(text_bert_encoder_forward)
    out, mask = fwd(params, tokens, input_length)
    jax.block_until_ready(out)
    jax.block_until_ready(mask)

    assert out.shape == (B, S, HIDDEN) and out.dtype == jnp.float32
    assert mask.shape == (B, S)
    assert bool(jnp.all(jnp.isfinite(out)))
    print("KERNEL_OK")
</pallas_src>

<mosaic_0001>
module attributes {stable_mosaic.version = 11 : i64} {
  func.func @_encoder_kernel(%arg0: i32, %arg1: memref<1x8x32xf32, #tpu.memory_space<vmem>>, %arg2: memref<1x1x8xf32, #tpu.memory_space<vmem>>, %arg3: memref<32x128xbf16, #tpu.memory_space<vmem>>, %arg4: memref<1x128xf32, #tpu.memory_space<vmem>>, %arg5: memref<2x128x384xbf16, #tpu.memory_space<vmem>>, %arg6: memref<2x1x384xf32, #tpu.memory_space<vmem>>, %arg7: memref<2x128x128xbf16, #tpu.memory_space<vmem>>, %arg8: memref<2x1x128xf32, #tpu.memory_space<vmem>>, %arg9: memref<2x1x128xf32, #tpu.memory_space<vmem>>, %arg10: memref<2x1x128xf32, #tpu.memory_space<vmem>>, %arg11: memref<2x128x3072xbf16, #tpu.memory_space<vmem>>, %arg12: memref<2x1x3072xf32, #tpu.memory_space<vmem>>, %arg13: memref<2x3072x128xbf16, #tpu.memory_space<vmem>>, %arg14: memref<2x1x128xf32, #tpu.memory_space<vmem>>, %arg15: memref<2x1x128xf32, #tpu.memory_space<vmem>>, %arg16: memref<2x1x128xf32, #tpu.memory_space<vmem>>, %arg17: memref<1x8x128xf32, #tpu.memory_space<vmem>>) attributes {dimension_semantics = [#tpu.dimension_semantics<parallel>], iteration_bounds = array<i64: 2>, scalar_prefetch = 0 : i64, scratch_operands = 0 : i64, tpu.core_type = #tpu.core_type<tc>, window_params = [{transform_indices = @transform_0, window_bounds = array<i64: 1, 8, 32>}, {transform_indices = @transform_1, window_bounds = array<i64: 1, 1, 8>}, {pipeline_mode = #tpu.pipeline_mode<synchronous>, transform_indices = @transform_2, window_bounds = array<i64: 32, 128>}, {pipeline_mode = #tpu.pipeline_mode<synchronous>, transform_indices = @transform_3, window_bounds = array<i64: 1, 128>}, {pipeline_mode = #tpu.pipeline_mode<synchronous>, transform_indices = @transform_4, window_bounds = array<i64: 2, 128, 384>}, {pipeline_mode = #tpu.pipeline_mode<synchronous>, transform_indices = @transform_5, window_bounds = array<i64: 2, 1, 384>}, {pipeline_mode = #tpu.pipeline_mode<synchronous>, transform_indices = @transform_6, window_bounds = array<i64: 2, 128, 128>}, {pipeline_mode = #tpu.pipeline_mode<synchronous>, transform_indices = @transform_7, window_bounds = array<i64: 2, 1, 128>}, {pipeline_mode = #tpu.pipeline_mode<synchronous>, transform_indices = @transform_8, window_bounds = array<i64: 2, 1, 128>}, {pipeline_mode = #tpu.pipeline_mode<synchronous>, transform_indices = @transform_9, window_bounds = array<i64: 2, 1, 128>}, {pipeline_mode = #tpu.pipeline_mode<synchronous>, transform_indices = @transform_10, window_bounds = array<i64: 2, 128, 3072>}, {pipeline_mode = #tpu.pipeline_mode<synchronous>, transform_indices = @transform_11, window_bounds = array<i64: 2, 1, 3072>}, {pipeline_mode = #tpu.pipeline_mode<synchronous>, transform_indices = @transform_12, window_bounds = array<i64: 2, 3072, 128>}, {pipeline_mode = #tpu.pipeline_mode<synchronous>, transform_indices = @transform_13, window_bounds = array<i64: 2, 1, 128>}, {pipeline_mode = #tpu.pipeline_mode<synchronous>, transform_indices = @transform_14, window_bounds = array<i64: 2, 1, 128>}, {pipeline_mode = #tpu.pipeline_mode<synchronous>, transform_indices = @transform_15, window_bounds = array<i64: 2, 1, 128>}, {transform_indices = @transform_16, window_bounds = array<i64: 1, 8, 128>}]} {
    %c0 = arith.constant 0 : index
    %c0_0 = arith.constant 0 : index
    %c0_1 = arith.constant 0 : index
    %0 = vector.load %arg1[%c0, %c0_0, %c0_1] : memref<1x8x32xf32, #tpu.memory_space<vmem>>, vector<1x8x32xf32>
    %1 = vector.shape_cast %0 : vector<1x8x32xf32> to vector<8x32xf32>
    %c0_2 = arith.constant 0 : index
    %c0_3 = arith.constant 0 : index
    %c0_4 = arith.constant 0 : index
    %2 = vector.load %arg2[%c0_2, %c0_3, %c0_4] : memref<1x1x8xf32, #tpu.memory_space<vmem>>, vector<1x1x8xf32>
    %3 = vector.shape_cast %2 : vector<1x1x8xf32> to vector<1x8xf32>
    %4 = arith.truncf %1 : vector<8x32xf32> to vector<8x32xbf16>
    %c0_5 = arith.constant 0 : index
    %c0_6 = arith.constant 0 : index
    %5 = vector.load %arg3[%c0_5, %c0_6] : memref<32x128xbf16, #tpu.memory_space<vmem>>, vector<32x128xbf16>
    %cst = arith.constant dense<0.000000e+00> : vector<8x128xf32>
    %6 = tpu.matmul %4, %5, %cst {dimension_numbers = #tpu.dot_dimension_numbers<[1], [0], [0], [1], [0, 0, 1, 1], [], []>} : vector<8x32xbf16>, vector<32x128xbf16>, vector<8x128xf32> -> vector<8x128xf32>
    %c0_7 = arith.constant 0 : index
    %c0_8 = arith.constant 0 : index
    %7 = vector.load %arg4[%c0_7, %c0_8] : memref<1x128xf32, #tpu.memory_space<vmem>>, vector<1x128xf32>
    %8 = vector.broadcast %7 : vector<1x128xf32> to vector<8x128xf32>
    %9 = arith.addf %6, %8 : vector<8x128xf32>
    %10 = math.tanh %9 : vector<8x128xf32>
    %11 = arith.truncf %10 : vector<8x128xf32> to vector<8x128xbf16>
    %c0_9 = arith.constant 0 : index
    %c0_10 = arith.constant 0 : index
    %c0_11 = arith.constant 0 : index
    %12 = vector.load %arg5[%c0_9, %c0_10, %c0_11] : memref<2x128x384xbf16, #tpu.memory_space<vmem>>, vector<1x128x384xbf16>
    %13 = vector.shape_cast %12 : vector<1x128x384xbf16> to vector<128x384xbf16>
    %cst_12 = arith.constant dense<0.000000e+00> : vector<8x384xf32>
    %14 = tpu.matmul %11, %13, %cst_12 {dimension_numbers = #tpu.dot_dimension_numbers<[1], [0], [0], [1], [0, 0, 1, 1], [], []>} : vector<8x128xbf16>, vector<128x384xbf16>, vector<8x384xf32> -> vector<8x384xf32>
    %c0_13 = arith.constant 0 : index
    %c0_14 = arith.constant 0 : index
    %c0_15 = arith.constant 0 : index
    %15 = vector.load %arg6[%c0_13, %c0_14, %c0_15] : memref<2x1x384xf32, #tpu.memory_space<vmem>>, vector<1x1x384xf32>
    %16 = vector.shape_cast %15 : vector<1x1x384xf32> to vector<1x384xf32>
    %17 = vector.broadcast %16 : vector<1x384xf32> to vector<8x384xf32>
    %18 = arith.addf %14, %17 : vector<8x384xf32>
    %19 = vector.extract_strided_slice %18 {offsets = [0, 0], sizes = [8, 128], strides = [1, 1]} : vector<8x384xf32> to vector<8x128xf32>
    %20 = vector.extract_strided_slice %18 {offsets = [0, 128], sizes = [8, 128], strides = [1, 1]} : vector<8x384xf32> to vector<8x128xf32>
    %21 = vector.extract_strided_slice %18 {offsets = [0, 256], sizes = [8, 128], strides = [1, 1]} : vector<8x384xf32> to vector<8x128xf32>
    %22 = vector.extract_strided_slice %19 {offsets = [0, 0], sizes = [8, 32], strides = [1, 1]} : vector<8x128xf32> to vector<8x32xf32>
    %23 = vector.extract_strided_slice %19 {offsets = [0, 32], sizes = [8, 32], strides = [1, 1]} : vector<8x128xf32> to vector<8x32xf32>
    %24 = vector.extract_strided_slice %19 {offsets = [0, 64], sizes = [8, 32], strides = [1, 1]} : vector<8x128xf32> to vector<8x32xf32>
    %25 = vector.extract_strided_slice %19 {offsets = [0, 96], sizes = [8, 32], strides = [1, 1]} : vector<8x128xf32> to vector<8x32xf32>
    %26 = vector.shape_cast %22 : vector<8x32xf32> to vector<1x8x32xf32>
    %27 = vector.shape_cast %23 : vector<8x32xf32> to vector<1x8x32xf32>
    %28 = vector.shape_cast %24 : vector<8x32xf32> to vector<1x8x32xf32>
    %29 = vector.shape_cast %25 : vector<8x32xf32> to vector<1x8x32xf32>
    %30 = tpu.concatenate %26, %27, %28, %29 in 0 : vector<1x8x32xf32>, vector<1x8x32xf32>, vector<1x8x32xf32>, vector<1x8x32xf32> -> vector<4x8x32xf32>
    %31 = vector.extract_strided_slice %20 {offsets = [0, 0], sizes = [8, 32], strides = [1, 1]} : vector<8x128xf32> to vector<8x32xf32>
    %32 = vector.extract_strided_slice %20 {offsets = [0, 32], sizes = [8, 32], strides = [1, 1]} : vector<8x128xf32> to vector<8x32xf32>
    %33 = vector.extract_strided_slice %20 {offsets = [0, 64], sizes = [8, 32], strides = [1, 1]} : vector<8x128xf32> to vector<8x32xf32>
    %34 = vector.extract_strided_slice %20 {offsets = [0, 96], sizes = [8, 32], strides = [1, 1]} : vector<8x128xf32> to vector<8x32xf32>
    %35 = vector.shape_cast %31 : vector<8x32xf32> to vector<1x8x32xf32>
    %36 = vector.shape_cast %32 : vector<8x32xf32> to vector<1x8x32xf32>
    %37 = vector.shape_cast %33 : vector<8x32xf32> to vector<1x8x32xf32>
    %38 = vector.shape_cast %34 : vector<8x32xf32> to vector<1x8x32xf32>
    %39 = tpu.concatenate %35, %36, %37, %38 in 0 : vector<1x8x32xf32>, vector<1x8x32xf32>, vector<1x8x32xf32>, vector<1x8x32xf32> -> vector<4x8x32xf32>
    %40 = vector.extract_strided_slice %21 {offsets = [0, 0], sizes = [8, 32], strides = [1, 1]} : vector<8x128xf32> to vector<8x32xf32>
    %41 = vector.extract_strided_slice %21 {offsets = [0, 32], sizes = [8, 32], strides = [1, 1]} : vector<8x128xf32> to vector<8x32xf32>
    %42 = vector.extract_strided_slice %21 {offsets = [0, 64], sizes = [8, 32], strides = [1, 1]} : vector<8x128xf32> to vector<8x32xf32>
    %43 = vector.extract_strided_slice %21 {offsets = [0, 96], sizes = [8, 32], strides = [1, 1]} : vector<8x128xf32> to vector<8x32xf32>
    %44 = vector.shape_cast %40 : vector<8x32xf32> to vector<1x8x32xf32>
    %45 = vector.shape_cast %41 : vector<8x32xf32> to vector<1x8x32xf32>
    %46 = vector.shape_cast %42 : vector<8x32xf32> to vector<1x8x32xf32>
    %47 = vector.shape_cast %43 : vector<8x32xf32> to vector<1x8x32xf32>
    %48 = tpu.concatenate %44, %45, %46, %47 in 0 : vector<1x8x32xf32>, vector<1x8x32xf32>, vector<1x8x32xf32>, vector<1x8x32xf32> -> vector<4x8x32xf32>
    %49 = arith.truncf %30 : vector<4x8x32xf32> to vector<4x8x32xbf16>
    %50 = arith.truncf %39 : vector<4x8x32xf32> to vector<4x8x32xbf16>
    "tpu.trace_start"() <{level = 10 : i32, message = "hqd,hkd->hqk"}> : () -> ()
    %cst_16 = arith.constant dense<0.000000e+00> : vector<4x8x8xf32>
    %51 = tpu.matmul %49, %50, %cst_16 {dimension_numbers = #tpu.dot_dimension_numbers<[2], [2], [1], [1], [0, 0, 0, 1, 1, 1], [0], [0]>} : vector<4x8x32xbf16>, vector<4x8x32xbf16>, vector<4x8x8xf32> -> vector<4x8x8xf32>
    "tpu.trace_stop"() : () -> ()
    %cst_17 = arith.constant 0.176776692 : f32
    %52 = vector.broadcast %cst_17 : f32 to vector<4x8x8xf32>
    %53 = arith.mulf %51, %52 : vector<4x8x8xf32>
    %54 = vector.shape_cast %3 : vector<1x8xf32> to vector<1x1x8xf32>
    %55 = vector.broadcast %54 : vector<1x1x8xf32> to vector<4x8x8xf32>
    %56 = arith.addf %53, %55 : vector<4x8x8xf32>
    %cst_18 = arith.constant dense<0xFF800000> : vector<4x8xf32>
    %57 = vector.multi_reduction <maximumf>, %56, %cst_18 [2] : vector<4x8x8xf32> to vector<4x8xf32>
    %58 = vector.shape_cast %57 : vector<4x8xf32> to vector<4x8x1xf32>
    %59 = vector.broadcast %58 : vector<4x8x1xf32> to vector<4x8x8xf32>
    %60 = arith.subf %56, %59 : vector<4x8x8xf32>
    %61 = math.exp %60 : vector<4x8x8xf32>
    %cst_19 = arith.constant dense<0.000000e+00> : vector<4x8xf32>
    %62 = vector.multi_reduction <add>, %61, %cst_19 [2] : vector<4x8x8xf32> to vector<4x8xf32>
    %63 = vector.shape_cast %62 : vector<4x8xf32> to vector<4x8x1xf32>
    %64 = vector.broadcast %63 : vector<4x8x1xf32> to vector<4x8x8xf32>
    %65 = arith.divf %61, %64 : vector<4x8x8xf32>
    %66 = arith.truncf %65 : vector<4x8x8xf32> to vector<4x8x8xbf16>
    %67 = arith.truncf %48 : vector<4x8x32xf32> to vector<4x8x32xbf16>
    "tpu.trace_start"() <{level = 10 : i32, message = "hqk,hkd->hqd"}> : () -> ()
    %cst_20 = arith.constant dense<0.000000e+00> : vector<4x8x32xf32>
    %68 = tpu.matmul %66, %67, %cst_20 {dimension_numbers = #tpu.dot_dimension_numbers<[2], [1], [1], [2], [0, 0, 0, 1, 1, 2], [0], [0]>} : vector<4x8x8xbf16>, vector<4x8x32xbf16>, vector<4x8x32xf32> -> vector<4x8x32xf32>
    "tpu.trace_stop"() : () -> ()
    %69 = vector.extract_strided_slice %68 {offsets = [0, 0, 0], sizes = [1, 8, 32], strides = [1, 1, 1]} : vector<4x8x32xf32> to vector<1x8x32xf32>
    %70 = vector.shape_cast %69 : vector<1x8x32xf32> to vector<8x32xf32>
    %71 = vector.extract_strided_slice %68 {offsets = [1, 0, 0], sizes = [1, 8, 32], strides = [1, 1, 1]} : vector<4x8x32xf32> to vector<1x8x32xf32>
    %72 = vector.shape_cast %71 : vector<1x8x32xf32> to vector<8x32xf32>
    %73 = vector.extract_strided_slice %68 {offsets = [2, 0, 0], sizes = [1, 8, 32], strides = [1, 1, 1]} : vector<4x8x32xf32> to vector<1x8x32xf32>
    %74 = vector.shape_cast %73 : vector<1x8x32xf32> to vector<8x32xf32>
    %75 = vector.extract_strided_slice %68 {offsets = [3, 0, 0], sizes = [1, 8, 32], strides = [1, 1, 1]} : vector<4x8x32xf32> to vector<1x8x32xf32>
    %76 = vector.shape_cast %75 : vector<1x8x32xf32> to vector<8x32xf32>
    %77 = tpu.concatenate %70, %72, %74, %76 in 1 : vector<8x32xf32>, vector<8x32xf32>, vector<8x32xf32>, vector<8x32xf32> -> vector<8x128xf32>
    %78 = arith.truncf %77 : vector<8x128xf32> to vector<8x128xbf16>
    %c0_21 = arith.constant 0 : index
    %c0_22 = arith.constant 0 : index
    %c0_23 = arith.constant 0 : index
    %79 = vector.load %arg7[%c0_21, %c0_22, %c0_23] : memref<2x128x128xbf16, #tpu.memory_space<vmem>>, vector<1x128x128xbf16>
    %80 = vector.shape_cast %79 : vector<1x128x128xbf16> to vector<128x128xbf16>
    %cst_24 = arith.constant dense<0.000000e+00> : vector<8x128xf32>
    %81 = tpu.matmul %78, %80, %cst_24 {dimension_numbers = #tpu.dot_dimension_numbers<[1], [0], [0], [1], [0, 0, 1, 1], [], []>} : vector<8x128xbf16>, vector<128x128xbf16>, vector<8x128xf32> -> vector<8x128xf32>
    %c0_25 = arith.constant 0 : index
    %c0_26 = arith.constant 0 : index
    %c0_27 = arith.constant 0 : index
    %82 = vector.load %arg8[%c0_25, %c0_26, %c0_27] : memref<2x1x128xf32, #tpu.memory_space<vmem>>, vector<1x1x128xf32>
    %83 = vector.shape_cast %82 : vector<1x1x128xf32> to vector<1x128xf32>
    %84 = vector.broadcast %83 : vector<1x128xf32> to vector<8x128xf32>
    %85 = arith.addf %81, %84 : vector<8x128xf32>
    %86 = arith.addf %85, %10 : vector<8x128xf32>
    %c0_28 = arith.constant 0 : index
    %c0_29 = arith.constant 0 : index
    %c0_30 = arith.constant 0 : index
    %87 = vector.load %arg9[%c0_28, %c0_29, %c0_30] : memref<2x1x128xf32, #tpu.memory_space<vmem>>, vector<1x1x128xf32>
    %88 = vector.shape_cast %87 : vector<1x1x128xf32> to vector<1x128xf32>
    %c0_31 = arith.constant 0 : index
    %c0_32 = arith.constant 0 : index
    %c0_33 = arith.constant 0 : index
    %89 = vector.load %arg10[%c0_31, %c0_32, %c0_33] : memref<2x1x128xf32, #tpu.memory_space<vmem>>, vector<1x1x128xf32>
    %90 = vector.shape_cast %89 : vector<1x1x128xf32> to vector<1x128xf32>
    %cst_34 = arith.constant dense<0.000000e+00> : vector<8xf32>
    %91 = vector.multi_reduction <add>, %86, %cst_34 [1] : vector<8x128xf32> to vector<8xf32>
    %92 = vector.shape_cast %91 : vector<8xf32> to vector<8x1xf32>
    %cst_35 = arith.constant 1.280000e+02 : f32
    %93 = vector.broadcast %cst_35 : f32 to vector<8x1xf32>
    %94 = arith.divf %92, %93 : vector<8x1xf32>
    %95 = vector.broadcast %94 : vector<8x1xf32> to vector<8x128xf32>
    %96 = arith.subf %86, %95 : vector<8x128xf32>
    %97 = arith.mulf %96, %96 : vector<8x128xf32>
    %cst_36 = arith.constant dense<0.000000e+00> : vector<8xf32>
    %98 = vector.multi_reduction <add>, %97, %cst_36 [1] : vector<8x128xf32> to vector<8xf32>
    %99 = vector.shape_cast %98 : vector<8xf32> to vector<8x1xf32>
    %cst_37 = arith.constant 1.280000e+02 : f32
    %100 = vector.broadcast %cst_37 : f32 to vector<8x1xf32>
    %101 = arith.divf %99, %100 : vector<8x1xf32>
    %102 = vector.broadcast %94 : vector<8x1xf32> to vector<8x128xf32>
    %103 = arith.subf %86, %102 : vector<8x128xf32>
    %cst_38 = arith.constant 9.99999996E-13 : f32
    %104 = vector.broadcast %cst_38 : f32 to vector<8x1xf32>
    %105 = arith.addf %101, %104 : vector<8x1xf32>
    %106 = math.rsqrt %105 : vector<8x1xf32>
    %107 = vector.broadcast %106 : vector<8x1xf32> to vector<8x128xf32>
    %108 = arith.mulf %103, %107 : vector<8x128xf32>
    %109 = vector.broadcast %88 : vector<1x128xf32> to vector<8x128xf32>
    %110 = arith.mulf %108, %109 : vector<8x128xf32>
    %111 = vector.broadcast %90 : vector<1x128xf32> to vector<8x128xf32>
    %112 = arith.addf %110, %111 : vector<8x128xf32>
    %113 = arith.truncf %112 : vector<8x128xf32> to vector<8x128xbf16>
    %cst_39 = arith.constant 0.000000e+00 : f32
    %114 = vector.broadcast %cst_39 : f32 to vector<8x128xf32>
    %c0_40 = arith.constant 0 : index
    %c0_41 = arith.constant 0 : index
    %c0_42 = arith.constant 0 : index
    %115 = vector.load %arg11[%c0_40, %c0_41, %c0_42] : memref<2x128x3072xbf16, #tpu.memory_space<vmem>>, vector<1x128x1024xbf16>
    %116 = vector.shape_cast %115 : vector<1x128x1024xbf16> to vector<128x1024xbf16>
    %c0_43 = arith.constant 0 : index
    %c0_44 = arith.constant 0 : index
    %c0_45 = arith.constant 0 : index
    %117 = vector.load %arg12[%c0_43, %c0_44, %c0_45] : memref<2x1x3072xf32, #tpu.memory_space<vmem>>, vector<1x1x1024xf32>
    %118 = vector.shape_cast %117 : vector<1x1x1024xf32> to vector<1x1024xf32>
    %cst_46 = arith.constant dense<0.000000e+00> : vector<8x1024xf32>
    %119 = tpu.matmul %113, %116, %cst_46 {dimension_numbers = #tpu.dot_dimension_numbers<[1], [0], [0], [1], [0, 0, 1, 1], [], []>} : vector<8x128xbf16>, vector<128x1024xbf16>, vector<8x1024xf32> -> vector<8x1024xf32>
    %120 = vector.broadcast %118 : vector<1x1024xf32> to vector<8x1024xf32>
    %121 = arith.addf %119, %120 : vector<8x1024xf32>
    %cst_47 = arith.constant 5.000000e-01 : f32
    %122 = vector.broadcast %cst_47 : f32 to vector<8x1024xf32>
    %123 = arith.mulf %122, %121 : vector<8x1024xf32>
    %124 = arith.mulf %121, %121 : vector<8x1024xf32>
    %125 = arith.mulf %124, %121 : vector<8x1024xf32>
    %cst_48 = arith.constant 4.471500e-02 : f32
    %126 = vector.broadcast %cst_48 : f32 to vector<8x1024xf32>
    %127 = arith.mulf %126, %125 : vector<8x1024xf32>
    %128 = arith.addf %121, %127 : vector<8x1024xf32>
    %cst_49 = arith.constant 0.797884583 : f32
    %129 = vector.broadcast %cst_49 : f32 to vector<8x1024xf32>
    %130 = arith.mulf %129, %128 : vector<8x1024xf32>
    %131 = math.tanh %130 : vector<8x1024xf32>
    %cst_50 = arith.constant 1.000000e+00 : f32
    %132 = vector.broadcast %cst_50 : f32 to vector<8x1024xf32>
    %133 = arith.addf %132, %131 : vector<8x1024xf32>
    %134 = arith.mulf %123, %133 : vector<8x1024xf32>
    %c0_51 = arith.constant 0 : index
    %c0_52 = arith.constant 0 : index
    %c0_53 = arith.constant 0 : index
    %135 = vector.load %arg13[%c0_51, %c0_52, %c0_53] : memref<2x3072x128xbf16, #tpu.memory_space<vmem>>, vector<1x1024x128xbf16>
    %136 = vector.shape_cast %135 : vector<1x1024x128xbf16> to vector<1024x128xbf16>
    %137 = arith.truncf %134 : vector<8x1024xf32> to vector<8x1024xbf16>
    %cst_54 = arith.constant dense<0.000000e+00> : vector<8x128xf32>
    %138 = tpu.matmul %137, %136, %cst_54 {dimension_numbers = #tpu.dot_dimension_numbers<[1], [0], [0], [1], [0, 0, 1, 1], [], []>} : vector<8x1024xbf16>, vector<1024x128xbf16>, vector<8x128xf32> -> vector<8x128xf32>
    %139 = arith.addf %114, %138 : vector<8x128xf32>
    %c0_55 = arith.constant 0 : index
    %c0_56 = arith.constant 0 : index
    %c1024 = arith.constant 1024 : index
    %140 = vector.load %arg11[%c0_55, %c0_56, %c1024] : memref<2x128x3072xbf16, #tpu.memory_space<vmem>>, vector<1x128x1024xbf16>
    %141 = vector.shape_cast %140 : vector<1x128x1024xbf16> to vector<128x1024xbf16>
    %c0_57 = arith.constant 0 : index
    %c0_58 = arith.constant 0 : index
    %c1024_59 = arith.constant 1024 : index
    %142 = vector.load %arg12[%c0_57, %c0_58, %c1024_59] : memref<2x1x3072xf32, #tpu.memory_space<vmem>>, vector<1x1x1024xf32>
    %143 = vector.shape_cast %142 : vector<1x1x1024xf32> to vector<1x1024xf32>
    %cst_60 = arith.constant dense<0.000000e+00> : vector<8x1024xf32>
    %144 = tpu.matmul %113, %141, %cst_60 {dimension_numbers = #tpu.dot_dimension_numbers<[1], [0], [0], [1], [0, 0, 1, 1], [], []>} : vector<8x128xbf16>, vector<128x1024xbf16>, vector<8x1024xf32> -> vector<8x1024xf32>
    %145 = vector.broadcast %143 : vector<1x1024xf32> to vector<8x1024xf32>
    %146 = arith.addf %144, %145 : vector<8x1024xf32>
    %cst_61 = arith.constant 5.000000e-01 : f32
    %147 = vector.broadcast %cst_61 : f32 to vector<8x1024xf32>
    %148 = arith.mulf %147, %146 : vector<8x1024xf32>
    %149 = arith.mulf %146, %146 : vector<8x1024xf32>
    %150 = arith.mulf %149, %146 : vector<8x1024xf32>
    %cst_62 = arith.constant 4.471500e-02 : f32
    %151 = vector.broadcast %cst_62 : f32 to vector<8x1024xf32>
    %152 = arith.mulf %151, %150 : vector<8x1024xf32>
    %153 = arith.addf %146, %152 : vector<8x1024xf32>
    %cst_63 = arith.constant 0.797884583 : f32
    %154 = vector.broadcast %cst_63 : f32 to vector<8x1024xf32>
    %155 = arith.mulf %154, %153 : vector<8x1024xf32>
    %156 = math.tanh %155 : vector<8x1024xf32>
    %cst_64 = arith.constant 1.000000e+00 : f32
    %157 = vector.broadcast %cst_64 : f32 to vector<8x1024xf32>
    %158 = arith.addf %157, %156 : vector<8x1024xf32>
    %159 = arith.mulf %148, %158 : vector<8x1024xf32>
    %c0_65 = arith.constant 0 : index
    %c1024_66 = arith.constant 1024 : index
    %c0_67 = arith.constant 0 : index
    %160 = vector.load %arg13[%c0_65, %c1024_66, %c0_67] : memref<2x3072x128xbf16, #tpu.memory_space<vmem>>, vector<1x1024x128xbf16>
    %161 = vector.shape_cast %160 : vector<1x1024x128xbf16> to vector<1024x128xbf16>
    %162 = arith.truncf %159 : vector<8x1024xf32> to vector<8x1024xbf16>
    %cst_68 = arith.constant dense<0.000000e+00> : vector<8x128xf32>
    %163 = tpu.matmul %162, %161, %cst_68 {dimension_numbers = #tpu.dot_dimension_numbers<[1], [0], [0], [1], [0, 0, 1, 1], [], []>} : vector<8x1024xbf16>, vector<1024x128xbf16>, vector<8x128xf32> -> vector<8x128xf32>
    %164 = arith.addf %139, %163 : vector<8x128xf32>
    %c0_69 = arith.constant 0 : index
    %c0_70 = arith.constant 0 : index
    %c2048 = arith.constant 2048 : index
    %165 = vector.load %arg11[%c0_69, %c0_70, %c2048] : memref<2x128x3072xbf16, #tpu.memory_space<vmem>>, vector<1x128x1024xbf16>
    %166 = vector.shape_cast %165 : vector<1x128x1024xbf16> to vector<128x1024xbf16>
    %c0_71 = arith.constant 0 : index
    %c0_72 = arith.constant 0 : index
    %c2048_73 = arith.constant 2048 : index
    %167 = vector.load %arg12[%c0_71, %c0_72, %c2048_73] : memref<2x1x3072xf32, #tpu.memory_space<vmem>>, vector<1x1x1024xf32>
    %168 = vector.shape_cast %167 : vector<1x1x1024xf32> to vector<1x1024xf32>
    %cst_74 = arith.constant dense<0.000000e+00> : vector<8x1024xf32>
    %169 = tpu.matmul %113, %166, %cst_74 {dimension_numbers = #tpu.dot_dimension_numbers<[1], [0], [0], [1], [0, 0, 1, 1], [], []>} : vector<8x128xbf16>, vector<128x1024xbf16>, vector<8x1024xf32> -> vector<8x1024xf32>
    %170 = vector.broadcast %168 : vector<1x1024xf32> to vector<8x1024xf32>
    %171 = arith.addf %169, %170 : vector<8x1024xf32>
    %cst_75 = arith.constant 5.000000e-01 : f32
    %172 = vector.broadcast %cst_75 : f32 to vector<8x1024xf32>
    %173 = arith.mulf %172, %171 : vector<8x1024xf32>
    %174 = arith.mulf %171, %171 : vector<8x1024xf32>
    %175 = arith.mulf %174, %171 : vector<8x1024xf32>
    %cst_76 = arith.constant 4.471500e-02 : f32
    %176 = vector.broadcast %cst_76 : f32 to vector<8x1024xf32>
    %177 = arith.mulf %176, %175 : vector<8x1024xf32>
    %178 = arith.addf %171, %177 : vector<8x1024xf32>
    %cst_77 = arith.constant 0.797884583 : f32
    %179 = vector.broadcast %cst_77 : f32 to vector<8x1024xf32>
    %180 = arith.mulf %179, %178 : vector<8x1024xf32>
    %181 = math.tanh %180 : vector<8x1024xf32>
    %cst_78 = arith.constant 1.000000e+00 : f32
    %182 = vector.broadcast %cst_78 : f32 to vector<8x1024xf32>
    %183 = arith.addf %182, %181 : vector<8x1024xf32>
    %184 = arith.mulf %173, %183 : vector<8x1024xf32>
    %c0_79 = arith.constant 0 : index
    %c2048_80 = arith.constant 2048 : index
    %c0_81 = arith.constant 0 : index
    %185 = vector.load %arg13[%c0_79, %c2048_80, %c0_81] : memref<2x3072x128xbf16, #tpu.memory_space<vmem>>, vector<1x1024x128xbf16>
    %186 = vector.shape_cast %185 : vector<1x1024x128xbf16> to vector<1024x128xbf16>
    %187 = arith.truncf %184 : vector<8x1024xf32> to vector<8x1024xbf16>
    %cst_82 = arith.constant dense<0.000000e+00> : vector<8x128xf32>
    %188 = tpu.matmul %187, %186, %cst_82 {dimension_numbers = #tpu.dot_dimension_numbers<[1], [0], [0], [1], [0, 0, 1, 1], [], []>} : vector<8x1024xbf16>, vector<1024x128xbf16>, vector<8x128xf32> -> vector<8x128xf32>
    %189 = arith.addf %164, %188 : vector<8x128xf32>
    %c0_83 = arith.constant 0 : index
    %c0_84 = arith.constant 0 : index
    %c0_85 = arith.constant 0 : index
    %190 = vector.load %arg14[%c0_83, %c0_84, %c0_85] : memref<2x1x128xf32, #tpu.memory_space<vmem>>, vector<1x1x128xf32>
    %191 = vector.shape_cast %190 : vector<1x1x128xf32> to vector<1x128xf32>
    %192 = vector.broadcast %191 : vector<1x128xf32> to vector<8x128xf32>
    %193 = arith.addf %189, %192 : vector<8x128xf32>
    %194 = arith.addf %193, %112 : vector<8x128xf32>
    %c0_86 = arith.constant 0 : index
    %c0_87 = arith.constant 0 : index
    %c0_88 = arith.constant 0 : index
    %195 = vector.load %arg15[%c0_86, %c0_87, %c0_88] : memref<2x1x128xf32, #tpu.memory_space<vmem>>, vector<1x1x128xf32>
    %196 = vector.shape_cast %195 : vector<1x1x128xf32> to vector<1x128xf32>
    %c0_89 = arith.constant 0 : index
    %c0_90 = arith.constant 0 : index
    %c0_91 = arith.constant 0 : index
    %197 = vector.load %arg16[%c0_89, %c0_90, %c0_91] : memref<2x1x128xf32, #tpu.memory_space<vmem>>, vector<1x1x128xf32>
    %198 = vector.shape_cast %197 : vector<1x1x128xf32> to vector<1x128xf32>
    %cst_92 = arith.constant dense<0.000000e+00> : vector<8xf32>
    %199 = vector.multi_reduction <add>, %194, %cst_92 [1] : vector<8x128xf32> to vector<8xf32>
    %200 = vector.shape_cast %199 : vector<8xf32> to vector<8x1xf32>
    %cst_93 = arith.constant 1.280000e+02 : f32
    %201 = vector.broadcast %cst_93 : f32 to vector<8x1xf32>
    %202 = arith.divf %200, %201 : vector<8x1xf32>
    %203 = vector.broadcast %202 : vector<8x1xf32> to vector<8x128xf32>
    %204 = arith.subf %194, %203 : vector<8x128xf32>
    %205 = arith.mulf %204, %204 : vector<8x128xf32>
    %cst_94 = arith.constant dense<0.000000e+00> : vector<8xf32>
    %206 = vector.multi_reduction <add>, %205, %cst_94 [1] : vector<8x128xf32> to vector<8xf32>
    %207 = vector.shape_cast %206 : vector<8xf32> to vector<8x1xf32>
    %cst_95 = arith.constant 1.280000e+02 : f32
    %208 = vector.broadcast %cst_95 : f32 to vector<8x1xf32>
    %209 = arith.divf %207, %208 : vector<8x1xf32>
    %210 = vector.broadcast %202 : vector<8x1xf32> to vector<8x128xf32>
    %211 = arith.subf %194, %210 : vector<8x128xf32>
    %cst_96 = arith.constant 9.99999996E-13 : f32
    %212 = vector.broadcast %cst_96 : f32 to vector<8x1xf32>
    %213 = arith.addf %209, %212 : vector<8x1xf32>
    %214 = math.rsqrt %213 : vector<8x1xf32>
    %215 = vector.broadcast %214 : vector<8x1xf32> to vector<8x128xf32>
    %216 = arith.mulf %211, %215 : vector<8x128xf32>
    %217 = vector.broadcast %196 : vector<1x128xf32> to vector<8x128xf32>
    %218 = arith.mulf %216, %217 : vector<8x128xf32>
    %219 = vector.broadcast %198 : vector<1x128xf32> to vector<8x128xf32>
    %220 = arith.addf %218, %219 : vector<8x128xf32>
    %221 = arith.truncf %220 : vector<8x128xf32> to vector<8x128xbf16>
    %c1 = arith.constant 1 : index
    %c0_97 = arith.constant 0 : index
    %c0_98 = arith.constant 0 : index
    %222 = vector.load %arg5[%c1, %c0_97, %c0_98] : memref<2x128x384xbf16, #tpu.memory_space<vmem>>, vector<1x128x384xbf16>
    %223 = vector.shape_cast %222 : vector<1x128x384xbf16> to vector<128x384xbf16>
    %cst_99 = arith.constant dense<0.000000e+00> : vector<8x384xf32>
    %224 = tpu.matmul %221, %223, %cst_99 {dimension_numbers = #tpu.dot_dimension_numbers<[1], [0], [0], [1], [0, 0, 1, 1], [], []>} : vector<8x128xbf16>, vector<128x384xbf16>, vector<8x384xf32> -> vector<8x384xf32>
    %c1_100 = arith.constant 1 : index
    %c0_101 = arith.constant 0 : index
    %c0_102 = arith.constant 0 : index
    %225 = vector.load %arg6[%c1_100, %c0_101, %c0_102] : memref<2x1x384xf32, #tpu.memory_space<vmem>>, vector<1x1x384xf32>
    %226 = vector.shape_cast %225 : vector<1x1x384xf32> to vector<1x384xf32>
    %227 = vector.broadcast %226 : vector<1x384xf32> to vector<8x384xf32>
    %228 = arith.addf %224, %227 : vector<8x384xf32>
    %229 = vector.extract_strided_slice %228 {offsets = [0, 0], sizes = [8, 128], strides = [1, 1]} : vector<8x384xf32> to vector<8x128xf32>
    %230 = vector.extract_strided_slice %228 {offsets = [0, 128], sizes = [8, 128], strides = [1, 1]} : vector<8x384xf32> to vector<8x128xf32>
    %231 = vector.extract_strided_slice %228 {offsets = [0, 256], sizes = [8, 128], strides = [1, 1]} : vector<8x384xf32> to vector<8x128xf32>
    %232 = vector.extract_strided_slice %229 {offsets = [0, 0], sizes = [8, 32], strides = [1, 1]} : vector<8x128xf32> to vector<8x32xf32>
    %233 = vector.extract_strided_slice %229 {offsets = [0, 32], sizes = [8, 32], strides = [1, 1]} : vector<8x128xf32> to vector<8x32xf32>
    %234 = vector.extract_strided_slice %229 {offsets = [0, 64], sizes = [8, 32], strides = [1, 1]} : vector<8x128xf32> to vector<8x32xf32>
    %235 = vector.extract_strided_slice %229 {offsets = [0, 96], sizes = [8, 32], strides = [1, 1]} : vector<8x128xf32> to vector<8x32xf32>
    %236 = vector.shape_cast %232 : vector<8x32xf32> to vector<1x8x32xf32>
    %237 = vector.shape_cast %233 : vector<8x32xf32> to vector<1x8x32xf32>
    %238 = vector.shape_cast %234 : vector<8x32xf32> to vector<1x8x32xf32>
    %239 = vector.shape_cast %235 : vector<8x32xf32> to vector<1x8x32xf32>
    %240 = tpu.concatenate %236, %237, %238, %239 in 0 : vector<1x8x32xf32>, vector<1x8x32xf32>, vector<1x8x32xf32>, vector<1x8x32xf32> -> vector<4x8x32xf32>
    %241 = vector.extract_strided_slice %230 {offsets = [0, 0], sizes = [8, 32], strides = [1, 1]} : vector<8x128xf32> to vector<8x32xf32>
    %242 = vector.extract_strided_slice %230 {offsets = [0, 32], sizes = [8, 32], strides = [1, 1]} : vector<8x128xf32> to vector<8x32xf32>
    %243 = vector.extract_strided_slice %230 {offsets = [0, 64], sizes = [8, 32], strides = [1, 1]} : vector<8x128xf32> to vector<8x32xf32>
    %244 = vector.extract_strided_slice %230 {offsets = [0, 96], sizes = [8, 32], strides = [1, 1]} : vector<8x128xf32> to vector<8x32xf32>
    %245 = vector.shape_cast %241 : vector<8x32xf32> to vector<1x8x32xf32>
    %246 = vector.shape_cast %242 : vector<8x32xf32> to vector<1x8x32xf32>
    %247 = vector.shape_cast %243 : vector<8x32xf32> to vector<1x8x32xf32>
    %248 = vector.shape_cast %244 : vector<8x32xf32> to vector<1x8x32xf32>
    %249 = tpu.concatenate %245, %246, %247, %248 in 0 : vector<1x8x32xf32>, vector<1x8x32xf32>, vector<1x8x32xf32>, vector<1x8x32xf32> -> vector<4x8x32xf32>
    %250 = vector.extract_strided_slice %231 {offsets = [0, 0], sizes = [8, 32], strides = [1, 1]} : vector<8x128xf32> to vector<8x32xf32>
    %251 = vector.extract_strided_slice %231 {offsets = [0, 32], sizes = [8, 32], strides = [1, 1]} : vector<8x128xf32> to vector<8x32xf32>
    %252 = vector.extract_strided_slice %231 {offsets = [0, 64], sizes = [8, 32], strides = [1, 1]} : vector<8x128xf32> to vector<8x32xf32>
    %253 = vector.extract_strided_slice %231 {offsets = [0, 96], sizes = [8, 32], strides = [1, 1]} : vector<8x128xf32> to vector<8x32xf32>
    %254 = vector.shape_cast %250 : vector<8x32xf32> to vector<1x8x32xf32>
    %255 = vector.shape_cast %251 : vector<8x32xf32> to vector<1x8x32xf32>
    %256 = vector.shape_cast %252 : vector<8x32xf32> to vector<1x8x32xf32>
    %257 = vector.shape_cast %253 : vector<8x32xf32> to vector<1x8x32xf32>
    %258 = tpu.concatenate %254, %255, %256, %257 in 0 : vector<1x8x32xf32>, vector<1x8x32xf32>, vector<1x8x32xf32>, vector<1x8x32xf32> -> vector<4x8x32xf32>
    %259 = arith.truncf %240 : vector<4x8x32xf32> to vector<4x8x32xbf16>
    %260 = arith.truncf %249 : vector<4x8x32xf32> to vector<4x8x32xbf16>
    "tpu.trace_start"() <{level = 10 : i32, message = "hqd,hkd->hqk"}> : () -> ()
    %cst_103 = arith.constant dense<0.000000e+00> : vector<4x8x8xf32>
    %261 = tpu.matmul %259, %260, %cst_103 {dimension_numbers = #tpu.dot_dimension_numbers<[2], [2], [1], [1], [0, 0, 0, 1, 1, 1], [0], [0]>} : vector<4x8x32xbf16>, vector<4x8x32xbf16>, vector<4x8x8xf32> -> vector<4x8x8xf32>
    "tpu.trace_stop"() : () -> ()
    %cst_104 = arith.constant 0.176776692 : f32
    %262 = vector.broadcast %cst_104 : f32 to vector<4x8x8xf32>
    %263 = arith.mulf %261, %262 : vector<4x8x8xf32>
    %264 = vector.shape_cast %3 : vector<1x8xf32> to vector<1x1x8xf32>
    %265 = vector.broadcast %264 : vector<1x1x8xf32> to vector<4x8x8xf32>
    %266 = arith.addf %263, %265 : vector<4x8x8xf32>
    %cst_105 = arith.constant dense<0xFF800000> : vector<4x8xf32>
    %267 = vector.multi_reduction <maximumf>, %266, %cst_105 [2] : vector<4x8x8xf32> to vector<4x8xf32>
    %268 = vector.shape_cast %267 : vector<4x8xf32> to vector<4x8x1xf32>
    %269 = vector.broadcast %268 : vector<4x8x1xf32> to vector<4x8x8xf32>
    %270 = arith.subf %266, %269 : vector<4x8x8xf32>
    %271 = math.exp %270 : vector<4x8x8xf32>
    %cst_106 = arith.constant dense<0.000000e+00> : vector<4x8xf32>
    %272 = vector.multi_reduction <add>, %271, %cst_106 [2] : vector<4x8x8xf32> to vector<4x8xf32>
    %273 = vector.shape_cast %272 : vector<4x8xf32> to vector<4x8x1xf32>
    %274 = vector.broadcast %273 : vector<4x8x1xf32> to vector<4x8x8xf32>
    %275 = arith.divf %271, %274 : vector<4x8x8xf32>
    %276 = arith.truncf %275 : vector<4x8x8xf32> to vector<4x8x8xbf16>
    %277 = arith.truncf %258 : vector<4x8x32xf32> to vector<4x8x32xbf16>
    "tpu.trace_start"() <{level = 10 : i32, message = "hqk,hkd->hqd"}> : () -> ()
    %cst_107 = arith.constant dense<0.000000e+00> : vector<4x8x32xf32>
    %278 = tpu.matmul %276, %277, %cst_107 {dimension_numbers = #tpu.dot_dimension_numbers<[2], [1], [1], [2], [0, 0, 0, 1, 1, 2], [0], [0]>} : vector<4x8x8xbf16>, vector<4x8x32xbf16>, vector<4x8x32xf32> -> vector<4x8x32xf32>
    "tpu.trace_stop"() : () -> ()
    %279 = vector.extract_strided_slice %278 {offsets = [0, 0, 0], sizes = [1, 8, 32], strides = [1, 1, 1]} : vector<4x8x32xf32> to vector<1x8x32xf32>
    %280 = vector.shape_cast %279 : vector<1x8x32xf32> to vector<8x32xf32>
    %281 = vector.extract_strided_slice %278 {offsets = [1, 0, 0], sizes = [1, 8, 32], strides = [1, 1, 1]} : vector<4x8x32xf32> to vector<1x8x32xf32>
    %282 = vector.shape_cast %281 : vector<1x8x32xf32> to vector<8x32xf32>
    %283 = vector.extract_strided_slice %278 {offsets = [2, 0, 0], sizes = [1, 8, 32], strides = [1, 1, 1]} : vector<4x8x32xf32> to vector<1x8x32xf32>
    %284 = vector.shape_cast %283 : vector<1x8x32xf32> to vector<8x32xf32>
    %285 = vector.extract_strided_slice %278 {offsets = [3, 0, 0], sizes = [1, 8, 32], strides = [1, 1, 1]} : vector<4x8x32xf32> to vector<1x8x32xf32>
    %286 = vector.shape_cast %285 : vector<1x8x32xf32> to vector<8x32xf32>
    %287 = tpu.concatenate %280, %282, %284, %286 in 1 : vector<8x32xf32>, vector<8x32xf32>, vector<8x32xf32>, vector<8x32xf32> -> vector<8x128xf32>
    %288 = arith.truncf %287 : vector<8x128xf32> to vector<8x128xbf16>
    %c1_108 = arith.constant 1 : index
    %c0_109 = arith.constant 0 : index
    %c0_110 = arith.constant 0 : index
    %289 = vector.load %arg7[%c1_108, %c0_109, %c0_110] : memref<2x128x128xbf16, #tpu.memory_space<vmem>>, vector<1x128x128xbf16>
    %290 = vector.shape_cast %289 : vector<1x128x128xbf16> to vector<128x128xbf16>
    %cst_111 = arith.constant dense<0.000000e+00> : vector<8x128xf32>
    %291 = tpu.matmul %288, %290, %cst_111 {dimension_numbers = #tpu.dot_dimension_numbers<[1], [0], [0], [1], [0, 0, 1, 1], [], []>} : vector<8x128xbf16>, vector<128x128xbf16>, vector<8x128xf32> -> vector<8x128xf32>
    %c1_112 = arith.constant 1 : index
    %c0_113 = arith.constant 0 : index
    %c0_114 = arith.constant 0 : index
    %292 = vector.load %arg8[%c1_112, %c0_113, %c0_114] : memref<2x1x128xf32, #tpu.memory_space<vmem>>, vector<1x1x128xf32>
    %293 = vector.shape_cast %292 : vector<1x1x128xf32> to vector<1x128xf32>
    %294 = vector.broadcast %293 : vector<1x128xf32> to vector<8x128xf32>
    %295 = arith.addf %291, %294 : vector<8x128xf32>
    %296 = arith.addf %295, %220 : vector<8x128xf32>
    %c1_115 = arith.constant 1 : index
    %c0_116 = arith.constant 0 : index
    %c0_117 = arith.constant 0 : index
    %297 = vector.load %arg9[%c1_115, %c0_116, %c0_117] : memref<2x1x128xf32, #tpu.memory_space<vmem>>, vector<1x1x128xf32>
    %298 = vector.shape_cast %297 : vector<1x1x128xf32> to vector<1x128xf32>
    %c1_118 = arith.constant 1 : index
    %c0_119 = arith.constant 0 : index
    %c0_120 = arith.constant 0 : index
    %299 = vector.load %arg10[%c1_118, %c0_119, %c0_120] : memref<2x1x128xf32, #tpu.memory_space<vmem>>, vector<1x1x128xf32>
    %300 = vector.shape_cast %299 : vector<1x1x128xf32> to vector<1x128xf32>
    %cst_121 = arith.constant dense<0.000000e+00> : vector<8xf32>
    %301 = vector.multi_reduction <add>, %296, %cst_121 [1] : vector<8x128xf32> to vector<8xf32>
    %302 = vector.shape_cast %301 : vector<8xf32> to vector<8x1xf32>
    %cst_122 = arith.constant 1.280000e+02 : f32
    %303 = vector.broadcast %cst_122 : f32 to vector<8x1xf32>
    %304 = arith.divf %302, %303 : vector<8x1xf32>
    %305 = vector.broadcast %304 : vector<8x1xf32> to vector<8x128xf32>
    %306 = arith.subf %296, %305 : vector<8x128xf32>
    %307 = arith.mulf %306, %306 : vector<8x128xf32>
    %cst_123 = arith.constant dense<0.000000e+00> : vector<8xf32>
    %308 = vector.multi_reduction <add>, %307, %cst_123 [1] : vector<8x128xf32> to vector<8xf32>
    %309 = vector.shape_cast %308 : vector<8xf32> to vector<8x1xf32>
    %cst_124 = arith.constant 1.280000e+02 : f32
    %310 = vector.broadcast %cst_124 : f32 to vector<8x1xf32>
    %311 = arith.divf %309, %310 : vector<8x1xf32>
    %312 = vector.broadcast %304 : vector<8x1xf32> to vector<8x128xf32>
    %313 = arith.subf %296, %312 : vector<8x128xf32>
    %cst_125 = arith.constant 9.99999996E-13 : f32
    %314 = vector.broadcast %cst_125 : f32 to vector<8x1xf32>
    %315 = arith.addf %311, %314 : vector<8x1xf32>
    %316 = math.rsqrt %315 : vector<8x1xf32>
    %317 = vector.broadcast %316 : vector<8x1xf32> to vector<8x128xf32>
    %318 = arith.mulf %313, %317 : vector<8x128xf32>
    %319 = vector.broadcast %298 : vector<1x128xf32> to vector<8x128xf32>
    %320 = arith.mulf %318, %319 : vector<8x128xf32>
    %321 = vector.broadcast %300 : vector<1x128xf32> to vector<8x128xf32>
    %322 = arith.addf %320, %321 : vector<8x128xf32>
    %323 = arith.truncf %322 : vector<8x128xf32> to vector<8x128xbf16>
    %cst_126 = arith.constant 0.000000e+00 : f32
    %324 = vector.broadcast %cst_126 : f32 to vector<8x128xf32>
    %c1_127 = arith.constant 1 : index
    %c0_128 = arith.constant 0 : index
    %c0_129 = arith.constant 0 : index
    %325 = vector.load %arg11[%c1_127, %c0_128, %c0_129] : memref<2x128x3072xbf16, #tpu.memory_space<vmem>>, vector<1x128x1024xbf16>
    %326 = vector.shape_cast %325 : vector<1x128x1024xbf16> to vector<128x1024xbf16>
    %c1_130 = arith.constant 1 : index
    %c0_131 = arith.constant 0 : index
    %c0_132 = arith.constant 0 : index
    %327 = vector.load %arg12[%c1_130, %c0_131, %c0_132] : memref<2x1x3072xf32, #tpu.memory_space<vmem>>, vector<1x1x1024xf32>
    %328 = vector.shape_cast %327 : vector<1x1x1024xf32> to vector<1x1024xf32>
    %cst_133 = arith.constant dense<0.000000e+00> : vector<8x1024xf32>
    %329 = tpu.matmul %323, %326, %cst_133 {dimension_numbers = #tpu.dot_dimension_numbers<[1], [0], [0], [1], [0, 0, 1, 1], [], []>} : vector<8x128xbf16>, vector<128x1024xbf16>, vector<8x1024xf32> -> vector<8x1024xf32>
    %330 = vector.broadcast %328 : vector<1x1024xf32> to vector<8x1024xf32>
    %331 = arith.addf %329, %330 : vector<8x1024xf32>
    %cst_134 = arith.constant 5.000000e-01 : f32
    %332 = vector.broadcast %cst_134 : f32 to vector<8x1024xf32>
    %333 = arith.mulf %332, %331 : vector<8x1024xf32>
    %334 = arith.mulf %331, %331 : vector<8x1024xf32>
    %335 = arith.mulf %334, %331 : vector<8x1024xf32>
    %cst_135 = arith.constant 4.471500e-02 : f32
    %336 = vector.broadcast %cst_135 : f32 to vector<8x1024xf32>
    %337 = arith.mulf %336, %335 : vector<8x1024xf32>
    %338 = arith.addf %331, %337 : vector<8x1024xf32>
    %cst_136 = arith.constant 0.797884583 : f32
    %339 = vector.broadcast %cst_136 : f32 to vector<8x1024xf32>
    %340 = arith.mulf %339, %338 : vector<8x1024xf32>
    %341 = math.tanh %340 : vector<8x1024xf32>
    %cst_137 = arith.constant 1.000000e+00 : f32
    %342 = vector.broadcast %cst_137 : f32 to vector<8x1024xf32>
    %343 = arith.addf %342, %341 : vector<8x1024xf32>
    %344 = arith.mulf %333, %343 : vector<8x1024xf32>
    %c1_138 = arith.constant 1 : index
    %c0_139 = arith.constant 0 : index
    %c0_140 = arith.constant 0 : index
    %345 = vector.load %arg13[%c1_138, %c0_139, %c0_140] : memref<2x3072x128xbf16, #tpu.memory_space<vmem>>, vector<1x1024x128xbf16>
    %346 = vector.shape_cast %345 : vector<1x1024x128xbf16> to vector<1024x128xbf16>
    %347 = arith.truncf %344 : vector<8x1024xf32> to vector<8x1024xbf16>
    %cst_141 = arith.constant dense<0.000000e+00> : vector<8x128xf32>
    %348 = tpu.matmul %347, %346, %cst_141 {dimension_numbers = #tpu.dot_dimension_numbers<[1], [0], [0], [1], [0, 0, 1, 1], [], []>} : vector<8x1024xbf16>, vector<1024x128xbf16>, vector<8x128xf32> -> vector<8x128xf32>
    %349 = arith.addf %324, %348 : vector<8x128xf32>
    %c1_142 = arith.constant 1 : index
    %c0_143 = arith.constant 0 : index
    %c1024_144 = arith.constant 1024 : index
    %350 = vector.load %arg11[%c1_142, %c0_143, %c1024_144] : memref<2x128x3072xbf16, #tpu.memory_space<vmem>>, vector<1x128x1024xbf16>
    %351 = vector.shape_cast %350 : vector<1x128x1024xbf16> to vector<128x1024xbf16>
    %c1_145 = arith.constant 1 : index
    %c0_146 = arith.constant 0 : index
    %c1024_147 = arith.constant 1024 : index
    %352 = vector.load %arg12[%c1_145, %c0_146, %c1024_147] : memref<2x1x3072xf32, #tpu.memory_space<vmem>>, vector<1x1x1024xf32>
    %353 = vector.shape_cast %352 : vector<1x1x1024xf32> to vector<1x1024xf32>
    %cst_148 = arith.constant dense<0.000000e+00> : vector<8x1024xf32>
    %354 = tpu.matmul %323, %351, %cst_148 {dimension_numbers = #tpu.dot_dimension_numbers<[1], [0], [0], [1], [0, 0, 1, 1], [], []>} : vector<8x128xbf16>, vector<128x1024xbf16>, vector<8x1024xf32> -> vector<8x1024xf32>
    %355 = vector.broadcast %353 : vector<1x1024xf32> to vector<8x1024xf32>
    %356 = arith.addf %354, %355 : vector<8x1024xf32>
    %cst_149 = arith.constant 5.000000e-01 : f32
    %357 = vector.broadcast %cst_149 : f32 to vector<8x1024xf32>
    %358 = arith.mulf %357, %356 : vector<8x1024xf32>
    %359 = arith.mulf %356, %356 : vector<8x1024xf32>
    %360 = arith.mulf %359, %356 : vector<8x1024xf32>
    %cst_150 = arith.constant 4.471500e-02 : f32
    %361 = vector.broadcast %cst_150 : f32 to vector<8x1024xf32>
    %362 = arith.mulf %361, %360 : vector<8x1024xf32>
    %363 = arith.addf %356, %362 : vector<8x1024xf32>
    %cst_151 = arith.constant 0.797884583 : f32
    %364 = vector.broadcast %cst_151 : f32 to vector<8x1024xf32>
    %365 = arith.mulf %364, %363 : vector<8x1024xf32>
    %366 = math.tanh %365 : vector<8x1024xf32>
    %cst_152 = arith.constant 1.000000e+00 : f32
    %367 = vector.broadcast %cst_152 : f32 to vector<8x1024xf32>
    %368 = arith.addf %367, %366 : vector<8x1024xf32>
    %369 = arith.mulf %358, %368 : vector<8x1024xf32>
    %c1_153 = arith.constant 1 : index
    %c1024_154 = arith.constant 1024 : index
    %c0_155 = arith.constant 0 : index
    %370 = vector.load %arg13[%c1_153, %c1024_154, %c0_155] : memref<2x3072x128xbf16, #tpu.memory_space<vmem>>, vector<1x1024x128xbf16>
    %371 = vector.shape_cast %370 : vector<1x1024x128xbf16> to vector<1024x128xbf16>
    %372 = arith.truncf %369 : vector<8x1024xf32> to vector<8x1024xbf16>
    %cst_156 = arith.constant dense<0.000000e+00> : vector<8x128xf32>
    %373 = tpu.matmul %372, %371, %cst_156 {dimension_numbers = #tpu.dot_dimension_numbers<[1], [0], [0], [1], [0, 0, 1, 1], [], []>} : vector<8x1024xbf16>, vector<1024x128xbf16>, vector<8x128xf32> -> vector<8x128xf32>
    %374 = arith.addf %349, %373 : vector<8x128xf32>
    %c1_157 = arith.constant 1 : index
    %c0_158 = arith.constant 0 : index
    %c2048_159 = arith.constant 2048 : index
    %375 = vector.load %arg11[%c1_157, %c0_158, %c2048_159] : memref<2x128x3072xbf16, #tpu.memory_space<vmem>>, vector<1x128x1024xbf16>
    %376 = vector.shape_cast %375 : vector<1x128x1024xbf16> to vector<128x1024xbf16>
    %c1_160 = arith.constant 1 : index
    %c0_161 = arith.constant 0 : index
    %c2048_162 = arith.constant 2048 : index
    %377 = vector.load %arg12[%c1_160, %c0_161, %c2048_162] : memref<2x1x3072xf32, #tpu.memory_space<vmem>>, vector<1x1x1024xf32>
    %378 = vector.shape_cast %377 : vector<1x1x1024xf32> to vector<1x1024xf32>
    %cst_163 = arith.constant dense<0.000000e+00> : vector<8x1024xf32>
    %379 = tpu.matmul %323, %376, %cst_163 {dimension_numbers = #tpu.dot_dimension_numbers<[1], [0], [0], [1], [0, 0, 1, 1], [], []>} : vector<8x128xbf16>, vector<128x1024xbf16>, vector<8x1024xf32> -> vector<8x1024xf32>
    %380 = vector.broadcast %378 : vector<1x1024xf32> to vector<8x1024xf32>
    %381 = arith.addf %379, %380 : vector<8x1024xf32>
    %cst_164 = arith.constant 5.000000e-01 : f32
    %382 = vector.broadcast %cst_164 : f32 to vector<8x1024xf32>
    %383 = arith.mulf %382, %381 : vector<8x1024xf32>
    %384 = arith.mulf %381, %381 : vector<8x1024xf32>
    %385 = arith.mulf %384, %381 : vector<8x1024xf32>
    %cst_165 = arith.constant 4.471500e-02 : f32
    %386 = vector.broadcast %cst_165 : f32 to vector<8x1024xf32>
    %387 = arith.mulf %386, %385 : vector<8x1024xf32>
    %388 = arith.addf %381, %387 : vector<8x1024xf32>
    %cst_166 = arith.constant 0.797884583 : f32
    %389 = vector.broadcast %cst_166 : f32 to vector<8x1024xf32>
    %390 = arith.mulf %389, %388 : vector<8x1024xf32>
    %391 = math.tanh %390 : vector<8x1024xf32>
    %cst_167 = arith.constant 1.000000e+00 : f32
    %392 = vector.broadcast %cst_167 : f32 to vector<8x1024xf32>
    %393 = arith.addf %392, %391 : vector<8x1024xf32>
    %394 = arith.mulf %383, %393 : vector<8x1024xf32>
    %c1_168 = arith.constant 1 : index
    %c2048_169 = arith.constant 2048 : index
    %c0_170 = arith.constant 0 : index
    %395 = vector.load %arg13[%c1_168, %c2048_169, %c0_170] : memref<2x3072x128xbf16, #tpu.memory_space<vmem>>, vector<1x1024x128xbf16>
    %396 = vector.shape_cast %395 : vector<1x1024x128xbf16> to vector<1024x128xbf16>
    %397 = arith.truncf %394 : vector<8x1024xf32> to vector<8x1024xbf16>
    %cst_171 = arith.constant dense<0.000000e+00> : vector<8x128xf32>
    %398 = tpu.matmul %397, %396, %cst_171 {dimension_numbers = #tpu.dot_dimension_numbers<[1], [0], [0], [1], [0, 0, 1, 1], [], []>} : vector<8x1024xbf16>, vector<1024x128xbf16>, vector<8x128xf32> -> vector<8x128xf32>
    %399 = arith.addf %374, %398 : vector<8x128xf32>
    %c1_172 = arith.constant 1 : index
    %c0_173 = arith.constant 0 : index
    %c0_174 = arith.constant 0 : index
    %400 = vector.load %arg14[%c1_172, %c0_173, %c0_174] : memref<2x1x128xf32, #tpu.memory_space<vmem>>, vector<1x1x128xf32>
    %401 = vector.shape_cast %400 : vector<1x1x128xf32> to vector<1x128xf32>
    %402 = vector.broadcast %401 : vector<1x128xf32> to vector<8x128xf32>
    %403 = arith.addf %399, %402 : vector<8x128xf32>
    %404 = arith.addf %403, %322 : vector<8x128xf32>
    %c1_175 = arith.constant 1 : index
    %c0_176 = arith.constant 0 : index
    %c0_177 = arith.constant 0 : index
    %405 = vector.load %arg15[%c1_175, %c0_176, %c0_177] : memref<2x1x128xf32, #tpu.memory_space<vmem>>, vector<1x1x128xf32>
    %406 = vector.shape_cast %405 : vector<1x1x128xf32> to vector<1x128xf32>
    %c1_178 = arith.constant 1 : index
    %c0_179 = arith.constant 0 : index
    %c0_180 = arith.constant 0 : index
    %407 = vector.load %arg16[%c1_178, %c0_179, %c0_180] : memref<2x1x128xf32, #tpu.memory_space<vmem>>, vector<1x1x128xf32>
    %408 = vector.shape_cast %407 : vector<1x1x128xf32> to vector<1x128xf32>
    %cst_181 = arith.constant dense<0.000000e+00> : vector<8xf32>
    %409 = vector.multi_reduction <add>, %404, %cst_181 [1] : vector<8x128xf32> to vector<8xf32>
    %410 = vector.shape_cast %409 : vector<8xf32> to vector<8x1xf32>
    %cst_182 = arith.constant 1.280000e+02 : f32
    %411 = vector.broadcast %cst_182 : f32 to vector<8x1xf32>
    %412 = arith.divf %410, %411 : vector<8x1xf32>
    %413 = vector.broadcast %412 : vector<8x1xf32> to vector<8x128xf32>
    %414 = arith.subf %404, %413 : vector<8x128xf32>
    %415 = arith.mulf %414, %414 : vector<8x128xf32>
    %cst_183 = arith.constant dense<0.000000e+00> : vector<8xf32>
    %416 = vector.multi_reduction <add>, %415, %cst_183 [1] : vector<8x128xf32> to vector<8xf32>
    %417 = vector.shape_cast %416 : vector<8xf32> to vector<8x1xf32>
    %cst_184 = arith.constant 1.280000e+02 : f32
    %418 = vector.broadcast %cst_184 : f32 to vector<8x1xf32>
    %419 = arith.divf %417, %418 : vector<8x1xf32>
    %420 = vector.broadcast %412 : vector<8x1xf32> to vector<8x128xf32>
    %421 = arith.subf %404, %420 : vector<8x128xf32>
    %cst_185 = arith.constant 9.99999996E-13 : f32
    %422 = vector.broadcast %cst_185 : f32 to vector<8x1xf32>
    %423 = arith.addf %419, %422 : vector<8x1xf32>
    %424 = math.rsqrt %423 : vector<8x1xf32>
    %425 = vector.broadcast %424 : vector<8x1xf32> to vector<8x128xf32>
    %426 = arith.mulf %421, %425 : vector<8x128xf32>
    %427 = vector.broadcast %406 : vector<1x128xf32> to vector<8x128xf32>
    %428 = arith.mulf %426, %427 : vector<8x128xf32>
    %429 = vector.broadcast %408 : vector<1x128xf32> to vector<8x128xf32>
    %430 = arith.addf %428, %429 : vector<8x128xf32>
    %c0_186 = arith.constant 0 : index
    %c0_187 = arith.constant 0 : index
    %c0_188 = arith.constant 0 : index
    %431 = vector.load %arg17[%c0_186, %c0_187, %c0_188] : memref<1x8x128xf32, #tpu.memory_space<vmem>>, vector<1x8x128xf32>
    %432 = vector.shape_cast %431 : vector<1x8x128xf32> to vector<8x128xf32>
    %433 = vector.shape_cast %430 : vector<8x128xf32> to vector<1x8x128xf32>
    tpu.vector_store %arg17[%c0_186, %c0_187, %c0_188], %433 {strides = array<i32>} : memref<1x8x128xf32, #tpu.memory_space<vmem>>, vector<1x8x128xf32>,
    return
  }
  func.func @transform_0(%arg0: i32) -> (i32, i32, i32) {
    %c0_i32 = arith.constant 0 : i32
    %c0_i32_0 = arith.constant 0 : i32
    %c0_i32_1 = arith.constant 0 : i32
    return %arg0, %c0_i32, %c0_i32_0 : i32, i32, i32
  }
  func.func @transform_1(%arg0: i32) -> (i32, i32, i32) {
    %c0_i32 = arith.constant 0 : i32
    %c0_i32_0 = arith.constant 0 : i32
    %c0_i32_1 = arith.constant 0 : i32
    return %arg0, %c0_i32, %c0_i32_0 : i32, i32, i32
  }
  func.func @transform_2(%arg0: i32) -> (i32, i32) {
    %c0_i32 = arith.constant 0 : i32
    %c0_i32_0 = arith.constant 0 : i32
    %c0_i32_1 = arith.constant 0 : i32
    return %c0_i32, %c0_i32_0 : i32, i32
  }
  func.func @transform_3(%arg0: i32) -> (i32, i32) {
    %c0_i32 = arith.constant 0 : i32
    %c0_i32_0 = arith.constant 0 : i32
    %c0_i32_1 = arith.constant 0 : i32
    return %c0_i32, %c0_i32_0 : i32, i32
  }
  func.func @transform_4(%arg0: i32) -> (i32, i32, i32) {
    %c0_i32 = arith.constant 0 : i32
    %c0_i32_0 = arith.constant 0 : i32
    %c0_i32_1 = arith.constant 0 : i32
    %c0_i32_2 = arith.constant 0 : i32
    return %c0_i32, %c0_i32_0, %c0_i32_1 : i32, i32, i32
  }
  func.func @transform_5(%arg0: i32) -> (i32, i32, i32) {
    %c0_i32 = arith.constant 0 : i32
    %c0_i32_0 = arith.constant 0 : i32
    %c0_i32_1 = arith.constant 0 : i32
    %c0_i32_2 = arith.constant 0 : i32
    return %c0_i32, %c0_i32_0, %c0_i32_1 : i32, i32, i32
  }
  func.func @transform_6(%arg0: i32) -> (i32, i32, i32) {
    %c0_i32 = arith.constant 0 : i32
    %c0_i32_0 = arith.constant 0 : i32
    %c0_i32_1 = arith.constant 0 : i32
    %c0_i32_2 = arith.constant 0 : i32
    return %c0_i32, %c0_i32_0, %c0_i32_1 : i32, i32, i32
  }
  func.func @transform_7(%arg0: i32) -> (i32, i32, i32) {
    %c0_i32 = arith.constant 0 : i32
    %c0_i32_0 = arith.constant 0 : i32
    %c0_i32_1 = arith.constant 0 : i32
    %c0_i32_2 = arith.constant 0 : i32
    return %c0_i32, %c0_i32_0, %c0_i32_1 : i32, i32, i32
  }
  func.func @transform_8(%arg0: i32) -> (i32, i32, i32) {
    %c0_i32 = arith.constant 0 : i32
    %c0_i32_0 = arith.constant 0 : i32
    %c0_i32_1 = arith.constant 0 : i32
    %c0_i32_2 = arith.constant 0 : i32
    return %c0_i32, %c0_i32_0, %c0_i32_1 : i32, i32, i32
  }
  func.func @transform_9(%arg0: i32) -> (i32, i32, i32) {
    %c0_i32 = arith.constant 0 : i32
    %c0_i32_0 = arith.constant 0 : i32
    %c0_i32_1 = arith.constant 0 : i32
    %c0_i32_2 = arith.constant 0 : i32
    return %c0_i32, %c0_i32_0, %c0_i32_1 : i32, i32, i32
  }
  func.func @transform_10(%arg0: i32) -> (i32, i32, i32) {
    %c0_i32 = arith.constant 0 : i32
    %c0_i32_0 = arith.constant 0 : i32
    %c0_i32_1 = arith.constant 0 : i32
    %c0_i32_2 = arith.constant 0 : i32
    return %c0_i32, %c0_i32_0, %c0_i32_1 : i32, i32, i32
  }
  func.func @transform_11(%arg0: i32) -> (i32, i32, i32) {
    %c0_i32 = arith.constant 0 : i32
    %c0_i32_0 = arith.constant 0 : i32
    %c0_i32_1 = arith.constant 0 : i32
    %c0_i32_2 = arith.constant 0 : i32
    return %c0_i32, %c0_i32_0, %c0_i32_1 : i32, i32, i32
  }
  func.func @transform_12(%arg0: i32) -> (i32, i32, i32) {
    %c0_i32 = arith.constant 0 : i32
    %c0_i32_0 = arith.constant 0 : i32
    %c0_i32_1 = arith.constant 0 : i32
    %c0_i32_2 = arith.constant 0 : i32
    return %c0_i32, %c0_i32_0, %c0_i32_1 : i32, i32, i32
  }
  func.func @transform_13(%arg0: i32) -> (i32, i32, i32) {
    %c0_i32 = arith.constant 0 : i32
    %c0_i32_0 = arith.constant 0 : i32
    %c0_i32_1 = arith.constant 0 : i32
    %c0_i32_2 = arith.constant 0 : i32
    return %c0_i32, %c0_i32_0, %c0_i32_1 : i32, i32, i32
  }
  func.func @transform_14(%arg0: i32) -> (i32, i32, i32) {
    %c0_i32 = arith.constant 0 : i32
    %c0_i32_0 = arith.constant 0 : i32
    %c0_i32_1 = arith.constant 0 : i32
    %c0_i32_2 = arith.constant 0 : i32
    return %c0_i32, %c0_i32_0, %c0_i32_1 : i32, i32, i32
  }
  func.func @transform_15(%arg0: i32) -> (i32, i32, i32) {
    %c0_i32 = arith.constant 0 : i32
    %c0_i32_0 = arith.constant 0 : i32
    %c0_i32_1 = arith.constant 0 : i32
    %c0_i32_2 = arith.constant 0 : i32
    return %c0_i32, %c0_i32_0, %c0_i32_1 : i32, i32, i32
  }
  func.func @transform_16(%arg0: i32) -> (i32, i32, i32) {
    %c0_i32 = arith.constant 0 : i32
    %c0_i32_0 = arith.constant 0 : i32
    %c0_i32_1 = arith.constant 0 : i32
    return %arg0, %c0_i32, %c0_i32_0 : i32, i32, i32
  }
}

</mosaic_0001>

<bundles_post_ra>
// kernel: text_bert_encoder_forward.1
= control target key start
LH: loop header
LB: loop body
LE: loop exit
PB: predicated region body
PF: predicated region fallthrough
CT: control target
= control target key end

     0   :  { %s17052_s0 = inlined_call_operand.vmem [shape: f32[2,8,32], index: 0, kind: input, shape index: {}]   ;;  %s17053_s1 = inlined_call_operand.vmem [shape: f32[2,1,8], index: 1, kind: input, shape index: {}]   ;;  %s17054_s2 = inlined_call_operand.vmem [shape: bf16[32,128], index: 2, kind: input, shape index: {}]   ;;  %s17055_s3 = inlined_call_operand.vmem [shape: f32[1,128], index: 3, kind: input, shape index: {}]   ;;  %s17056_s4 = inlined_call_operand.vmem [shape: bf16[2,128,384], index: 4, kind: input, shape index: {}]   ;;  %s17057_s5 = inlined_call_operand.vmem [shape: f32[2,1,384], index: 5, kind: input, shape index: {}]   ;;  %s17058_s6 = inlined_call_operand.vmem [shape: bf16[2,128,128], index: 6, kind: input, shape index: {}]   ;;  %s17059_s7 = inlined_call_operand.vmem [shape: f32[2,1,128], index: 7, kind: input, shape index: {}]   ;;  %s17060_s8 = inlined_call_operand.vmem [shape: f32[2,1,128], index: 8, kind: input, shape index: {}]   ;;  %s17061_s9 = inlined_call_operand.vmem [shape: f32[2,1,128], index: 9, kind: input, shape index: {}]   ;;  %s17062_s10 = inlined_call_operand.vmem [shape: bf16[2,128,3072], index: 10, kind: input, shape index: {}]   ;;  %s17063_s11 = inlined_call_operand.vmem [shape: f32[2,1,3072], index: 11, kind: input, shape index: {}]   ;;  %s17064_s12 = inlined_call_operand.vmem [shape: bf16[2,3072,128], index: 12, kind: input, shape index: {}]   ;;  %s17065_s13 = inlined_call_operand.vmem [shape: f32[2,1,128], index: 13, kind: input, shape index: {}]   ;;  %s17066_s14 = inlined_call_operand.vmem [shape: f32[2,1,128], index: 14, kind: input, shape index: {}]   ;;  %s17067_s15 = inlined_call_operand.vmem [shape: f32[2,1,128], index: 15, kind: input, shape index: {}]   ;;  %s17068_s16 = inlined_call_operand.hbm [shape: f32[2,8,128], index: 16, kind: output, shape index: {}]  }
   0x1   :  { %17080 = sst [smem:[#allocation10_spill]] %s17052_s0 }
   0x2   :  { %17081 = sst [smem:[#allocation11_spill]] %s17053_s1 }
   0x3   :  { %17082 = sst [smem:[#allocation12_spill]] %s17054_s2 }
   0x4   :  { %21 = vsyncpa [#allocation3], 0 }
   0x5   :  { %23 = vsyncpa [#allocation3 + $0x1], 0  ;;  %s13695_s21 = smov 0   ;;  %s13697_s22 = smov 0  }
   0x6   :  { %s13699_s23 = smov 0   ;;  %s13701_s24 = smov 0  }
   0x7 LB: > { %17083 = sst [smem:[#allocation5_spill]] %s13589_s21  ;;  %s13716_s25 = sadd.s32 4294967295, %s13601_s24   ;;  %s13601_s24 = sphi %s13701_s24, %s17098_s24   ;;  %s13597_s23 = sphi %s13699_s23, %s17100_s23   ;;  %s13593_s22 = sphi %s13697_s22, %s17102_s22   ;;  %s13589_s21 = sphi %s13695_s21, %s17101_s21  }
   0x8   : > { %17084 = sst [smem:[#allocation6_spill]] %s13597_s23  ;;  %s10597_s26 = sadd.s32 4294967294, %s13601_s24  }
   0x9   : > { %s13720_s27 = sadd.s32 1, %s13601_s24   ;;  %s382_s28 = sadd.s32 1, %s13597_s23 }
   0xa   : > { %17085 = sst [smem:[#allocation7_spill]] %s13720_s27  ;;  %s379_s29 = ssub.s32 %s13601_s24, %s13720_s27 }
   0xb   : > { %p392_p0 = scmp.ne.s32.totalorder %s13597_s23, %s13593_s22  ;;  %p380_p1 = scmp.eq.s32.totalorder %s379_s29, 0 }
   0xc   : > { %p393_p2 = scmp.eq.s32.totalorder %s13716_s25, 1  ;;  %p398_p3 = scmp.ne.s32.totalorder %s13593_s22, %s13589_s21 }
   0xd   : > { %p399_p4 = scmp.eq.s32.totalorder %s10597_s26, 1  ;;  %p10600_p7 = scmp.ge.s32.totalorder %s13601_s24, 1 }
   0xe   : > { %s13731_s30 = scalar_select %p380_p1, %s13597_s23, %s382_s28  }
   0xf   : > { %p13733_p5 = por %p393_p2, %p392_p0  ;;  %p13737_p6 = por %p399_p4, %p398_p3 }
  0x10   : > { %17086 = sst [smem:[#allocation8_spill]] %s13731_s30  ;;  %p472_p8 = scmp.lt.s32.totalorder %s13601_s24, 3 }
  0x11   : > { %s17088_s17 = scalar_select %p13737_p6, 1, 0 }
  0x12   : > { %p473_p9 = pnand %p10600_p7, %p472_p8 }
  0x13   : > { %17089 = sst [smem:[#allocation9_spill]] %s17088_s17  ;;  %s17090_s2 = sld [smem:[#allocation12_spill]] (!%p473_p9)  ;;  %v13603_v1 = vmov (!%p473_p9), 0.0   ;;  %vm13604_vm0 = vmmov (!%p473_p9), 0   ;;  %v12936_v3 = vld [vmem:[%s17056_s4 + $0x4] ss:$12 sps:$4 sm:$0xff] (!%p473_p9)   ;;  %v638_v38 = vlaneseq (!%p473_p9) }
  0x14   : > { %476 = sbr.rel (%p473_p9) target bundleno = 6259 (0x1873), region = 84  ;;  %12705 = vmatprep.subr.bf16.mxu0 (!%p473_p9), %v13603_v1  ;;  %12709 = vmatprep.mubr.msk.bf16.mxu0 (!%p473_p9), %vm13604_vm0, %v13603_v1  ;;  %p524_p10 = scmp.lt.s32.totalorder (!%p473_p9), %s13716_s25, 1  ;;  %v12938_v4 = vld [vmem:[%s17056_s4] ss:$12 sps:$4 sm:$0xff] (!%p473_p9)   ;;  %v12940_v5 = vld [vmem:[%s17056_s4 + $0x1c] ss:$12 sps:$4 sm:$0xff] (!%p473_p9)  }
  0x15   : > { %781 = vmatprep.subr.bf16.mxu1 (!%p473_p9), %v12936_v3  ;;  %v12942_v6 = vld [vmem:[%s17056_s4 + $0x18] ss:$12 sps:$4 sm:$0xff] (!%p473_p9)   ;;  %s17091_s17 = sld [smem:[#allocation10_spill]] (!%p473_p9)  ;;  %v12944_v7 = vld [vmem:[%s17056_s4 + $0x34] ss:$12 sps:$4 sm:$0xff] (!%p473_p9)   ;;  %vm558_vm1 = vcmask (!%p473_p9), 261120  }
  0x16   : > { %782 = vmatpush1.bf16.msra.mxu1 (!%p473_p9), %v12938_v4  ;;  %v12939_v9 = vld [vmem:[%s17056_s4 + $0x8] ss:$12 sps:$4 sm:$0xff] (!%p473_p9)   ;;  %v12946_v11 = vld [vmem:[%s17056_s4 + $0x30] ss:$12 sps:$4 sm:$0xff] (!%p473_p9)   ;;  %v12948_v12 = vld [vmem:[%s17056_s4 + $0x4c] ss:$12 sps:$4 sm:$0xff] (!%p473_p9)  }
  0x17   : > { %783 = vmatprep.subr.bf16.mxu1 (!%p473_p9), %v12940_v5  ;;  %v12943_v13 = vld [vmem:[%s17056_s4 + $0x20] ss:$12 sps:$4 sm:$0xff] (!%p473_p9)   ;;  %v12950_v14 = vld [vmem:[%s17056_s4 + $0x48] ss:$12 sps:$4 sm:$0xff] (!%p473_p9)   ;;  %v12947_v15 = vld [vmem:[%s17056_s4 + $0x38] ss:$12 sps:$4 sm:$0xff] (!%p473_p9)  }
  0x18   : > { %v12951_v16 = vld [vmem:[%s17056_s4 + $0x50] ss:$12 sps:$4 sm:$0xff] (!%p473_p9)   ;;  %v12954_v18 = vld [vmem:[%s17056_s4 + $0x60] ss:$12 sps:$4 sm:$0xff] (!%p473_p9)   ;;  %v12955_v19 = vld [vmem:[%s17056_s4 + $0x68] ss:$12 sps:$4 sm:$0xff] (!%p473_p9)  }
  0x19   : > { %v12934_v0 = vld [vmem:[%s17090_s2] sm:$0xff] (!%p473_p9)   ;;  %v12935_v2 = vld [vmem:[%s17090_s2 + $0x8] sm:$0xff] (!%p473_p9)   ;;  %v12962_v24 = vld [vmem:[%s17056_s4 + $0x90] ss:$12 sps:$4 sm:$0xff] (!%p473_p9)   ;;  %v13605_v29 = vmov (!%p473_p9), 0   ;;  %v13858_v39 = vshrl.u32 (!%p473_p9), %v638_v38, 7 }
  0x1a   : > { %12706 = vmatpush3.bf16.msra.mxu0 (!%p473_p9), %v12934_v0  ;;  %784 = vmatpush1.bf16.msra.mxu1 (!%p473_p9), %v12942_v6  ;;  %v12952_v17 = vld [vmem:[%s17056_s4 + $0x64] ss:$12 sps:$4 sm:$0xff] (!%p473_p9)   ;;  %v12956_v20 = vld [vmem:[%s17056_s4 + $0x7c] ss:$12 sps:$4 sm:$0xff] (!%p473_p9)   ;;  %v12959_v22 = vld [vmem:[%s17056_s4 + $0x80] ss:$12 sps:$4 sm:$0xff] (!%p473_p9)  }
  0x1b   : > { %12707 = vmatprep.subr.bf16.mxu0 %v13603_v1  ;;  %s13761_s30 = scalar_select %p524_p10, %s13716_s25, 1  ;;  %785 = vmatprep.subr.bf16.mxu1 %v12944_v7  ;;  %v12958_v21 = vld [vmem:[%s17056_s4 + $0x78] ss:$12 sps:$4 sm:$0xff]   ;;  %v12960_v23 = vld [vmem:[%s17056_s4 + $0x94] ss:$12 sps:$4 sm:$0xff]   ;;  %v13861_v40 = vsub.s32 0, %v13858_v39 }
  0x1c   : > { %v12963_v25 = vld [vmem:[%s17056_s4 + $0x98] ss:$12 sps:$4 sm:$0xff]   ;;  %v12966_v27 = vld [vmem:[%s17056_s4 + $0xa8] ss:$12 sps:$4 sm:$0xff]   ;;  %v12967_v28 = vld [vmem:[%s17056_s4 + $0xb0] ss:$12 sps:$4 sm:$0xff]   ;;  %813 = vmatprep.mubr.bf16.mxu1 %v13605_v29 }
  0x1d   : > { %s10602_s28 = sshll.u32 %s13761_s30, 3  ;;  %v12964_v26 = vld [vmem:[%s17056_s4 + $0xac] ss:$12 sps:$4 sm:$0xff]   ;;  %v10603_v30 = vld [vmem:[%s17055_s3] ss:$0 sm:$0xff]  ;;  %v13867_v42 = vsub.s32 1, %v13858_v39 }
  0x1e   : > { %12708 = vmatpush3.bf16.msra.mxu0 %v12935_v2  ;;  %s527_s18 = scalar_lea.vmem %s17091_s17, %s10602_s28  ;;  %786 = vmatpush1.bf16.msra.mxu1 %v12946_v11  ;;  %v636_v41 = vld [vmem:[%s17057_s5] sm:$0x7]  ;;  %s17076_s19 = smov 32   ;;  %v13883_v58 = vsub.s32 2, %v13858_v39  ;;  %vm1154_vm2 = vcmask 1043456   ;;  %vm1098_vm3 = vcmask 64512  }
  0x1f   : > { %12713 = vmatprep.subr.bf16.mxu0 %v13603_v1  ;;  %v532_v8 = vld [vmem:[%s527_s18] sm:$0xff]  ;;  %787 = vmatprep.subr.bf16.mxu1 %v12948_v12  ;;  %v641_v43 = vrot.slane %v636_v41, %v13861_v40  ;;  %v645_v44 = vrot.slane %v636_v41, %v13867_v42  ;;  %s17078_s18 = smov 96   ;;  %s17074_s20 = smov 64   ;;  %vm1349_vm4 = vcmask 523264   ;;  %vm1351_vm5 = vcmask 785408  }
  0x20   : > { %v534_v10 = vpack.c.bf16 %v532_v8, %v532_v8  ;;  %v649_v62 = vrot.slane %v636_v41, %v13883_v58  ;;  %s17092_s1 = sld [smem:[#allocation11_spill]]  ;;  %s17093_s26 = smov 96  }
  0x21   : > { %s17094_s2 = smov 32   ;;  %s12103_s27 = sshll.u32 %s13716_s25, 7 }
  0x22   : > { %12710 = vmatmul.mubr.msk.bf16.vlgmr.msra.gmra.mrb[0].mxu0 %vm558_vm1, %v534_v10  ;;  %788 = vmatpush1.bf16.msra.mxu1 %v12950_v14  ;;  %s13609_s25 = smov [#allocation2]  }
  0x23   : > { %12714 = vmatpush3.bf16.msra.mxu0 %v12939_v9  ;;  %12729 = vmatprep.mubr.msk.bf16.mxu0 %vm13604_vm0, %v13603_v1 }
  0x24   : > { %12715 = vmatprep.subr.bf16.mxu0 %v13603_v1  ;;  %789 = vmatprep.subr.bf16.mxu1 %v12952_v17 }
  0x26   : > { %790 = vmatpush1.bf16.msra.mxu1 %v12954_v18  ;;  %s13911_s23 = scalar_lea.vmem %s17092_s1, %s13761_s30  ;;  %s17095_s30 = smov 64  }
  0x27   : > { %12716 = vmatpush3.bf16.msra.mxu0 %v12943_v13  ;;  %791 = vmatprep.subr.bf16.mxu1 %v12956_v20 }
  0x28   : > { %12717 = vmatprep.subr.bf16.mxu0 %v13603_v1 }
  0x2a   : > { %792 = vmatpush1.bf16.msra.mxu1 %v12958_v21 }
  0x2b   : > { %12718 = vmatpush3.bf16.msra.mxu0 %v12947_v15  ;;  %793 = vmatprep.subr.bf16.mxu1 %v12960_v23  ;;  %v10635_v15 = vld [vmem:[%s13911_s23] ss:$0 sm:$0xff] }
  0x2c   : > { %12719 = vmatprep.subr.bf16.mxu0 %v13603_v1 }
  0x2e   : > { %794 = vmatpush1.bf16.msra.mxu1 %v12962_v24 }
  0x2f   : > { %12720 = vmatpush3.bf16.msra.mxu0 %v12951_v16  ;;  %795 = vmatprep.subr.bf16.mxu1 %v12964_v26 }
  0x30   : > { %12721 = vmatprep.subr.bf16.mxu0 %v13603_v1 }
  0x32   : > { %796 = vmatpush1.bf16.msra.mxu1 %v12966_v27 }
  0x33   : > { %12722 = vmatpush3.bf16.msra.mxu0 %v12955_v19  ;;  %12745 = vmatprep.subr.bf16.mxu1 %v13603_v1 }
  0x34   : > { %12723 = vmatprep.subr.bf16.mxu0 %v13603_v1 }
  0x37   : > { %12724 = vmatpush3.bf16.msra.mxu0 %v12959_v22 }
  0x38   : > { %12725 = vmatprep.subr.bf16.mxu0 %v13603_v1 }
  0x3b   : > { %12726 = vmatpush3.bf16.msra.mxu0 %v12963_v25 }
  0x3c   : > { %12727 = vmatprep.subr.bf16.mxu0 %v13603_v1 }
  0x3f   : > { %12728 = vmatpush3.bf16.msra.mxu0 %v12967_v28 }
  0x40   : > { %12733 = vmatprep.subr.bf16.mxu0 %v13603_v1 }
  0xf5   : > { %v596_v31 = vpop.f32.mrb[0].mxu0 }
  0xf6   : > { %v597_v32 = vadd.f32 %v10603_v30, %v596_v31  ;;  %v12711_v33 = vpop.f32.mrb[1].mxu0 }
  0xf7   : > { %v599_v34 = vpop.f32.mrb[2].mxu0 }
  0xf8   : > { %13400 = vtanh.f32 %v597_v32  ;;  %v12712_v35 = vpop.f32.mrb[3].mxu0 }
 0x102   : > { %v13850_v36 = vpop.eup %13400 }
 0x103   : > { %v603_v37 = vpack.c.bf16 %v13850_v36, %v13850_v36 }
 0x105   : > { %814 = vmatmul.mubr.bf16.vlgmr.msra.gmra.mrb[0].mxu1 %v603_v37  ;;  %12730 = vmatmul.mubr.bf16.vlgmr.msra.gmra.mrb[4].mxu0 %v603_v37 }
 0x106   : > { %12735 = vmatprep.mubr.msk.bf16.mxu0 %vm13604_vm0, %v13603_v1  ;;  %12747 = vmatprep.mubr.msk.bf16.mxu1 %vm13604_vm0, %v13603_v1 }
 0x1d8   : > { %v815_v45 = vpop.f32.mrb[0].mxu1  ;;  %v856_v46 = vpop.f32.mrb[4].mxu0 }
 0x1d9   : > { %v816_v47 = vadd.f32 %v815_v45, %v641_v43  ;;  %v817_v48 = vpop.f32.mrb[1].mxu1  ;;  %v12731_v49 = vpop.f32.mrb[5].mxu0  ;;  %v13888_v4 = vadd.f32 %v856_v46, %v649_v62 }
 0x1da   : > { %v818_v50 = vadd.f32 %v817_v48, %v645_v44  ;;  %v819_v51 = vpop.f32.mrb[2].mxu1  ;;  %v859_v52 = vpop.f32.mrb[6].mxu0 }
 0x1db   : > { %v820_v53 = vpop.f32.mrb[3].mxu1  ;;  %863 = vrot.lane.b32.xlu1 %v816_v47, %s17078_s18  ;;  %v12732_v54 = vpop.f32.mrb[7].mxu0  ;;  %v892_v57 = vpack.c.bf16 %v816_v47, %v816_v47  ;;  %v1147_v10 = vpack.c.bf16 %v13888_v4, %v13888_v4 }
 0x1dc   : > { %873 = vrot.lane.b32.xlu0 %v818_v50, %s17078_s18  ;;  %v896_v55 = vpack.c.bf16 %v818_v50, %v818_v50 }
 0x1dd   : > { %v1156_v13 = vsel %vm1154_vm2, %v1147_v10, 0 }
 0x1de   : > { %v904_v56 = vsel %vm558_vm1, %v896_v55, 0 }
 0x1df   : > { %12734 = vmatpush3.bf16.xpose.msra.mxu0 %v904_v56  ;;  %879 = vrot.lane.b32.xlu1 %v818_v50, %s17076_s19 }
 0x1e0   : > { %876 = vrot.lane.b32.xlu0 %v818_v50, %s17074_s20  ;;  %12739 = vmatprep.subr.bf16.mxu0 %v13603_v1 }
 0x1e3   : > { %869 = vrot.lane.b32.xlu1 %v816_v47, %s17076_s19 }
 0x1e4   : > { %866 = vrot.lane.b32.xlu0 %v816_v47, %s17074_s20 }
 0x1e6   : > { %12736 = vmatmul.mubr.msk.bf16.vlgmr.msra.gmra.mrb[8].mxu0 %vm558_vm1, %v892_v57 }
 0x1e7   : > { %12741 = vmatprep.mubr.msk.bf16.mxu0 %vm13604_vm0, %v13603_v1 }
 0x24d   : > { %v864_v59 = vpop.permute.xlu1 %863 }
 0x24e   : > { %v874_v60 = vpop.permute.xlu0 %873  ;;  %v893_v7 = vpack.c.bf16 %v864_v59, %v864_v59 }
 0x24f   : > { %v897_v61 = vpack.c.bf16 %v874_v60, %v874_v60 }
 0x251   : > { %v950_v63 = vsel %vm558_vm1, %v897_v61, 0  ;;  %v880_v0 = vpop.permute.xlu1 %879 }
 0x252   : > { %v877_v2 = vpop.permute.xlu0 %876  ;;  %12740 = vmatpush3.bf16.xpose.msra.mxu0 %v950_v63  ;;  %v899_v5 = vpack.c.bf16 %v880_v0, %v880_v0 }
 0x253   : > { %v898_v3 = vpack.c.bf16 %v877_v2, %v877_v2  ;;  %12751 = vmatprep.subr.bf16.mxu0 %v13603_v1 }
 0x254   : > { %v1042_v9 = vsel %vm558_vm1, %v899_v5, 0 }
 0x255   : > { %v996_v6 = vsel %vm558_vm1, %v898_v3, 0  ;;  %v870_v12 = vpop.permute.xlu1 %869 }
 0x256   : > { %12746 = vmatpush3.bf16.xpose.msra.mxu1 %v996_v6  ;;  %v867_v8 = vpop.permute.xlu0 %866  ;;  %v895_v14 = vpack.c.bf16 %v870_v12, %v870_v12 }
 0x257   : > { %12757 = vmatprep.subr.bf16.mxu1 %v13603_v1  ;;  %v894_v11 = vpack.c.bf16 %v867_v8, %v867_v8 }
 0x259   : > { %12742 = vmatmul.mubr.msk.bf16.vlgmr.msra.gmra.mrb[12].mxu0 %vm558_vm1, %v893_v7 }
 0x25a   : > { %12752 = vmatpush3.bf16.xpose.msra.mxu0 %v1042_v9  ;;  %12753 = vmatprep.mubr.msk.bf16.mxu0 %vm13604_vm0, %v13603_v1 }
 0x25b   : > { %12763 = vmatprep.subr.bf16.mxu0 %v13603_v1 }
 0x25d   : > { %12748 = vmatmul.mubr.msk.bf16.vlgmr.msra.gmra.mrb[4].mxu1 %vm558_vm1, %v894_v11 }
 0x25e   : > { %12758 = vmatpush3.bf16.msra.mxu1 %v1156_v13  ;;  %12759 = vmatprep.mubr.msk.bf16.mxu1 %vm13604_vm0, %v13603_v1 }
 0x25f   : > { %12769 = vmatprep.subr.bf16.mxu1 %v13603_v1 }
 0x261   : > { %12754 = vmatmul.mubr.msk.bf16.vlgmr.msra.gmra.mrb[16].mxu0 %vm558_vm1, %v895_v14 }
 0x262   : > { %12765 = vmatprep.mubr.msk.bf16.mxu0 %vm13604_vm0, %v13603_v1 }
 0x2b9   : > { %v940_v16 = vpop.f32.mrb[8].mxu0 }
 0x2ba   : > { %v1084_v17 = vmul.f32 0.17677669, %v940_v16  ;;  %v12737_v18 = vpop.f32.mrb[9].mxu0 }
 0x2bb   : > { %v943_v19 = vpop.f32.mrb[10].mxu0 }
 0x2bc   : > { %v12738_v20 = vpop.f32.mrb[11].mxu0  ;;  %v1094_v21 = vadd.f32 %v10635_v15, %v1084_v17 }
 0x2be   : > { %v1099_v22 = vsel %vm1098_vm3, %v1094_v21, -inf }
 0x2bf   : > { %1100 = vmax.xlane.f32.xlu0 %v1099_v22 }
 0x32c   : > { %v986_v23 = vpop.f32.mrb[12].mxu0 }
 0x32d   : > { %v1085_v24 = vmul.f32 0.17677669, %v986_v23  ;;  %v12743_v25 = vpop.f32.mrb[13].mxu0 }
 0x32e   : > { %v989_v26 = vpop.f32.mrb[14].mxu0 }
 0x32f   : > { %v12744_v27 = vpop.f32.mrb[15].mxu0  ;;  %v1095_v28 = vadd.f32 %v10635_v15, %v1085_v24 }
 0x330   : > { %v1032_v30 = vpop.f32.mrb[4].mxu1 }
 0x331   : > { %v1086_v31 = vmul.f32 0.17677669, %v1032_v30  ;;  %v12749_v32 = vpop.f32.mrb[5].mxu1  ;;  %v1102_v33 = vsel %vm1098_vm3, %v1095_v28, -inf }
 0x332   : > { %v1035_v34 = vpop.f32.mrb[6].mxu1  ;;  %1103 = vmax.xlane.f32.xlu1 %v1102_v33  ;;  %v12968_v33 = vld [vmem:[%s17058_s6] sm:$0xff]  }
 0x333   : > { %v12750_v35 = vpop.f32.mrb[7].mxu1  ;;  %v1096_v37 = vadd.f32 %v10635_v15, %v1086_v31  ;;  %v12969_v34 = vld [vmem:[%s17058_s6 + $0x8] sm:$0xff]  }
 0x334   : > { %v1078_v38 = vpop.f32.mrb[16].mxu0  ;;  %v12970_v35 = vld [vmem:[%s17058_s6 + $0x10] sm:$0xff]  }
 0x335   : > { %v1087_v41 = vmul.f32 0.17677669, %v1078_v38  ;;  %v12755_v43 = vpop.f32.mrb[17].mxu0  ;;  %v1105_v44 = vsel %vm1098_vm3, %v1096_v37, -inf }
 0x336   : > { %1106 = vmax.xlane.f32.xlu0 %v1105_v44  ;;  %v1081_v45 = vpop.f32.mrb[18].mxu0  ;;  %v12972_v44 = vld [vmem:[%s17058_s6 + $0x20] sm:$0xff]  }
 0x337   : > { %v12756_v46 = vpop.f32.mrb[19].mxu0  ;;  %v1097_v47 = vadd.f32 %v10635_v15, %v1087_v41 }
 0x338   : > { %v12973_v46 = vld [vmem:[%s17058_s6 + $0x28] sm:$0xff]  }
 0x339   : > { %v1108_v48 = vsel %vm1098_vm3, %v1097_v47, -inf }
 0x33a   : > { %1109 = vmax.xlane.f32.xlu0 %v1108_v48  ;;  %v12975_v48 = vld [vmem:[%s17058_s6 + $0x38] sm:$0xff]  }
 0x343   : > { %883 = vrot.lane.b32.xlu1 %v13888_v4, %s17078_s18 }
 0x34c   : > { %v1101_v49 = vpop.xlane.xlu0 %1100 }
 0x34d   : > { %v1111_v50 = vsub.f32 %v1094_v21, %v1101_v49 }
 0x34f   : > { %v1115_v51 = vmul.f32 1.442695, %v1111_v50 }
 0x351   : > { %13402 = vpow2.f32 %v1115_v51 }
 0x35b   : > { %v13403_v52 = vpop.eup %13402 }
 0x35c   : > { %v1123_v53 = vsel %vm1098_vm3, %v13403_v52, 0.0 }
 0x367   : > { %1124 = vadd.xlane.f32.xlu1 %v1123_v53 }
 0x3bf   : > { %v1104_v54 = vpop.xlane.xlu1 %1103 }
 0x3c0   : > { %v1112_v55 = vsub.f32 %v1095_v28, %v1104_v54 }
 0x3c2   : > { %v1117_v56 = vmul.f32 1.442695, %v1112_v55 }
 0x3c3   : > { %v1107_v57 = vpop.xlane.xlu0 %1106  ;;  %v884_v59 = vpop.permute.xlu1 %883 }
 0x3c4   : > { %13404 = vpow2.f32 %v1117_v56  ;;  %v1113_v60 = vsub.f32 %v1096_v37, %v1107_v57  ;;  %v1148_v61 = vpack.c.bf16 %v884_v59, %v884_v59  ;;  %v12971_v37 = vld [vmem:[%s17058_s6 + $0x18] sm:$0xff]  }
 0x3c6   : > { %v1119_v62 = vmul.f32 1.442695, %v1113_v60  ;;  %v1202_v63 = vsel %vm1154_vm2, %v1148_v61, 0 }
 0x3c7   : > { %12764 = vmatpush3.bf16.msra.mxu0 %v1202_v63  ;;  %v1110_v0 = vpop.xlane.xlu0 %1109 }
 0x3c8   : > { %13406 = vpow2.f32 %v1119_v62  ;;  %v1114_v2 = vsub.f32 %v1097_v47, %v1110_v0  ;;  %12775 = vmatprep.subr.bf16.mxu0 %v13603_v1  ;;  %v12974_v47 = vld [vmem:[%s17058_s6 + $0x30] sm:$0xff]  }
 0x3ca   : > { %v1121_v3 = vmul.f32 1.442695, %v1114_v2 }
 0x3cc   : > { %13408 = vpow2.f32 %v1121_v3 }
 0x3ce   : > { %v13405_v5 = vpop.eup %13404 }
 0x3cf   : > { %v1126_v6 = vsel %vm1098_vm3, %v13405_v5, 0.0 }
 0x3d0   : > { %1127 = vadd.xlane.f32.xlu0 %v1126_v6 }
 0x3d2   : > { %v13407_v7 = vpop.eup %13406 }
 0x3d3   : > { %v1129_v8 = vsel %vm1098_vm3, %v13407_v7, 0.0 }
 0x3d4   : > { %1130 = vadd.xlane.f32.xlu1 %v1129_v8 }
 0x3d6   : > { %v13409_v9 = vpop.eup %13408 }
 0x3d7   : > { %v1132_v10 = vsel %vm1098_vm3, %v13409_v9, 0.0 }
 0x3d8   : > { %1133 = vadd.xlane.f32.xlu0 %v1132_v10 }
 0x3e5   : > { %889 = vrot.lane.b32.xlu1 %v13888_v4, %s17076_s19 }
 0x3ee   : > { %886 = vrot.lane.b32.xlu0 %v13888_v4, %s17074_s20 }
 0x3f4   : > { %v1125_v11 = vpop.xlane.xlu1 %1124 }
 0x3f5   : > { %13410 = vrcp.f32 %v1125_v11 }
 0x3ff   : > { %v13411_v12 = vpop.eup %13410 }
 0x400   : > { %v1136_v13 = vmul.f32 %v13411_v12, %v13403_v52 }
 0x402   : > { %v1143_v14 = vpack.c.bf16 %v1136_v13, %v1136_v13 }
 0x404   : > { %12760 = vmatmul.mubr.msk.bf16.vlgmr.msra.gmra.mrb[8].mxu1 %vm1098_vm3, %v1143_v14  ;;  %v1495_v14 = vld [vmem:[%s17062_s10] sm:$0xff] }
 0x405   : > { %12771 = vmatprep.mubr.msk.bf16.mxu1 %vm13604_vm0, %v13603_v1 }
 0x45d   : > { %v1128_v15 = vpop.xlane.xlu0 %1127 }
 0x45e   : > { %13412 = vrcp.f32 %v1128_v15  ;;  %v1499_v15 = vld [vmem:[%s17062_s10 + $0x60] sm:$0xff] }
 0x461   : > { %v1131_v16 = vpop.xlane.xlu1 %1130 }
 0x462   : > { %13414 = vrcp.f32 %v1131_v16  ;;  %v1496_v16 = vld [vmem:[%s17062_s10 + $0x8] sm:$0xff] }
 0x465   : > { %v1134_v17 = vpop.xlane.xlu0 %1133  ;;  %v890_v18 = vpop.permute.xlu1 %889 }
 0x466   : > { %13416 = vrcp.f32 %v1134_v17  ;;  %v1150_v4 = vpack.c.bf16 %v890_v18, %v890_v18  ;;  %v10651_v17 = vcombine.low %v1495_v14, %v1499_v15  ;;  %v10652_v18 = vcombine.high %v1495_v14, %v1499_v15 }
 0x468   : > { %v13413_v19 = vpop.eup %13412  ;;  %v1294_v27 = vsel %vm1154_vm2, %v1150_v4, 0 }
 0x469   : > { %v1138_v20 = vmul.f32 %v13413_v19, %v13405_v5  ;;  %v887_v21 = vpop.permute.xlu0 %886  ;;  %v1500_v19 = vld [vmem:[%s17062_s10 + $0x68] sm:$0xff] }
 0x46a   : > { %v1149_v22 = vpack.c.bf16 %v887_v21, %v887_v21  ;;  %v10653_v4 = vcombine.low %v1496_v16, %v1500_v19  ;;  %v10654_v21 = vcombine.high %v1496_v16, %v1500_v19  ;;  %v1551_v16 = vld [vmem:[%s17062_s10 + $0x540] sm:$0xff] }
 0x46b   : > { %v1144_v23 = vpack.c.bf16 %v1138_v20, %v1138_v20  ;;  %v1507_v20 = vld [vmem:[%s17062_s10 + $0x120] sm:$0xff] }
 0x46c   : > { %v13415_v24 = vpop.eup %13414  ;;  %v1248_v25 = vsel %vm1154_vm2, %v1149_v22, 0 }
 0x46d   : > { %v1140_v26 = vmul.f32 %v13415_v24, %v13407_v7  ;;  %12766 = vmatmul.mubr.msk.bf16.vlgmr.msra.gmra.mrb[20].mxu0 %vm1098_vm3, %v1144_v23  ;;  %12770 = vmatpush3.bf16.msra.mxu1 %v1248_v25  ;;  %v10640_v7 = vld [vmem:[%s17059_s7] ss:$0 sm:$0xff]  ;;  %v1504_v23 = vld [vmem:[%s17062_s10 + $0xc8] sm:$0xff] }
 0x46e   : > { %12776 = vmatpush3.bf16.msra.mxu0 %v1294_v27  ;;  %12777 = vmatprep.mubr.msk.bf16.mxu0 %vm13604_vm0, %v13603_v1  ;;  %v1508_v24 = vld [vmem:[%s17062_s10 + $0x128] sm:$0xff]  ;;  %v1511_v25 = vld [vmem:[%s17062_s10 + $0x180] sm:$0xff] }
 0x46f   : > { %v1145_v28 = vpack.c.bf16 %v1140_v26, %v1140_v26  ;;  %12781 = vmatprep.subr.bf16.mxu1 %v13603_v1  ;;  %1921 = vmatprep.subr.bf16.mxu0 %v10652_v18  ;;  %v10662_v26 = vcombine.high %v1504_v23, %v1508_v24  ;;  %v1515_v27 = vld [vmem:[%s17062_s10 + $0x1e0] sm:$0xff]  ;;  %v1552_v18 = vld [vmem:[%s17062_s10 + $0x548] sm:$0xff] }
 0x470   : > { %v13417_v30 = vpop.eup %13416 }
 0x471   : > { %v1142_v31 = vmul.f32 %v13417_v30, %v13409_v9  ;;  %12772 = vmatmul.mubr.msk.bf16.vlgmr.msra.gmra.mrb[12].mxu1 %vm1098_vm3, %v1145_v28  ;;  %v1512_v28 = vld [vmem:[%s17062_s10 + $0x188] sm:$0xff] }
 0x472   : > { %12797 = vmatprep.mubr.msk.bf16.mxu1 %vm13604_vm0, %v13603_v1  ;;  %12782 = vmatpush3.bf16.msra.mxu1 %v12968_v33  ;;  %v1516_v30 = vld [vmem:[%s17062_s10 + $0x1e8] sm:$0xff]  ;;  %v10668_v33 = vcombine.high %v1511_v25, %v1515_v27 }
 0x473   : > { %v1146_v32 = vpack.c.bf16 %v1142_v31, %v1142_v31  ;;  %12783 = vmatprep.subr.bf16.mxu1 %v13603_v1 }
 0x475   : > { %12778 = vmatmul.mubr.msk.bf16.vlgmr.msra.gmra.mrb[24].mxu0 %vm1098_vm3, %v1146_v32  ;;  %v10661_v32 = vcombine.low %v1504_v23, %v1508_v24  ;;  %v1501_v23 = vld [vmem:[%s17062_s10 + $0x70] sm:$0xff]  ;;  %v1498_v24 = vld [vmem:[%s17062_s10 + $0x18] sm:$0xff] }
 0x476   : > { %1953 = vmatprep.mubr.bf16.mxu0 %v13605_v29  ;;  %12784 = vmatpush3.bf16.msra.mxu1 %v12969_v34  ;;  %v10670_v34 = vcombine.high %v1512_v28, %v1516_v30 }
 0x477   : > { %12785 = vmatprep.subr.bf16.mxu1 %v13603_v1  ;;  %1922 = vmatpush1.bf16.msra.mxu0 %v10651_v17  ;;  %v1555_v17 = vld [vmem:[%s17062_s10 + $0x5a0] sm:$0xff] }
 0x478   : > { %v10708_v19 = vcombine.high %v1551_v16, %v1555_v17 }
 0x47a   : > { %12786 = vmatpush3.bf16.msra.mxu1 %v12970_v35  ;;  %v10667_v35 = vcombine.low %v1511_v25, %v1515_v27  ;;  %v1502_v27 = vld [vmem:[%s17062_s10 + $0x78] sm:$0xff] }
 0x47b   : > { %12787 = vmatprep.subr.bf16.mxu1 %v13603_v1 }
 0x47e   : > { %12788 = vmatpush3.bf16.msra.mxu1 %v12971_v37  ;;  %v10669_v37 = vcombine.low %v1512_v28, %v1516_v30  ;;  %v10657_v28 = vcombine.low %v1498_v24, %v1502_v27  ;;  %v10658_v30 = vcombine.high %v1498_v24, %v1502_v27 }
 0x47f   : > { %12789 = vmatprep.subr.bf16.mxu1 %v13603_v1 }
 0x482   : > { %12790 = vmatpush3.bf16.msra.mxu1 %v12972_v44 }
 0x483   : > { %12791 = vmatprep.subr.bf16.mxu1 %v13603_v1 }
 0x486   : > { %12792 = vmatpush3.bf16.msra.mxu1 %v12973_v46  ;;  %v1523_v46 = vld [vmem:[%s17062_s10 + $0x2a0] sm:$0xff] }
 0x487   : > { %12793 = vmatprep.subr.bf16.mxu1 %v13603_v1 }
 0x48a   : > { %12794 = vmatpush3.bf16.msra.mxu1 %v12974_v47  ;;  %v1520_v47 = vld [vmem:[%s17062_s10 + $0x248] sm:$0xff] }
 0x48b   : > { %12795 = vmatprep.subr.bf16.mxu1 %v13603_v1 }
 0x48e   : > { %12796 = vmatpush3.bf16.msra.mxu1 %v12975_v48 }
 0x48f   : > { %1962 = vmatprep.subr.bf16.mxu1 %v10654_v21 }
 0x4d7   : > { %v1192_v38 = vpop.f32.mrb[8].mxu1 }
 0x4d8   : > { %v12761_v41 = vpop.f32.mrb[9].mxu1 }
 0x4d9   : > { %v1195_v43 = vpop.f32.mrb[10].mxu1 }
 0x4da   : > { %v12762_v45 = vpop.f32.mrb[11].mxu1 }
 0x4db   : > { %v1519_v45 = vld [vmem:[%s17062_s10 + $0x240] sm:$0xff] }
 0x4dc   : > { %v10676_v48 = vcombine.high %v1519_v45, %v1523_v46 }
 0x540   : > { %v1238_v49 = vpop.f32.mrb[20].mxu0 }
 0x541   : > { %1337 = vrot.lane.b32.xlu1 %v1238_v49, %s17076_s19  ;;  %v12767_v50 = vpop.f32.mrb[21].mxu0  ;;  %v1524_v49 = vld [vmem:[%s17062_s10 + $0x2a8] sm:$0xff] }
 0x542   : > { %v1241_v51 = vpop.f32.mrb[22].mxu0  ;;  %v10675_v50 = vcombine.low %v1519_v45, %v1523_v46  ;;  %v1509_v45 = vld [vmem:[%s17062_s10 + $0x130] sm:$0xff]  ;;  %v1506_v46 = vld [vmem:[%s17062_s10 + $0xd8] sm:$0xff] }
 0x543   : > { %v12768_v52 = vpop.f32.mrb[23].mxu0  ;;  %v10677_v51 = vcombine.low %v1520_v47, %v1524_v49 }
 0x544   : > { %v1284_v53 = vpop.f32.mrb[12].mxu1  ;;  %v10678_v52 = vcombine.high %v1520_v47, %v1524_v49 }
 0x545   : > { %1341 = vrot.lane.b32.xlu0 %v1284_v53, %s17074_s20  ;;  %v12773_v54 = vpop.f32.mrb[13].mxu1  ;;  %v1527_v53 = vld [vmem:[%s17062_s10 + $0x300] sm:$0xff] }
 0x546   : > { %v1287_v55 = vpop.f32.mrb[14].mxu1  ;;  %v1531_v54 = vld [vmem:[%s17062_s10 + $0x360] sm:$0xff] }
 0x547   : > { %v12774_v56 = vpop.f32.mrb[15].mxu1  ;;  %v1528_v55 = vld [vmem:[%s17062_s10 + $0x308] sm:$0xff] }
 0x548   : > { %v1330_v57 = vpop.f32.mrb[24].mxu0  ;;  %v10684_v56 = vcombine.high %v1527_v53, %v1531_v54 }
 0x549   : > { %1345 = vrot.lane.b32.xlu1 %v1330_v57, %s17078_s18  ;;  %v12779_v59 = vpop.f32.mrb[25].mxu0  ;;  %v1532_v57 = vld [vmem:[%s17062_s10 + $0x368] sm:$0xff] }
 0x54a   : > { %v1333_v60 = vpop.f32.mrb[26].mxu0  ;;  %v10683_v59 = vcombine.low %v1527_v53, %v1531_v54  ;;  %v1514_v53 = vld [vmem:[%s17062_s10 + $0x198] sm:$0xff] }
 0x54b   : > { %v12780_v61 = vpop.f32.mrb[27].mxu0  ;;  %v10685_v60 = vcombine.low %v1528_v55, %v1532_v57  ;;  %v1518_v54 = vld [vmem:[%s17062_s10 + $0x1f8] sm:$0xff] }
 0x54c   : > { %v10686_v61 = vcombine.high %v1528_v55, %v1532_v57 }
 0x5b3   : > { %v1338_v62 = vpop.permute.xlu1 %1337 }
 0x5b4   : > { %v1348_v0 = vsel %vm558_vm1, %v1192_v38, %v1338_v62  ;;  %v1535_v62 = vld [vmem:[%s17062_s10 + $0x3c0] sm:$0xff] }
 0x5b7   : > { %v1342_v63 = vpop.permute.xlu0 %1341 }
 0x5b8   : > { %v1350_v2 = vsel %vm1349_vm4, %v1348_v0, %v1342_v63  ;;  %v1539_v63 = vld [vmem:[%s17062_s10 + $0x420] sm:$0xff]  ;;  %v1536_v0 = vld [vmem:[%s17062_s10 + $0x3c8] sm:$0xff] }
 0x5bb   : > { %v1346_v3 = vpop.permute.xlu1 %1345 }
 0x5bc   : > { %v1352_v5 = vsel %vm1351_vm5, %v1350_v2, %v1346_v3  ;;  %v10692_v2 = vcombine.high %v1535_v62, %v1539_v63  ;;  %v1540_v3 = vld [vmem:[%s17062_s10 + $0x428] sm:$0xff] }
 0x5bd   : > { %v1353_v6 = vpack.c.bf16 %v1352_v5, %v1352_v5  ;;  %v10691_v5 = vcombine.low %v1535_v62, %v1539_v63  ;;  %v1522_v62 = vld [vmem:[%s17062_s10 + $0x258] sm:$0xff] }
 0x5be   : > { %v1526_v63 = vld [vmem:[%s17062_s10 + $0x2b8] sm:$0xff] }
 0x5bf   : > { %12798 = vmatmul.mubr.bf16.vlgmr.msra.gmra.mrb[16].mxu1 %v1353_v6  ;;  %v10693_v6 = vcombine.low %v1536_v0, %v1540_v3 }
 0x5c0   : > { %1994 = vmatprep.mubr.bf16.mxu1 %v13605_v29  ;;  %1963 = vmatpush1.bf16.msra.mxu1 %v10653_v4 }
 0x5c1   : > { %1964 = vmatprep.subr.bf16.mxu1 %v10662_v26 }
 0x5c4   : > { %1965 = vmatpush1.bf16.msra.mxu1 %v10661_v32 }
 0x5c5   : > { %1966 = vmatprep.subr.bf16.mxu1 %v10670_v34 }
 0x5c8   : > { %1967 = vmatpush1.bf16.msra.mxu1 %v10669_v37 }
 0x5c9   : > { %1968 = vmatprep.subr.bf16.mxu1 %v10678_v52  ;;  %v1517_v52 = vld [vmem:[%s17062_s10 + $0x1f0] sm:$0xff] }
 0x5cc   : > { %1969 = vmatpush1.bf16.msra.mxu1 %v10677_v51  ;;  %v1513_v51 = vld [vmem:[%s17062_s10 + $0x190] sm:$0xff] }
 0x5cd   : > { %1970 = vmatprep.subr.bf16.mxu1 %v10686_v61  ;;  %v10672_v57 = vcombine.high %v1513_v51, %v1517_v52  ;;  %v1525_v61 = vld [vmem:[%s17062_s10 + $0x2b0] sm:$0xff] }
 0x5d0   : > { %1971 = vmatpush1.bf16.msra.mxu1 %v10685_v60  ;;  %v1521_v60 = vld [vmem:[%s17062_s10 + $0x250] sm:$0xff] }
 0x692   : > { %v1459_v8 = vpop.f32.mrb[16].mxu1 }
 0x693   : > { %v1460_v9 = vadd.f32 %v10640_v7, %v1459_v8  ;;  %v12799_v10 = vpop.f32.mrb[17].mxu1  ;;  %v10694_v7 = vcombine.high %v1536_v0, %v1540_v3  ;;  %v1543_v8 = vld [vmem:[%s17062_s10 + $0x480] sm:$0xff]  ;;  %v10671_v0 = vcombine.low %v1513_v51, %v1517_v52  ;;  %v10680_v3 = vcombine.high %v1521_v60, %v1525_v61 }
 0x694   : > { %v1462_v11 = vpop.f32.mrb[18].mxu1  ;;  %v1544_v10 = vld [vmem:[%s17062_s10 + $0x488] sm:$0xff]  ;;  %v2301_v51 = vld [vmem:[%s17062_s10 + $0xe0] sm:$0xff] }
 0x695   : > { %v12800_v12 = vpop.f32.mrb[19].mxu1  ;;  %v1465_v13 = vadd.f32 %v13850_v36, %v1460_v9  ;;  %v1503_v36 = vld [vmem:[%s17062_s10 + $0xc0] sm:$0xff]  ;;  %1972 = vmatprep.subr.bf16.mxu1 %v10694_v7  ;;  %v1533_v7 = vld [vmem:[%s17062_s10 + $0x370] sm:$0xff] }
 0x696   : > { %v10660_v22 = vcombine.high %v1503_v36, %v1507_v20  ;;  %v10659_v31 = vcombine.low %v1503_v36, %v1507_v20  ;;  %v1547_v9 = vld [vmem:[%s17062_s10 + $0x4e0] sm:$0xff]  ;;  %1973 = vmatpush1.bf16.msra.mxu1 %v10693_v6  ;;  %v1548_v12 = vld [vmem:[%s17062_s10 + $0x4e8] sm:$0xff]  ;;  %v10707_v20 = vcombine.low %v1551_v16, %v1555_v17  ;;  %v1529_v6 = vld [vmem:[%s17062_s10 + $0x310] sm:$0xff] }
 0x697   : > { %1468 = vadd.xlane.f32.xlu0 %v1465_v13  ;;  %v10700_v11 = vcombine.high %v1543_v8, %v1547_v9  ;;  %v10701_v14 = vcombine.low %v1544_v10, %v1548_v12  ;;  %v10702_v15 = vcombine.high %v1544_v10, %v1548_v12  ;;  %v1556_v36 = vld [vmem:[%s17062_s10 + $0x5a8] sm:$0xff]  ;;  %v10679_v10 = vcombine.low %v1521_v60, %v1525_v61  ;;  %v1538_v16 = vld [vmem:[%s17062_s10 + $0x3d8] sm:$0xff]  ;;  %v2305_v52 = vld [vmem:[%s17062_s10 + $0x140] sm:$0xff] }
 0x698   : > { %1923 = vmatprep.subr.bf16.mxu0 %v10660_v22  ;;  %v10709_v4 = vcombine.low %v1552_v18, %v1556_v36  ;;  %v10710_v21 = vcombine.high %v1552_v18, %v1556_v36  ;;  %v1497_v22 = vld [vmem:[%s17062_s10 + $0x10] sm:$0xff]  ;;  %v10688_v12 = vcombine.high %v1529_v6, %v1533_v7  ;;  %v1542_v17 = vld [vmem:[%s17062_s10 + $0x438] sm:$0xff]  ;;  %v10687_v18 = vcombine.low %v1529_v6, %v1533_v7  ;;  %v2309_v60 = vld [vmem:[%s17062_s10 + $0x1a0] sm:$0xff] }
 0x699   : > { %1924 = vmatpush1.bf16.msra.mxu0 %v10659_v31  ;;  %1974 = vmatprep.subr.bf16.mxu1 %v10702_v15  ;;  %v10655_v25 = vcombine.low %v1497_v22, %v1501_v23  ;;  %v10656_v26 = vcombine.high %v1497_v22, %v1501_v23  ;;  %v1541_v15 = vld [vmem:[%s17062_s10 + $0x430] sm:$0xff]  ;;  %v1546_v22 = vld [vmem:[%s17062_s10 + $0x498] sm:$0xff]  ;;  %v2313_v61 = vld [vmem:[%s17062_s10 + $0x200] sm:$0xff] }
 0x69a   : > { %1925 = vmatprep.subr.bf16.mxu0 %v10668_v33  ;;  %1975 = vmatpush1.bf16.msra.mxu1 %v10701_v14  ;;  %v1537_v14 = vld [vmem:[%s17062_s10 + $0x3d0] sm:$0xff]  ;;  %v1550_v23 = vld [vmem:[%s17062_s10 + $0x4f8] sm:$0xff]  ;;  %v2317_v6 = vld [vmem:[%s17062_s10 + $0x260] sm:$0xff] }
 0x69b   : > { %1976 = vmatprep.subr.bf16.mxu1 %v10710_v21  ;;  %v10696_v36 = vcombine.high %v1537_v14, %v1541_v15  ;;  %v1549_v21 = vld [vmem:[%s17062_s10 + $0x4f0] sm:$0xff]  ;;  %v10695_v24 = vcombine.low %v1537_v14, %v1541_v15  ;;  %v10706_v27 = vcombine.high %v1546_v22, %v1550_v23  ;;  %v2321_v7 = vld [vmem:[%s17062_s10 + $0x2c0] sm:$0xff] }
 0x69c   : > { %v2325_v14 = vld [vmem:[%s17062_s10 + $0x320] sm:$0xff] }
 0x69d   : > { %1926 = vmatpush1.bf16.msra.mxu0 %v10667_v35  ;;  %v10649_v35 = vld [vmem:[%s17060_s8] ss:$0 sm:$0xff] }
 0x69e   : > { %1927 = vmatprep.subr.bf16.mxu0 %v10676_v48  ;;  %1977 = vmatpush1.bf16.msra.mxu1 %v10709_v4  ;;  %v1545_v4 = vld [vmem:[%s17062_s10 + $0x490] sm:$0xff]  ;;  %v2329_v15 = vld [vmem:[%s17062_s10 + $0x380] sm:$0xff] }
 0x69f   : > { %2044 = vmatprep.subr.bf16.mxu1 %v10658_v30  ;;  %v1557_v30 = vld [vmem:[%s17062_s10 + $0x5b0] sm:$0xff] }
 0x6a1   : > { %1928 = vmatpush1.bf16.msra.mxu0 %v10675_v50 }
 0x6a2   : > { %1929 = vmatprep.subr.bf16.mxu0 %v10684_v56 }
 0x6a5   : > { %1930 = vmatpush1.bf16.msra.mxu0 %v10683_v59  ;;  %v10674_v59 = vcombine.high %v1514_v53, %v1518_v54 }
 0x6a6   : > { %1931 = vmatprep.subr.bf16.mxu0 %v10692_v2  ;;  %v10673_v2 = vcombine.low %v1514_v53, %v1518_v54  ;;  %v2302_v53 = vld [vmem:[%s17062_s10 + $0xe8] sm:$0xff] }
 0x6a7   : > { %v2306_v54 = vld [vmem:[%s17062_s10 + $0x148] sm:$0xff] }
 0x6a9   : > { %1932 = vmatpush1.bf16.msra.mxu0 %v10691_v5  ;;  %v10682_v5 = vcombine.high %v1522_v62, %v1526_v63 }
 0x6aa   : > { %1933 = vmatprep.subr.bf16.mxu0 %v10700_v11  ;;  %v10681_v11 = vcombine.low %v1522_v62, %v1526_v63  ;;  %v2310_v62 = vld [vmem:[%s17062_s10 + $0x1a8] sm:$0xff] }
 0x6ab   : > { %v2314_v63 = vld [vmem:[%s17062_s10 + $0x208] sm:$0xff] }
 0x724   : > { %v1469_v38 = vpop.xlane.xlu0 %1468 }
 0x725   : > { %v1471_v41 = vmul.f32 0.0078125, %v1469_v38  ;;  %v10650_v38 = vld [vmem:[%s17061_s9] ss:$0 sm:$0xff] }
 0x727   : > { %v14022_v43 = vsub.f32 %v1465_v13, %v1471_v41  ;;  %v10699_v13 = vcombine.low %v1543_v8, %v1547_v9  ;;  %v1530_v8 = vld [vmem:[%s17062_s10 + $0x318] sm:$0xff] }
 0x728   : > { %v1534_v9 = vld [vmem:[%s17062_s10 + $0x378] sm:$0xff] }
 0x729   : > { %v1473_v44 = vmul.f32 %v14022_v43, %v14022_v43  ;;  %1934 = vmatpush1.bf16.msra.mxu0 %v10699_v13  ;;  %v10690_v13 = vcombine.high %v1530_v8, %v1534_v9 }
 0x72a   : > { %1935 = vmatprep.subr.bf16.mxu0 %v10708_v19  ;;  %v10689_v19 = vcombine.low %v1530_v8, %v1534_v9  ;;  %v2318_v8 = vld [vmem:[%s17062_s10 + $0x268] sm:$0xff] }
 0x72b   : > { %1474 = vadd.xlane.f32.xlu1 %v1473_v44  ;;  %v1505_v44 = vld [vmem:[%s17062_s10 + $0xd0] sm:$0xff]  ;;  %v2322_v9 = vld [vmem:[%s17062_s10 + $0x2c8] sm:$0xff] }
 0x72c   : > { %v10664_v49 = vcombine.high %v1505_v44, %v1509_v45  ;;  %v10663_v55 = vcombine.low %v1505_v44, %v1509_v45  ;;  %v2294_v44 = vld [vmem:[%s17062_s10 + $0x28] sm:$0xff] }
 0x72d   : > { %1936 = vmatpush1.bf16.msra.mxu0 %v10707_v20  ;;  %v10698_v20 = vcombine.high %v1538_v16, %v1542_v17  ;;  %v2298_v45 = vld [vmem:[%s17062_s10 + $0x88] sm:$0xff] }
 0x72e   : > { %2003 = vmatprep.subr.bf16.mxu0 %v10656_v26  ;;  %v10704_v26 = vcombine.high %v1545_v4, %v1549_v21 }
 0x7b8   : > { %v1475_v31 = vpop.xlane.xlu1 %1474 }
 0x7b9   : > { %v1476_v32 = vmul.f32 0.0078125, %v1475_v31  ;;  %v1554_v31 = vld [vmem:[%s17062_s10 + $0x558] sm:$0xff] }
 0x7bb   : > { %v1477_v33 = vadd.f32 1e-12, %v1476_v32  ;;  %v1558_v32 = vld [vmem:[%s17062_s10 + $0x5b8] sm:$0xff] }
 0x7bd   : > { %13418 = vrsqrt.f32 %v1477_v33  ;;  %v10703_v33 = vcombine.low %v1545_v4, %v1549_v21  ;;  %v2333_v4 = vld [vmem:[%s17062_s10 + $0x3e0] sm:$0xff] }
 0x7be   : > { %v2337_v21 = vld [vmem:[%s17062_s10 + $0x440] sm:$0xff] }
 0x7c7   : > { %v13419_v34 = vpop.eup %13418 }
 0x7c8   : > { %v1479_v37 = vmul.f32 %v13419_v34, %v14022_v43  ;;  %v1510_v43 = vld [vmem:[%s17062_s10 + $0x138] sm:$0xff]  ;;  %v10705_v34 = vcombine.low %v1546_v22, %v1550_v23  ;;  %v2334_v22 = vld [vmem:[%s17062_s10 + $0x3e8] sm:$0xff] }
 0x7c9   : > { %v10666_v50 = vcombine.high %v1506_v46, %v1510_v43  ;;  %v10665_v56 = vcombine.low %v1506_v46, %v1510_v43  ;;  %v10713_v43 = vcombine.low %v1554_v31, %v1558_v32  ;;  %v2338_v23 = vld [vmem:[%s17062_s10 + $0x448] sm:$0xff] }
 0x7ca   : > { %v1486_v41 = vmul.f32 %v10649_v35, %v1479_v37  ;;  %v10714_v37 = vcombine.high %v1554_v31, %v1558_v32  ;;  %v2342_v31 = vld [vmem:[%s17062_s10 + $0x4a8] sm:$0xff] }
 0x7cb   : > { %v2346_v32 = vld [vmem:[%s17062_s10 + $0x508] sm:$0xff] }
 0x7cc   : > { %v14117_v47 = vadd.f32 %v10650_v38, %v1486_v41  ;;  %v2293_v38 = vld [vmem:[%s17062_s10 + $0x20] sm:$0xff] }
 0x7cd   : > { %v2297_v41 = vld [vmem:[%s17062_s10 + $0x80] sm:$0xff] }
 0x7ce   : > { %v14121_v48 = vpack.c.bf16 %v14117_v47, %v14117_v47 }
 0x7d0   : > { %1954 = vmatmul.mubr.bf16.vlgmr.msra.gmra.mrb[28].mxu0 %v14121_v48  ;;  %1995 = vmatmul.mubr.bf16.vlgmr.msra.gmra.mrb[20].mxu1 %v14121_v48 }
 0x7d1   : > { %2004 = vmatpush1.bf16.msra.mxu0 %v10655_v25  ;;  %2045 = vmatpush1.bf16.msra.mxu1 %v10657_v28  ;;  %v10697_v25 = vcombine.low %v1538_v16, %v1542_v17  ;;  %v1553_v28 = vld [vmem:[%s17062_s10 + $0x550] sm:$0xff]  ;;  %v2326_v16 = vld [vmem:[%s17062_s10 + $0x328] sm:$0xff] }
 0x7d2   : > { %2005 = vmatprep.subr.bf16.mxu0 %v10664_v49  ;;  %2046 = vmatprep.subr.bf16.mxu1 %v10666_v50  ;;  %v10712_v35 = vcombine.high %v1553_v28, %v1557_v30  ;;  %v10711_v46 = vcombine.low %v1553_v28, %v1557_v30  ;;  %v10716_v49 = vcombine.high %v2293_v38, %v2297_v41  ;;  %v2330_v17 = vld [vmem:[%s17062_s10 + $0x388] sm:$0xff]  ;;  %v2341_v28 = vld [vmem:[%s17062_s10 + $0x4a0] sm:$0xff] }
 0x7d3   : > { %2035 = vmatprep.mubr.bf16.mxu0 %v13605_v29  ;;  %2076 = vmatprep.mubr.bf16.mxu1 %v13605_v29  ;;  %v10718_v50 = vcombine.high %v2294_v44, %v2298_v45  ;;  %v2345_v30 = vld [vmem:[%s17062_s10 + $0x500] sm:$0xff] }
 0x7d5   : > { %2006 = vmatpush1.bf16.msra.mxu0 %v10663_v55  ;;  %2047 = vmatpush1.bf16.msra.mxu1 %v10665_v56  ;;  %v10715_v55 = vcombine.low %v2293_v38, %v2297_v41  ;;  %v10717_v56 = vcombine.low %v2294_v44, %v2298_v45  ;;  %v2349_v38 = vld [vmem:[%s17062_s10 + $0x560] sm:$0xff]  ;;  %v2350_v44 = vld [vmem:[%s17062_s10 + $0x568] sm:$0xff] }
 0x7d6   : > { %2007 = vmatprep.subr.bf16.mxu0 %v10672_v57  ;;  %2048 = vmatprep.subr.bf16.mxu1 %v10674_v59  ;;  %v10724_v57 = vcombine.high %v2301_v51, %v2305_v52  ;;  %v10726_v59 = vcombine.high %v2302_v53, %v2306_v54  ;;  %v2353_v41 = vld [vmem:[%s17062_s10 + $0x5c0] sm:$0xff]  ;;  %v2354_v45 = vld [vmem:[%s17062_s10 + $0x5c8] sm:$0xff] }
 0x7d9   : > { %2008 = vmatpush1.bf16.msra.mxu0 %v10671_v0  ;;  %2049 = vmatpush1.bf16.msra.mxu1 %v10673_v2  ;;  %v10723_v0 = vcombine.low %v2301_v51, %v2305_v52  ;;  %v10725_v2 = vcombine.low %v2302_v53, %v2306_v54  ;;  %v2295_v51 = vld [vmem:[%s17062_s10 + $0x30] sm:$0xff]  ;;  %v2296_v53 = vld [vmem:[%s17062_s10 + $0x38] sm:$0xff] }
 0x7da   : > { %2009 = vmatprep.subr.bf16.mxu0 %v10680_v3  ;;  %2050 = vmatprep.subr.bf16.mxu1 %v10682_v5  ;;  %v10732_v3 = vcombine.high %v2309_v60, %v2313_v61  ;;  %v10734_v5 = vcombine.high %v2310_v62, %v2314_v63  ;;  %v2299_v52 = vld [vmem:[%s17062_s10 + $0x90] sm:$0xff]  ;;  %v2300_v54 = vld [vmem:[%s17062_s10 + $0x98] sm:$0xff] }
 0x7dd   : > { %2010 = vmatpush1.bf16.msra.mxu0 %v10679_v10  ;;  %2051 = vmatpush1.bf16.msra.mxu1 %v10681_v11  ;;  %v10731_v10 = vcombine.low %v2309_v60, %v2313_v61  ;;  %v10733_v11 = vcombine.low %v2310_v62, %v2314_v63  ;;  %v2303_v60 = vld [vmem:[%s17062_s10 + $0xf0] sm:$0xff]  ;;  %v2304_v62 = vld [vmem:[%s17062_s10 + $0xf8] sm:$0xff] }
 0x7de   : > { %2011 = vmatprep.subr.bf16.mxu0 %v10688_v12  ;;  %2052 = vmatprep.subr.bf16.mxu1 %v10690_v13  ;;  %v10740_v12 = vcombine.high %v2317_v6, %v2321_v7  ;;  %v10742_v13 = vcombine.high %v2318_v8, %v2322_v9  ;;  %v2307_v61 = vld [vmem:[%s17062_s10 + $0x150] sm:$0xff]  ;;  %v2308_v63 = vld [vmem:[%s17062_s10 + $0x158] sm:$0xff] }
 0x7e1   : > { %2012 = vmatpush1.bf16.msra.mxu0 %v10687_v18  ;;  %2053 = vmatpush1.bf16.msra.mxu1 %v10689_v19  ;;  %v10739_v18 = vcombine.low %v2317_v6, %v2321_v7  ;;  %v10741_v19 = vcombine.low %v2318_v8, %v2322_v9  ;;  %v2311_v6 = vld [vmem:[%s17062_s10 + $0x1b0] sm:$0xff]  ;;  %v2312_v8 = vld [vmem:[%s17062_s10 + $0x1b8] sm:$0xff] }
 0x7e2   : > { %2013 = vmatprep.subr.bf16.mxu0 %v10696_v36  ;;  %2054 = vmatprep.subr.bf16.mxu1 %v10698_v20  ;;  %v10748_v36 = vcombine.high %v2325_v14, %v2329_v15  ;;  %v10750_v20 = vcombine.high %v2326_v16, %v2330_v17  ;;  %v2315_v7 = vld [vmem:[%s17062_s10 + $0x210] sm:$0xff]  ;;  %v2316_v9 = vld [vmem:[%s17062_s10 + $0x218] sm:$0xff] }
 0x7e5   : > { %2014 = vmatpush1.bf16.msra.mxu0 %v10695_v24  ;;  %2055 = vmatpush1.bf16.msra.mxu1 %v10697_v25  ;;  %v10747_v24 = vcombine.low %v2325_v14, %v2329_v15  ;;  %v10749_v25 = vcombine.low %v2326_v16, %v2330_v17  ;;  %v2319_v14 = vld [vmem:[%s17062_s10 + $0x270] sm:$0xff]  ;;  %v2320_v16 = vld [vmem:[%s17062_s10 + $0x278] sm:$0xff] }
 0x7e6   : > { %2015 = vmatprep.subr.bf16.mxu0 %v10704_v26  ;;  %2056 = vmatprep.subr.bf16.mxu1 %v10706_v27  ;;  %v10756_v26 = vcombine.high %v2333_v4, %v2337_v21  ;;  %v10758_v27 = vcombine.high %v2334_v22, %v2338_v23  ;;  %v2323_v15 = vld [vmem:[%s17062_s10 + $0x2d0] sm:$0xff]  ;;  %v2324_v17 = vld [vmem:[%s17062_s10 + $0x2d8] sm:$0xff] }
 0x7e9   : > { %2016 = vmatpush1.bf16.msra.mxu0 %v10703_v33  ;;  %2057 = vmatpush1.bf16.msra.mxu1 %v10705_v34  ;;  %v10755_v33 = vcombine.low %v2333_v4, %v2337_v21  ;;  %v10757_v34 = vcombine.low %v2334_v22, %v2338_v23  ;;  %v2327_v4 = vld [vmem:[%s17062_s10 + $0x330] sm:$0xff]  ;;  %v2328_v22 = vld [vmem:[%s17062_s10 + $0x338] sm:$0xff] }
 0x7ea   : > { %2017 = vmatprep.subr.bf16.mxu0 %v10712_v35  ;;  %2058 = vmatprep.subr.bf16.mxu1 %v10714_v37  ;;  %v10764_v35 = vcombine.high %v2341_v28, %v2345_v30  ;;  %v10766_v37 = vcombine.high %v2342_v31, %v2346_v32  ;;  %v2331_v21 = vld [vmem:[%s17062_s10 + $0x390] sm:$0xff]  ;;  %v2332_v23 = vld [vmem:[%s17062_s10 + $0x398] sm:$0xff] }
 0x7ed   : > { %2018 = vmatpush1.bf16.msra.mxu0 %v10711_v46  ;;  %2059 = vmatpush1.bf16.msra.mxu1 %v10713_v43  ;;  %v10763_v46 = vcombine.low %v2341_v28, %v2345_v30  ;;  %v10765_v43 = vcombine.low %v2342_v31, %v2346_v32  ;;  %v2335_v28 = vld [vmem:[%s17062_s10 + $0x3f0] sm:$0xff]  ;;  %v2336_v31 = vld [vmem:[%s17062_s10 + $0x3f8] sm:$0xff] }
 0x7ee   : > { %2719 = vmatprep.subr.bf16.mxu0 %v10716_v49  ;;  %2760 = vmatprep.subr.bf16.mxu1 %v10718_v50  ;;  %v10772_v49 = vcombine.high %v2349_v38, %v2353_v41  ;;  %v10774_v50 = vcombine.high %v2350_v44, %v2354_v45  ;;  %v2339_v30 = vld [vmem:[%s17062_s10 + $0x450] sm:$0xff]  ;;  %v2340_v32 = vld [vmem:[%s17062_s10 + $0x458] sm:$0xff] }
 0x7f0   : > { %2036 = vmatmul.mubr.bf16.vlgmr.msra.gmra.mrb[32].mxu0 %v14121_v48  ;;  %2077 = vmatmul.mubr.bf16.vlgmr.msra.gmra.mrb[24].mxu1 %v14121_v48 }
 0x7f1   : > { %2720 = vmatpush1.bf16.msra.mxu0 %v10715_v55  ;;  %2761 = vmatpush1.bf16.msra.mxu1 %v10717_v56  ;;  %v10771_v55 = vcombine.low %v2349_v38, %v2353_v41  ;;  %v10773_v56 = vcombine.low %v2350_v44, %v2354_v45  ;;  %v2343_v38 = vld [vmem:[%s17062_s10 + $0x4b0] sm:$0xff]  ;;  %v2344_v44 = vld [vmem:[%s17062_s10 + $0x4b8] sm:$0xff] }
 0x7f2   : > { %2721 = vmatprep.subr.bf16.mxu0 %v10724_v57  ;;  %2762 = vmatprep.subr.bf16.mxu1 %v10726_v59  ;;  %v10720_v57 = vcombine.high %v2295_v51, %v2299_v52  ;;  %v10722_v59 = vcombine.high %v2296_v53, %v2300_v54  ;;  %v2347_v41 = vld [vmem:[%s17062_s10 + $0x510] sm:$0xff]  ;;  %v2348_v45 = vld [vmem:[%s17062_s10 + $0x518] sm:$0xff] }
 0x7f3   : > { %2751 = vmatprep.mubr.bf16.mxu0 %v13605_v29  ;;  %2792 = vmatprep.mubr.bf16.mxu1 %v13605_v29 }
 0x7f5   : > { %2722 = vmatpush1.bf16.msra.mxu0 %v10723_v0  ;;  %2763 = vmatpush1.bf16.msra.mxu1 %v10725_v2  ;;  %v10719_v0 = vcombine.low %v2295_v51, %v2299_v52  ;;  %v10721_v2 = vcombine.low %v2296_v53, %v2300_v54  ;;  %v2351_v51 = vld [vmem:[%s17062_s10 + $0x570] sm:$0xff]  ;;  %v2352_v53 = vld [vmem:[%s17062_s10 + $0x578] sm:$0xff] }
 0x7f6   : > { %2723 = vmatprep.subr.bf16.mxu0 %v10732_v3  ;;  %2764 = vmatprep.subr.bf16.mxu1 %v10734_v5  ;;  %v10728_v3 = vcombine.high %v2303_v60, %v2307_v61  ;;  %v10730_v5 = vcombine.high %v2304_v62, %v2308_v63  ;;  %v2355_v52 = vld [vmem:[%s17062_s10 + $0x5d0] sm:$0xff]  ;;  %v2356_v54 = vld [vmem:[%s17062_s10 + $0x5d8] sm:$0xff] }
 0x7f9   : > { %2724 = vmatpush1.bf16.msra.mxu0 %v10731_v10  ;;  %2765 = vmatpush1.bf16.msra.mxu1 %v10733_v11  ;;  %v10727_v10 = vcombine.low %v2303_v60, %v2307_v61  ;;  %v10729_v11 = vcombine.low %v2304_v62, %v2308_v63  ;;  %v10775_v60 = vcombine.low %v2351_v51, %v2355_v52  ;;  %v12976_v62 = vld [vmem:[%s17064_s12 + $0x240] sm:$0xff]  }
 0x7fa   : > { %2725 = vmatprep.subr.bf16.mxu0 %v10740_v12  ;;  %2766 = vmatprep.subr.bf16.mxu1 %v10742_v13  ;;  %v10736_v12 = vcombine.high %v2311_v6, %v2315_v7  ;;  %v10738_v13 = vcombine.high %v2312_v8, %v2316_v9  ;;  %v10777_v61 = vcombine.low %v2352_v53, %v2356_v54  ;;  %v12977_v63 = vld [vmem:[%s17064_s12 + $0x2c0] sm:$0xff]  }
 0x7fd   : > { %2726 = vmatpush1.bf16.msra.mxu0 %v10739_v18  ;;  %2767 = vmatpush1.bf16.msra.mxu1 %v10741_v19  ;;  %v10735_v18 = vcombine.low %v2311_v6, %v2315_v7  ;;  %v10737_v19 = vcombine.low %v2312_v8, %v2316_v9  ;;  %v12982_v6 = vld [vmem:[%s17064_s12 + $0x208] sm:$0xff]   ;;  %v12984_v8 = vld [vmem:[%s17064_s12 + $0x250] sm:$0xff]  }
 0x7fe   : > { %2727 = vmatprep.subr.bf16.mxu0 %v10748_v36  ;;  %2768 = vmatprep.subr.bf16.mxu1 %v10750_v20  ;;  %v10744_v36 = vcombine.high %v2319_v14, %v2323_v15  ;;  %v10746_v20 = vcombine.high %v2320_v16, %v2324_v17  ;;  %v12983_v7 = vld [vmem:[%s17064_s12 + $0x288] sm:$0xff]   ;;  %v12985_v9 = vld [vmem:[%s17064_s12 + $0x2d0] sm:$0xff]  }
 0x801   : > { %2728 = vmatpush1.bf16.msra.mxu0 %v10747_v24  ;;  %2769 = vmatpush1.bf16.msra.mxu1 %v10749_v25  ;;  %v10743_v24 = vcombine.low %v2319_v14, %v2323_v15  ;;  %v10745_v25 = vcombine.low %v2320_v16, %v2324_v17  ;;  %v12990_v14 = vld [vmem:[%s17064_s12 + $0x218] sm:$0xff]   ;;  %v12992_v16 = vld [vmem:[%s17064_s12 + $0x260] sm:$0xff]  }
 0x802   : > { %2729 = vmatprep.subr.bf16.mxu0 %v10756_v26  ;;  %2770 = vmatprep.subr.bf16.mxu1 %v10758_v27  ;;  %v10752_v26 = vcombine.high %v2327_v4, %v2331_v21  ;;  %v10754_v27 = vcombine.high %v2328_v22, %v2332_v23  ;;  %v12991_v15 = vld [vmem:[%s17064_s12 + $0x298] sm:$0xff]   ;;  %v12993_v17 = vld [vmem:[%s17064_s12 + $0x2e0] sm:$0xff]  }
 0x805   : > { %2730 = vmatpush1.bf16.msra.mxu0 %v10755_v33  ;;  %2771 = vmatpush1.bf16.msra.mxu1 %v10757_v34  ;;  %v10751_v33 = vcombine.low %v2327_v4, %v2331_v21  ;;  %v10753_v34 = vcombine.low %v2328_v22, %v2332_v23  ;;  %v12998_v4 = vld [vmem:[%s17064_s12 + $0x228] sm:$0xff]   ;;  %v13000_v22 = vld [vmem:[%s17064_s12 + $0x270] sm:$0xff]  }
 0x806   : > { %2731 = vmatprep.subr.bf16.mxu0 %v10764_v35  ;;  %2772 = vmatprep.subr.bf16.mxu1 %v10766_v37  ;;  %v10760_v35 = vcombine.high %v2335_v28, %v2339_v30  ;;  %v10762_v37 = vcombine.high %v2336_v31, %v2340_v32  ;;  %v12999_v21 = vld [vmem:[%s17064_s12 + $0x2a8] sm:$0xff]   ;;  %v13001_v23 = vld [vmem:[%s17064_s12 + $0x2f0] sm:$0xff]  }
 0x809   : > { %2732 = vmatpush1.bf16.msra.mxu0 %v10763_v46  ;;  %2773 = vmatpush1.bf16.msra.mxu1 %v10765_v43  ;;  %v10759_v46 = vcombine.low %v2335_v28, %v2339_v30  ;;  %v10761_v43 = vcombine.low %v2336_v31, %v2340_v32  ;;  %v13006_v28 = vld [vmem:[%s17064_s12 + $0x238] sm:$0xff]   ;;  %v13008_v31 = vld [vmem:[%s17064_s12 + $0x340] sm:$0xff]  }
 0x80a   : > { %2733 = vmatprep.subr.bf16.mxu0 %v10772_v49  ;;  %2774 = vmatprep.subr.bf16.mxu1 %v10774_v50  ;;  %v10768_v49 = vcombine.high %v2343_v38, %v2347_v41  ;;  %v10770_v50 = vcombine.high %v2344_v44, %v2348_v45  ;;  %v13007_v30 = vld [vmem:[%s17064_s12 + $0x2b8] sm:$0xff]   ;;  %v13009_v32 = vld [vmem:[%s17064_s12 + $0x3c0] sm:$0xff]  }
 0x80d   : > { %2734 = vmatpush1.bf16.msra.mxu0 %v10771_v55  ;;  %2775 = vmatpush1.bf16.msra.mxu1 %v10773_v56  ;;  %v10767_v55 = vcombine.low %v2343_v38, %v2347_v41  ;;  %v10769_v56 = vcombine.low %v2344_v44, %v2348_v45 }
 0x80e   : > { %2801 = vmatprep.subr.bf16.mxu0 %v10720_v57  ;;  %2842 = vmatprep.subr.bf16.mxu1 %v10722_v59  ;;  %v10776_v57 = vcombine.high %v2351_v51, %v2355_v52  ;;  %v10778_v59 = vcombine.high %v2352_v53, %v2356_v54 }
 0x810   : > { %2752 = vmatmul.mubr.bf16.vlgmr.msra.gmra.mrb[36].mxu0 %v14121_v48  ;;  %2793 = vmatmul.mubr.bf16.vlgmr.msra.gmra.mrb[28].mxu1 %v14121_v48 }
 0x811   : > { %2802 = vmatpush1.bf16.msra.mxu0 %v10719_v0  ;;  %2843 = vmatpush1.bf16.msra.mxu1 %v10721_v2  ;;  %v12978_v0 = vld [vmem:[%s17064_s12 + $0x200] sm:$0xff]  }
 0x812   : > { %2803 = vmatprep.subr.bf16.mxu0 %v10728_v3  ;;  %2844 = vmatprep.subr.bf16.mxu1 %v10730_v5  ;;  %v12979_v2 = vld [vmem:[%s17064_s12 + $0x280] sm:$0xff]   ;;  %v12980_v3 = vld [vmem:[%s17064_s12 + $0x248] sm:$0xff]  }
 0x813   : > { %2833 = vmatprep.mubr.bf16.mxu0 %v13605_v29  ;;  %2874 = vmatprep.mubr.bf16.mxu1 %v13605_v29  ;;  %v12981_v5 = vld [vmem:[%s17064_s12 + $0x2c8] sm:$0xff]  }
 0x815   : > { %2804 = vmatpush1.bf16.msra.mxu0 %v10727_v10  ;;  %2845 = vmatpush1.bf16.msra.mxu1 %v10729_v11  ;;  %v12986_v10 = vld [vmem:[%s17064_s12 + $0x210] sm:$0xff]  }
 0x816   : > { %2805 = vmatprep.subr.bf16.mxu0 %v10736_v12  ;;  %2846 = vmatprep.subr.bf16.mxu1 %v10738_v13  ;;  %v12987_v11 = vld [vmem:[%s17064_s12 + $0x290] sm:$0xff]   ;;  %v12988_v12 = vld [vmem:[%s17064_s12 + $0x258] sm:$0xff]  }
 0x817   : > { %v12989_v13 = vld [vmem:[%s17064_s12 + $0x2d8] sm:$0xff]  }
 0x819   : > { %2806 = vmatpush1.bf16.msra.mxu0 %v10735_v18  ;;  %2847 = vmatpush1.bf16.msra.mxu1 %v10737_v19  ;;  %v12994_v18 = vld [vmem:[%s17064_s12 + $0x220] sm:$0xff]  }
 0x81a   : > { %2807 = vmatprep.subr.bf16.mxu0 %v10744_v36  ;;  %2848 = vmatprep.subr.bf16.mxu1 %v10746_v20  ;;  %v12995_v19 = vld [vmem:[%s17064_s12 + $0x2a0] sm:$0xff]   ;;  %v12996_v36 = vld [vmem:[%s17064_s12 + $0x268] sm:$0xff]  }
 0x81b   : > { %v12997_v20 = vld [vmem:[%s17064_s12 + $0x2e8] sm:$0xff]  }
 0x81d   : > { %2808 = vmatpush1.bf16.msra.mxu0 %v10743_v24  ;;  %2849 = vmatpush1.bf16.msra.mxu1 %v10745_v25  ;;  %v13002_v24 = vld [vmem:[%s17064_s12 + $0x230] sm:$0xff]  }
 0x81e   : > { %2809 = vmatprep.subr.bf16.mxu0 %v10752_v26  ;;  %2850 = vmatprep.subr.bf16.mxu1 %v10754_v27  ;;  %v13003_v25 = vld [vmem:[%s17064_s12 + $0x2b0] sm:$0xff]   ;;  %v13004_v26 = vld [vmem:[%s17064_s12 + $0x278] sm:$0xff]  }
 0x81f   : > { %v13005_v27 = vld [vmem:[%s17064_s12 + $0x2f8] sm:$0xff]  }
 0x821   : > { %2810 = vmatpush1.bf16.msra.mxu0 %v10751_v33  ;;  %2851 = vmatpush1.bf16.msra.mxu1 %v10753_v34 }
 0x822   : > { %2811 = vmatprep.subr.bf16.mxu0 %v10760_v35  ;;  %2852 = vmatprep.subr.bf16.mxu1 %v10762_v37 }
 0x825   : > { %2812 = vmatpush1.bf16.msra.mxu0 %v10759_v46  ;;  %2853 = vmatpush1.bf16.msra.mxu1 %v10761_v43 }
 0x826   : > { %2813 = vmatprep.subr.bf16.mxu0 %v10768_v49  ;;  %2854 = vmatprep.subr.bf16.mxu1 %v10770_v50 }
 0x829   : > { %2814 = vmatpush1.bf16.msra.mxu0 %v10767_v55  ;;  %2855 = vmatpush1.bf16.msra.mxu1 %v10769_v56  ;;  %v14518_v55 = vld [vmem:[%s17063_s11 + $0x8] sm:$0xff]  ;;  %v14521_v56 = vsub.s32 3, %v13858_v39 }
 0x82a   : > { %2815 = vmatprep.subr.bf16.mxu0 %v10776_v57  ;;  %2856 = vmatprep.subr.bf16.mxu1 %v10778_v59  ;;  %v2362_v57 = vrot.slane %v14518_v55, %v13861_v40  ;;  %v2370_v59 = vrot.slane %v14518_v55, %v13883_v58 }
 0x82d   : > { %2816 = vmatpush1.bf16.msra.mxu0 %v10775_v60  ;;  %2857 = vmatpush1.bf16.msra.mxu1 %v10777_v61  ;;  %v2366_v60 = vrot.slane %v14518_v55, %v13867_v42  ;;  %v2374_v61 = vrot.slane %v14518_v55, %v14521_v56 }
 0x82e   : > { %12143 = vmatprep.subr.bf16.mxu0 %v12976_v62  ;;  %12165 = vmatprep.subr.bf16.mxu1 %v12977_v63 }
 0x830   : > { %2834 = vmatmul.mubr.bf16.vlgmr.msra.gmra.mrb[40].mxu0 %v14121_v48  ;;  %2875 = vmatmul.mubr.bf16.vlgmr.msra.gmra.mrb[32].mxu1 %v14121_v48 }
 0x831   : > { %12144 = vmatpush3.bf16.msra.mxu0 %v12978_v0  ;;  %12166 = vmatpush3.bf16.msra.mxu1 %v12979_v2 }
 0x832   : > { %12145 = vmatprep.subr.bf16.mxu0 %v12980_v3  ;;  %12167 = vmatprep.subr.bf16.mxu1 %v12981_v5 }
 0x835   : > { %12146 = vmatpush3.bf16.msra.mxu0 %v12982_v6  ;;  %12168 = vmatpush3.bf16.msra.mxu1 %v12983_v7 }
 0x836   : > { %12147 = vmatprep.subr.bf16.mxu0 %v12984_v8  ;;  %12169 = vmatprep.subr.bf16.mxu1 %v12985_v9 }
 0x839   : > { %12148 = vmatpush3.bf16.msra.mxu0 %v12986_v10  ;;  %12170 = vmatpush3.bf16.msra.mxu1 %v12987_v11 }
 0x83a   : > { %12149 = vmatprep.subr.bf16.mxu0 %v12988_v12  ;;  %12171 = vmatprep.subr.bf16.mxu1 %v12989_v13 }
 0x83d   : > { %12150 = vmatpush3.bf16.msra.mxu0 %v12990_v14  ;;  %12172 = vmatpush3.bf16.msra.mxu1 %v12991_v15 }
 0x83e   : > { %12151 = vmatprep.subr.bf16.mxu0 %v12992_v16  ;;  %12173 = vmatprep.subr.bf16.mxu1 %v12993_v17 }
 0x841   : > { %12152 = vmatpush3.bf16.msra.mxu0 %v12994_v18  ;;  %12174 = vmatpush3.bf16.msra.mxu1 %v12995_v19 }
 0x842   : > { %12153 = vmatprep.subr.bf16.mxu0 %v12996_v36  ;;  %12175 = vmatprep.subr.bf16.mxu1 %v12997_v20 }
 0x845   : > { %12154 = vmatpush3.bf16.msra.mxu0 %v12998_v4  ;;  %12176 = vmatpush3.bf16.msra.mxu1 %v12999_v21 }
 0x846   : > { %12155 = vmatprep.subr.bf16.mxu0 %v13000_v22  ;;  %12177 = vmatprep.subr.bf16.mxu1 %v13001_v23 }
 0x849   : > { %12156 = vmatpush3.bf16.msra.mxu0 %v13002_v24  ;;  %12178 = vmatpush3.bf16.msra.mxu1 %v13003_v25 }
 0x84a   : > { %12157 = vmatprep.subr.bf16.mxu0 %v13004_v26  ;;  %12179 = vmatprep.subr.bf16.mxu1 %v13005_v27 }
 0x84d   : > { %12158 = vmatpush3.bf16.msra.mxu0 %v13006_v28  ;;  %12180 = vmatpush3.bf16.msra.mxu1 %v13007_v30  ;;  %v14534_v28 = vld [vmem:[%s17063_s11] sm:$0xff] }
 0x84e   : > { %12187 = vmatprep.subr.bf16.mxu0 %v13008_v31  ;;  %12209 = vmatprep.subr.bf16.mxu1 %v13009_v32  ;;  %v1568_v32 = vrot.slane %v14534_v28, %v13867_v42 }
 0x8a3   : > { %v14503_v33 = vpop.f32.mrb[28].mxu0  ;;  %v14505_v34 = vpop.f32.mrb[20].mxu1 }
 0x8a4   : > { %v1957_v35 = vpop.f32.mrb[29].mxu0  ;;  %v1998_v37 = vpop.f32.mrb[21].mxu1 }
 0x8a5   : > { %v1959_v38 = vpop.f32.mrb[30].mxu0  ;;  %v2000_v41 = vpop.f32.mrb[22].mxu1 }
 0x8a6   : > { %v1960_v44 = vpop.f32.mrb[31].mxu0  ;;  %v2001_v45 = vpop.f32.mrb[23].mxu1  ;;  %v1576_v38 = vrot.slane %v14534_v28, %v14521_v56  ;;  %v14540_v41 = vadd.f32 %v1957_v35, %v1568_v32 }
 0x8a8   : > { %v14542_v44 = vadd.f32 %v1998_v37, %v1576_v38 }
 0x8c3   : > { %v14507_v46 = vpop.f32.mrb[32].mxu0  ;;  %v14509_v43 = vpop.f32.mrb[24].mxu1 }
 0x8c4   : > { %v14511_v49 = vpop.f32.mrb[33].mxu0  ;;  %v14513_v50 = vpop.f32.mrb[25].mxu1 }
 0x8c5   : > { %v2041_v51 = vpop.f32.mrb[34].mxu0  ;;  %v2082_v52 = vpop.f32.mrb[26].mxu1 }
 0x8c6   : > { %v2042_v53 = vpop.f32.mrb[35].mxu0  ;;  %v2083_v54 = vpop.f32.mrb[27].mxu1  ;;  %v2094_v51 = vmul.f32 %v14540_v41, %v14540_v41 }
 0x8c7   : > { %v2096_v53 = vmul.f32 %v14542_v44, %v14542_v44 }
 0x8e3   : > { %v2753_v62 = vpop.f32.mrb[36].mxu0  ;;  %v2794_v63 = vpop.f32.mrb[28].mxu1 }
 0x8e4   : > { %v2754_v0 = vadd.f32 %v2753_v62, %v2362_v57  ;;  %v2795_v2 = vadd.f32 %v2794_v63, %v2370_v59  ;;  %v2755_v3 = vpop.f32.mrb[37].mxu0  ;;  %v2796_v5 = vpop.f32.mrb[29].mxu1  ;;  %v14549_v59 = vsub.s32 4, %v13858_v39  ;;  %v14555_v62 = vsub.s32 5, %v13858_v39 }
 0x8e5   : > { %v2756_v6 = vadd.f32 %v2755_v3, %v2366_v60  ;;  %v2797_v7 = vadd.f32 %v2796_v5, %v2374_v61  ;;  %v2757_v8 = vpop.f32.mrb[38].mxu0  ;;  %v2798_v9 = vpop.f32.mrb[30].mxu1  ;;  %v14552_v60 = vsub.s32 6, %v13858_v39 }
 0x8e6   : > { %v2891_v10 = vmul.f32 %v2754_v0, %v2754_v0  ;;  %v2893_v11 = vmul.f32 %v2795_v2, %v2795_v2  ;;  %v2758_v12 = vpop.f32.mrb[39].mxu0  ;;  %v2799_v13 = vpop.f32.mrb[31].mxu1  ;;  %v2883_v35 = vmul.f32 0.5, %v2754_v0  ;;  %v2885_v63 = vmul.f32 0.5, %v2795_v2 }
 0x8e7   : > { %v2892_v14 = vmul.f32 %v2756_v6, %v2756_v6  ;;  %v2894_v15 = vmul.f32 %v2797_v7, %v2797_v7  ;;  %v2884_v3 = vmul.f32 0.5, %v2756_v6  ;;  %v2102_v8 = vmul.f32 %v2094_v51, %v14540_v41  ;;  %v13014_v51 = vld [vmem:[%s17064_s12 + $0x308] sm:$0xff]  }
 0x8e8   : > { %v2899_v16 = vmul.f32 %v2891_v10, %v2754_v0  ;;  %v2901_v17 = vmul.f32 %v2893_v11, %v2795_v2  ;;  %v2886_v9 = vmul.f32 0.5, %v2797_v7  ;;  %v2104_v12 = vmul.f32 %v2096_v53, %v14542_v44 }
 0x8e9   : > { %v2900_v18 = vmul.f32 %v2892_v14, %v2756_v6  ;;  %v2902_v19 = vmul.f32 %v2894_v15, %v2797_v7  ;;  %v14560_v13 = vsub.s32 7, %v13858_v39 }
 0x8ea   : > { %v2907_v36 = vmul.f32 0.044715, %v2899_v16  ;;  %v2909_v20 = vmul.f32 0.044715, %v2901_v17  ;;  %v2378_v16 = vrot.slane %v14518_v55, %v14549_v59  ;;  %v2382_v17 = vrot.slane %v14518_v55, %v14555_v62 }
 0x8eb   : > { %v2908_v4 = vmul.f32 0.044715, %v2900_v18  ;;  %v2910_v21 = vmul.f32 0.044715, %v2902_v19  ;;  %v2390_v39 = vrot.slane %v14518_v55, %v14560_v13  ;;  %v2110_v18 = vmul.f32 0.044715, %v2102_v8 }
 0x8ec   : > { %v2915_v22 = vadd.f32 %v2907_v36, %v2754_v0  ;;  %v2917_v23 = vadd.f32 %v2909_v20, %v2795_v2  ;;  %v2386_v2 = vrot.slane %v14518_v55, %v14552_v60  ;;  %v13011_v20 = vld [vmem:[%s17064_s12 + $0x380] sm:$0xff]   ;;  %v13013_v55 = vld [vmem:[%s17064_s12 + $0x3c8] sm:$0xff]   ;;  %v13017_v8 = vld [vmem:[%s17064_s12 + $0x3d0] sm:$0xff]  }
 0x8ed   : > { %v2916_v24 = vadd.f32 %v2908_v4, %v2756_v6  ;;  %v2918_v25 = vadd.f32 %v2910_v21, %v2797_v7  ;;  %v13010_v7 = vld [vmem:[%s17064_s12 + $0x300] sm:$0xff]   ;;  %v13012_v4 = vld [vmem:[%s17064_s12 + $0x348] sm:$0xff]   ;;  %v2112_v21 = vmul.f32 0.044715, %v2104_v12 }
 0x8ee   : > { %v2923_v26 = vmul.f32 0.7978846, %v2915_v22  ;;  %v2925_v27 = vmul.f32 0.7978846, %v2917_v23 }
 0x8ef   : > { %v2924_v30 = vmul.f32 0.7978846, %v2916_v24  ;;  %v2926_v31 = vmul.f32 0.7978846, %v2918_v25 }
 0x8f0   : > { %13420 = vtanh.f32 %v2923_v26 }
 0x8f1   : > { %13422 = vtanh.f32 %v2925_v27 }
 0x8f2   : > { %13424 = vtanh.f32 %v2924_v30 }
 0x8f3   : > { %13426 = vtanh.f32 %v2926_v31 }
 0x8fa   : > { %v13421_v45 = vpop.eup %13420 }
 0x8fb   : > { %v13423_v52 = vpop.eup %13422  ;;  %v2939_v54 = vadd.f32 1.0, %v13421_v45 }
 0x8fc   : > { %v13425_v57 = vpop.eup %13424  ;;  %v2941_v61 = vadd.f32 1.0, %v13423_v52  ;;  %v2118_v52 = vadd.f32 %v2110_v18, %v14540_v41 }
 0x8fd   : > { %v13427_v37 = vpop.eup %13426  ;;  %v2940_v5 = vadd.f32 1.0, %v13425_v57  ;;  %v2947_v11 = vmul.f32 %v2939_v54, %v2883_v35 }
 0x8fe   : > { %v2942_v10 = vadd.f32 1.0, %v13427_v37  ;;  %v2949_v0 = vmul.f32 %v2941_v61, %v2885_v63  ;;  %v13015_v61 = vld [vmem:[%s17064_s12 + $0x388] sm:$0xff]   ;;  %v13016_v37 = vld [vmem:[%s17064_s12 + $0x350] sm:$0xff]   ;;  %v2120_v63 = vadd.f32 %v2112_v21, %v14542_v44  ;;  %v13022_v21 = vld [vmem:[%s17064_s12 + $0x318] sm:$0xff]  }
 0x8ff   : > { %v2948_v14 = vmul.f32 %v2940_v5, %v2884_v3  ;;  %v3083_v36 = vpack.c.bf16 %v2947_v11, %v2947_v11  ;;  %v13018_v11 = vld [vmem:[%s17064_s12 + $0x310] sm:$0xff]  }
 0x900   : > { %v2950_v15 = vmul.f32 %v2942_v10, %v2886_v9  ;;  %v3085_v24 = vpack.c.bf16 %v2949_v0, %v2949_v0  ;;  %v13019_v0 = vld [vmem:[%s17064_s12 + $0x390] sm:$0xff]  }
 0x901   : > { %v3084_v6 = vpack.c.bf16 %v2948_v14, %v2948_v14 }
 0x902   : > { %v3086_v19 = vpack.c.bf16 %v2950_v15, %v2950_v15  ;;  %v13020_v15 = vld [vmem:[%s17064_s12 + $0x358] sm:$0xff]  }
 0x903   : > { %3507 = vmatprep.mubr.bf16.mxu0 %v3084_v6  ;;  %v2835_v22 = vpop.f32.mrb[40].mxu0  ;;  %v2876_v23 = vpop.f32.mrb[32].mxu1 }
 0x904   : > { %3547 = vmatprep.mubr.bf16.mxu1 %v3086_v19  ;;  %v14582_v25 = vadd.f32 %v2835_v22, %v2378_v16  ;;  %v14584_v26 = vadd.f32 %v2876_v23, %v2386_v2  ;;  %3508 = vmatmul.mubr.bf16.vlgmr.msra.gmra.mrb[44].mxu0 %v3083_v36  ;;  %v2837_v27 = vpop.f32.mrb[41].mxu0  ;;  %v2878_v30 = vpop.f32.mrb[33].mxu1  ;;  %v13021_v16 = vld [vmem:[%s17064_s12 + $0x3d8] sm:$0xff]   ;;  %v2126_v2 = vmul.f32 0.7978846, %v2118_v52  ;;  %v1572_v52 = vrot.slane %v14534_v28, %v13883_v58 }
 0x905   : > { %3548 = vmatmul.mubr.bf16.vlgmr.msra.gmra.mrb[36].mxu1 %v3085_v24  ;;  %12188 = vmatpush3.bf16.msra.mxu0 %v13010_v7  ;;  %v14586_v31 = vadd.f32 %v2837_v27, %v2382_v17  ;;  %v14588_v32 = vadd.f32 %v2878_v30, %v2390_v39  ;;  %v2839_v38 = vpop.f32.mrb[42].mxu0  ;;  %v2880_v45 = vpop.f32.mrb[34].mxu1  ;;  %v2128_v17 = vmul.f32 0.7978846, %v2120_v63  ;;  %v13023_v24 = vld [vmem:[%s17064_s12 + $0x398] sm:$0xff]   ;;  %v1564_v27 = vrot.slane %v14534_v28, %v13861_v40  ;;  %v13030_v63 = vld [vmem:[%s17064_s12 + $0x328] sm:$0xff]  }
 0x906   : > { %v2895_v53 = vmul.f32 %v14582_v25, %v14582_v25  ;;  %v2897_v54 = vmul.f32 %v14584_v26, %v14584_v26  ;;  %12210 = vmatpush3.bf16.msra.mxu1 %v13011_v20  ;;  %v2840_v57 = vpop.f32.mrb[43].mxu0  ;;  %v2881_v35 = vpop.f32.mrb[35].mxu1  ;;  %12189 = vmatprep.subr.bf16.mxu0 %v13012_v4  ;;  %13428 = vtanh.f32 %v2126_v2  ;;  %v13025_v45 = vld [vmem:[%s17064_s12 + $0x3e0] sm:$0xff]  }
 0x907   : > { %v2896_v3 = vmul.f32 %v14586_v31, %v14586_v31  ;;  %v2898_v5 = vmul.f32 %v14588_v32, %v14588_v32  ;;  %12211 = vmatprep.subr.bf16.mxu1 %v13013_v55  ;;  %v13024_v55 = vld [vmem:[%s17064_s12 + $0x360] sm:$0xff]   ;;  %13430 = vtanh.f32 %v2128_v17  ;;  %v14658_v57 = vadd.f32 %v14503_v33, %v1564_v27 }
 0x908   : > { %v2903_v9 = vmul.f32 %v2895_v53, %v14582_v25  ;;  %v2905_v10 = vmul.f32 %v2897_v54, %v14584_v26  ;;  %v13027_v53 = vld [vmem:[%s17064_s12 + $0x3a0] sm:$0xff]   ;;  %v13028_v54 = vld [vmem:[%s17064_s12 + $0x368] sm:$0xff]   ;;  %v1584_v35 = vrot.slane %v14534_v28, %v14555_v62  ;;  %v14671_v33 = vadd.f32 %v14505_v34, %v1572_v52  ;;  %v13033_v34 = vld [vmem:[%s17064_s12 + $0x3f0] sm:$0xff]  }
 0x909   : > { %v2904_v12 = vmul.f32 %v2896_v3, %v14586_v31  ;;  %v2906_v14 = vmul.f32 %v2898_v5, %v14588_v32  ;;  %12190 = vmatpush3.bf16.msra.mxu0 %v13014_v51  ;;  %v13026_v51 = vld [vmem:[%s17064_s12 + $0x320] sm:$0xff]   ;;  %v13031_v3 = vld [vmem:[%s17064_s12 + $0x3a8] sm:$0xff]   ;;  %v13032_v5 = vld [vmem:[%s17064_s12 + $0x370] sm:$0xff]  }
 0x90a   : > { %v2911_v6 = vmul.f32 0.044715, %v2903_v9  ;;  %v2913_v7 = vmul.f32 0.044715, %v2905_v10  ;;  %12212 = vmatpush3.bf16.msra.mxu1 %v13015_v61  ;;  %12191 = vmatprep.subr.bf16.mxu0 %v13016_v37  ;;  %v13029_v61 = vld [vmem:[%s17064_s12 + $0x3e8] sm:$0xff]   ;;  %v1592_v37 = vrot.slane %v14534_v28, %v14560_v13  ;;  %v14682_v9 = vadd.f32 %v14511_v49, %v1584_v35  ;;  %v13041_v52 = vld [vmem:[%s17064_s12 + $0xc0] sm:$0xff]  }
 0x90b   : > { %v2912_v39 = vmul.f32 0.044715, %v2904_v12  ;;  %v2914_v18 = vmul.f32 0.044715, %v2906_v14  ;;  %12213 = vmatprep.subr.bf16.mxu1 %v13017_v8  ;;  %v2093_v8 = vmul.f32 %v14658_v57, %v14658_v57  ;;  %v13034_v14 = vld [vmem:[%s17064_s12 + $0x330] sm:$0xff]   ;;  %v2095_v49 = vmul.f32 %v14671_v33, %v14671_v33 }
 0x90c   : > { %v2919_v19 = vadd.f32 %v2911_v6, %v14582_v25  ;;  %v2921_v36 = vadd.f32 %v2913_v7, %v14584_v26  ;;  %v2098_v6 = vmul.f32 %v14682_v9, %v14682_v9  ;;  %v13037_v7 = vld [vmem:[%s17064_s12 + $0x3f8] sm:$0xff]  }
 0x90d   : > { %v2920_v20 = vadd.f32 %v2912_v39, %v14586_v31  ;;  %v2922_v4 = vadd.f32 %v2914_v18, %v14588_v32  ;;  %12192 = vmatpush3.bf16.msra.mxu0 %v13018_v11  ;;  %v14688_v11 = vadd.f32 %v14513_v50, %v1592_v37  ;;  %v13036_v50 = vld [vmem:[%s17064_s12 + $0x378] sm:$0xff]   ;;  %v2101_v2 = vmul.f32 %v2093_v8, %v14658_v57 }
 0x90e   : > { %v2927_v22 = vmul.f32 0.7978846, %v2919_v19  ;;  %v2929_v23 = vmul.f32 0.7978846, %v2921_v36  ;;  %12214 = vmatpush3.bf16.msra.mxu1 %v13019_v0  ;;  %12193 = vmatprep.subr.bf16.mxu0 %v13020_v15  ;;  %v13035_v15 = vld [vmem:[%s17064_s12 + $0x3b0] sm:$0xff]   ;;  %v2086_v39 = vmul.f32 0.5, %v14540_v41  ;;  %v2103_v27 = vmul.f32 %v2095_v49, %v14671_v33 }
 0x90f   : > { %v2928_v30 = vmul.f32 0.7978846, %v2920_v20  ;;  %v2930_v38 = vmul.f32 0.7978846, %v2922_v4  ;;  %12215 = vmatprep.subr.bf16.mxu1 %v13021_v16  ;;  %v2100_v19 = vmul.f32 %v14688_v11, %v14688_v11  ;;  %v2887_v36 = vmul.f32 0.5, %v14582_v25  ;;  %v13039_v25 = vld [vmem:[%s17064_s12 + $0x3b8] sm:$0xff]  }
 0x910   : > { %13432 = vtanh.f32 %v2927_v22  ;;  %v13429_v10 = vpop.eup %13428  ;;  %v2889_v22 = vmul.f32 0.5, %v14584_v26  ;;  %v2109_v37 = vmul.f32 0.044715, %v2101_v2  ;;  %v2111_v8 = vmul.f32 0.044715, %v2103_v27  ;;  %v13054_v27 = vld [vmem:[%s17064_s12 + $0x18] sm:$0xff]  }
 0x911   : > { %13434 = vtanh.f32 %v2929_v23  ;;  %12194 = vmatpush3.bf16.msra.mxu0 %v13022_v21  ;;  %v13431_v12 = vpop.eup %13430  ;;  %v2142_v4 = vadd.f32 1.0, %v13429_v10  ;;  %v13038_v23 = vld [vmem:[%s17064_s12 + $0x338] sm:$0xff]   ;;  %v2108_v35 = vmul.f32 %v2100_v19, %v14688_v11  ;;  %v13049_v19 = vld [vmem:[%s17064_s12 + $0xd0] sm:$0xff]  }
 0x912   : > { %12216 = vmatpush3.bf16.msra.mxu1 %v13023_v24  ;;  %12195 = vmatprep.subr.bf16.mxu0 %v13024_v55  ;;  %13436 = vtanh.f32 %v2928_v30  ;;  %v2888_v24 = vmul.f32 0.5, %v14586_v31  ;;  %v2144_v41 = vadd.f32 1.0, %v13431_v12  ;;  %v2890_v30 = vmul.f32 0.5, %v14588_v32 }
 0x913   : > { %12217 = vmatprep.subr.bf16.mxu1 %v13025_v45  ;;  %13438 = vtanh.f32 %v2930_v38  ;;  %v13040_v38 = vld [vmem:[%s17064_s12 + $0x40] sm:$0xff]   ;;  %v2106_v31 = vmul.f32 %v2098_v6, %v14682_v9  ;;  %v2116_v49 = vmul.f32 0.044715, %v2108_v35  ;;  %v13046_v6 = vld [vmem:[%s17064_s12 + $0x8] sm:$0xff]  }
 0x915   : > { %12196 = vmatpush3.bf16.msra.mxu0 %v13026_v51  ;;  %v2114_v12 = vmul.f32 0.044715, %v2106_v31  ;;  %v1588_v31 = vrot.slane %v14534_v28, %v14552_v60 }
 0x916   : > { %12218 = vmatpush3.bf16.msra.mxu1 %v13027_v53  ;;  %12197 = vmatprep.subr.bf16.mxu0 %v13028_v54  ;;  %v2088_v54 = vmul.f32 0.5, %v14542_v44  ;;  %v13043_v44 = vld [vmem:[%s17064_s12 + $0x80] sm:$0xff]  }
 0x917   : > { %12219 = vmatprep.subr.bf16.mxu1 %v13029_v61  ;;  %v2150_v61 = vmul.f32 %v2142_v4, %v2086_v39  ;;  %v13048_v39 = vld [vmem:[%s17064_s12 + $0x50] sm:$0xff]   ;;  %v14805_v35 = vadd.f32 %v14509_v43, %v1588_v31 }
 0x918   : > { %v13050_v4 = vld [vmem:[%s17064_s12 + $0x10] sm:$0xff]  }
 0x919   : > { %12198 = vmatpush3.bf16.msra.mxu0 %v13030_v63  ;;  %v13080_v31 = vld [vmem:[%s17064_s12 + $0x150] sm:$0xff]  }
 0x91a   : > { %v13433_v0 = vpop.eup %13432  ;;  %12220 = vmatpush3.bf16.msra.mxu1 %v13031_v3  ;;  %12199 = vmatprep.subr.bf16.mxu0 %v13032_v5  ;;  %v13042_v3 = vld [vmem:[%s17064_s12] sm:$0xff]   ;;  %v2152_v5 = vmul.f32 %v2144_v41, %v2088_v54 }
 0x91b   : > { %v13435_v16 = vpop.eup %13434  ;;  %12221 = vmatprep.subr.bf16.mxu1 %v13033_v34  ;;  %v2943_v17 = vadd.f32 1.0, %v13433_v0  ;;  %v13044_v0 = vld [vmem:[%s17064_s12 + $0x48] sm:$0xff]  }
 0x91c   : > { %v13437_v18 = vpop.eup %13436  ;;  %v2945_v20 = vadd.f32 1.0, %v13435_v16  ;;  %v2117_v16 = vadd.f32 %v2109_v37, %v14658_v57  ;;  %v2288_v2 = vpack.c.bf16 %v2152_v5, %v2152_v5  ;;  %v13065_v37 = vld [vmem:[%s17064_s12 + $0xf0] sm:$0xff]  }
 0x91d   : > { %v13439_v21 = vpop.eup %13438  ;;  %12200 = vmatpush3.bf16.msra.mxu0 %v13034_v14  ;;  %v2944_v55 = vadd.f32 1.0, %v13437_v18  ;;  %v2951_v45 = vmul.f32 %v2943_v17, %v2887_v36  ;;  %v13047_v17 = vld [vmem:[%s17064_s12 + $0x88] sm:$0xff]   ;;  %v2122_v18 = vadd.f32 %v2114_v12, %v14682_v9  ;;  %v2124_v36 = vadd.f32 %v2116_v49, %v14688_v11  ;;  %v13066_v5 = vld [vmem:[%s17064_s12 + $0x30] sm:$0xff]  }
 0x91e   : > { %12222 = vmatpush3.bf16.msra.mxu1 %v13035_v15  ;;  %12201 = vmatprep.subr.bf16.mxu0 %v13036_v50  ;;  %v2946_v26 = vadd.f32 1.0, %v13439_v21  ;;  %v2953_v53 = vmul.f32 %v2945_v20, %v2889_v22  ;;  %v2286_v15 = vpack.c.bf16 %v2150_v61, %v2150_v61  ;;  %v13045_v50 = vld [vmem:[%s17064_s12 + $0xc8] sm:$0xff]   ;;  %v2125_v20 = vmul.f32 0.7978846, %v2117_v16  ;;  %v13051_v22 = vld [vmem:[%s17064_s12 + $0x90] sm:$0xff]  }
 0x91f   : > { %12223 = vmatprep.subr.bf16.mxu1 %v13037_v7  ;;  %v2952_v51 = vmul.f32 %v2944_v55, %v2888_v24  ;;  %v3087_v10 = vpack.c.bf16 %v2951_v45, %v2951_v45  ;;  %v2119_v7 = vadd.f32 %v2111_v8, %v14671_v33  ;;  %v2130_v24 = vmul.f32 0.7978846, %v2122_v18  ;;  %v13053_v55 = vld [vmem:[%s17064_s12 + $0xd8] sm:$0xff]   ;;  %v13058_v45 = vld [vmem:[%s17064_s12 + $0x20] sm:$0xff]   ;;  %v13064_v61 = vld [vmem:[%s17064_s12 + $0x70] sm:$0xff]  }
 0x920   : > { %v2954_v32 = vmul.f32 %v2946_v26, %v2890_v30  ;;  %v3089_v14 = vpack.c.bf16 %v2953_v53, %v2953_v53  ;;  %v2132_v41 = vmul.f32 0.7978846, %v2124_v36  ;;  %13440 = vtanh.f32 %v2125_v20  ;;  %v13056_v30 = vld [vmem:[%s17064_s12 + $0x60] sm:$0xff]   ;;  %v13061_v53 = vld [vmem:[%s17064_s12 + $0xe8] sm:$0xff]  }
 0x921   : > { %12202 = vmatpush3.bf16.msra.mxu0 %v13038_v23  ;;  %v3088_v63 = vpack.c.bf16 %v2952_v51, %v2952_v51  ;;  %v2127_v21 = vmul.f32 0.7978846, %v2119_v7  ;;  %v13052_v23 = vld [vmem:[%s17064_s12 + $0x58] sm:$0xff]   ;;  %v13057_v26 = vld [vmem:[%s17064_s12 + $0xe0] sm:$0xff]   ;;  %v2085_v49 = vmul.f32 0.5, %v14658_v57  ;;  %v2092_v36 = vmul.f32 0.5, %v14688_v11 }
 0x922   : > { %12224 = vmatpush3.bf16.msra.mxu1 %v13039_v25  ;;  %v3090_v34 = vpack.c.bf16 %v2954_v32, %v2954_v32  ;;  %12231 = vmatprep.subr.bf16.mxu0 %v13040_v38  ;;  %v13055_v25 = vld [vmem:[%s17064_s12 + $0x98] sm:$0xff]   ;;  %v1580_v38 = vrot.slane %v14534_v28, %v14549_v59  ;;  %v13059_v51 = vld [vmem:[%s17064_s12 + $0xa0] sm:$0xff]   ;;  %v13062_v28 = vld [vmem:[%s17064_s12 + $0x28] sm:$0xff]  }
 0x923   : > { %3587 = vmatprep.mubr.bf16.mxu0 %v3088_v63  ;;  %12253 = vmatprep.subr.bf16.mxu1 %v13041_v52  ;;  %13442 = vtanh.f32 %v2127_v21  ;;  %v13060_v52 = vld [vmem:[%s17064_s12 + $0x68] sm:$0xff]   ;;  %v13074_v21 = vld [vmem:[%s17064_s12 + $0x100] sm:$0xff]  }
 0x924   : > { %3627 = vmatprep.mubr.bf16.mxu1 %v3090_v34  ;;  %3588 = vmatmul.mubr.bf16.vlgmr.msra.gmra.mrb[48].mxu0 %v3087_v10  ;;  %13444 = vtanh.f32 %v2130_v24  ;;  %v14799_v54 = vadd.f32 %v14507_v46, %v1580_v38  ;;  %v13063_v32 = vld [vmem:[%s17064_s12 + $0xa8] sm:$0xff]   ;;  %v2099_v34 = vmul.f32 %v14805_v35, %v14805_v35  ;;  %v13067_v10 = vld [vmem:[%s17064_s12 + $0xb0] sm:$0xff]  }
 0x925   : > { %3628 = vmatmul.mubr.bf16.vlgmr.msra.gmra.mrb[40].mxu1 %v3089_v14  ;;  %12232 = vmatpush3.bf16.msra.mxu0 %v13042_v3  ;;  %13446 = vtanh.f32 %v2132_v41  ;;  %v13069_v14 = vld [vmem:[%s17064_s12 + $0xf8] sm:$0xff]   ;;  %v13076_v11 = vld [vmem:[%s17064_s12 + $0x148] sm:$0xff]  }
 0x926   : > { %12254 = vmatpush3.bf16.msra.mxu1 %v13043_v44  ;;  %4051 = vmatprep.mubr.bf16.mxu0 %v2286_v15  ;;  %v2097_v43 = vmul.f32 %v14799_v54, %v14799_v54  ;;  %v13068_v44 = vld [vmem:[%s17064_s12 + $0x78] sm:$0xff]   ;;  %v2107_v7 = vmul.f32 %v2099_v34, %v14805_v35  ;;  %v13092_v34 = vld [vmem:[%s17064_s12 + $0x168] sm:$0xff]  }
 0x927   : > { %4091 = vmatprep.mubr.bf16.mxu1 %v2288_v2  ;;  %12233 = vmatprep.subr.bf16.mxu0 %v13044_v0  ;;  %v13070_v2 = vld [vmem:[%s17064_s12 + $0x38] sm:$0xff]  }
 0x928   : > { %12255 = vmatprep.subr.bf16.mxu1 %v13045_v50  ;;  %v2087_v50 = vmul.f32 0.5, %v14671_v33  ;;  %v2105_v16 = vmul.f32 %v2097_v43, %v14799_v54  ;;  %v13072_v33 = vld [vmem:[%s17064_s12 + $0x140] sm:$0xff]  }
 0x929   : > { %12234 = vmatpush3.bf16.msra.mxu0 %v13046_v6  ;;  %v13089_v43 = vld [vmem:[%s17064_s12 + $0x1e0] sm:$0xff]  }
 0x92a   : > { %12256 = vmatpush3.bf16.msra.mxu1 %v13047_v17  ;;  %12235 = vmatprep.subr.bf16.mxu0 %v13048_v39  ;;  %v13441_v46 = vpop.eup %13440  ;;  %v13071_v17 = vld [vmem:[%s17064_s12 + $0xb8] sm:$0xff]   ;;  %v2090_v39 = vmul.f32 0.5, %v14682_v9  ;;  %v13075_v9 = vld [vmem:[%s17064_s12 + $0x180] sm:$0xff]  }
 0x92b   : > { %12257 = vmatprep.subr.bf16.mxu1 %v13049_v19  ;;  %v2141_v12 = vadd.f32 1.0, %v13441_v46  ;;  %v13073_v19 = vld [vmem:[%s17064_s12 + $0x1c0] sm:$0xff]   ;;  %v13085_v46 = vld [vmem:[%s17064_s12 + $0x1d8] sm:$0xff]  }
 0x92d   : > { %12236 = vmatpush3.bf16.msra.mxu0 %v13050_v4  ;;  %v13443_v63 = vpop.eup %13442  ;;  %v2149_v57 = vmul.f32 %v2141_v12, %v2085_v49  ;;  %v2113_v4 = vmul.f32 0.044715, %v2105_v16  ;;  %v13095_v12 = vld [vmem:[%s17064_s12 + $0x1a8] sm:$0xff]   ;;  %v13097_v49 = vld [vmem:[%s17064_s12 + $0x1f0] sm:$0xff]  }
 0x92e   : > { %12258 = vmatpush3.bf16.msra.mxu1 %v13051_v22  ;;  %12237 = vmatprep.subr.bf16.mxu0 %v13052_v23  ;;  %v13445_v3 = vpop.eup %13444  ;;  %v2143_v0 = vadd.f32 1.0, %v13443_v63  ;;  %v2115_v23 = vmul.f32 0.044715, %v2107_v7  ;;  %v13087_v63 = vld [vmem:[%s17064_s12 + $0x198] sm:$0xff]   ;;  %v13099_v16 = vld [vmem:[%s17064_s12 + $0x1b0] sm:$0xff]  }
 0x92f   : > { %12259 = vmatprep.subr.bf16.mxu1 %v13053_v55  ;;  %v13447_v8 = vpop.eup %13446  ;;  %v2146_v15 = vadd.f32 1.0, %v13445_v3  ;;  %v2285_v24 = vpack.c.bf16 %v2149_v57, %v2149_v57  ;;  %v13088_v3 = vld [vmem:[%s17064_s12 + $0x160] sm:$0xff]   ;;  %v13101_v7 = vld [vmem:[%s17064_s12 + $0x1f8] sm:$0xff]  }
 0x930   : > { %v2148_v6 = vadd.f32 1.0, %v13447_v8  ;;  %v2151_v18 = vmul.f32 %v2143_v0, %v2087_v50  ;;  %v2123_v38 = vadd.f32 %v2115_v23, %v14805_v35  ;;  %v13091_v8 = vld [vmem:[%s17064_s12 + $0x1a0] sm:$0xff]   ;;  %v13098_v50 = vld [vmem:[%s17064_s12 + $0x130] sm:$0xff]  }
 0x931   : > { %12238 = vmatpush3.bf16.msra.mxu0 %v13054_v27  ;;  %v2154_v20 = vmul.f32 %v2146_v15, %v2090_v39  ;;  %v13077_v27 = vld [vmem:[%s17064_s12 + $0x1c8] sm:$0xff]   ;;  %v4179_v57 = vld [vmem:[%s17062_s10 + $0x40] sm:$0xff]  ;;  %v2089_v39 = vmul.f32 0.5, %v14799_v54 }
 0x932   : > { %12260 = vmatpush3.bf16.msra.mxu1 %v13055_v25  ;;  %12239 = vmatprep.subr.bf16.mxu0 %v13056_v30  ;;  %v2156_v22 = vmul.f32 %v2148_v6, %v2092_v36  ;;  %v2287_v55 = vpack.c.bf16 %v2151_v18, %v2151_v18  ;;  %v2121_v25 = vadd.f32 %v2113_v4, %v14799_v54  ;;  %v4180_v18 = vld [vmem:[%s17062_s10 + $0x48] sm:$0xff]  ;;  %v2091_v36 = vmul.f32 0.5, %v14805_v35  ;;  %v13103_v54 = vld [vmem:[%s17064_s12 + $0x1b8] sm:$0xff]   ;;  %v4187_v35 = vld [vmem:[%s17062_s10 + $0x100] sm:$0xff] }
 0x933   : > { %12261 = vmatprep.subr.bf16.mxu1 %v13057_v26  ;;  %v2290_v41 = vpack.c.bf16 %v2154_v20, %v2154_v20  ;;  %v13078_v26 = vld [vmem:[%s17064_s12 + $0x108] sm:$0xff]   ;;  %v13102_v20 = vld [vmem:[%s17064_s12 + $0x138] sm:$0xff]  }
 0x934   : > { %v2292_v30 = vpack.c.bf16 %v2156_v22, %v2156_v22 }
 0x935   : > { %12240 = vmatpush3.bf16.msra.mxu0 %v13058_v45  ;;  %v13079_v45 = vld [vmem:[%s17064_s12 + $0x188] sm:$0xff]  }
 0x936   : > { %12262 = vmatpush3.bf16.msra.mxu1 %v13059_v51  ;;  %12241 = vmatprep.subr.bf16.mxu0 %v13060_v52  ;;  %v13081_v51 = vld [vmem:[%s17064_s12 + $0x1d0] sm:$0xff]   ;;  %v2129_v52 = vmul.f32 0.7978846, %v2121_v25 }
 0x937   : > { %12263 = vmatprep.subr.bf16.mxu1 %v13061_v53  ;;  %v13082_v53 = vld [vmem:[%s17064_s12 + $0x110] sm:$0xff]  }
 0x938   : > { %13448 = vtanh.f32 %v2129_v52 }
 0x939   : > { %12242 = vmatpush3.bf16.msra.mxu0 %v13062_v28  ;;  %v2131_v28 = vmul.f32 0.7978846, %v2123_v38  ;;  %v4195_v38 = vld [vmem:[%s17062_s10 + $0x1c0] sm:$0xff] }
 0x93a   : > { %12264 = vmatpush3.bf16.msra.mxu1 %v13063_v32  ;;  %12243 = vmatprep.subr.bf16.mxu0 %v13064_v61  ;;  %v13083_v32 = vld [vmem:[%s17064_s12 + $0x190] sm:$0xff]   ;;  %v13084_v61 = vld [vmem:[%s17064_s12 + $0x158] sm:$0xff]  }
 0x93b   : > { %12265 = vmatprep.subr.bf16.mxu1 %v13065_v37  ;;  %v13086_v37 = vld [vmem:[%s17064_s12 + $0x118] sm:$0xff]   ;;  %13450 = vtanh.f32 %v2131_v28 }
 0x93d   : > { %12244 = vmatpush3.bf16.msra.mxu0 %v13066_v5  ;;  %v13090_v5 = vld [vmem:[%s17064_s12 + $0x120] sm:$0xff]  }
 0x93e   : > { %12266 = vmatpush3.bf16.msra.mxu1 %v13067_v10  ;;  %12245 = vmatprep.subr.bf16.mxu0 %v13068_v44  ;;  %v13093_v10 = vld [vmem:[%s17064_s12 + $0x1e8] sm:$0xff]  }
 0x93f   : > { %12267 = vmatprep.subr.bf16.mxu1 %v13069_v14  ;;  %v13094_v44 = vld [vmem:[%s17064_s12 + $0x128] sm:$0xff]   ;;  %v13096_v14 = vld [vmem:[%s17064_s12 + $0x170] sm:$0xff]  }
 0x941   : > { %12246 = vmatpush3.bf16.msra.mxu0 %v13070_v2  ;;  %v13100_v2 = vld [vmem:[%s17064_s12 + $0x178] sm:$0xff]  }
 0x942   : > { %12268 = vmatpush3.bf16.msra.mxu1 %v13071_v17  ;;  %12275 = vmatprep.subr.bf16.mxu0 %v13072_v33  ;;  %v13449_v0 = vpop.eup %13448  ;;  %v4183_v33 = vld [vmem:[%s17062_s10 + $0xa0] sm:$0xff] }
 0x943   : > { %12297 = vmatprep.subr.bf16.mxu1 %v13073_v19  ;;  %v2145_v6 = vadd.f32 1.0, %v13449_v0  ;;  %v4184_v19 = vld [vmem:[%s17062_s10 + $0xa8] sm:$0xff] }
 0x944   : > { %4052 = vmatmul.mubr.bf16.vlgmr.msra.gmra.mrb[52].mxu0 %v2285_v24  ;;  %v10910_v23 = vcombine.high %v4180_v18, %v4184_v19  ;;  %v4191_v24 = vld [vmem:[%s17062_s10 + $0x160] sm:$0xff] }
 0x945   : > { %4092 = vmatmul.mubr.bf16.vlgmr.msra.gmra.mrb[44].mxu1 %v2287_v55  ;;  %12276 = vmatpush3.bf16.msra.mxu0 %v13074_v21  ;;  %v13451_v15 = vpop.eup %13450  ;;  %v2153_v4 = vmul.f32 %v2145_v6, %v2089_v39  ;;  %v10908_v21 = vcombine.high %v4179_v57, %v4183_v33  ;;  %v4192_v55 = vld [vmem:[%s17062_s10 + $0x168] sm:$0xff]  ;;  %v10916_v25 = vcombine.high %v4187_v35, %v4191_v24  ;;  %v4227_v39 = vld [vmem:[%s17062_s10 + $0x4c0] sm:$0xff] }
 0x946   : > { %4131 = vmatprep.mubr.bf16.mxu0 %v2290_v41  ;;  %12298 = vmatpush3.bf16.msra.mxu1 %v13075_v9  ;;  %v2147_v17 = vadd.f32 1.0, %v13451_v15  ;;  %v4188_v9 = vld [vmem:[%s17062_s10 + $0x108] sm:$0xff]  ;;  %v10915_v52 = vcombine.low %v4187_v35, %v4191_v24 }
 0x947   : > { %4171 = vmatprep.mubr.bf16.mxu1 %v2292_v30  ;;  %12277 = vmatprep.subr.bf16.mxu0 %v13076_v11  ;;  %v10907_v11 = vcombine.low %v4179_v57, %v4183_v33  ;;  %v2289_v41 = vpack.c.bf16 %v2153_v4, %v2153_v4  ;;  %v4224_v6 = vld [vmem:[%s17062_s10 + $0x468] sm:$0xff] }
 0x948   : > { %12299 = vmatprep.subr.bf16.mxu1 %v13077_v27  ;;  %v2155_v22 = vmul.f32 %v2147_v17, %v2091_v36  ;;  %v10909_v27 = vcombine.low %v4180_v18, %v4184_v19  ;;  %v4231_v18 = vld [vmem:[%s17062_s10 + $0x520] sm:$0xff]  ;;  %v4228_v19 = vld [vmem:[%s17062_s10 + $0x4c8] sm:$0xff] }
 0x949   : > { %12278 = vmatpush3.bf16.msra.mxu0 %v13078_v26  ;;  %v10918_v26 = vcombine.high %v4188_v9, %v4192_v55  ;;  %v4232_v36 = vld [vmem:[%s17062_s10 + $0x528] sm:$0xff]  ;;  %v10956_v4 = vcombine.high %v4227_v39, %v4231_v18 }
 0x94a   : > { %12300 = vmatpush3.bf16.msra.mxu1 %v13079_v45  ;;  %12279 = vmatprep.subr.bf16.mxu0 %v13080_v31  ;;  %v2291_v30 = vpack.c.bf16 %v2155_v22, %v2155_v22  ;;  %v4199_v45 = vld [vmem:[%s17062_s10 + $0x220] sm:$0xff]  ;;  %v4196_v31 = vld [vmem:[%s17062_s10 + $0x1c8] sm:$0xff] }
 0x94b   : > { %12301 = vmatprep.subr.bf16.mxu1 %v13081_v51  ;;  %v4200_v51 = vld [vmem:[%s17062_s10 + $0x228] sm:$0xff]  ;;  %v10924_v28 = vcombine.high %v4195_v38, %v4199_v45  ;;  %v4235_v22 = vld [vmem:[%s17062_s10 + $0x580] sm:$0xff] }
 0x94c   : > { %v4236_v35 = vld [vmem:[%s17062_s10 + $0x588] sm:$0xff] }
 0x94d   : > { %12280 = vmatpush3.bf16.msra.mxu0 %v13082_v53  ;;  %v10917_v53 = vcombine.low %v4188_v9, %v4192_v55  ;;  %v4240_v24 = vld [vmem:[%s17062_s10 + $0x5e8] sm:$0xff]  ;;  %v10955_v9 = vcombine.low %v4227_v39, %v4231_v18  ;;  %v10957_v55 = vcombine.low %v4228_v19, %v4232_v36 }
 0x94e   : > { %12302 = vmatpush3.bf16.msra.mxu1 %v13083_v32  ;;  %12281 = vmatprep.subr.bf16.mxu0 %v13084_v61  ;;  %v10926_v32 = vcombine.high %v4196_v31, %v4200_v51  ;;  %v4203_v61 = vld [vmem:[%s17062_s10 + $0x280] sm:$0xff] }
 0x94f   : > { %12303 = vmatprep.subr.bf16.mxu1 %v13085_v46  ;;  %v4207_v46 = vld [vmem:[%s17062_s10 + $0x2e0] sm:$0xff] }
 0x951   : > { %12282 = vmatpush3.bf16.msra.mxu0 %v13086_v37  ;;  %v4204_v37 = vld [vmem:[%s17062_s10 + $0x288] sm:$0xff] }
 0x952   : > { %12304 = vmatpush3.bf16.msra.mxu1 %v13087_v63  ;;  %12283 = vmatprep.subr.bf16.mxu0 %v13088_v3  ;;  %v4208_v63 = vld [vmem:[%s17062_s10 + $0x2e8] sm:$0xff]  ;;  %v10923_v3 = vcombine.low %v4195_v38, %v4199_v45  ;;  %v10965_v45 = vcombine.low %v4236_v35, %v4240_v24 }
 0x953   : > { %12305 = vmatprep.subr.bf16.mxu1 %v13089_v43  ;;  %v10925_v43 = vcombine.low %v4196_v31, %v4200_v51  ;;  %v10933_v0 = vcombine.low %v4204_v37, %v4208_v63 }
 0x955   : > { %12284 = vmatpush3.bf16.msra.mxu0 %v13090_v5  ;;  %v10932_v5 = vcombine.high %v4203_v61, %v4207_v46 }
 0x956   : > { %12306 = vmatpush3.bf16.msra.mxu1 %v13091_v8  ;;  %12285 = vmatprep.subr.bf16.mxu0 %v13092_v34  ;;  %v10934_v8 = vcombine.high %v4204_v37, %v4208_v63  ;;  %v4211_v34 = vld [vmem:[%s17062_s10 + $0x340] sm:$0xff] }
 0x957   : > { %12307 = vmatprep.subr.bf16.mxu1 %v13093_v10  ;;  %v4215_v10 = vld [vmem:[%s17062_s10 + $0x3a0] sm:$0xff] }
 0x959   : > { %12286 = vmatpush3.bf16.msra.mxu0 %v13094_v44  ;;  %v4212_v44 = vld [vmem:[%s17062_s10 + $0x348] sm:$0xff] }
 0x95a   : > { %12308 = vmatpush3.bf16.msra.mxu1 %v13095_v12  ;;  %12287 = vmatprep.subr.bf16.mxu0 %v13096_v14  ;;  %v4216_v12 = vld [vmem:[%s17062_s10 + $0x3a8] sm:$0xff]  ;;  %v10931_v14 = vcombine.low %v4203_v61, %v4207_v46 }
 0x95b   : > { %12309 = vmatprep.subr.bf16.mxu1 %v13097_v49  ;;  %v10940_v49 = vcombine.high %v4211_v34, %v4215_v10  ;;  %v10942_v15 = vcombine.high %v4212_v44, %v4216_v12  ;;  %v10941_v17 = vcombine.low %v4212_v44, %v4216_v12 }
 0x95d   : > { %12288 = vmatpush3.bf16.msra.mxu0 %v13098_v50  ;;  %v4219_v50 = vld [vmem:[%s17062_s10 + $0x400] sm:$0xff] }
 0x95e   : > { %12310 = vmatpush3.bf16.msra.mxu1 %v13099_v16  ;;  %12289 = vmatprep.subr.bf16.mxu0 %v13100_v2  ;;  %v4223_v16 = vld [vmem:[%s17062_s10 + $0x460] sm:$0xff]  ;;  %v4220_v2 = vld [vmem:[%s17062_s10 + $0x408] sm:$0xff] }
 0x95f   : > { %12311 = vmatprep.subr.bf16.mxu1 %v13101_v7  ;;  %v10939_v7 = vcombine.low %v4211_v34, %v4215_v10  ;;  %v10948_v57 = vcombine.high %v4219_v50, %v4223_v16  ;;  %v10950_v33 = vcombine.high %v4220_v2, %v4224_v6 }
 0x961   : > { %12290 = vmatpush3.bf16.msra.mxu0 %v13102_v20  ;;  %v10947_v20 = vcombine.low %v4219_v50, %v4223_v16 }
 0x962   : > { %12312 = vmatpush3.bf16.msra.mxu1 %v13103_v54  ;;  %4605 = vmatprep.subr.bf16.mxu0 %v10908_v21  ;;  %v10949_v54 = vcombine.low %v4220_v2, %v4224_v6  ;;  %v10958_v21 = vcombine.high %v4228_v19, %v4232_v36 }
 0x963   : > { %4646 = vmatprep.subr.bf16.mxu1 %v10910_v23  ;;  %v4239_v23 = vld [vmem:[%s17062_s10 + $0x5e0] sm:$0xff] }
 0x964   : > { %4132 = vmatmul.mubr.bf16.vlgmr.msra.gmra.mrb[56].mxu0 %v2289_v41  ;;  %v10966_v41 = vcombine.high %v4236_v35, %v4240_v24  ;;  %v10963_v38 = vcombine.low %v4235_v22, %v4239_v23 }
 0x965   : > { %4172 = vmatmul.mubr.bf16.vlgmr.msra.gmra.mrb[48].mxu1 %v2291_v30  ;;  %4606 = vmatpush1.bf16.msra.mxu0 %v10907_v11  ;;  %v10964_v11 = vcombine.high %v4235_v22, %v4239_v23  ;;  %v4182_v30 = vld [vmem:[%s17062_s10 + $0x58] sm:$0xff] }
 0x966   : > { %4647 = vmatpush1.bf16.msra.mxu1 %v10909_v27  ;;  %4607 = vmatprep.subr.bf16.mxu0 %v10916_v25  ;;  %v4181_v27 = vld [vmem:[%s17062_s10 + $0x50] sm:$0xff] }
 0x967   : > { %4648 = vmatprep.subr.bf16.mxu1 %v10918_v26  ;;  %4637 = vmatprep.mubr.bf16.mxu0 %v13605_v29  ;;  %v4185_v25 = vld [vmem:[%s17062_s10 + $0xb0] sm:$0xff]  ;;  %v4186_v26 = vld [vmem:[%s17062_s10 + $0xb8] sm:$0xff] }
 0x968   : > { %4678 = vmatprep.mubr.bf16.mxu1 %v13605_v29  ;;  %v10912_v31 = vcombine.high %v4181_v27, %v4185_v25  ;;  %v10914_v51 = vcombine.high %v4182_v30, %v4186_v26  ;;  %v10911_v61 = vcombine.low %v4181_v27, %v4185_v25  ;;  %v10913_v46 = vcombine.low %v4182_v30, %v4186_v26 }
 0x969   : > { %4608 = vmatpush1.bf16.msra.mxu0 %v10915_v52  ;;  %v4189_v52 = vld [vmem:[%s17062_s10 + $0x110] sm:$0xff] }
 0x96a   : > { %4649 = vmatpush1.bf16.msra.mxu1 %v10917_v53  ;;  %4609 = vmatprep.subr.bf16.mxu0 %v10924_v28  ;;  %v4193_v53 = vld [vmem:[%s17062_s10 + $0x170] sm:$0xff]  ;;  %v4190_v28 = vld [vmem:[%s17062_s10 + $0x118] sm:$0xff] }
 0x96b   : > { %4650 = vmatprep.subr.bf16.mxu1 %v10926_v32  ;;  %v4194_v32 = vld [vmem:[%s17062_s10 + $0x178] sm:$0xff]  ;;  %v10920_v37 = vcombine.high %v4189_v52, %v4193_v53  ;;  %v10919_v34 = vcombine.low %v4189_v52, %v4193_v53 }
 0x96c   : > { %v10922_v63 = vcombine.high %v4190_v28, %v4194_v32  ;;  %v10921_v10 = vcombine.low %v4190_v28, %v4194_v32 }
 0x96d   : > { %4610 = vmatpush1.bf16.msra.mxu0 %v10923_v3  ;;  %v4197_v3 = vld [vmem:[%s17062_s10 + $0x1d0] sm:$0xff] }
 0x96e   : > { %4651 = vmatpush1.bf16.msra.mxu1 %v10925_v43  ;;  %4611 = vmatprep.subr.bf16.mxu0 %v10932_v5  ;;  %v4201_v43 = vld [vmem:[%s17062_s10 + $0x230] sm:$0xff]  ;;  %v4198_v5 = vld [vmem:[%s17062_s10 + $0x1d8] sm:$0xff] }
 0x96f   : > { %4652 = vmatprep.subr.bf16.mxu1 %v10934_v8  ;;  %v4202_v8 = vld [vmem:[%s17062_s10 + $0x238] sm:$0xff]  ;;  %v10928_v44 = vcombine.high %v4197_v3, %v4201_v43  ;;  %v10927_v50 = vcombine.low %v4197_v3, %v4201_v43  ;;  %v13105_v3 = vld [vmem:[%s17064_s12 + $0x4c0] sm:$0xff]  }
 0x970   : > { %v10930_v12 = vcombine.high %v4198_v5, %v4202_v8  ;;  %v10929_v16 = vcombine.low %v4198_v5, %v4202_v8  ;;  %v13106_v8 = vld [vmem:[%s17064_s12 + $0x400] sm:$0xff]  }
 0x971   : > { %4612 = vmatpush1.bf16.msra.mxu0 %v10931_v14  ;;  %v4205_v14 = vld [vmem:[%s17062_s10 + $0x290] sm:$0xff] }
 0x972   : > { %4653 = vmatpush1.bf16.msra.mxu1 %v10933_v0  ;;  %4613 = vmatprep.subr.bf16.mxu0 %v10940_v49  ;;  %v4209_v0 = vld [vmem:[%s17062_s10 + $0x2f0] sm:$0xff]  ;;  %v4206_v49 = vld [vmem:[%s17062_s10 + $0x298] sm:$0xff] }
 0x973   : > { %4654 = vmatprep.subr.bf16.mxu1 %v10942_v15  ;;  %v4210_v15 = vld [vmem:[%s17062_s10 + $0x2f8] sm:$0xff]  ;;  %v10936_v2 = vcombine.high %v4205_v14, %v4209_v0  ;;  %v10935_v39 = vcombine.low %v4205_v14, %v4209_v0 }
 0x974   : > { %v10938_v6 = vcombine.high %v4206_v49, %v4210_v15  ;;  %v10937_v18 = vcombine.low %v4206_v49, %v4210_v15  ;;  %v13108_v15 = vld [vmem:[%s17064_s12 + $0x448] sm:$0xff]  }
 0x975   : > { %4614 = vmatpush1.bf16.msra.mxu0 %v10939_v7  ;;  %v4213_v7 = vld [vmem:[%s17062_s10 + $0x350] sm:$0xff] }
 0x976   : > { %4655 = vmatpush1.bf16.msra.mxu1 %v10941_v17  ;;  %4615 = vmatprep.subr.bf16.mxu0 %v10948_v57  ;;  %v4217_v17 = vld [vmem:[%s17062_s10 + $0x3b0] sm:$0xff]  ;;  %v4214_v57 = vld [vmem:[%s17062_s10 + $0x358] sm:$0xff] }
 0x977   : > { %4656 = vmatprep.subr.bf16.mxu1 %v10950_v33  ;;  %v4218_v33 = vld [vmem:[%s17062_s10 + $0x3b8] sm:$0xff]  ;;  %v10944_v19 = vcombine.high %v4213_v7, %v4217_v17  ;;  %v10943_v22 = vcombine.low %v4213_v7, %v4217_v17  ;;  %v13112_v7 = vld [vmem:[%s17064_s12 + $0x450] sm:$0xff]  }
 0x978   : > { %v10946_v36 = vcombine.high %v4214_v57, %v4218_v33  ;;  %v10945_v23 = vcombine.low %v4214_v57, %v4218_v33  ;;  %v13113_v17 = vld [vmem:[%s17064_s12 + $0x4d0] sm:$0xff]  }
 0x979   : > { %4616 = vmatpush1.bf16.msra.mxu0 %v10947_v20  ;;  %v4221_v20 = vld [vmem:[%s17062_s10 + $0x410] sm:$0xff] }
 0x97a   : > { %4657 = vmatpush1.bf16.msra.mxu1 %v10949_v54  ;;  %4617 = vmatprep.subr.bf16.mxu0 %v10956_v4  ;;  %v4225_v54 = vld [vmem:[%s17062_s10 + $0x470] sm:$0xff]  ;;  %v4222_v4 = vld [vmem:[%s17062_s10 + $0x418] sm:$0xff] }
 0x97b   : > { %4658 = vmatprep.subr.bf16.mxu1 %v10958_v21  ;;  %v4226_v21 = vld [vmem:[%s17062_s10 + $0x478] sm:$0xff]  ;;  %v10952_v35 = vcombine.high %v4221_v20, %v4225_v54  ;;  %v10951_v27 = vcombine.low %v4221_v20, %v4225_v54  ;;  %v13114_v57 = vld [vmem:[%s17064_s12 + $0x410] sm:$0xff]   ;;  %v13120_v20 = vld [vmem:[%s17064_s12 + $0x460] sm:$0xff]  }
 0x97c   : > { %v10954_v24 = vcombine.high %v4222_v4, %v4226_v21  ;;  %v10953_v25 = vcombine.low %v4222_v4, %v4226_v21  ;;  %v13115_v33 = vld [vmem:[%s17064_s12 + $0x490] sm:$0xff]   ;;  %v13121_v54 = vld [vmem:[%s17064_s12 + $0x4e0] sm:$0xff]  }
 0x97d   : > { %4618 = vmatpush1.bf16.msra.mxu0 %v10955_v9  ;;  %v4229_v9 = vld [vmem:[%s17062_s10 + $0x4d0] sm:$0xff]  ;;  %v13122_v4 = vld [vmem:[%s17064_s12 + $0x420] sm:$0xff]  }
 0x97e   : > { %4659 = vmatpush1.bf16.msra.mxu1 %v10957_v55  ;;  %4619 = vmatprep.subr.bf16.mxu0 %v10964_v11  ;;  %v4233_v55 = vld [vmem:[%s17062_s10 + $0x530] sm:$0xff]  ;;  %v4230_v11 = vld [vmem:[%s17062_s10 + $0x4d8] sm:$0xff]  ;;  %v13123_v21 = vld [vmem:[%s17064_s12 + $0x4a0] sm:$0xff]  }
 0x97f   : > { %4660 = vmatprep.subr.bf16.mxu1 %v10966_v41  ;;  %v4234_v41 = vld [vmem:[%s17062_s10 + $0x538] sm:$0xff]  ;;  %v10960_v30 = vcombine.high %v4229_v9, %v4233_v55  ;;  %v10959_v52 = vcombine.low %v4229_v9, %v4233_v55  ;;  %v13128_v9 = vld [vmem:[%s17064_s12 + $0x470] sm:$0xff]  }
 0x980   : > { %v10962_v26 = vcombine.high %v4230_v11, %v4234_v41  ;;  %v10961_v53 = vcombine.low %v4230_v11, %v4234_v41  ;;  %v13129_v55 = vld [vmem:[%s17064_s12 + $0x4f0] sm:$0xff]  }
 0x981   : > { %4620 = vmatpush1.bf16.msra.mxu0 %v10963_v38  ;;  %v4237_v38 = vld [vmem:[%s17062_s10 + $0x590] sm:$0xff] }
 0x982   : > { %4661 = vmatpush1.bf16.msra.mxu1 %v10965_v45  ;;  %4687 = vmatprep.subr.bf16.mxu0 %v10912_v31  ;;  %v4241_v45 = vld [vmem:[%s17062_s10 + $0x5f0] sm:$0xff]  ;;  %v4238_v31 = vld [vmem:[%s17062_s10 + $0x598] sm:$0xff] }
 0x983   : > { %4728 = vmatprep.subr.bf16.mxu1 %v10914_v51  ;;  %v4242_v51 = vld [vmem:[%s17062_s10 + $0x5f8] sm:$0xff]  ;;  %v10968_v28 = vcombine.high %v4237_v38, %v4241_v45  ;;  %v13130_v11 = vld [vmem:[%s17064_s12 + $0x430] sm:$0xff]  }
 0x984   : > { %4638 = vmatmul.mubr.bf16.vlgmr.msra.gmra.mrb[60].mxu0 %v14121_v48  ;;  %v10970_v32 = vcombine.high %v4238_v31, %v4242_v51  ;;  %v13131_v41 = vld [vmem:[%s17064_s12 + $0x4b0] sm:$0xff]  }
 0x985   : > { %4679 = vmatmul.mubr.bf16.vlgmr.msra.gmra.mrb[52].mxu1 %v14121_v48  ;;  %4688 = vmatpush1.bf16.msra.mxu0 %v10911_v61  ;;  %v10967_v61 = vcombine.low %v4237_v38, %v4241_v45  ;;  %v13136_v45 = vld [vmem:[%s17064_s12 + $0x540] sm:$0xff]  }
 0x986   : > { %4729 = vmatpush1.bf16.msra.mxu1 %v10913_v46  ;;  %4689 = vmatprep.subr.bf16.mxu0 %v10920_v37  ;;  %v10969_v46 = vcombine.low %v4238_v31, %v4242_v51  ;;  %v13137_v31 = vld [vmem:[%s17064_s12 + $0x5c0] sm:$0xff]  }
 0x987   : > { %4730 = vmatprep.subr.bf16.mxu1 %v10922_v63  ;;  %4719 = vmatprep.mubr.bf16.mxu0 %v13605_v29  ;;  %v13104_v63 = vld [vmem:[%s17064_s12 + $0x440] sm:$0xff]  }
 0x988   : > { %4760 = vmatprep.mubr.bf16.mxu1 %v13605_v29 }
 0x989   : > { %4690 = vmatpush1.bf16.msra.mxu0 %v10919_v34  ;;  %v13107_v34 = vld [vmem:[%s17064_s12 + $0x480] sm:$0xff]  }
 0x98a   : > { %4731 = vmatpush1.bf16.msra.mxu1 %v10921_v10  ;;  %4691 = vmatprep.subr.bf16.mxu0 %v10928_v44 }
 0x98b   : > { %4732 = vmatprep.subr.bf16.mxu1 %v10930_v12 }
 0x98d   : > { %4692 = vmatpush1.bf16.msra.mxu0 %v10927_v50  ;;  %v13109_v50 = vld [vmem:[%s17064_s12 + $0x4c8] sm:$0xff]  }
 0x98e   : > { %4733 = vmatpush1.bf16.msra.mxu1 %v10929_v16  ;;  %4693 = vmatprep.subr.bf16.mxu0 %v10936_v2  ;;  %v13110_v2 = vld [vmem:[%s17064_s12 + $0x408] sm:$0xff]  }
 0x98f   : > { %4734 = vmatprep.subr.bf16.mxu1 %v10938_v6  ;;  %v13111_v6 = vld [vmem:[%s17064_s12 + $0x488] sm:$0xff]  }
 0x991   : > { %4694 = vmatpush1.bf16.msra.mxu0 %v10935_v39  ;;  %v13116_v39 = vld [vmem:[%s17064_s12 + $0x458] sm:$0xff]  }
 0x992   : > { %4735 = vmatpush1.bf16.msra.mxu1 %v10937_v18  ;;  %4695 = vmatprep.subr.bf16.mxu0 %v10944_v19  ;;  %v13117_v18 = vld [vmem:[%s17064_s12 + $0x4d8] sm:$0xff]  }
 0x993   : > { %4736 = vmatprep.subr.bf16.mxu1 %v10946_v36  ;;  %v13118_v19 = vld [vmem:[%s17064_s12 + $0x418] sm:$0xff]  }
 0x994   : > { %v13119_v36 = vld [vmem:[%s17064_s12 + $0x498] sm:$0xff]  }
 0x995   : > { %4696 = vmatpush1.bf16.msra.mxu0 %v10943_v22  ;;  %v13124_v22 = vld [vmem:[%s17064_s12 + $0x468] sm:$0xff]  }
 0x996   : > { %4737 = vmatpush1.bf16.msra.mxu1 %v10945_v23  ;;  %4697 = vmatprep.subr.bf16.mxu0 %v10952_v35  ;;  %v13125_v23 = vld [vmem:[%s17064_s12 + $0x4e8] sm:$0xff]  }
 0x997   : > { %4738 = vmatprep.subr.bf16.mxu1 %v10954_v24  ;;  %v13126_v35 = vld [vmem:[%s17064_s12 + $0x428] sm:$0xff]  }
 0x998   : > { %v13127_v24 = vld [vmem:[%s17064_s12 + $0x4a8] sm:$0xff]  }
 0x999   : > { %4698 = vmatpush1.bf16.msra.mxu0 %v10951_v27  ;;  %v13132_v27 = vld [vmem:[%s17064_s12 + $0x478] sm:$0xff]  }
 0x99a   : > { %4739 = vmatpush1.bf16.msra.mxu1 %v10953_v25  ;;  %4699 = vmatprep.subr.bf16.mxu0 %v10960_v30  ;;  %v13133_v25 = vld [vmem:[%s17064_s12 + $0x4f8] sm:$0xff]  }
 0x99b   : > { %4740 = vmatprep.subr.bf16.mxu1 %v10962_v26  ;;  %v13134_v30 = vld [vmem:[%s17064_s12 + $0x438] sm:$0xff]  }
 0x99c   : > { %v13135_v26 = vld [vmem:[%s17064_s12 + $0x4b8] sm:$0xff]  }
 0x99d   : > { %4700 = vmatpush1.bf16.msra.mxu0 %v10959_v52 }
 0x99e   : > { %4741 = vmatpush1.bf16.msra.mxu1 %v10961_v53  ;;  %4701 = vmatprep.subr.bf16.mxu0 %v10968_v28 }
 0x99f   : > { %4742 = vmatprep.subr.bf16.mxu1 %v10970_v32 }
 0x9a1   : > { %4702 = vmatpush1.bf16.msra.mxu0 %v10967_v61 }
 0x9a2   : > { %4743 = vmatpush1.bf16.msra.mxu1 %v10969_v46  ;;  %12319 = vmatprep.subr.bf16.mxu0 %v13104_v63 }
 0x9a3   : > { %12341 = vmatprep.subr.bf16.mxu1 %v13105_v3 }
 0x9a4   : > { %4720 = vmatmul.mubr.bf16.vlgmr.msra.gmra.mrb[64].mxu0 %v14121_v48 }
 0x9a5   : > { %4761 = vmatmul.mubr.bf16.vlgmr.msra.gmra.mrb[56].mxu1 %v14121_v48  ;;  %12320 = vmatpush3.bf16.msra.mxu0 %v13106_v8 }
 0x9a6   : > { %12342 = vmatpush3.bf16.msra.mxu1 %v13107_v34  ;;  %12321 = vmatprep.subr.bf16.mxu0 %v13108_v15 }
 0x9a7   : > { %12343 = vmatprep.subr.bf16.mxu1 %v13109_v50 }
 0x9a9   : > { %12322 = vmatpush3.bf16.msra.mxu0 %v13110_v2 }
 0x9aa   : > { %12344 = vmatpush3.bf16.msra.mxu1 %v13111_v6  ;;  %12323 = vmatprep.subr.bf16.mxu0 %v13112_v7 }
 0x9ab   : > { %12345 = vmatprep.subr.bf16.mxu1 %v13113_v17 }
 0x9ad   : > { %12324 = vmatpush3.bf16.msra.mxu0 %v13114_v57 }
 0x9ae   : > { %12346 = vmatpush3.bf16.msra.mxu1 %v13115_v33  ;;  %12325 = vmatprep.subr.bf16.mxu0 %v13116_v39 }
 0x9af   : > { %12347 = vmatprep.subr.bf16.mxu1 %v13117_v18 }
 0x9b1   : > { %12326 = vmatpush3.bf16.msra.mxu0 %v13118_v19 }
 0x9b2   : > { %12348 = vmatpush3.bf16.msra.mxu1 %v13119_v36  ;;  %12327 = vmatprep.subr.bf16.mxu0 %v13120_v20 }
 0x9b3   : > { %12349 = vmatprep.subr.bf16.mxu1 %v13121_v54  ;;  %v15254_v54 = vld [vmem:[%s17063_s11 + $0x10] sm:$0xff] }
 0x9b5   : > { %12328 = vmatpush3.bf16.msra.mxu0 %v13122_v4  ;;  %v4248_v4 = vrot.slane %v15254_v54, %v13861_v40 }
 0x9b6   : > { %12350 = vmatpush3.bf16.msra.mxu1 %v13123_v21  ;;  %12329 = vmatprep.subr.bf16.mxu0 %v13124_v22  ;;  %v4256_v21 = vrot.slane %v15254_v54, %v13883_v58  ;;  %v4252_v22 = vrot.slane %v15254_v54, %v13867_v42 }
 0x9b7   : > { %12351 = vmatprep.subr.bf16.mxu1 %v13125_v23  ;;  %v4260_v23 = vrot.slane %v15254_v54, %v14521_v56 }
 0x9b9   : > { %12330 = vmatpush3.bf16.msra.mxu0 %v13126_v35 }
 0x9ba   : > { %12352 = vmatpush3.bf16.msra.mxu1 %v13127_v24  ;;  %12331 = vmatprep.subr.bf16.mxu0 %v13128_v9 }
 0x9bb   : > { %12353 = vmatprep.subr.bf16.mxu1 %v13129_v55 }
 0x9bd   : > { %12332 = vmatpush3.bf16.msra.mxu0 %v13130_v11 }
 0x9be   : > { %12354 = vmatpush3.bf16.msra.mxu1 %v13131_v41  ;;  %12333 = vmatprep.subr.bf16.mxu0 %v13132_v27 }
 0x9bf   : > { %12355 = vmatprep.subr.bf16.mxu1 %v13133_v25 }
 0x9c1   : > { %12334 = vmatpush3.bf16.msra.mxu0 %v13134_v30 }
 0x9c2   : > { %12356 = vmatpush3.bf16.msra.mxu1 %v13135_v26  ;;  %12363 = vmatprep.subr.bf16.mxu0 %v13136_v45 }
 0x9c3   : > { %12385 = vmatprep.subr.bf16.mxu1 %v13137_v31 }
 0x9d7   : > { %v12159_v37 = vpop.f32.mrb[44].mxu0 }
 0x9d8   : > { %v12181_v43 = vpop.f32.mrb[36].mxu1  ;;  %v12160_v5 = vpop.f32.mrb[45].mxu0 }
 0x9d9   : > { %v12161_v48 = vadd.f32 %v12160_v5, %v12159_v37  ;;  %v12182_v10 = vpop.f32.mrb[37].mxu1  ;;  %v12162_v44 = vpop.f32.mrb[46].mxu0 }
 0x9da   : > { %v12183_v12 = vadd.f32 %v12182_v10, %v12181_v43  ;;  %v12184_v14 = vpop.f32.mrb[38].mxu1  ;;  %v12163_v0 = vpop.f32.mrb[47].mxu0 }
 0x9db   : > { %v12185_v49 = vpop.f32.mrb[39].mxu1 }
 0x9dc   : > { %v15162_v16 = vadd.f32 %v12183_v12, %v12161_v48 }
 0x9f7   : > { %v12203_v38 = vpop.f32.mrb[48].mxu0 }
 0x9f8   : > { %v12225_v51 = vpop.f32.mrb[40].mxu1  ;;  %v12204_v52 = vpop.f32.mrb[49].mxu0 }
 0x9f9   : > { %v12205_v53 = vadd.f32 %v12204_v52, %v12203_v38  ;;  %v12226_v28 = vpop.f32.mrb[41].mxu1  ;;  %v12206_v32 = vpop.f32.mrb[50].mxu0 }
 0x9fa   : > { %v12227_v61 = vadd.f32 %v12226_v28, %v12225_v51  ;;  %v12228_v46 = vpop.f32.mrb[42].mxu1  ;;  %v12207_v37 = vpop.f32.mrb[51].mxu0 }
 0x9fb   : > { %v3590_v63 = vadd.f32 %v12205_v53, %v15162_v16  ;;  %v12229_v3 = vpop.f32.mrb[43].mxu1 }
 0x9fd   : > { %v3630_v43 = vadd.f32 %v12227_v61, %v3590_v63 }
 0xa17   : > { %v12247_v5 = vpop.f32.mrb[52].mxu0 }
 0xa18   : > { %v12269_v8 = vpop.f32.mrb[44].mxu1  ;;  %v12248_v34 = vpop.f32.mrb[53].mxu0 }
 0xa19   : > { %v12249_v48 = vadd.f32 %v12248_v34, %v12247_v5  ;;  %v12270_v10 = vpop.f32.mrb[45].mxu1  ;;  %v12250_v44 = vpop.f32.mrb[54].mxu0 }
 0xa1a   : > { %v12271_v12 = vadd.f32 %v12270_v10, %v12269_v8  ;;  %v12272_v14 = vpop.f32.mrb[46].mxu1  ;;  %v12251_v0 = vpop.f32.mrb[55].mxu0 }
 0xa1b   : > { %v4054_v49 = vadd.f32 %v12249_v48, %v3630_v43  ;;  %v12273_v15 = vpop.f32.mrb[47].mxu1 }
 0xa1d   : > { %v4094_v50 = vadd.f32 %v12271_v12, %v4054_v49 }
 0xa37   : > { %v12291_v2 = vpop.f32.mrb[56].mxu0 }
 0xa38   : > { %v12313_v6 = vpop.f32.mrb[48].mxu1  ;;  %v12292_v7 = vpop.f32.mrb[57].mxu0 }
 0xa39   : > { %v12293_v17 = vadd.f32 %v12292_v7, %v12291_v2  ;;  %v12314_v57 = vpop.f32.mrb[49].mxu1  ;;  %v12294_v16 = vpop.f32.mrb[58].mxu0 }
 0xa3a   : > { %v12315_v33 = vadd.f32 %v12314_v57, %v12313_v6  ;;  %v12316_v39 = vpop.f32.mrb[50].mxu1  ;;  %v12295_v18 = vpop.f32.mrb[59].mxu0 }
 0xa3b   : > { %v4134_v19 = vadd.f32 %v12293_v17, %v4094_v50  ;;  %v12317_v36 = vpop.f32.mrb[51].mxu1 }
 0xa3d   : > { %v15249_v20 = vadd.f32 %v12315_v33, %v4134_v19 }
 0xa57   : > { %v4639_v35 = vpop.f32.mrb[60].mxu0 }
 0xa58   : > { %v4640_v24 = vadd.f32 %v4639_v35, %v4248_v4  ;;  %v4680_v9 = vpop.f32.mrb[52].mxu1  ;;  %v4641_v55 = vpop.f32.mrb[61].mxu0  ;;  %v4268_v35 = vrot.slane %v15254_v54, %v14555_v62 }
 0xa59   : > { %v4681_v11 = vadd.f32 %v4680_v9, %v4256_v21  ;;  %v4642_v41 = vadd.f32 %v4641_v55, %v4252_v22  ;;  %v4682_v27 = vpop.f32.mrb[53].mxu1  ;;  %v4643_v25 = vpop.f32.mrb[62].mxu0  ;;  %v4264_v21 = vrot.slane %v15254_v54, %v14549_v59 }
 0xa5a   : > { %v4777_v30 = vmul.f32 %v4640_v24, %v4640_v24  ;;  %v4683_v26 = vadd.f32 %v4682_v27, %v4260_v23  ;;  %v4684_v38 = vpop.f32.mrb[54].mxu1  ;;  %v4644_v45 = vpop.f32.mrb[63].mxu0  ;;  %v4769_v2 = vmul.f32 0.5, %v4640_v24  ;;  %v4272_v23 = vrot.slane %v15254_v54, %v14552_v60  ;;  %v13140_v27 = vld [vmem:[%s17064_s12 + $0x548] sm:$0xff]  }
 0xa5b   : > { %v4779_v31 = vmul.f32 %v4681_v11, %v4681_v11  ;;  %v4778_v51 = vmul.f32 %v4642_v41, %v4642_v41  ;;  %v4685_v52 = vpop.f32.mrb[55].mxu1  ;;  %v4771_v17 = vmul.f32 0.5, %v4681_v11  ;;  %v4770_v57 = vmul.f32 0.5, %v4642_v41 }
 0xa5c   : > { %v4785_v53 = vmul.f32 %v4777_v30, %v4640_v24  ;;  %v4780_v28 = vmul.f32 %v4683_v26, %v4683_v26  ;;  %v4772_v33 = vmul.f32 0.5, %v4683_v26 }
 0xa5d   : > { %v4787_v32 = vmul.f32 %v4779_v31, %v4681_v11  ;;  %v4786_v61 = vmul.f32 %v4778_v51, %v4642_v41 }
 0xa5e   : > { %v4793_v46 = vmul.f32 0.044715, %v4785_v53  ;;  %v4788_v37 = vmul.f32 %v4780_v28, %v4683_v26  ;;  %v13142_v28 = vld [vmem:[%s17064_s12 + $0x508] sm:$0xff]  }
 0xa5f   : > { %v4795_v63 = vmul.f32 0.044715, %v4787_v32  ;;  %v4794_v3 = vmul.f32 0.044715, %v4786_v61 }
 0xa60   : > { %v4801_v43 = vadd.f32 %v4793_v46, %v4640_v24  ;;  %v4796_v5 = vmul.f32 0.044715, %v4788_v37  ;;  %v13138_v24 = vld [vmem:[%s17064_s12 + $0x500] sm:$0xff]  }
 0xa61   : > { %v4803_v8 = vadd.f32 %v4795_v63, %v4681_v11  ;;  %v4802_v34 = vadd.f32 %v4794_v3, %v4642_v41  ;;  %v4276_v11 = vrot.slane %v15254_v54, %v14560_v13  ;;  %v13139_v41 = vld [vmem:[%s17064_s12 + $0x580] sm:$0xff]   ;;  %v13143_v63 = vld [vmem:[%s17064_s12 + $0x588] sm:$0xff]   ;;  %v13144_v3 = vld [vmem:[%s17064_s12 + $0x550] sm:$0xff]  }
 0xa62   : > { %v4809_v48 = vmul.f32 0.7978846, %v4801_v43  ;;  %v4804_v10 = vadd.f32 %v4796_v5, %v4683_v26  ;;  %v13141_v26 = vld [vmem:[%s17064_s12 + $0x5c8] sm:$0xff]  }
 0xa63   : > { %v4811_v44 = vmul.f32 0.7978846, %v4803_v8  ;;  %v4810_v12 = vmul.f32 0.7978846, %v4802_v34  ;;  %v13145_v34 = vld [vmem:[%s17064_s12 + $0x5d0] sm:$0xff]  }
 0xa64   : > { %13452 = vtanh.f32 %v4809_v48  ;;  %v4812_v14 = vmul.f32 0.7978846, %v4804_v10 }
 0xa65   : > { %13454 = vtanh.f32 %v4811_v44 }
 0xa66   : > { %13456 = vtanh.f32 %v4810_v12 }
 0xa67   : > { %13458 = vtanh.f32 %v4812_v14  ;;  %v13146_v14 = vld [vmem:[%s17064_s12 + $0x510] sm:$0xff]  }
 0xa6e   : > { %v13453_v0 = vpop.eup %13452 }
 0xa6f   : > { %v13455_v49 = vpop.eup %13454  ;;  %v4825_v15 = vadd.f32 1.0, %v13453_v0 }
 0xa70   : > { %v13457_v50 = vpop.eup %13456  ;;  %v4827_v6 = vadd.f32 1.0, %v13455_v49 }
 0xa71   : > { %v13459_v7 = vpop.eup %13458  ;;  %v4826_v16 = vadd.f32 1.0, %v13457_v50  ;;  %v4833_v18 = vmul.f32 %v4825_v15, %v4769_v2  ;;  %v13147_v15 = vld [vmem:[%s17064_s12 + $0x590] sm:$0xff]   ;;  %v13148_v50 = vld [vmem:[%s17064_s12 + $0x558] sm:$0xff]  }
 0xa72   : > { %v4828_v39 = vadd.f32 1.0, %v13459_v7  ;;  %v4835_v36 = vmul.f32 %v4827_v6, %v4771_v17  ;;  %v13149_v7 = vld [vmem:[%s17064_s12 + $0x5d8] sm:$0xff]  }
 0xa73   : > { %v4834_v19 = vmul.f32 %v4826_v16, %v4770_v57  ;;  %v4969_v55 = vpack.c.bf16 %v4833_v18, %v4833_v18 }
 0xa74   : > { %v4836_v4 = vmul.f32 %v4828_v39, %v4772_v33  ;;  %v4971_v30 = vpack.c.bf16 %v4835_v36, %v4835_v36  ;;  %v13150_v39 = vld [vmem:[%s17064_s12 + $0x518] sm:$0xff]  }
 0xa75   : > { %v4970_v22 = vpack.c.bf16 %v4834_v19, %v4834_v19  ;;  %v13151_v36 = vld [vmem:[%s17064_s12 + $0x598] sm:$0xff]  }
 0xa76   : > { %v4972_v9 = vpack.c.bf16 %v4836_v4, %v4836_v4  ;;  %v13152_v4 = vld [vmem:[%s17064_s12 + $0x560] sm:$0xff]  }
 0xa77   : > { %5393 = vmatprep.mubr.bf16.mxu0 %v4970_v22  ;;  %v4721_v25 = vpop.f32.mrb[64].mxu0 }
 0xa78   : > { %5433 = vmatprep.mubr.bf16.mxu1 %v4972_v9  ;;  %v15284_v38 = vadd.f32 %v4721_v25, %v4264_v21  ;;  %v4762_v45 = vpop.f32.mrb[56].mxu1  ;;  %5394 = vmatmul.mubr.bf16.vlgmr.msra.gmra.mrb[68].mxu0 %v4969_v55  ;;  %v4723_v54 = vpop.f32.mrb[65].mxu0  ;;  %v13155_v9 = vld [vmem:[%s17064_s12 + $0x5a0] sm:$0xff]   ;;  %v13156_v55 = vld [vmem:[%s17064_s12 + $0x568] sm:$0xff]   ;;  %v13160_v25 = vld [vmem:[%s17064_s12 + $0x570] sm:$0xff]  }
 0xa79   : > { %v15286_v31 = vadd.f32 %v4762_v45, %v4272_v23  ;;  %5434 = vmatmul.mubr.bf16.vlgmr.msra.gmra.mrb[60].mxu1 %v4971_v30  ;;  %v15288_v51 = vadd.f32 %v4723_v54, %v4268_v35  ;;  %v4764_v52 = vpop.f32.mrb[57].mxu1  ;;  %12364 = vmatpush3.bf16.msra.mxu0 %v13138_v24  ;;  %v4725_v53 = vpop.f32.mrb[66].mxu0  ;;  %v13153_v23 = vld [vmem:[%s17064_s12 + $0x5e0] sm:$0xff]   ;;  %v13161_v30 = vld [vmem:[%s17064_s12 + $0x5f0] sm:$0xff]  }
 0xa7a   : > { %v4781_v32 = vmul.f32 %v15284_v38, %v15284_v38  ;;  %v15295_v61 = vadd.f32 %v4764_v52, %v4276_v11  ;;  %12386 = vmatpush3.bf16.msra.mxu1 %v13139_v41  ;;  %v4766_v46 = vpop.f32.mrb[58].mxu1  ;;  %v4726_v37 = vpop.f32.mrb[67].mxu0  ;;  %12365 = vmatprep.subr.bf16.mxu0 %v13140_v27  ;;  %v13154_v24 = vld [vmem:[%s17064_s12 + $0x520] sm:$0xff]   ;;  %v13157_v11 = vld [vmem:[%s17064_s12 + $0x5e8] sm:$0xff]   ;;  %v13163_v54 = vld [vmem:[%s17064_s12 + $0x5b0] sm:$0xff]  }
 0xa7b   : > { %v4783_v43 = vmul.f32 %v15286_v31, %v15286_v31  ;;  %v4782_v5 = vmul.f32 %v15288_v51, %v15288_v51  ;;  %v4767_v8 = vpop.f32.mrb[59].mxu1  ;;  %12387 = vmatprep.subr.bf16.mxu1 %v13141_v26  ;;  %v13158_v41 = vld [vmem:[%s17064_s12 + $0x528] sm:$0xff]   ;;  %v13162_v26 = vld [vmem:[%s17064_s12 + $0x530] sm:$0xff]   ;;  %v13164_v52 = vld [vmem:[%s17064_s12 + $0x578] sm:$0xff]   ;;  %v4773_v37 = vmul.f32 0.5, %v15284_v38 }
 0xa7c   : > { %v4789_v48 = vmul.f32 %v4781_v32, %v15284_v38  ;;  %v4784_v10 = vmul.f32 %v15295_v61, %v15295_v61  ;;  %v13159_v27 = vld [vmem:[%s17064_s12 + $0x5a8] sm:$0xff]   ;;  %v4774_v8 = vmul.f32 0.5, %v15288_v51 }
 0xa7d   : > { %v4791_v44 = vmul.f32 %v4783_v43, %v15286_v31  ;;  %v4790_v12 = vmul.f32 %v4782_v5, %v15288_v51  ;;  %12366 = vmatpush3.bf16.msra.mxu0 %v13142_v28  ;;  %v13165_v28 = vld [vmem:[%s17064_s12 + $0x5f8] sm:$0xff]   ;;  %v4775_v43 = vmul.f32 0.5, %v15286_v31 }
 0xa7e   : > { %v4797_v0 = vmul.f32 0.044715, %v4789_v48  ;;  %v4792_v49 = vmul.f32 %v4784_v10, %v15295_v61  ;;  %12388 = vmatpush3.bf16.msra.mxu1 %v13143_v63  ;;  %12367 = vmatprep.subr.bf16.mxu0 %v13144_v3  ;;  %v13166_v5 = vld [vmem:[%s17064_s12 + $0x538] sm:$0xff]  }
 0xa7f   : > { %v4799_v2 = vmul.f32 0.044715, %v4791_v44  ;;  %v4798_v6 = vmul.f32 0.044715, %v4790_v12  ;;  %12389 = vmatprep.subr.bf16.mxu1 %v13145_v34  ;;  %v13167_v48 = vld [vmem:[%s17064_s12 + $0x5b8] sm:$0xff]  }
 0xa80   : > { %v4805_v17 = vadd.f32 %v4797_v0, %v15284_v38  ;;  %v4800_v57 = vmul.f32 0.044715, %v4792_v49  ;;  %v4776_v38 = vmul.f32 0.5, %v15295_v61 }
 0xa81   : > { %v4807_v16 = vadd.f32 %v4799_v2, %v15286_v31  ;;  %v4806_v33 = vadd.f32 %v4798_v6, %v15288_v51  ;;  %12368 = vmatpush3.bf16.msra.mxu0 %v13146_v14 }
 0xa82   : > { %v4813_v18 = vmul.f32 0.7978846, %v4805_v17  ;;  %v4808_v19 = vadd.f32 %v4800_v57, %v15295_v61  ;;  %12390 = vmatpush3.bf16.msra.mxu1 %v13147_v15  ;;  %12369 = vmatprep.subr.bf16.mxu0 %v13148_v50 }
 0xa83   : > { %v4815_v21 = vmul.f32 0.7978846, %v4807_v16  ;;  %v4814_v22 = vmul.f32 0.7978846, %v4806_v33  ;;  %12391 = vmatprep.subr.bf16.mxu1 %v13149_v7 }
 0xa84   : > { %13460 = vtanh.f32 %v4813_v18  ;;  %v4816_v35 = vmul.f32 0.7978846, %v4808_v19 }
 0xa85   : > { %13462 = vtanh.f32 %v4815_v21  ;;  %12370 = vmatpush3.bf16.msra.mxu0 %v13150_v39 }
 0xa86   : > { %12392 = vmatpush3.bf16.msra.mxu1 %v13151_v36  ;;  %12371 = vmatprep.subr.bf16.mxu0 %v13152_v4  ;;  %13464 = vtanh.f32 %v4814_v22 }
 0xa87   : > { %12393 = vmatprep.subr.bf16.mxu1 %v13153_v23  ;;  %13466 = vtanh.f32 %v4816_v35 }
 0xa89   : > { %12372 = vmatpush3.bf16.msra.mxu0 %v13154_v24 }
 0xa8a   : > { %12394 = vmatpush3.bf16.msra.mxu1 %v13155_v9  ;;  %12373 = vmatprep.subr.bf16.mxu0 %v13156_v55 }
 0xa8b   : > { %12395 = vmatprep.subr.bf16.mxu1 %v13157_v11 }
 0xa8d   : > { %12374 = vmatpush3.bf16.msra.mxu0 %v13158_v41 }
 0xa8e   : > { %v13461_v45 = vpop.eup %13460  ;;  %12396 = vmatpush3.bf16.msra.mxu1 %v13159_v27  ;;  %12375 = vmatprep.subr.bf16.mxu0 %v13160_v25  ;;  %v11035_v27 = vld [vmem:[%s17065_s13] ss:$0 sm:$0xff] }
 0xa8f   : > { %v13463_v53 = vpop.eup %13462  ;;  %12397 = vmatprep.subr.bf16.mxu1 %v13161_v30  ;;  %v4829_v32 = vadd.f32 1.0, %v13461_v45  ;;  %v13168_v45 = vld [vmem:[%s17056_s4 + $0xc0] ss:$12 sps:$4 sm:$0xff]  }
 0xa90   : > { %v13465_v46 = vpop.eup %13464  ;;  %v4831_v63 = vadd.f32 1.0, %v13463_v53  ;;  %v13172_v53 = vld [vmem:[%s17056_s4 + $0xd8] ss:$12 sps:$4 sm:$0xff]  }
 0xa91   : > { %v13467_v3 = vpop.eup %13466  ;;  %12376 = vmatpush3.bf16.msra.mxu0 %v13162_v26  ;;  %v4830_v34 = vadd.f32 1.0, %v13465_v46  ;;  %v4837_v44 = vmul.f32 %v4829_v32, %v4773_v37  ;;  %v13176_v32 = vld [vmem:[%s17056_s4 + $0xf0] ss:$12 sps:$4 sm:$0xff]  }
 0xa92   : > { %12398 = vmatpush3.bf16.msra.mxu1 %v13163_v54  ;;  %12377 = vmatprep.subr.bf16.mxu0 %v13164_v52  ;;  %v4832_v10 = vadd.f32 1.0, %v13467_v3  ;;  %v4839_v12 = vmul.f32 %v4831_v63, %v4775_v43  ;;  %v13170_v54 = vld [vmem:[%s17056_s4 + $0xc4] ss:$12 sps:$4 sm:$0xff]   ;;  %v13171_v52 = vld [vmem:[%s17056_s4 + $0xc8] ss:$12 sps:$4 sm:$0xff]  }
 0xa93   : > { %12399 = vmatprep.subr.bf16.mxu1 %v13165_v28  ;;  %v4838_v31 = vmul.f32 %v4830_v34, %v4774_v8  ;;  %v4973_v51 = vpack.c.bf16 %v4837_v44, %v4837_v44  ;;  %v13178_v28 = vld [vmem:[%s17056_s4 + $0xf4] ss:$12 sps:$4 sm:$0xff]   ;;  %v13179_v43 = vld [vmem:[%s17056_s4 + $0xf8] ss:$12 sps:$4 sm:$0xff]   ;;  %v13183_v34 = vld [vmem:[%s17056_s4 + $0x110] ss:$12 sps:$4 sm:$0xff]  }
 0xa94   : > { %v4840_v14 = vmul.f32 %v4832_v10, %v4776_v38  ;;  %v4975_v15 = vpack.c.bf16 %v4839_v12, %v4839_v12  ;;  %v13180_v8 = vld [vmem:[%s17056_s4 + $0x108] ss:$12 sps:$4 sm:$0xff]   ;;  %v13184_v38 = vld [vmem:[%s17056_s4 + $0x120] ss:$12 sps:$4 sm:$0xff]  }
 0xa95   : > { %12378 = vmatpush3.bf16.msra.mxu0 %v13166_v5  ;;  %v4974_v0 = vpack.c.bf16 %v4838_v31, %v4838_v31  ;;  %v13182_v5 = vld [vmem:[%s17056_s4 + $0x10c] ss:$12 sps:$4 sm:$0xff]   ;;  %v13187_v10 = vld [vmem:[%s17056_s4 + $0x128] ss:$12 sps:$4 sm:$0xff]  }
 0xa96   : > { %12400 = vmatpush3.bf16.msra.mxu1 %v13167_v48  ;;  %v4976_v49 = vpack.c.bf16 %v4840_v14, %v4840_v14  ;;  %5738 = vmatprep.subr.bf16.mxu0 %v13170_v54  ;;  %v13186_v48 = vld [vmem:[%s17056_s4 + $0x124] ss:$12 sps:$4 sm:$0xff]   ;;  %v13190_v44 = vld [vmem:[%s17056_s4 + $0x13c] ss:$12 sps:$4 sm:$0xff]   ;;  %v13191_v12 = vld [vmem:[%s17056_s4 + $0x140] ss:$12 sps:$4 sm:$0xff]  }
 0xa97   : > { %5473 = vmatprep.mubr.bf16.mxu0 %v4974_v0  ;;  %12801 = vmatprep.subr.bf16.mxu1 %v13603_v1  ;;  %v13188_v31 = vld [vmem:[%s17056_s4 + $0x138] ss:$12 sps:$4 sm:$0xff]   ;;  %v13194_v14 = vld [vmem:[%s17056_s4 + $0x154] ss:$12 sps:$4 sm:$0xff]   ;;  %v13192_v0 = vld [vmem:[%s17056_s4 + $0x150] ss:$12 sps:$4 sm:$0xff]  }
 0xa98   : > { %5513 = vmatprep.mubr.bf16.mxu1 %v4976_v49  ;;  %5474 = vmatmul.mubr.bf16.vlgmr.msra.gmra.mrb[72].mxu0 %v4973_v51  ;;  %v13195_v49 = vld [vmem:[%s17056_s4 + $0x158] ss:$12 sps:$4 sm:$0xff]  }
 0xa99   : > { %5514 = vmatmul.mubr.bf16.vlgmr.msra.gmra.mrb[64].mxu1 %v4975_v15  ;;  %5770 = vmatprep.mubr.bf16.mxu0 %v13605_v29  ;;  %v13198_v51 = vld [vmem:[%s17056_s4 + $0x16c] ss:$12 sps:$4 sm:$0xff]   ;;  %v13196_v15 = vld [vmem:[%s17056_s4 + $0x168] ss:$12 sps:$4 sm:$0xff]  }
 0xa9a   : > { %12817 = vmatprep.mubr.msk.bf16.mxu1 %vm13604_vm0, %v13603_v1  ;;  %12802 = vmatpush3.bf16.msra.mxu1 %v13171_v52 }
 0xa9b   : > { %5739 = vmatpush1.bf16.msra.mxu0 %v13168_v45  ;;  %12803 = vmatprep.subr.bf16.mxu1 %v13603_v1 }
 0xb4b   : > { %v12335_v61 = vpop.f32.mrb[68].mxu0 }
 0xb4c   : > { %v12357_v50 = vpop.f32.mrb[60].mxu1  ;;  %v12336_v2 = vpop.f32.mrb[69].mxu0 }
 0xb4d   : > { %v12337_v6 = vadd.f32 %v12336_v2, %v12335_v61  ;;  %v12358_v7 = vpop.f32.mrb[61].mxu1  ;;  %v12338_v17 = vpop.f32.mrb[70].mxu0  ;;  %v13199_v61 = vld [vmem:[%s17056_s4 + $0x170] ss:$12 sps:$4 sm:$0xff]  }
 0xb4e   : > { %v12359_v57 = vadd.f32 %v12358_v7, %v12357_v50  ;;  %v12360_v16 = vpop.f32.mrb[62].mxu1  ;;  %v12339_v33 = vpop.f32.mrb[71].mxu0  ;;  %v11036_v17 = vld [vmem:[%s17066_s14] ss:$0 sm:$0xff] }
 0xb4f   : > { %v12361_v39 = vpop.f32.mrb[63].mxu1  ;;  %v11037_v16 = vld [vmem:[%s17067_s15] ss:$0 sm:$0xff] }
 0xb50   : > { %v5436_v18 = vadd.f32 %v12359_v57, %v12337_v6 }
 0xb6b   : > { %v12379_v19 = vpop.f32.mrb[72].mxu0 }
 0xb6c   : > { %v12401_v36 = vpop.f32.mrb[64].mxu1  ;;  %v12380_v4 = vpop.f32.mrb[73].mxu0 }
 0xb6d   : > { %v12381_v21 = vadd.f32 %v12380_v4, %v12379_v19  ;;  %v12402_v22 = vpop.f32.mrb[65].mxu1  ;;  %v12382_v23 = vpop.f32.mrb[74].mxu0  ;;  %v11070_v19 = vld [vmem:[%s17057_s5 + $0x3] sm:$0x7] }
 0xb6e   : > { %v12403_v35 = vadd.f32 %v12402_v22, %v12401_v36  ;;  %v12404_v24 = vpop.f32.mrb[66].mxu1  ;;  %v12383_v9 = vpop.f32.mrb[75].mxu0  ;;  %v5598_v36 = vrot.slane %v11070_v19, %v13861_v40  ;;  %v5606_v4 = vrot.slane %v11070_v19, %v13883_v58 }
 0xb6f   : > { %v5476_v55 = vadd.f32 %v12381_v21, %v5436_v18  ;;  %v12405_v11 = vpop.f32.mrb[67].mxu1  ;;  %v5602_v21 = vrot.slane %v11070_v19, %v13867_v42 }
 0xb71   : > { %v5516_v41 = vadd.f32 %v12403_v35, %v5476_v55 }
 0xb73   : > { %v5521_v25 = vadd.f32 %v5516_v41, %v15249_v20  ;;  %v13174_v20 = vld [vmem:[%s17056_s4 + $0xdc] ss:$12 sps:$4 sm:$0xff]  }
 0xb74   : > { %5740 = vmatprep.subr.bf16.mxu0 %v13174_v20 }
 0xb75   : > { %v5529_v30 = vadd.f32 %v11035_v27, %v5521_v25  ;;  %5741 = vmatpush1.bf16.msra.mxu0 %v13172_v53 }
 0xb76   : > { %5742 = vmatprep.subr.bf16.mxu0 %v13178_v28 }
 0xb77   : > { %v5530_v26 = vadd.f32 %v5529_v30, %v14117_v47  ;;  %v13175_v47 = vld [vmem:[%s17056_s4 + $0xe0] ss:$12 sps:$4 sm:$0xff]  }
 0xb78   : > { %12804 = vmatpush3.bf16.msra.mxu1 %v13175_v47 }
 0xb79   : > { %5533 = vadd.xlane.f32.xlu0 %v5530_v26  ;;  %12805 = vmatprep.subr.bf16.mxu1 %v13603_v1 }
 0xb7a   : > { %5743 = vmatpush1.bf16.msra.mxu0 %v13176_v32 }
 0xb7b   : > { %5744 = vmatprep.subr.bf16.mxu0 %v13182_v5 }
 0xb7c   : > { %12806 = vmatpush3.bf16.msra.mxu1 %v13179_v43 }
 0xb7d   : > { %12807 = vmatprep.subr.bf16.mxu1 %v13603_v1 }
 0xb7e   : > { %5745 = vmatpush1.bf16.msra.mxu0 %v13180_v8 }
 0xb7f   : > { %5746 = vmatprep.subr.bf16.mxu0 %v13186_v48 }
 0xb80   : > { %12808 = vmatpush3.bf16.msra.mxu1 %v13183_v34 }
 0xb81   : > { %12809 = vmatprep.subr.bf16.mxu1 %v13603_v1 }
 0xb82   : > { %5747 = vmatpush1.bf16.msra.mxu0 %v13184_v38 }
 0xb83   : > { %5748 = vmatprep.subr.bf16.mxu0 %v13190_v44 }
 0xb84   : > { %12810 = vmatpush3.bf16.msra.mxu1 %v13187_v10 }
 0xb85   : > { %12811 = vmatprep.subr.bf16.mxu1 %v13603_v1 }
 0xb86   : > { %5749 = vmatpush1.bf16.msra.mxu0 %v13188_v31 }
 0xb87   : > { %5750 = vmatprep.subr.bf16.mxu0 %v13194_v14 }
 0xb88   : > { %12812 = vmatpush3.bf16.msra.mxu1 %v13191_v12 }
 0xb89   : > { %12813 = vmatprep.subr.bf16.mxu1 %v13603_v1 }
 0xb8a   : > { %5751 = vmatpush1.bf16.msra.mxu0 %v13192_v0 }
 0xb8b   : > { %5752 = vmatprep.subr.bf16.mxu0 %v13198_v51 }
 0xb8c   : > { %12814 = vmatpush3.bf16.msra.mxu1 %v13195_v49  ;;  %v13538_v49 = vld [vmem:[%s13911_s23] ss:$0 sm:$0xff] }
 0xb8d   : > { %12815 = vmatprep.subr.bf16.mxu1 %v13603_v1 }
 0xb8e   : > { %5753 = vmatpush1.bf16.msra.mxu0 %v13196_v15 }
 0xb8f   : > { %12821 = vmatprep.subr.bf16.mxu0 %v13603_v1 }
 0xb90   : > { %12816 = vmatpush3.bf16.msra.mxu1 %v13199_v61 }
 0xb91   : > { %12845 = vmatprep.subr.bf16.mxu1 %v13603_v1 }
 0xc06   : > { %v5534_v46 = vpop.xlane.xlu0 %5533 }
 0xc07   : > { %v5535_v37 = vmul.f32 0.0078125, %v5534_v46 }
 0xc09   : > { %v5536_v63 = vsub.f32 %v5530_v26, %v5535_v37 }
 0xc0b   : > { %v5537_v3 = vmul.f32 %v5536_v63, %v5536_v63 }
 0xc0d   : > { %5538 = vadd.xlane.f32.xlu0 %v5537_v3 }
 0xc9a   : > { %v5539_v50 = vpop.xlane.xlu0 %5538 }
 0xc9b   : > { %v5540_v2 = vmul.f32 0.0078125, %v5539_v50 }
 0xc9d   : > { %v5541_v6 = vadd.f32 1e-12, %v5540_v2 }
 0xc9f   : > { %13468 = vrsqrt.f32 %v5541_v6 }
 0xca9   : > { %v13469_v7 = vpop.eup %13468 }
 0xcaa   : > { %v5543_v57 = vmul.f32 %v13469_v7, %v5536_v63 }
 0xcac   : > { %v5550_v33 = vmul.f32 %v11036_v17, %v5543_v57 }
 0xcae   : > { %v15486_v39 = vadd.f32 %v11037_v16, %v5550_v33 }
 0xcb0   : > { %v5558_v18 = vpack.c.bf16 %v15486_v39, %v15486_v39 }
 0xcb2   : > { %5771 = vmatmul.mubr.bf16.vlgmr.msra.gmra.mrb[76].mxu0 %v5558_v18  ;;  %12818 = vmatmul.mubr.bf16.vlgmr.msra.gmra.mrb[68].mxu1 %v5558_v18 }
 0xcb3   : > { %12823 = vmatprep.mubr.msk.bf16.mxu0 %vm13604_vm0, %v13603_v1  ;;  %12847 = vmatprep.mubr.msk.bf16.mxu1 %vm13604_vm0, %v13603_v1 }
 0xd85   : > { %v5772_v22 = vpop.f32.mrb[76].mxu0  ;;  %v5813_v23 = vpop.f32.mrb[68].mxu1 }
 0xd86   : > { %v5773_v35 = vadd.f32 %v5772_v22, %v5598_v36  ;;  %v15500_v24 = vadd.f32 %v5813_v23, %v5606_v4  ;;  %v5774_v9 = vpop.f32.mrb[77].mxu0  ;;  %v12819_v55 = vpop.f32.mrb[69].mxu1 }
 0xd87   : > { %v5775_v11 = vadd.f32 %v5774_v9, %v5602_v21  ;;  %v5776_v41 = vpop.f32.mrb[78].mxu0  ;;  %v5816_v27 = vpop.f32.mrb[70].mxu1 }
 0xd88   : > { %v5777_v25 = vpop.f32.mrb[79].mxu0  ;;  %v12820_v30 = vpop.f32.mrb[71].mxu1  ;;  %5820 = vrot.lane.b32.xlu0 %v5773_v35, %s17093_s26  ;;  %v6097_v26 = vpack.c.bf16 %v15500_v24, %v15500_v24  ;;  %v5849_v20 = vpack.c.bf16 %v5773_v35, %v5773_v35 }
 0xd89   : > { %5830 = vrot.lane.b32.xlu1 %v5775_v11, %s17093_s26  ;;  %v5853_v45 = vpack.c.bf16 %v5775_v11, %v5775_v11 }
 0xd8a   : > { %v6105_v54 = vsel %vm1154_vm2, %v6097_v26, 0 }
 0xd8b   : > { %12846 = vmatpush3.bf16.msra.mxu1 %v6105_v54  ;;  %v5861_v52 = vsel %vm558_vm1, %v5853_v45, 0 }
 0xd8c   : > { %12822 = vmatpush3.bf16.xpose.msra.mxu0 %v5861_v52  ;;  %5836 = vrot.lane.b32.xlu0 %v5775_v11, %s17094_s2 }
 0xd8d   : > { %5833 = vrot.lane.b32.xlu1 %v5775_v11, %s17095_s30  ;;  %12827 = vmatprep.subr.bf16.mxu0 %v13603_v1 }
 0xd8e   : > { %12857 = vmatprep.subr.bf16.mxu1 %v13603_v1 }
 0xd91   : > { %5823 = vrot.lane.b32.xlu1 %v5773_v35, %s17095_s30 }
 0xd93   : > { %12824 = vmatmul.mubr.msk.bf16.vlgmr.msra.gmra.mrb[80].mxu0 %vm558_vm1, %v5849_v20 }
 0xd94   : > { %12829 = vmatprep.mubr.msk.bf16.mxu0 %vm13604_vm0, %v13603_v1 }
 0xd95   : > { %5826 = vrot.lane.b32.xlu1 %v5773_v35, %s17094_s2 }
 0xdfa   : > { %v5821_v46 = vpop.permute.xlu0 %5820 }
 0xdfb   : > { %v5831_v47 = vpop.permute.xlu1 %5830  ;;  %v5850_v63 = vpack.c.bf16 %v5821_v46, %v5821_v46 }
 0xdfc   : > { %v5854_v53 = vpack.c.bf16 %v5831_v47, %v5831_v47 }
 0xdfe   : > { %v5907_v28 = vsel %vm558_vm1, %v5854_v53, 0  ;;  %v5837_v43 = vpop.permute.xlu0 %5836 }
 0xdff   : > { %v5834_v32 = vpop.permute.xlu1 %5833  ;;  %12828 = vmatpush3.bf16.xpose.msra.mxu0 %v5907_v28  ;;  %v5856_v8 = vpack.c.bf16 %v5837_v43, %v5837_v43 }
 0xe00   : > { %12833 = vmatprep.subr.bf16.mxu0 %v13603_v1  ;;  %v5855_v37 = vpack.c.bf16 %v5834_v32, %v5834_v32 }
 0xe01   : > { %v5999_v48 = vsel %vm558_vm1, %v5856_v8, 0 }
 0xe02   : > { %v5953_v3 = vsel %vm558_vm1, %v5855_v37, 0 }
 0xe03   : > { %v5824_v5 = vpop.permute.xlu1 %5823 }
 0xe04   : > { %v5851_v34 = vpack.c.bf16 %v5824_v5, %v5824_v5 }
 0xe06   : > { %12830 = vmatmul.mubr.msk.bf16.vlgmr.msra.gmra.mrb[84].mxu0 %vm558_vm1, %v5850_v63 }
 0xe07   : > { %12834 = vmatpush3.bf16.xpose.msra.mxu0 %v5953_v3  ;;  %12835 = vmatprep.mubr.msk.bf16.mxu0 %vm13604_vm0, %v13603_v1  ;;  %v5827_v38 = vpop.permute.xlu1 %5826 }
 0xe08   : > { %12839 = vmatprep.subr.bf16.mxu0 %v13603_v1  ;;  %v5852_v10 = vpack.c.bf16 %v5827_v38, %v5827_v38 }
 0xe0e   : > { %12836 = vmatmul.mubr.msk.bf16.vlgmr.msra.gmra.mrb[88].mxu0 %vm558_vm1, %v5851_v34 }
 0xe0f   : > { %12840 = vmatpush3.bf16.xpose.msra.mxu0 %v5999_v48  ;;  %12841 = vmatprep.mubr.msk.bf16.mxu0 %vm13604_vm0, %v13603_v1 }
 0xe10   : > { %12851 = vmatprep.subr.bf16.mxu0 %v13603_v1 }
 0xe16   : > { %12842 = vmatmul.mubr.msk.bf16.vlgmr.msra.gmra.mrb[92].mxu0 %vm558_vm1, %v5852_v10 }
 0xe17   : > { %12853 = vmatprep.mubr.msk.bf16.mxu0 %vm13604_vm0, %v13603_v1 }
 0xe66   : > { %v5897_v44 = vpop.f32.mrb[80].mxu0 }
 0xe67   : > { %v6041_v31 = vmul.f32 0.17677669, %v5897_v44  ;;  %v12825_v12 = vpop.f32.mrb[81].mxu0 }
 0xe68   : > { %v5900_v14 = vpop.f32.mrb[82].mxu0 }
 0xe69   : > { %v12826_v0 = vpop.f32.mrb[83].mxu0  ;;  %v6045_v51 = vadd.f32 %v13538_v49, %v6041_v31 }
 0xe6b   : > { %v6049_v15 = vsel %vm1098_vm3, %v6045_v51, -inf }
 0xe6c   : > { %6050 = vmax.xlane.f32.xlu0 %v6049_v15 }
 0xed9   : > { %v5943_v61 = vpop.f32.mrb[84].mxu0 }
 0xeda   : > { %v6042_v50 = vmul.f32 0.17677669, %v5943_v61  ;;  %v12831_v2 = vpop.f32.mrb[85].mxu0 }
 0xedb   : > { %v5946_v6 = vpop.f32.mrb[86].mxu0 }
 0xedc   : > { %v12832_v7 = vpop.f32.mrb[87].mxu0  ;;  %v6046_v17 = vadd.f32 %v13538_v49, %v6042_v50 }
 0xede   : > { %v6052_v57 = vsel %vm1098_vm3, %v6046_v17, -inf }
 0xedf   : > { %6053 = vmax.xlane.f32.xlu1 %v6052_v57 }
 0xee1   : > { %v5989_v16 = vpop.f32.mrb[88].mxu0 }
 0xee2   : > { %v6043_v33 = vmul.f32 0.17677669, %v5989_v16  ;;  %v12837_v18 = vpop.f32.mrb[89].mxu0 }
 0xee3   : > { %v5992_v19 = vpop.f32.mrb[90].mxu0 }
 0xee4   : > { %v12838_v36 = vpop.f32.mrb[91].mxu0  ;;  %v6047_v4 = vadd.f32 %v13538_v49, %v6043_v33 }
 0xee6   : > { %v6055_v21 = vsel %vm1098_vm3, %v6047_v4, -inf }
 0xee7   : > { %6056 = vmax.xlane.f32.xlu0 %v6055_v21  ;;  %v13200_v21 = vld [vmem:[%s17058_s6 + $0x40] sm:$0xff]  }
 0xee9   : > { %v6035_v22 = vpop.f32.mrb[92].mxu0 }
 0xeea   : > { %v6044_v23 = vmul.f32 0.17677669, %v6035_v22  ;;  %v12843_v35 = vpop.f32.mrb[93].mxu0  ;;  %v13201_v22 = vld [vmem:[%s17058_s6 + $0x48] sm:$0xff]  }
 0xeeb   : > { %v6038_v9 = vpop.f32.mrb[94].mxu0 }
 0xeec   : > { %v12844_v55 = vpop.f32.mrb[95].mxu0  ;;  %v6048_v11 = vadd.f32 %v13538_v49, %v6044_v23 }
 0xeed   : > { %v13202_v55 = vld [vmem:[%s17058_s6 + $0x50] sm:$0xff]  }
 0xeee   : > { %v6058_v41 = vsel %vm1098_vm3, %v6048_v11, -inf }
 0xeef   : > { %6059 = vmax.xlane.f32.xlu0 %v6058_v41  ;;  %v13203_v41 = vld [vmem:[%s17058_s6 + $0x58] sm:$0xff]  }
 0xef0   : > { %5840 = vrot.lane.b32.xlu1 %v15500_v24, %s17093_s26 }
 0xef9   : > { %v6051_v27 = vpop.xlane.xlu0 %6050 }
 0xefa   : > { %v6061_v25 = vsub.f32 %v6045_v51, %v6051_v27  ;;  %v13204_v27 = vld [vmem:[%s17058_s6 + $0x60] sm:$0xff]  }
 0xefc   : > { %v6065_v30 = vmul.f32 1.442695, %v6061_v25  ;;  %v13205_v25 = vld [vmem:[%s17058_s6 + $0x68] sm:$0xff]  }
 0xefe   : > { %13470 = vpow2.f32 %v6065_v30  ;;  %v13206_v30 = vld [vmem:[%s17058_s6 + $0x70] sm:$0xff]  }
 0xf08   : > { %v13471_v26 = vpop.eup %13470 }
 0xf09   : > { %v6073_v45 = vsel %vm1098_vm3, %v13471_v26, 0.0 }
 0xf14   : > { %6074 = vadd.xlane.f32.xlu1 %v6073_v45 }
 0xf6c   : > { %v6054_v54 = vpop.xlane.xlu1 %6053 }
 0xf6d   : > { %v6062_v52 = vsub.f32 %v6046_v17, %v6054_v54 }
 0xf6f   : > { %v6067_v20 = vmul.f32 1.442695, %v6062_v52 }
 0xf70   : > { %v5841_v47 = vpop.permute.xlu1 %5840 }
 0xf71   : > { %13472 = vpow2.f32 %v6067_v20  ;;  %v6098_v53 = vpack.c.bf16 %v5841_v47, %v5841_v47  ;;  %v13207_v20 = vld [vmem:[%s17058_s6 + $0x78] sm:$0xff]  }
 0xf73   : > { %v6151_v28 = vsel %vm1154_vm2, %v6098_v53, 0 }
 0xf74   : > { %12852 = vmatpush3.bf16.msra.mxu0 %v6151_v28  ;;  %v6057_v32 = vpop.xlane.xlu0 %6056 }
 0xf75   : > { %v6063_v46 = vsub.f32 %v6047_v4, %v6057_v32  ;;  %12863 = vmatprep.subr.bf16.mxu0 %v13603_v1 }
 0xf77   : > { %v6069_v37 = vmul.f32 1.442695, %v6063_v46 }
 0xf79   : > { %13474 = vpow2.f32 %v6069_v37 }
 0xf7b   : > { %v13473_v63 = vpop.eup %13472 }
 0xf7c   : > { %v6060_v3 = vpop.xlane.xlu0 %6059  ;;  %v6076_v43 = vsel %vm1098_vm3, %v13473_v63, 0.0 }
 0xf7d   : > { %v6064_v5 = vsub.f32 %v6048_v11, %v6060_v3  ;;  %6077 = vadd.xlane.f32.xlu0 %v6076_v43 }
 0xf7f   : > { %v6071_v8 = vmul.f32 1.442695, %v6064_v5 }
 0xf81   : > { %13476 = vpow2.f32 %v6071_v8 }
 0xf83   : > { %v13475_v34 = vpop.eup %13474 }
 0xf84   : > { %v6079_v48 = vsel %vm1098_vm3, %v13475_v34, 0.0 }
 0xf85   : > { %6080 = vadd.xlane.f32.xlu1 %v6079_v48 }
 0xf8b   : > { %v13477_v38 = vpop.eup %13476 }
 0xf8c   : > { %v6082_v10 = vsel %vm1098_vm3, %v13477_v38, 0.0 }
 0xf8d   : > { %6083 = vadd.xlane.f32.xlu0 %v6082_v10  ;;  %v11120_v10 = vld [vmem:[%s17059_s7 + $0x1] ss:$0 sm:$0xff] }
 0xf96   : > { %5846 = vrot.lane.b32.xlu1 %v15500_v24, %s17094_s2 }
 0xfa1   : > { %v6075_v44 = vpop.xlane.xlu1 %6074 }
 0xfa2   : > { %13478 = vrcp.f32 %v6075_v44 }
 0xfa3   : > { %5843 = vrot.lane.b32.xlu0 %v15500_v24, %s17095_s30 }
 0xfac   : > { %v13479_v31 = vpop.eup %13478 }
 0xfad   : > { %v6086_v12 = vmul.f32 %v13479_v31, %v13471_v26 }
 0xfaf   : > { %v6093_v14 = vpack.c.bf16 %v6086_v12, %v6086_v12 }
 0xfb1   : > { %12848 = vmatmul.mubr.msk.bf16.vlgmr.msra.gmra.mrb[72].mxu1 %vm1098_vm3, %v6093_v14 }
 0xfb2   : > { %12859 = vmatprep.mubr.msk.bf16.mxu1 %vm13604_vm0, %v13603_v1 }
0x100a   : > { %v6078_v0 = vpop.xlane.xlu0 %6077 }
0x100b   : > { %13480 = vrcp.f32 %v6078_v0 }
0x1012   : > { %v6081_v49 = vpop.xlane.xlu1 %6080 }
0x1013   : > { %13482 = vrcp.f32 %v6081_v49 }
0x1015   : > { %v13481_v51 = vpop.eup %13480 }
0x1016   : > { %v6088_v15 = vmul.f32 %v13481_v51, %v13473_v63  ;;  %v5847_v61 = vpop.permute.xlu1 %5846  ;;  %v11133_v51 = vld [vmem:[%s17062_s10 + $0x600] sm:$0xff] }
0x1017   : > { %v6100_v50 = vpack.c.bf16 %v5847_v61, %v5847_v61  ;;  %v11134_v61 = vld [vmem:[%s17062_s10 + $0x608] sm:$0xff] }
0x1018   : > { %v6094_v2 = vpack.c.bf16 %v6088_v15, %v6088_v15  ;;  %v11137_v15 = vld [vmem:[%s17062_s10 + $0x660] sm:$0xff] }
0x1019   : > { %v6243_v6 = vsel %vm1154_vm2, %v6100_v50, 0  ;;  %v11198_v50 = vcombine.low %v11133_v51, %v11137_v15 }
0x101a   : > { %12854 = vmatmul.mubr.msk.bf16.vlgmr.msra.gmra.mrb[96].mxu0 %vm1098_vm3, %v6094_v2  ;;  %v6084_v24 = vpop.xlane.xlu0 %6083  ;;  %v11199_v2 = vcombine.high %v11133_v51, %v11137_v15  ;;  %v11186_v15 = vld [vmem:[%s17062_s10 + $0xae8] sm:$0xff] }
0x101b   : > { %12864 = vmatpush3.bf16.msra.mxu0 %v6243_v6  ;;  %13484 = vrcp.f32 %v6084_v24  ;;  %12865 = vmatprep.mubr.msk.bf16.mxu0 %vm13604_vm0, %v13603_v1  ;;  %v11138_v6 = vld [vmem:[%s17062_s10 + $0x668] sm:$0xff]  ;;  %v11145_v24 = vld [vmem:[%s17062_s10 + $0x720] sm:$0xff] }
0x101c   : > { %6873 = vmatprep.subr.bf16.mxu0 %v11199_v2 }
0x101d   : > { %v13483_v7 = vpop.eup %13482 }
0x101e   : > { %v5844_v17 = vpop.permute.xlu0 %5843  ;;  %v6090_v57 = vmul.f32 %v13483_v7, %v13475_v34  ;;  %v11200_v7 = vcombine.low %v11134_v61, %v11138_v6 }
0x101f   : > { %v6099_v16 = vpack.c.bf16 %v5844_v17, %v5844_v17  ;;  %v11201_v17 = vcombine.high %v11134_v61, %v11138_v6  ;;  %v11189_v6 = vld [vmem:[%s17062_s10 + $0xb40] sm:$0xff] }
0x1020   : > { %v6095_v18 = vpack.c.bf16 %v6090_v57, %v6090_v57 }
0x1021   : > { %v6197_v33 = vsel %vm1154_vm2, %v6099_v16, 0  ;;  %v11142_v16 = vld [vmem:[%s17062_s10 + $0x6c8] sm:$0xff] }
0x1022   : > { %12858 = vmatpush3.bf16.msra.mxu1 %v6197_v33  ;;  %v11146_v33 = vld [vmem:[%s17062_s10 + $0x728] sm:$0xff] }
0x1023   : > { %12869 = vmatprep.subr.bf16.mxu1 %v13603_v1 }
0x1025   : > { %v13485_v19 = vpop.eup %13484  ;;  %12860 = vmatmul.mubr.msk.bf16.vlgmr.msra.gmra.mrb[76].mxu1 %vm1098_vm3, %v6095_v18  ;;  %v11149_v18 = vld [vmem:[%s17062_s10 + $0x780] sm:$0xff] }
0x1026   : > { %v6092_v36 = vmul.f32 %v13485_v19, %v13477_v38  ;;  %12885 = vmatprep.mubr.msk.bf16.mxu1 %vm13604_vm0, %v13603_v1  ;;  %12870 = vmatpush3.bf16.msra.mxu1 %v13200_v21  ;;  %v11209_v19 = vcombine.high %v11142_v16, %v11146_v33  ;;  %v11154_v21 = vld [vmem:[%s17062_s10 + $0x7e8] sm:$0xff] }
0x1027   : > { %12871 = vmatprep.subr.bf16.mxu1 %v13603_v1 }
0x1028   : > { %v6096_v4 = vpack.c.bf16 %v6092_v36, %v6092_v36  ;;  %v11153_v36 = vld [vmem:[%s17062_s10 + $0x7e0] sm:$0xff] }
0x102a   : > { %12866 = vmatmul.mubr.msk.bf16.vlgmr.msra.gmra.mrb[100].mxu0 %vm1098_vm3, %v6096_v4  ;;  %12872 = vmatpush3.bf16.msra.mxu1 %v13201_v22  ;;  %v11150_v4 = vld [vmem:[%s17062_s10 + $0x788] sm:$0xff] }
0x102b   : > { %6905 = vmatprep.mubr.bf16.mxu0 %v13605_v29  ;;  %12873 = vmatprep.subr.bf16.mxu1 %v13603_v1 }
0x102c   : > { %6874 = vmatpush1.bf16.msra.mxu0 %v11198_v50 }
0x102e   : > { %12874 = vmatpush3.bf16.msra.mxu1 %v13202_v55  ;;  %v11214_v55 = vcombine.low %v11149_v18, %v11153_v36 }
0x102f   : > { %12875 = vmatprep.subr.bf16.mxu1 %v13603_v1 }
0x1032   : > { %12876 = vmatpush3.bf16.msra.mxu1 %v13203_v41 }
0x1033   : > { %12877 = vmatprep.subr.bf16.mxu1 %v13603_v1 }
0x1036   : > { %12878 = vmatpush3.bf16.msra.mxu1 %v13204_v27 }
0x1037   : > { %12879 = vmatprep.subr.bf16.mxu1 %v13603_v1 }
0x103a   : > { %12880 = vmatpush3.bf16.msra.mxu1 %v13205_v25 }
0x103b   : > { %12881 = vmatprep.subr.bf16.mxu1 %v13603_v1 }
0x103e   : > { %12882 = vmatpush3.bf16.msra.mxu1 %v13206_v30 }
0x103f   : > { %12883 = vmatprep.subr.bf16.mxu1 %v13603_v1 }
0x1042   : > { %12884 = vmatpush3.bf16.msra.mxu1 %v13207_v20  ;;  %v11162_v20 = vld [vmem:[%s17062_s10 + $0x8a8] sm:$0xff] }
0x1043   : > { %6914 = vmatprep.subr.bf16.mxu1 %v11201_v17  ;;  %v11194_v17 = vld [vmem:[%s17062_s10 + $0xba8] sm:$0xff] }
0x1084   : > { %v6141_v23 = vpop.f32.mrb[72].mxu1 }
0x1085   : > { %v12849_v35 = vpop.f32.mrb[73].mxu1 }
0x1086   : > { %v6144_v9 = vpop.f32.mrb[74].mxu1  ;;  %v11215_v35 = vcombine.high %v11149_v18, %v11153_v36  ;;  %v11135_v18 = vld [vmem:[%s17062_s10 + $0x610] sm:$0xff]  ;;  %v11136_v36 = vld [vmem:[%s17062_s10 + $0x618] sm:$0xff] }
0x1087   : > { %v12850_v11 = vpop.f32.mrb[75].mxu1  ;;  %v11217_v9 = vcombine.high %v11150_v4, %v11154_v21 }
0x1088   : > { %v11216_v11 = vcombine.low %v11150_v4, %v11154_v21 }
0x10ed   : > { %v6187_v26 = vpop.f32.mrb[96].mxu0 }
0x10ee   : > { %6286 = vrot.lane.b32.xlu1 %v6187_v26, %s17094_s2  ;;  %v12855_v45 = vpop.f32.mrb[97].mxu0  ;;  %v11157_v26 = vld [vmem:[%s17062_s10 + $0x840] sm:$0xff]  ;;  %s17010_s2 = scalar_lea.hbm %s17068_s16, %s12103_s27 }
0x10ef   : > { %v6190_v54 = vpop.f32.mrb[98].mxu0  ;;  %v11161_v45 = vld [vmem:[%s17062_s10 + $0x8a0] sm:$0xff] }
0x10f0   : > { %v12856_v52 = vpop.f32.mrb[99].mxu0  ;;  %v11158_v54 = vld [vmem:[%s17062_s10 + $0x848] sm:$0xff] }
0x10f1   : > { %v11223_v52 = vcombine.high %v11157_v26, %v11161_v45 }
0x10f8   : > { %v6233_v47 = vpop.f32.mrb[76].mxu1 }
0x10f9   : > { %6290 = vrot.lane.b32.xlu0 %v6233_v47, %s17095_s30  ;;  %v12861_v53 = vpop.f32.mrb[77].mxu1  ;;  %v11222_v47 = vcombine.low %v11157_v26, %v11161_v45  ;;  %v11132_v26 = vld [vmem:[%s17061_s9 + $0x1] ss:$0 sm:$0xff] }
0x10fa   : > { %v6236_v28 = vpop.f32.mrb[78].mxu1  ;;  %v11224_v53 = vcombine.low %v11158_v54, %v11162_v20 }
0x10fb   : > { %v12862_v32 = vpop.f32.mrb[79].mxu1  ;;  %v11225_v28 = vcombine.high %v11158_v54, %v11162_v20  ;;  %v11143_v54 = vld [vmem:[%s17062_s10 + $0x6d0] sm:$0xff]  ;;  %v11144_v20 = vld [vmem:[%s17062_s10 + $0x6d8] sm:$0xff] }
0x10fc   : > { %v11165_v32 = vld [vmem:[%s17062_s10 + $0x900] sm:$0xff] }
0x10fd   : > { %v6279_v46 = vpop.f32.mrb[100].mxu0 }
0x10fe   : > { %6294 = vrot.lane.b32.xlu1 %v6279_v46, %s17093_s26  ;;  %v12867_v37 = vpop.f32.mrb[101].mxu0  ;;  %v11169_v46 = vld [vmem:[%s17062_s10 + $0x960] sm:$0xff]  ;;  %s521_s26 = sand.u32 1, %s13593_s22  }
0x10ff   : > { %v6282_v63 = vpop.f32.mrb[102].mxu0  ;;  %v11166_v37 = vld [vmem:[%s17062_s10 + $0x908] sm:$0xff]  ;;  %s10601_s17 = sshll.u32 %s521_s26, 3  ;;  %s10516_s30 = scalar_lea.sflag [#allocation3], %s521_s26 }
0x1100   : > { %v12868_v3 = vpop.f32.mrb[103].mxu0  ;;  %v11231_v63 = vcombine.high %v11165_v32, %v11169_v46  ;;  %s523_s1 = scalar_lea.vmem [#allocation2], %s10601_s17  ;;  %s13543_s17 = sshll.u32 %s13609_s25, 4  ;;  %s13544_s17 = int_to_ptr.vmem [resolvable:$false] %s13543_s17 }
0x1101   : > { %v11170_v3 = vld [vmem:[%s17062_s10 + $0x968] sm:$0xff]  ;;  %s10529_s18 = sshll.u32 %s523_s1, 4  ;;  %s13545_s28 = scalar_lea.vmem %s13544_s17, 256  ;;  %s17012_s18 = int_to_ptr.vmem [resolvable:$true] %s10529_s18 }
0x1102   : > { %s13539_s21 = scalar_lea.vmem %s17012_s18, 128  ;;  %p13546_p0 = scmp.lt.s32.totalorder %s17012_s18, %s13544_s17 }
0x1103   : > { %p13540_p11 = scmp.ne.s32.totalorder %s17012_s18, %s13539_s21  ;;  %p13547_p1 = scmp.lt.s32.totalorder %s13545_s28, %s13539_s21 }
0x1105   : > { %p13541_p12 = pnand %p13540_p11, %p13733_p5  ;;  %p13548_p2 = por %p13547_p1, %p13546_p0 }
0x1107   : > { %p13542_p13 = pneg %p13541_p12 }
0x1109   : > { %p13549_p3 = pnand %p13548_p2, %p13542_p13 }
0x1160   : > { %v6287_v43 = vpop.permute.xlu1 %6286 }
0x1161   : > { %v6297_v5 = vsel %vm558_vm1, %v6141_v23, %v6287_v43  ;;  %v11208_v23 = vcombine.low %v11142_v16, %v11146_v33  ;;  %v11230_v43 = vcombine.low %v11165_v32, %v11169_v46  ;;  %v11151_v46 = vld [vmem:[%s17062_s10 + $0x790] sm:$0xff] }
0x116b   : > { %v6291_v1 = vpop.permute.xlu0 %6290 }
0x116c   : > { %v6298_v8 = vsel %vm1349_vm4, %v6297_v5, %v6291_v1  ;;  %v11232_v1 = vcombine.low %v11166_v37, %v11170_v3  ;;  %v11233_v5 = vcombine.high %v11166_v37, %v11170_v3  ;;  %v11155_v37 = vld [vmem:[%s17062_s10 + $0x7f0] sm:$0xff]  ;;  %v11156_v3 = vld [vmem:[%s17062_s10 + $0x7f8] sm:$0xff] }
0x1170   : > { %v6295_v34 = vpop.permute.xlu1 %6294 }
0x1171   : > { %v6299_v48 = vsel %vm1351_vm5, %v6298_v8, %v6295_v34  ;;  %v11173_v8 = vld [vmem:[%s17062_s10 + $0x9c0] sm:$0xff] }
0x1172   : > { %v6300_v38 = vpack.c.bf16 %v6299_v48, %v6299_v48  ;;  %v11177_v34 = vld [vmem:[%s17062_s10 + $0xa20] sm:$0xff]  ;;  %v11174_v48 = vld [vmem:[%s17062_s10 + $0x9c8] sm:$0xff] }
0x1174   : > { %12886 = vmatmul.mubr.bf16.vlgmr.msra.gmra.mrb[80].mxu1 %v6300_v38  ;;  %v11239_v38 = vcombine.high %v11173_v8, %v11177_v34 }
0x1175   : > { %6946 = vmatprep.mubr.bf16.mxu1 %v13605_v29  ;;  %6915 = vmatpush1.bf16.msra.mxu1 %v11200_v7 }
0x1176   : > { %6916 = vmatprep.subr.bf16.mxu1 %v11209_v19  ;;  %v11139_v19 = vld [vmem:[%s17062_s10 + $0x670] sm:$0xff] }
0x1177   : > { %v11202_v4 = vcombine.low %v11135_v18, %v11139_v19  ;;  %v11203_v21 = vcombine.high %v11135_v18, %v11139_v19  ;;  %v11183_v19 = vld [vmem:[%s17062_s10 + $0xa90] sm:$0xff] }
0x1179   : > { %6917 = vmatpush1.bf16.msra.mxu1 %v11208_v23 }
0x117a   : > { %6918 = vmatprep.subr.bf16.mxu1 %v11217_v9 }
0x117d   : > { %6919 = vmatpush1.bf16.msra.mxu1 %v11216_v11 }
0x117e   : > { %6920 = vmatprep.subr.bf16.mxu1 %v11225_v28 }
0x1181   : > { %6921 = vmatpush1.bf16.msra.mxu1 %v11224_v53 }
0x1182   : > { %6922 = vmatprep.subr.bf16.mxu1 %v11233_v5  ;;  %v11219_v5 = vcombine.high %v11151_v46, %v11155_v37 }
0x1185   : > { %6923 = vmatpush1.bf16.msra.mxu1 %v11232_v1 }
0x1247   : > { %v6408_v44 = vpop.f32.mrb[80].mxu1 }
0x1248   : > { %v6409_v31 = vadd.f32 %v11120_v10, %v6408_v44  ;;  %v12887_v12 = vpop.f32.mrb[81].mxu1  ;;  %v11178_v10 = vld [vmem:[%s17062_s10 + $0xa28] sm:$0xff]  ;;  %v11238_v44 = vcombine.low %v11173_v8, %v11177_v34  ;;  %v11159_v34 = vld [vmem:[%s17062_s10 + $0x850] sm:$0xff] }
0x1249   : > { %v6411_v14 = vpop.f32.mrb[82].mxu1  ;;  %v11241_v12 = vcombine.high %v11174_v48, %v11178_v10 }
0x124a   : > { %v12888_v0 = vpop.f32.mrb[83].mxu1  ;;  %v6414_v49 = vadd.f32 %v6409_v31, %v15486_v39  ;;  %v11141_v39 = vld [vmem:[%s17062_s10 + $0x6c0] sm:$0xff]  ;;  %v11240_v31 = vcombine.low %v11174_v48, %v11178_v10  ;;  %v11163_v48 = vld [vmem:[%s17062_s10 + $0x8b0] sm:$0xff]  ;;  %v11164_v10 = vld [vmem:[%s17062_s10 + $0x8b8] sm:$0xff] }
0x124b   : > { %v11207_v57 = vcombine.high %v11141_v39, %v11145_v24  ;;  %v11206_v22 = vcombine.low %v11141_v39, %v11145_v24  ;;  %6924 = vmatprep.subr.bf16.mxu1 %v11241_v12  ;;  %v11181_v14 = vld [vmem:[%s17062_s10 + $0xa80] sm:$0xff]  ;;  %v11190_v24 = vld [vmem:[%s17062_s10 + $0xb48] sm:$0xff]  ;;  %v11227_v12 = vcombine.high %v11159_v34, %v11163_v48 }
0x124c   : > { %6419 = vadd.xlane.f32.xlu0 %v6414_v49  ;;  %v11185_v0 = vld [vmem:[%s17062_s10 + $0xae0] sm:$0xff]  ;;  %6925 = vmatpush1.bf16.msra.mxu1 %v11240_v31  ;;  %v11256_v16 = vcombine.low %v11190_v24, %v11194_v17  ;;  %v11257_v33 = vcombine.high %v11190_v24, %v11194_v17  ;;  %v11179_v24 = vld [vmem:[%s17062_s10 + $0xa30] sm:$0xff]  ;;  %v11180_v17 = vld [vmem:[%s17062_s10 + $0xa38] sm:$0xff] }
0x124d   : > { %6875 = vmatprep.subr.bf16.mxu0 %v11207_v57  ;;  %v11247_v51 = vcombine.high %v11181_v14, %v11185_v0  ;;  %v11246_v61 = vcombine.low %v11181_v14, %v11185_v0  ;;  %v11193_v39 = vld [vmem:[%s17062_s10 + $0xba0] sm:$0xff]  ;;  %v11167_v0 = vld [vmem:[%s17062_s10 + $0x910] sm:$0xff] }
0x124e   : > { %6876 = vmatpush1.bf16.msra.mxu0 %v11206_v22  ;;  %v11255_v7 = vcombine.high %v11189_v6, %v11193_v39  ;;  %v11254_v57 = vcombine.low %v11189_v6, %v11193_v39  ;;  %v11140_v22 = vld [vmem:[%s17062_s10 + $0x678] sm:$0xff]  ;;  %v11175_v39 = vld [vmem:[%s17062_s10 + $0x9d0] sm:$0xff] }
0x124f   : > { %6877 = vmatprep.subr.bf16.mxu0 %v11215_v35  ;;  %v11204_v23 = vcombine.low %v11136_v36, %v11140_v22  ;;  %v11205_v35 = vcombine.high %v11136_v36, %v11140_v22  ;;  %v11187_v36 = vld [vmem:[%s17062_s10 + $0xaf0] sm:$0xff]  ;;  %v11242_v22 = vcombine.low %v11175_v39, %v11179_v24 }
0x1252   : > { %6878 = vmatpush1.bf16.msra.mxu0 %v11214_v55 }
0x1253   : > { %6879 = vmatprep.subr.bf16.mxu0 %v11223_v52  ;;  %v11147_v52 = vld [vmem:[%s17062_s10 + $0x730] sm:$0xff] }
0x1254   : > { %v11211_v28 = vcombine.high %v11143_v54, %v11147_v52 }
0x1256   : > { %6880 = vmatpush1.bf16.msra.mxu0 %v11222_v47 }
0x1257   : > { %6881 = vmatprep.subr.bf16.mxu0 %v11231_v63  ;;  %v11152_v63 = vld [vmem:[%s17062_s10 + $0x798] sm:$0xff] }
0x1258   : > { %v11221_v8 = vcombine.high %v11152_v63, %v11156_v3  ;;  %v11220_v31 = vcombine.low %v11152_v63, %v11156_v3  ;;  %v11398_v3 = vld [vmem:[%s17062_s10 + $0x6e0] sm:$0xff] }
0x125a   : > { %6882 = vmatpush1.bf16.msra.mxu0 %v11230_v43  ;;  %v11210_v43 = vcombine.low %v11143_v54, %v11147_v52  ;;  %v11390_v52 = vld [vmem:[%s17062_s10 + $0x620] sm:$0xff] }
0x125b   : > { %6883 = vmatprep.subr.bf16.mxu0 %v11239_v38  ;;  %v11160_v38 = vld [vmem:[%s17062_s10 + $0x858] sm:$0xff] }
0x125c   : > { %v11229_v14 = vcombine.high %v11160_v38, %v11164_v10 }
0x125e   : > { %6884 = vmatpush1.bf16.msra.mxu0 %v11238_v44  ;;  %v11218_v44 = vcombine.low %v11151_v46, %v11155_v37 }
0x125f   : > { %6885 = vmatprep.subr.bf16.mxu0 %v11247_v51  ;;  %v11168_v51 = vld [vmem:[%s17062_s10 + $0x918] sm:$0xff] }
0x1262   : > { %6886 = vmatpush1.bf16.msra.mxu0 %v11246_v61  ;;  %v11226_v61 = vcombine.low %v11159_v34, %v11163_v48 }
0x1263   : > { %6887 = vmatprep.subr.bf16.mxu0 %v11255_v7  ;;  %v11176_v7 = vld [vmem:[%s17062_s10 + $0x9d8] sm:$0xff] }
0x1264   : > { %v11245_v18 = vcombine.high %v11176_v7, %v11180_v17 }
0x1266   : > { %6888 = vmatpush1.bf16.msra.mxu0 %v11254_v57 }
0x1267   : > { %6955 = vmatprep.subr.bf16.mxu0 %v11203_v21  ;;  %v11188_v21 = vld [vmem:[%s17062_s10 + $0xaf8] sm:$0xff] }
0x12d9   : > { %v6420_v41 = vpop.xlane.xlu0 %6419 }
0x12da   : > { %v6421_v27 = vmul.f32 0.0078125, %v6420_v41 }
0x12dc   : > { %v15641_v25 = vsub.f32 %v6414_v49, %v6421_v27  ;;  %v11182_v49 = vld [vmem:[%s17062_s10 + $0xa88] sm:$0xff]  ;;  %v11131_v27 = vld [vmem:[%s17060_s8 + $0x1] ss:$0 sm:$0xff] }
0x12dd   : > { %v11248_v50 = vcombine.low %v11182_v49, %v11186_v15  ;;  %v11249_v2 = vcombine.high %v11182_v49, %v11186_v15  ;;  %v11171_v49 = vld [vmem:[%s17062_s10 + $0x970] sm:$0xff]  ;;  %v11172_v15 = vld [vmem:[%s17062_s10 + $0x978] sm:$0xff] }
0x12de   : > { %v6423_v30 = vmul.f32 %v15641_v25, %v15641_v25  ;;  %v11237_v6 = vcombine.high %v11168_v51, %v11172_v15  ;;  %v11234_v57 = vcombine.low %v11167_v0, %v11171_v49 }
0x12df   : > { %6926 = vmatprep.subr.bf16.mxu1 %v11249_v2  ;;  %v11235_v2 = vcombine.high %v11167_v0, %v11171_v49 }
0x12e0   : > { %6424 = vadd.xlane.f32.xlu1 %v6423_v30  ;;  %6927 = vmatpush1.bf16.msra.mxu1 %v11248_v50  ;;  %v11228_v50 = vcombine.low %v11160_v38, %v11164_v10  ;;  %v11406_v10 = vld [vmem:[%s17062_s10 + $0x7a0] sm:$0xff] }
0x12e1   : > { %6928 = vmatprep.subr.bf16.mxu1 %v11257_v33  ;;  %v11243_v33 = vcombine.high %v11175_v39, %v11179_v24 }
0x12e4   : > { %6929 = vmatpush1.bf16.msra.mxu1 %v11256_v16  ;;  %v11236_v16 = vcombine.low %v11168_v51, %v11172_v15  ;;  %v11414_v15 = vld [vmem:[%s17062_s10 + $0x860] sm:$0xff] }
0x12e5   : > { %6996 = vmatprep.subr.bf16.mxu1 %v11205_v35  ;;  %v11251_v35 = vcombine.high %v11183_v19, %v11187_v36 }
0x136d   : > { %v6425_v9 = vpop.xlane.xlu1 %6424 }
0x136e   : > { %v6426_v55 = vmul.f32 0.0078125, %v6425_v9 }
0x1370   : > { %v6427_v11 = vadd.f32 1e-12, %v6426_v55  ;;  %v11191_v55 = vld [vmem:[%s17062_s10 + $0xb50] sm:$0xff] }
0x1372   : > { %13486 = vrsqrt.f32 %v6427_v11  ;;  %v11195_v11 = vld [vmem:[%s17062_s10 + $0xbb0] sm:$0xff] }
0x137c   : > { %v13487_v41 = vpop.eup %13486 }
0x137d   : > { %v6429_v30 = vmul.f32 %v13487_v41, %v15641_v25  ;;  %v11148_v25 = vld [vmem:[%s17062_s10 + $0x738] sm:$0xff] }
0x137e   : > { %v11213_v32 = vcombine.high %v11144_v20, %v11148_v25  ;;  %v11212_v1 = vcombine.low %v11144_v20, %v11148_v25  ;;  %v11192_v41 = vld [vmem:[%s17062_s10 + $0xb58] sm:$0xff]  ;;  %v11394_v20 = vld [vmem:[%s17062_s10 + $0x680] sm:$0xff]  ;;  %v11391_v25 = vld [vmem:[%s17062_s10 + $0x628] sm:$0xff] }
0x137f   : > { %v6436_v45 = vmul.f32 %v11131_v27, %v6429_v30  ;;  %v11196_v27 = vld [vmem:[%s17062_s10 + $0xbb8] sm:$0xff]  ;;  %v11250_v30 = vcombine.low %v11183_v19, %v11187_v36  ;;  %v11456_v37 = vcombine.high %v11390_v52, %v11394_v20 }
0x1380   : > { %v11261_v54 = vcombine.high %v11192_v41, %v11196_v27  ;;  %v11260_v46 = vcombine.low %v11192_v41, %v11196_v27  ;;  %v11438_v27 = vld [vmem:[%s17062_s10 + $0xaa0] sm:$0xff] }
0x1381   : > { %v15736_v47 = vadd.f32 %v11132_v26, %v6436_v45  ;;  %v11259_v45 = vcombine.high %v11191_v55, %v11195_v11 }
0x1383   : > { %v15740_v53 = vpack.c.bf16 %v15736_v47, %v15736_v47 }
0x1385   : > { %6906 = vmatmul.mubr.bf16.vlgmr.msra.gmra.mrb[104].mxu0 %v15740_v53  ;;  %6947 = vmatmul.mubr.bf16.vlgmr.msra.gmra.mrb[84].mxu1 %v15740_v53 }
0x1386   : > { %6956 = vmatpush1.bf16.msra.mxu0 %v11202_v4  ;;  %6997 = vmatpush1.bf16.msra.mxu1 %v11204_v23  ;;  %v11184_v4 = vld [vmem:[%s17062_s10 + $0xa98] sm:$0xff]  ;;  %v11244_v23 = vcombine.low %v11176_v7, %v11180_v17  ;;  %v11422_v17 = vld [vmem:[%s17062_s10 + $0x920] sm:$0xff] }
0x1387   : > { %6957 = vmatprep.subr.bf16.mxu0 %v11211_v28  ;;  %6998 = vmatprep.subr.bf16.mxu1 %v11213_v32  ;;  %v11253_v9 = vcombine.high %v11184_v4, %v11188_v21  ;;  %v11252_v26 = vcombine.low %v11184_v4, %v11188_v21  ;;  %v11395_v28 = vld [vmem:[%s17062_s10 + $0x688] sm:$0xff]  ;;  %v11258_v32 = vcombine.low %v11191_v55, %v11195_v11  ;;  %v11430_v21 = vld [vmem:[%s17062_s10 + $0x9e0] sm:$0xff] }
0x1388   : > { %6987 = vmatprep.mubr.bf16.mxu0 %v13605_v29  ;;  %7028 = vmatprep.mubr.bf16.mxu1 %v13605_v29  ;;  %v11458_v63 = vcombine.high %v11391_v25, %v11395_v28  ;;  %v11457_v34 = vcombine.low %v11391_v25, %v11395_v28  ;;  %v11446_v28 = vld [vmem:[%s17062_s10 + $0xb60] sm:$0xff] }
0x138a   : > { %6958 = vmatpush1.bf16.msra.mxu0 %v11210_v43  ;;  %6999 = vmatpush1.bf16.msra.mxu1 %v11212_v1  ;;  %v11402_v43 = vld [vmem:[%s17062_s10 + $0x740] sm:$0xff]  ;;  %v11399_v1 = vld [vmem:[%s17062_s10 + $0x6e8] sm:$0xff] }
0x138b   : > { %6959 = vmatprep.subr.bf16.mxu0 %v11219_v5  ;;  %7000 = vmatprep.subr.bf16.mxu1 %v11221_v8  ;;  %v11403_v5 = vld [vmem:[%s17062_s10 + $0x748] sm:$0xff]  ;;  %v11455_v8 = vcombine.low %v11390_v52, %v11394_v20  ;;  %v11464_v48 = vcombine.high %v11398_v3, %v11402_v43 }
0x138c   : > { %v11466_v38 = vcombine.high %v11399_v1, %v11403_v5  ;;  %v11465_v0 = vcombine.low %v11399_v1, %v11403_v5  ;;  %v11392_v5 = vld [vmem:[%s17062_s10 + $0x630] sm:$0xff] }
0x138e   : > { %6960 = vmatpush1.bf16.msra.mxu0 %v11218_v44  ;;  %7001 = vmatpush1.bf16.msra.mxu1 %v11220_v31  ;;  %v11410_v44 = vld [vmem:[%s17062_s10 + $0x800] sm:$0xff]  ;;  %v11407_v31 = vld [vmem:[%s17062_s10 + $0x7a8] sm:$0xff] }
0x138f   : > { %6961 = vmatprep.subr.bf16.mxu0 %v11227_v12  ;;  %7002 = vmatprep.subr.bf16.mxu1 %v11229_v14  ;;  %v11411_v12 = vld [vmem:[%s17062_s10 + $0x808] sm:$0xff]  ;;  %v11463_v14 = vcombine.low %v11398_v3, %v11402_v43  ;;  %v11472_v49 = vcombine.high %v11406_v10, %v11410_v44 }
0x1390   : > { %v11474_v51 = vcombine.high %v11407_v31, %v11411_v12  ;;  %v11473_v39 = vcombine.low %v11407_v31, %v11411_v12  ;;  %v11400_v12 = vld [vmem:[%s17062_s10 + $0x6f0] sm:$0xff] }
0x1392   : > { %6962 = vmatpush1.bf16.msra.mxu0 %v11226_v61  ;;  %7003 = vmatpush1.bf16.msra.mxu1 %v11228_v50  ;;  %v11418_v61 = vld [vmem:[%s17062_s10 + $0x8c0] sm:$0xff]  ;;  %v11415_v50 = vld [vmem:[%s17062_s10 + $0x868] sm:$0xff] }
0x1393   : > { %6963 = vmatprep.subr.bf16.mxu0 %v11235_v2  ;;  %7004 = vmatprep.subr.bf16.mxu1 %v11237_v6  ;;  %v11419_v2 = vld [vmem:[%s17062_s10 + $0x8c8] sm:$0xff]  ;;  %v11471_v6 = vcombine.low %v11406_v10, %v11410_v44  ;;  %v11480_v24 = vcombine.high %v11414_v15, %v11418_v61 }
0x1394   : > { %v11482_v7 = vcombine.high %v11415_v50, %v11419_v2  ;;  %v11481_v19 = vcombine.low %v11415_v50, %v11419_v2  ;;  %v11408_v2 = vld [vmem:[%s17062_s10 + $0x7b0] sm:$0xff] }
0x1396   : > { %6964 = vmatpush1.bf16.msra.mxu0 %v11234_v57  ;;  %7005 = vmatpush1.bf16.msra.mxu1 %v11236_v16  ;;  %v11426_v57 = vld [vmem:[%s17062_s10 + $0x980] sm:$0xff]  ;;  %v11423_v16 = vld [vmem:[%s17062_s10 + $0x928] sm:$0xff] }
0x1397   : > { %6965 = vmatprep.subr.bf16.mxu0 %v11243_v33  ;;  %7006 = vmatprep.subr.bf16.mxu1 %v11245_v18  ;;  %v11427_v33 = vld [vmem:[%s17062_s10 + $0x988] sm:$0xff]  ;;  %v11479_v18 = vcombine.low %v11414_v15, %v11418_v61  ;;  %v11488_v36 = vcombine.high %v11422_v17, %v11426_v57 }
0x1398   : > { %v11490_v4 = vcombine.high %v11423_v16, %v11427_v33  ;;  %v11489_v55 = vcombine.low %v11423_v16, %v11427_v33  ;;  %v11416_v33 = vld [vmem:[%s17062_s10 + $0x870] sm:$0xff] }
0x139a   : > { %6966 = vmatpush1.bf16.msra.mxu0 %v11242_v22  ;;  %7007 = vmatpush1.bf16.msra.mxu1 %v11244_v23  ;;  %v11434_v22 = vld [vmem:[%s17062_s10 + $0xa40] sm:$0xff]  ;;  %v11431_v23 = vld [vmem:[%s17062_s10 + $0x9e8] sm:$0xff] }
0x139b   : > { %6967 = vmatprep.subr.bf16.mxu0 %v11251_v35  ;;  %7008 = vmatprep.subr.bf16.mxu1 %v11253_v9  ;;  %v11435_v35 = vld [vmem:[%s17062_s10 + $0xa48] sm:$0xff]  ;;  %v11487_v9 = vcombine.low %v11422_v17, %v11426_v57  ;;  %v11496_v11 = vcombine.high %v11430_v21, %v11434_v22 }
0x139c   : > { %v11498_v41 = vcombine.high %v11431_v23, %v11435_v35  ;;  %v11497_v52 = vcombine.low %v11431_v23, %v11435_v35  ;;  %v11424_v35 = vld [vmem:[%s17062_s10 + $0x930] sm:$0xff] }
0x139e   : > { %6968 = vmatpush1.bf16.msra.mxu0 %v11250_v30  ;;  %7009 = vmatpush1.bf16.msra.mxu1 %v11252_v26  ;;  %v11442_v30 = vld [vmem:[%s17062_s10 + $0xb00] sm:$0xff]  ;;  %v11439_v26 = vld [vmem:[%s17062_s10 + $0xaa8] sm:$0xff] }
0x139f   : > { %6969 = vmatprep.subr.bf16.mxu0 %v11259_v45  ;;  %7010 = vmatprep.subr.bf16.mxu1 %v11261_v54  ;;  %v11443_v45 = vld [vmem:[%s17062_s10 + $0xb08] sm:$0xff]  ;;  %v11495_v54 = vcombine.low %v11430_v21, %v11434_v22  ;;  %v11504_v20 = vcombine.high %v11438_v27, %v11442_v30 }
0x13a0   : > { %v11506_v25 = vcombine.high %v11439_v26, %v11443_v45  ;;  %v11505_v3 = vcombine.low %v11439_v26, %v11443_v45  ;;  %v11432_v45 = vld [vmem:[%s17062_s10 + $0x9f0] sm:$0xff] }
0x13a2   : > { %6970 = vmatpush1.bf16.msra.mxu0 %v11258_v32  ;;  %7011 = vmatpush1.bf16.msra.mxu1 %v11260_v46  ;;  %v11450_v32 = vld [vmem:[%s17062_s10 + $0xbc0] sm:$0xff]  ;;  %v11447_v46 = vld [vmem:[%s17062_s10 + $0xb68] sm:$0xff] }
0x13a3   : > { %7672 = vmatprep.subr.bf16.mxu0 %v11456_v37  ;;  %7713 = vmatprep.subr.bf16.mxu1 %v11458_v63  ;;  %v11451_v37 = vld [vmem:[%s17062_s10 + $0xbc8] sm:$0xff]  ;;  %v11503_v63 = vcombine.low %v11438_v27, %v11442_v30  ;;  %v11512_v43 = vcombine.high %v11446_v28, %v11450_v32 }
0x13a4   : > { %v11514_v1 = vcombine.high %v11447_v46, %v11451_v37  ;;  %v11513_v10 = vcombine.low %v11447_v46, %v11451_v37  ;;  %v11440_v37 = vld [vmem:[%s17062_s10 + $0xab0] sm:$0xff] }
0x13a5   : > { %6988 = vmatmul.mubr.bf16.vlgmr.msra.gmra.mrb[108].mxu0 %v15740_v53  ;;  %7029 = vmatmul.mubr.bf16.vlgmr.msra.gmra.mrb[88].mxu1 %v15740_v53 }
0x13a6   : > { %7673 = vmatpush1.bf16.msra.mxu0 %v11455_v8  ;;  %7714 = vmatpush1.bf16.msra.mxu1 %v11457_v34  ;;  %v11396_v8 = vld [vmem:[%s17062_s10 + $0x690] sm:$0xff]  ;;  %v11393_v34 = vld [vmem:[%s17062_s10 + $0x638] sm:$0xff] }
0x13a7   : > { %7674 = vmatprep.subr.bf16.mxu0 %v11464_v48  ;;  %7715 = vmatprep.subr.bf16.mxu1 %v11466_v38  ;;  %v11397_v48 = vld [vmem:[%s17062_s10 + $0x698] sm:$0xff]  ;;  %v11511_v38 = vcombine.low %v11446_v28, %v11450_v32  ;;  %v11460_v44 = vcombine.high %v11392_v5, %v11396_v8 }
0x13a8   : > { %7704 = vmatprep.mubr.bf16.mxu0 %v13605_v29  ;;  %7745 = vmatprep.mubr.bf16.mxu1 %v13605_v29  ;;  %v11462_v31 = vcombine.high %v11393_v34, %v11397_v48  ;;  %v11461_v15 = vcombine.low %v11393_v34, %v11397_v48  ;;  %v11448_v48 = vld [vmem:[%s17062_s10 + $0xb70] sm:$0xff] }
0x13aa   : > { %7675 = vmatpush1.bf16.msra.mxu0 %v11463_v14  ;;  %7716 = vmatpush1.bf16.msra.mxu1 %v11465_v0  ;;  %v11404_v14 = vld [vmem:[%s17062_s10 + $0x750] sm:$0xff]  ;;  %v11401_v0 = vld [vmem:[%s17062_s10 + $0x6f8] sm:$0xff] }
0x13ab   : > { %7676 = vmatprep.subr.bf16.mxu0 %v11472_v49  ;;  %7717 = vmatprep.subr.bf16.mxu1 %v11474_v51  ;;  %v11405_v49 = vld [vmem:[%s17062_s10 + $0x758] sm:$0xff]  ;;  %v11459_v51 = vcombine.low %v11392_v5, %v11396_v8  ;;  %v11468_v61 = vcombine.high %v11400_v12, %v11404_v14 }
0x13ac   : > { %v11470_v50 = vcombine.high %v11401_v0, %v11405_v49  ;;  %v11469_v17 = vcombine.low %v11401_v0, %v11405_v49 }
0x13ae   : > { %7677 = vmatpush1.bf16.msra.mxu0 %v11471_v6  ;;  %7718 = vmatpush1.bf16.msra.mxu1 %v11473_v39  ;;  %v11412_v6 = vld [vmem:[%s17062_s10 + $0x810] sm:$0xff]  ;;  %v11409_v39 = vld [vmem:[%s17062_s10 + $0x7b8] sm:$0xff] }
0x13af   : > { %7678 = vmatprep.subr.bf16.mxu0 %v11480_v24  ;;  %7719 = vmatprep.subr.bf16.mxu1 %v11482_v7  ;;  %v11413_v24 = vld [vmem:[%s17062_s10 + $0x818] sm:$0xff]  ;;  %v11467_v7 = vcombine.low %v11400_v12, %v11404_v14  ;;  %v11476_v57 = vcombine.high %v11408_v2, %v11412_v6 }
0x13b0   : > { %v11478_v16 = vcombine.high %v11409_v39, %v11413_v24  ;;  %v11477_v21 = vcombine.low %v11409_v39, %v11413_v24  ;;  %v13213_v39 = vld [vmem:[%s17064_s12 + $0x8c8] sm:$0xff]  }
0x13b1   : > { %v13214_v24 = vld [vmem:[%s17064_s12 + $0x808] sm:$0xff]  }
0x13b2   : > { %7679 = vmatpush1.bf16.msra.mxu0 %v11479_v18  ;;  %7720 = vmatpush1.bf16.msra.mxu1 %v11481_v19  ;;  %v11420_v18 = vld [vmem:[%s17062_s10 + $0x8d0] sm:$0xff]  ;;  %v11417_v19 = vld [vmem:[%s17062_s10 + $0x878] sm:$0xff] }
0x13b3   : > { %7680 = vmatprep.subr.bf16.mxu0 %v11488_v36  ;;  %7721 = vmatprep.subr.bf16.mxu1 %v11490_v4  ;;  %v11421_v36 = vld [vmem:[%s17062_s10 + $0x8d8] sm:$0xff]  ;;  %v11475_v4 = vcombine.low %v11408_v2, %v11412_v6  ;;  %v11484_v22 = vcombine.high %v11416_v33, %v11420_v18  ;;  %v13211_v2 = vld [vmem:[%s17064_s12 + $0x880] sm:$0xff]   ;;  %v13212_v6 = vld [vmem:[%s17064_s12 + $0x848] sm:$0xff]  }
0x13b4   : > { %v11486_v23 = vcombine.high %v11417_v19, %v11421_v36  ;;  %v11485_v27 = vcombine.low %v11417_v19, %v11421_v36  ;;  %v13221_v19 = vld [vmem:[%s17064_s12 + $0x8d8] sm:$0xff]  }
0x13b5   : > { %v13222_v36 = vld [vmem:[%s17064_s12 + $0x818] sm:$0xff]  }
0x13b6   : > { %7681 = vmatpush1.bf16.msra.mxu0 %v11487_v9  ;;  %7722 = vmatpush1.bf16.msra.mxu1 %v11489_v55  ;;  %v11428_v9 = vld [vmem:[%s17062_s10 + $0x990] sm:$0xff]  ;;  %v11425_v55 = vld [vmem:[%s17062_s10 + $0x938] sm:$0xff] }
0x13b7   : > { %7682 = vmatprep.subr.bf16.mxu0 %v11496_v11  ;;  %7723 = vmatprep.subr.bf16.mxu1 %v11498_v41  ;;  %v11429_v11 = vld [vmem:[%s17062_s10 + $0x998] sm:$0xff]  ;;  %v11483_v41 = vcombine.low %v11416_v33, %v11420_v18  ;;  %v11492_v30 = vcombine.high %v11424_v35, %v11428_v9  ;;  %v13219_v33 = vld [vmem:[%s17064_s12 + $0x890] sm:$0xff]  }
0x13b8   : > { %v11494_v26 = vcombine.high %v11425_v55, %v11429_v11  ;;  %v11493_v28 = vcombine.low %v11425_v55, %v11429_v11  ;;  %v13220_v18 = vld [vmem:[%s17064_s12 + $0x858] sm:$0xff]   ;;  %v13229_v55 = vld [vmem:[%s17064_s12 + $0x8e8] sm:$0xff]  }
0x13b9   : > { %v13230_v11 = vld [vmem:[%s17064_s12 + $0x828] sm:$0xff]  }
0x13ba   : > { %7683 = vmatpush1.bf16.msra.mxu0 %v11495_v54  ;;  %7724 = vmatpush1.bf16.msra.mxu1 %v11497_v52  ;;  %v11436_v54 = vld [vmem:[%s17062_s10 + $0xa50] sm:$0xff]  ;;  %v11433_v52 = vld [vmem:[%s17062_s10 + $0x9f8] sm:$0xff] }
0x13bb   : > { %7684 = vmatprep.subr.bf16.mxu0 %v11504_v20  ;;  %7725 = vmatprep.subr.bf16.mxu1 %v11506_v25  ;;  %v11437_v20 = vld [vmem:[%s17062_s10 + $0xa58] sm:$0xff]  ;;  %v11491_v25 = vcombine.low %v11424_v35, %v11428_v9  ;;  %v11500_v32 = vcombine.high %v11432_v45, %v11436_v54  ;;  %v13227_v35 = vld [vmem:[%s17064_s12 + $0x8a0] sm:$0xff]   ;;  %v13228_v9 = vld [vmem:[%s17064_s12 + $0x868] sm:$0xff]  }
0x13bc   : > { %v11502_v46 = vcombine.high %v11433_v52, %v11437_v20  ;;  %v11501_v5 = vcombine.low %v11433_v52, %v11437_v20  ;;  %v13237_v52 = vld [vmem:[%s17064_s12 + $0x8f8] sm:$0xff]  }
0x13bd   : > { %v13238_v20 = vld [vmem:[%s17064_s12 + $0x838] sm:$0xff]  }
0x13be   : > { %7685 = vmatpush1.bf16.msra.mxu0 %v11503_v63  ;;  %7726 = vmatpush1.bf16.msra.mxu1 %v11505_v3  ;;  %v11444_v63 = vld [vmem:[%s17062_s10 + $0xb10] sm:$0xff]  ;;  %v11441_v3 = vld [vmem:[%s17062_s10 + $0xab8] sm:$0xff] }
0x13bf   : > { %7686 = vmatprep.subr.bf16.mxu0 %v11512_v43  ;;  %7727 = vmatprep.subr.bf16.mxu1 %v11514_v1  ;;  %v11445_v43 = vld [vmem:[%s17062_s10 + $0xb18] sm:$0xff]  ;;  %v11499_v1 = vcombine.low %v11432_v45, %v11436_v54  ;;  %v11508_v8 = vcombine.high %v11440_v37, %v11444_v63  ;;  %v13235_v45 = vld [vmem:[%s17064_s12 + $0x8b0] sm:$0xff]  }
0x13c0   : > { %v11510_v34 = vcombine.high %v11441_v3, %v11445_v43  ;;  %v11509_v12 = vcombine.low %v11441_v3, %v11445_v43  ;;  %v13236_v54 = vld [vmem:[%s17064_s12 + $0x878] sm:$0xff]  }
0x13c2   : > { %7687 = vmatpush1.bf16.msra.mxu0 %v11511_v38  ;;  %7728 = vmatpush1.bf16.msra.mxu1 %v11513_v10  ;;  %v11452_v38 = vld [vmem:[%s17062_s10 + $0xbd0] sm:$0xff]  ;;  %v11449_v10 = vld [vmem:[%s17062_s10 + $0xb78] sm:$0xff] }
0x13c3   : > { %7754 = vmatprep.subr.bf16.mxu0 %v11460_v44  ;;  %7795 = vmatprep.subr.bf16.mxu1 %v11462_v31  ;;  %v11453_v44 = vld [vmem:[%s17062_s10 + $0xbd8] sm:$0xff]  ;;  %v11507_v31 = vcombine.low %v11440_v37, %v11444_v63  ;;  %v11516_v14 = vcombine.high %v11448_v48, %v11452_v38  ;;  %v11515_v49 = vcombine.low %v11448_v48, %v11452_v38 }
0x13c4   : > { %v11518_v0 = vcombine.high %v11449_v10, %v11453_v44 }
0x13c5   : > { %7705 = vmatmul.mubr.bf16.vlgmr.msra.gmra.mrb[112].mxu0 %v15740_v53  ;;  %7746 = vmatmul.mubr.bf16.vlgmr.msra.gmra.mrb[92].mxu1 %v15740_v53 }
0x13c6   : > { %7755 = vmatpush1.bf16.msra.mxu0 %v11459_v51  ;;  %7796 = vmatpush1.bf16.msra.mxu1 %v11461_v15  ;;  %v11517_v51 = vcombine.low %v11449_v10, %v11453_v44  ;;  %v13208_v15 = vld [vmem:[%s17064_s12 + $0x840] sm:$0xff]  }
0x13c7   : > { %7756 = vmatprep.subr.bf16.mxu0 %v11468_v61  ;;  %7797 = vmatprep.subr.bf16.mxu1 %v11470_v50  ;;  %v13209_v61 = vld [vmem:[%s17064_s12 + $0x8c0] sm:$0xff]  }
0x13c8   : > { %7786 = vmatprep.mubr.bf16.mxu0 %v13605_v29  ;;  %7827 = vmatprep.mubr.bf16.mxu1 %v13605_v29  ;;  %v13210_v50 = vld [vmem:[%s17064_s12 + $0x800] sm:$0xff]  }
0x13ca   : > { %7757 = vmatpush1.bf16.msra.mxu0 %v11467_v7  ;;  %7798 = vmatpush1.bf16.msra.mxu1 %v11469_v17  ;;  %v13215_v7 = vld [vmem:[%s17064_s12 + $0x888] sm:$0xff]   ;;  %v13216_v17 = vld [vmem:[%s17064_s12 + $0x850] sm:$0xff]  }
0x13cb   : > { %7758 = vmatprep.subr.bf16.mxu0 %v11476_v57  ;;  %7799 = vmatprep.subr.bf16.mxu1 %v11478_v16  ;;  %v13217_v57 = vld [vmem:[%s17064_s12 + $0x8d0] sm:$0xff]  }
0x13cc   : > { %v13218_v16 = vld [vmem:[%s17064_s12 + $0x810] sm:$0xff]  }
0x13ce   : > { %7759 = vmatpush1.bf16.msra.mxu0 %v11475_v4  ;;  %7800 = vmatpush1.bf16.msra.mxu1 %v11477_v21  ;;  %v13223_v4 = vld [vmem:[%s17064_s12 + $0x898] sm:$0xff]   ;;  %v13224_v21 = vld [vmem:[%s17064_s12 + $0x860] sm:$0xff]  }
0x13cf   : > { %7760 = vmatprep.subr.bf16.mxu0 %v11484_v22  ;;  %7801 = vmatprep.subr.bf16.mxu1 %v11486_v23  ;;  %v13225_v22 = vld [vmem:[%s17064_s12 + $0x8e0] sm:$0xff]  }
0x13d0   : > { %v13226_v23 = vld [vmem:[%s17064_s12 + $0x820] sm:$0xff]  }
0x13d2   : > { %7761 = vmatpush1.bf16.msra.mxu0 %v11483_v41  ;;  %7802 = vmatpush1.bf16.msra.mxu1 %v11485_v27  ;;  %v13231_v41 = vld [vmem:[%s17064_s12 + $0x8a8] sm:$0xff]   ;;  %v13232_v27 = vld [vmem:[%s17064_s12 + $0x870] sm:$0xff]  }
0x13d3   : > { %7762 = vmatprep.subr.bf16.mxu0 %v11492_v30  ;;  %7803 = vmatprep.subr.bf16.mxu1 %v11494_v26  ;;  %v13233_v30 = vld [vmem:[%s17064_s12 + $0x8f0] sm:$0xff]  }
0x13d4   : > { %v13234_v26 = vld [vmem:[%s17064_s12 + $0x830] sm:$0xff]  }
0x13d6   : > { %7763 = vmatpush1.bf16.msra.mxu0 %v11491_v25  ;;  %7804 = vmatpush1.bf16.msra.mxu1 %v11493_v28  ;;  %v13239_v25 = vld [vmem:[%s17064_s12 + $0x8b8] sm:$0xff]   ;;  %v13240_v28 = vld [vmem:[%s17064_s12 + $0x940] sm:$0xff]  }
0x13d7   : > { %7764 = vmatprep.subr.bf16.mxu0 %v11500_v32  ;;  %7805 = vmatprep.subr.bf16.mxu1 %v11502_v46  ;;  %v13241_v32 = vld [vmem:[%s17064_s12 + $0x9c0] sm:$0xff]  }
0x13da   : > { %7765 = vmatpush1.bf16.msra.mxu0 %v11499_v1  ;;  %7806 = vmatpush1.bf16.msra.mxu1 %v11501_v5 }
0x13db   : > { %7766 = vmatprep.subr.bf16.mxu0 %v11508_v8  ;;  %7807 = vmatprep.subr.bf16.mxu1 %v11510_v34 }
0x13de   : > { %7767 = vmatpush1.bf16.msra.mxu0 %v11507_v31  ;;  %7808 = vmatpush1.bf16.msra.mxu1 %v11509_v12 }
0x13df   : > { %7768 = vmatprep.subr.bf16.mxu0 %v11516_v14  ;;  %7809 = vmatprep.subr.bf16.mxu1 %v11518_v0  ;;  %v16137_v0 = vld [vmem:[%s17063_s11 + $0x20] sm:$0xff] }
0x13e2   : > { %7769 = vmatpush1.bf16.msra.mxu0 %v11515_v49  ;;  %7810 = vmatpush1.bf16.msra.mxu1 %v11517_v51  ;;  %v7315_v49 = vrot.slane %v16137_v0, %v13861_v40  ;;  %v7323_v51 = vrot.slane %v16137_v0, %v13883_v58 }
0x13e3   : > { %12441 = vmatprep.subr.bf16.mxu0 %v13208_v15  ;;  %12463 = vmatprep.subr.bf16.mxu1 %v13209_v61  ;;  %v7319_v15 = vrot.slane %v16137_v0, %v13867_v42  ;;  %v7327_v61 = vrot.slane %v16137_v0, %v14521_v56 }
0x13e5   : > { %7787 = vmatmul.mubr.bf16.vlgmr.msra.gmra.mrb[116].mxu0 %v15740_v53  ;;  %7828 = vmatmul.mubr.bf16.vlgmr.msra.gmra.mrb[96].mxu1 %v15740_v53 }
0x13e6   : > { %12442 = vmatpush3.bf16.msra.mxu0 %v13210_v50  ;;  %12464 = vmatpush3.bf16.msra.mxu1 %v13211_v2 }
0x13e7   : > { %12443 = vmatprep.subr.bf16.mxu0 %v13212_v6  ;;  %12465 = vmatprep.subr.bf16.mxu1 %v13213_v39 }
0x13ea   : > { %12444 = vmatpush3.bf16.msra.mxu0 %v13214_v24  ;;  %12466 = vmatpush3.bf16.msra.mxu1 %v13215_v7 }
0x13eb   : > { %12445 = vmatprep.subr.bf16.mxu0 %v13216_v17  ;;  %12467 = vmatprep.subr.bf16.mxu1 %v13217_v57 }
0x13ee   : > { %12446 = vmatpush3.bf16.msra.mxu0 %v13218_v16  ;;  %12468 = vmatpush3.bf16.msra.mxu1 %v13219_v33 }
0x13ef   : > { %12447 = vmatprep.subr.bf16.mxu0 %v13220_v18  ;;  %12469 = vmatprep.subr.bf16.mxu1 %v13221_v19 }
0x13f2   : > { %12448 = vmatpush3.bf16.msra.mxu0 %v13222_v36  ;;  %12470 = vmatpush3.bf16.msra.mxu1 %v13223_v4 }
0x13f3   : > { %12449 = vmatprep.subr.bf16.mxu0 %v13224_v21  ;;  %12471 = vmatprep.subr.bf16.mxu1 %v13225_v22 }
0x13f6   : > { %12450 = vmatpush3.bf16.msra.mxu0 %v13226_v23  ;;  %12472 = vmatpush3.bf16.msra.mxu1 %v13227_v35 }
0x13f7   : > { %12451 = vmatprep.subr.bf16.mxu0 %v13228_v9  ;;  %12473 = vmatprep.subr.bf16.mxu1 %v13229_v55 }
0x13fa   : > { %12452 = vmatpush3.bf16.msra.mxu0 %v13230_v11  ;;  %12474 = vmatpush3.bf16.msra.mxu1 %v13231_v41 }
0x13fb   : > { %12453 = vmatprep.subr.bf16.mxu0 %v13232_v27  ;;  %12475 = vmatprep.subr.bf16.mxu1 %v13233_v30 }
0x13fe   : > { %12454 = vmatpush3.bf16.msra.mxu0 %v13234_v26  ;;  %12476 = vmatpush3.bf16.msra.mxu1 %v13235_v45 }
0x13ff   : > { %12455 = vmatprep.subr.bf16.mxu0 %v13236_v54  ;;  %12477 = vmatprep.subr.bf16.mxu1 %v13237_v52 }
0x1402   : > { %12456 = vmatpush3.bf16.msra.mxu0 %v13238_v20  ;;  %12478 = vmatpush3.bf16.msra.mxu1 %v13239_v25 }
0x1403   : > { %12485 = vmatprep.subr.bf16.mxu0 %v13240_v28  ;;  %12507 = vmatprep.subr.bf16.mxu1 %v13241_v32  ;;  %v16150_v28 = vld [vmem:[%s17063_s11 + $0x18] sm:$0xff] }
0x1458   : > { %v16122_v46 = vpop.f32.mrb[104].mxu0  ;;  %v16124_v37 = vpop.f32.mrb[84].mxu1 }
0x1459   : > { %v6909_v63 = vpop.f32.mrb[105].mxu0  ;;  %v6950_v3 = vpop.f32.mrb[85].mxu1 }
0x145a   : > { %v6911_v43 = vpop.f32.mrb[106].mxu0  ;;  %v6952_v1 = vpop.f32.mrb[86].mxu1 }
0x145b   : > { %v6912_v5 = vpop.f32.mrb[107].mxu0  ;;  %v6953_v8 = vpop.f32.mrb[87].mxu1  ;;  %v6520_v1 = vrot.slane %v16150_v28, %v13867_v42 }
0x145c   : > { %v6528_v5 = vrot.slane %v16150_v28, %v14521_v56 }
0x145d   : > { %v16156_v8 = vadd.f32 %v6909_v63, %v6520_v1 }
0x1478   : > { %v16126_v34 = vpop.f32.mrb[108].mxu0  ;;  %v16128_v48 = vpop.f32.mrb[88].mxu1 }
0x1479   : > { %v16130_v38 = vpop.f32.mrb[109].mxu0  ;;  %v16132_v10 = vpop.f32.mrb[89].mxu1 }
0x147a   : > { %v6993_v44 = vpop.f32.mrb[110].mxu0  ;;  %v7034_v31 = vpop.f32.mrb[90].mxu1 }
0x147b   : > { %v6994_v12 = vpop.f32.mrb[111].mxu0  ;;  %v7035_v14 = vpop.f32.mrb[91].mxu1  ;;  %v16158_v44 = vadd.f32 %v6950_v3, %v6528_v5 }
0x147c   : > { %v7046_v12 = vmul.f32 %v16156_v8, %v16156_v8 }
0x147e   : > { %v7054_v63 = vmul.f32 %v7046_v12, %v16156_v8 }
0x1498   : > { %v7706_v50 = vpop.f32.mrb[112].mxu0  ;;  %v7747_v2 = vpop.f32.mrb[92].mxu1 }
0x1499   : > { %v7707_v6 = vadd.f32 %v7706_v50, %v7315_v49  ;;  %v7748_v39 = vadd.f32 %v7747_v2, %v7323_v51  ;;  %v7708_v24 = vpop.f32.mrb[113].mxu0  ;;  %v7749_v7 = vpop.f32.mrb[93].mxu1  ;;  %v7048_v49 = vmul.f32 %v16158_v44, %v16158_v44 }
0x149a   : > { %v7709_v17 = vadd.f32 %v7708_v24, %v7319_v15  ;;  %v7750_v57 = vadd.f32 %v7749_v7, %v7327_v61  ;;  %v7710_v16 = vpop.f32.mrb[114].mxu0  ;;  %v7751_v33 = vpop.f32.mrb[94].mxu1 }
0x149b   : > { %v7844_v18 = vmul.f32 %v7707_v6, %v7707_v6  ;;  %v7846_v19 = vmul.f32 %v7748_v39, %v7748_v39  ;;  %v7711_v36 = vpop.f32.mrb[115].mxu0  ;;  %v7752_v4 = vpop.f32.mrb[95].mxu1  ;;  %v7836_v61 = vmul.f32 0.5, %v7707_v6  ;;  %v7838_v24 = vmul.f32 0.5, %v7748_v39 }
0x149c   : > { %v7845_v21 = vmul.f32 %v7709_v17, %v7709_v17  ;;  %v7847_v22 = vmul.f32 %v7750_v57, %v7750_v57  ;;  %v7837_v7 = vmul.f32 0.5, %v7709_v17  ;;  %v7839_v3 = vmul.f32 0.5, %v7750_v57 }
0x149d   : > { %v7852_v23 = vmul.f32 %v7844_v18, %v7707_v6  ;;  %v7854_v35 = vmul.f32 %v7846_v19, %v7748_v39  ;;  %v7056_v19 = vmul.f32 %v7048_v49, %v16158_v44 }
0x149e   : > { %v7853_v9 = vmul.f32 %v7845_v21, %v7709_v17  ;;  %v7855_v55 = vmul.f32 %v7847_v22, %v7750_v57  ;;  %v7331_v22 = vrot.slane %v16137_v0, %v14549_v59 }
0x149f   : > { %v7860_v11 = vmul.f32 0.044715, %v7852_v23  ;;  %v7862_v41 = vmul.f32 0.044715, %v7854_v35  ;;  %v7062_v35 = vmul.f32 0.044715, %v7054_v63 }
0x14a0   : > { %v7861_v27 = vmul.f32 0.044715, %v7853_v9  ;;  %v7863_v30 = vmul.f32 0.044715, %v7855_v55 }
0x14a1   : > { %v7868_v26 = vadd.f32 %v7860_v11, %v7707_v6  ;;  %v7870_v45 = vadd.f32 %v7862_v41, %v7748_v39  ;;  %v7339_v6 = vrot.slane %v16137_v0, %v14552_v60  ;;  %v13242_v39 = vld [vmem:[%s17064_s12 + $0x900] sm:$0xff]   ;;  %v13244_v41 = vld [vmem:[%s17064_s12 + $0x948] sm:$0xff]   ;;  %v7070_v12 = vadd.f32 %v7062_v35, %v16156_v8 }
0x14a2   : > { %v7869_v54 = vadd.f32 %v7861_v27, %v7709_v17  ;;  %v7871_v52 = vadd.f32 %v7863_v30, %v7750_v57  ;;  %v7335_v17 = vrot.slane %v16137_v0, %v14555_v62  ;;  %v7343_v57 = vrot.slane %v16137_v0, %v14560_v13  ;;  %v13243_v11 = vld [vmem:[%s17064_s12 + $0x980] sm:$0xff]   ;;  %v13245_v0 = vld [vmem:[%s17064_s12 + $0x9c8] sm:$0xff]  }
0x14a3   : > { %v7876_v20 = vmul.f32 0.7978846, %v7868_v26  ;;  %v7878_v25 = vmul.f32 0.7978846, %v7870_v45  ;;  %v7064_v27 = vmul.f32 0.044715, %v7056_v19 }
0x14a4   : > { %v7877_v32 = vmul.f32 0.7978846, %v7869_v54  ;;  %v7879_v43 = vmul.f32 0.7978846, %v7871_v52 }
0x14a5   : > { %13488 = vtanh.f32 %v7876_v20 }
0x14a6   : > { %13490 = vtanh.f32 %v7878_v25 }
0x14a7   : > { %13492 = vtanh.f32 %v7877_v32 }
0x14a8   : > { %13494 = vtanh.f32 %v7879_v43 }
0x14af   : > { %v13489_v31 = vpop.eup %13488 }
0x14b0   : > { %v13491_v14 = vpop.eup %13490  ;;  %v7892_v51 = vadd.f32 1.0, %v13489_v31  ;;  %v13246_v31 = vld [vmem:[%s17064_s12 + $0x908] sm:$0xff]  }
0x14b1   : > { %v13493_v15 = vpop.eup %13492  ;;  %v7894_v50 = vadd.f32 1.0, %v13491_v14 }
0x14b2   : > { %v13495_v2 = vpop.eup %13494  ;;  %v7893_v16 = vadd.f32 1.0, %v13493_v15  ;;  %v7900_v18 = vmul.f32 %v7892_v51, %v7836_v61  ;;  %v13247_v61 = vld [vmem:[%s17064_s12 + $0x988] sm:$0xff]  }
0x14b3   : > { %v7895_v33 = vadd.f32 1.0, %v13495_v2  ;;  %v7902_v4 = vmul.f32 %v7894_v50, %v7838_v24  ;;  %v13248_v50 = vld [vmem:[%s17064_s12 + $0x950] sm:$0xff]   ;;  %v7072_v2 = vadd.f32 %v7064_v27, %v16158_v44 }
0x14b4   : > { %v7901_v36 = vmul.f32 %v7893_v16, %v7837_v7  ;;  %v8036_v55 = vpack.c.bf16 %v7900_v18, %v7900_v18  ;;  %v13249_v16 = vld [vmem:[%s17064_s12 + $0x9d0] sm:$0xff]  }
0x14b5   : > { %v7903_v21 = vmul.f32 %v7895_v33, %v7839_v3  ;;  %v8038_v45 = vpack.c.bf16 %v7902_v4, %v7902_v4  ;;  %v13250_v33 = vld [vmem:[%s17064_s12 + $0x910] sm:$0xff]   ;;  %v13252_v4 = vld [vmem:[%s17064_s12 + $0x958] sm:$0xff]  }
0x14b6   : > { %v8037_v23 = vpack.c.bf16 %v7901_v36, %v7901_v36  ;;  %v13251_v36 = vld [vmem:[%s17064_s12 + $0x990] sm:$0xff]  }
0x14b7   : > { %v8039_v9 = vpack.c.bf16 %v7903_v21, %v7903_v21  ;;  %v13253_v21 = vld [vmem:[%s17064_s12 + $0x9d8] sm:$0xff]  }
0x14b8   : > { %8460 = vmatprep.mubr.bf16.mxu0 %v8037_v23  ;;  %v7788_v30 = vpop.f32.mrb[116].mxu0  ;;  %v7829_v26 = vpop.f32.mrb[96].mxu1 }
0x14b9   : > { %8500 = vmatprep.mubr.bf16.mxu1 %v8039_v9  ;;  %v16186_v54 = vadd.f32 %v7788_v30, %v7331_v22  ;;  %v16188_v52 = vadd.f32 %v7829_v26, %v7339_v6  ;;  %8461 = vmatmul.mubr.bf16.vlgmr.msra.gmra.mrb[120].mxu0 %v8036_v55  ;;  %v7790_v20 = vpop.f32.mrb[117].mxu0  ;;  %v7831_v25 = vpop.f32.mrb[97].mxu1  ;;  %v7078_v22 = vmul.f32 0.7978846, %v7070_v12  ;;  %v13255_v26 = vld [vmem:[%s17064_s12 + $0x998] sm:$0xff]   ;;  %v13259_v12 = vld [vmem:[%s17064_s12 + $0x9a0] sm:$0xff]  }
0x14ba   : > { %8501 = vmatmul.mubr.bf16.vlgmr.msra.gmra.mrb[100].mxu1 %v8038_v45  ;;  %12486 = vmatpush3.bf16.msra.mxu0 %v13242_v39  ;;  %v16190_v32 = vadd.f32 %v7790_v20, %v7335_v17  ;;  %v16192_v43 = vadd.f32 %v7831_v25, %v7343_v57  ;;  %v7792_v1 = vpop.f32.mrb[118].mxu0  ;;  %v7833_v5 = vpop.f32.mrb[98].mxu1  ;;  %v7080_v39 = vmul.f32 0.7978846, %v7072_v2  ;;  %v13256_v45 = vld [vmem:[%s17064_s12 + $0x960] sm:$0xff]   ;;  %v13263_v2 = vld [vmem:[%s17064_s12 + $0x9a8] sm:$0xff]  }
0x14bb   : > { %v7848_v14 = vmul.f32 %v16186_v54, %v16186_v54  ;;  %v7850_v49 = vmul.f32 %v16188_v52, %v16188_v52  ;;  %12508 = vmatpush3.bf16.msra.mxu1 %v13243_v11  ;;  %v7793_v51 = vpop.f32.mrb[119].mxu0  ;;  %v7834_v15 = vpop.f32.mrb[99].mxu1  ;;  %12487 = vmatprep.subr.bf16.mxu0 %v13244_v41  ;;  %v13254_v41 = vld [vmem:[%s17064_s12 + $0x918] sm:$0xff]   ;;  %13496 = vtanh.f32 %v7078_v22  ;;  %v13257_v1 = vld [vmem:[%s17064_s12 + $0x9e0] sm:$0xff]  }
0x14bc   : > { %v7849_v24 = vmul.f32 %v16190_v32, %v16190_v32  ;;  %v7851_v7 = vmul.f32 %v16192_v43, %v16192_v43  ;;  %12509 = vmatprep.subr.bf16.mxu1 %v13245_v0  ;;  %v6516_v0 = vrot.slane %v16150_v28, %v13861_v40  ;;  %13498 = vtanh.f32 %v7080_v39  ;;  %v13258_v5 = vld [vmem:[%s17064_s12 + $0x920] sm:$0xff]   ;;  %v13261_v15 = vld [vmem:[%s17064_s12 + $0x9e8] sm:$0xff]  }
0x14bd   : > { %v7856_v63 = vmul.f32 %v7848_v14, %v16186_v54  ;;  %v7858_v3 = vmul.f32 %v7850_v49, %v16188_v52  ;;  %v13260_v14 = vld [vmem:[%s17064_s12 + $0x968] sm:$0xff]   ;;  %v6536_v51 = vrot.slane %v16150_v28, %v14555_v62  ;;  %v7038_v39 = vmul.f32 0.5, %v16156_v8 }
0x14be   : > { %v7857_v18 = vmul.f32 %v7849_v24, %v16190_v32  ;;  %v7859_v19 = vmul.f32 %v7851_v7, %v16192_v43  ;;  %12488 = vmatpush3.bf16.msra.mxu0 %v13246_v31  ;;  %v6524_v31 = vrot.slane %v16150_v28, %v13883_v58  ;;  %v16262_v49 = vadd.f32 %v16122_v46, %v6516_v0  ;;  %v13264_v24 = vld [vmem:[%s17064_s12 + $0x970] sm:$0xff]  }
0x14bf   : > { %v7864_v6 = vmul.f32 0.044715, %v7856_v63  ;;  %v7866_v23 = vmul.f32 0.044715, %v7858_v3  ;;  %12510 = vmatpush3.bf16.msra.mxu1 %v13247_v61  ;;  %12489 = vmatprep.subr.bf16.mxu0 %v13248_v50  ;;  %v6544_v61 = vrot.slane %v16150_v28, %v14560_v13  ;;  %v13262_v50 = vld [vmem:[%s17064_s12 + $0x928] sm:$0xff]   ;;  %v7843_v0 = vmul.f32 0.5, %v16192_v43 }
0x14c0   : > { %v7865_v17 = vmul.f32 0.044715, %v7857_v18  ;;  %v7867_v57 = vmul.f32 0.044715, %v7859_v19  ;;  %12511 = vmatprep.subr.bf16.mxu1 %v13249_v16  ;;  %v16275_v46 = vadd.f32 %v16124_v37, %v6524_v31  ;;  %v7045_v7 = vmul.f32 %v16262_v49, %v16262_v49  ;;  %v13265_v37 = vld [vmem:[%s17064_s12 + $0x9f0] sm:$0xff]  }
0x14c1   : > { %v7872_v35 = vadd.f32 %v7864_v6, %v16186_v54  ;;  %v7874_v9 = vadd.f32 %v7866_v23, %v16188_v52  ;;  %v16286_v16 = vadd.f32 %v16130_v38, %v6536_v51  ;;  %v16292_v3 = vadd.f32 %v16132_v10, %v6544_v61  ;;  %v13266_v18 = vld [vmem:[%s17064_s12 + $0x930] sm:$0xff]   ;;  %v13268_v10 = vld [vmem:[%s17064_s12 + $0x978] sm:$0xff]  }
0x14c2   : > { %v7873_v55 = vadd.f32 %v7865_v17, %v16190_v32  ;;  %v7875_v11 = vadd.f32 %v7867_v57, %v16192_v43  ;;  %12490 = vmatpush3.bf16.msra.mxu0 %v13250_v33  ;;  %v7047_v38 = vmul.f32 %v16275_v46, %v16275_v46  ;;  %v13269_v6 = vld [vmem:[%s17064_s12 + $0x9f8] sm:$0xff]  }
0x14c3   : > { %v7880_v27 = vmul.f32 0.7978846, %v7872_v35  ;;  %v7882_v30 = vmul.f32 0.7978846, %v7874_v9  ;;  %12512 = vmatpush3.bf16.msra.mxu1 %v13251_v36  ;;  %12491 = vmatprep.subr.bf16.mxu0 %v13252_v4  ;;  %v13267_v36 = vld [vmem:[%s17064_s12 + $0x9b0] sm:$0xff]   ;;  %v7050_v22 = vmul.f32 %v16286_v16, %v16286_v16  ;;  %v7052_v57 = vmul.f32 %v16292_v3, %v16292_v3 }
0x14c4   : > { %v7881_v20 = vmul.f32 0.7978846, %v7873_v55  ;;  %v7883_v25 = vmul.f32 0.7978846, %v7875_v11  ;;  %12513 = vmatprep.subr.bf16.mxu1 %v13253_v21  ;;  %v7053_v21 = vmul.f32 %v7045_v7, %v16262_v49  ;;  %v7840_v35 = vmul.f32 0.5, %v16186_v54  ;;  %v13271_v54 = vld [vmem:[%s17064_s12 + $0x9b8] sm:$0xff]  }
0x14c5   : > { %13500 = vtanh.f32 %v7880_v27  ;;  %v13497_v63 = vpop.eup %13496  ;;  %v13270_v27 = vld [vmem:[%s17064_s12 + $0x938] sm:$0xff]  }
0x14c6   : > { %13502 = vtanh.f32 %v7882_v30  ;;  %12492 = vmatpush3.bf16.msra.mxu0 %v13254_v41  ;;  %v13499_v33 = vpop.eup %13498  ;;  %v7094_v55 = vadd.f32 1.0, %v13497_v63  ;;  %v7842_v41 = vmul.f32 0.5, %v16188_v52  ;;  %v7841_v30 = vmul.f32 0.5, %v16190_v32 }
0x14c7   : > { %12514 = vmatpush3.bf16.msra.mxu1 %v13255_v26  ;;  %12493 = vmatprep.subr.bf16.mxu0 %v13256_v45  ;;  %13504 = vtanh.f32 %v7881_v20  ;;  %v7096_v8 = vadd.f32 1.0, %v13499_v33  ;;  %v7055_v45 = vmul.f32 %v7047_v38, %v16275_v46  ;;  %v13272_v20 = vld [vmem:[%s17064_s12 + $0x640] sm:$0xff]   ;;  %v7058_v32 = vmul.f32 %v7050_v22, %v16286_v16 }
0x14c8   : > { %12515 = vmatprep.subr.bf16.mxu1 %v13257_v1  ;;  %13506 = vtanh.f32 %v7883_v25  ;;  %v7102_v51 = vmul.f32 %v7094_v55, %v7038_v39 }
0x14c9   : > { %v7066_v63 = vmul.f32 0.044715, %v7058_v32  ;;  %v13291_v32 = vld [vmem:[%s17064_s12 + $0x6a0] sm:$0xff]  }
0x14ca   : > { %12494 = vmatpush3.bf16.msra.mxu0 %v13258_v5  ;;  %v13273_v5 = vld [vmem:[%s17064_s12 + $0x6c0] sm:$0xff]   ;;  %v7239_v38 = vpack.c.bf16 %v7102_v51, %v7102_v51  ;;  %v13297_v51 = vld [vmem:[%s17064_s12 + $0x6f0] sm:$0xff]  }
0x14cb   : > { %12516 = vmatpush3.bf16.msra.mxu1 %v13259_v12  ;;  %12495 = vmatprep.subr.bf16.mxu0 %v13260_v14  ;;  %v7040_v12 = vmul.f32 0.5, %v16158_v44  ;;  %v7060_v14 = vmul.f32 %v7052_v57, %v16292_v3  ;;  %v13275_v44 = vld [vmem:[%s17064_s12 + $0x680] sm:$0xff]   ;;  %v7074_v39 = vadd.f32 %v7066_v63, %v16286_v16  ;;  %v13301_v63 = vld [vmem:[%s17064_s12 + $0x6f8] sm:$0xff]  }
0x14cc   : > { %12517 = vmatprep.subr.bf16.mxu1 %v13261_v15  ;;  %v7061_v15 = vmul.f32 0.044715, %v7053_v21  ;;  %v13278_v21 = vld [vmem:[%s17064_s12 + $0x608] sm:$0xff]  }
0x14ce   : > { %12496 = vmatpush3.bf16.msra.mxu0 %v13262_v50  ;;  %v13274_v50 = vld [vmem:[%s17064_s12 + $0x600] sm:$0xff]  }
0x14cf   : > { %v13501_v19 = vpop.eup %13500  ;;  %12518 = vmatpush3.bf16.msra.mxu1 %v13263_v2  ;;  %12497 = vmatprep.subr.bf16.mxu0 %v13264_v24  ;;  %v7104_v2 = vmul.f32 %v7096_v8, %v7040_v12  ;;  %v7063_v24 = vmul.f32 0.044715, %v7055_v45  ;;  %v13286_v8 = vld [vmem:[%s17064_s12 + $0x618] sm:$0xff]  }
0x14d0   : > { %v13503_v4 = vpop.eup %13502  ;;  %12519 = vmatprep.subr.bf16.mxu1 %v13265_v37  ;;  %v7896_v23 = vadd.f32 1.0, %v13501_v19  ;;  %v7068_v19 = vmul.f32 0.044715, %v7060_v14  ;;  %v13287_v45 = vld [vmem:[%s17064_s12 + $0x698] sm:$0xff]   ;;  %v13295_v14 = vld [vmem:[%s17064_s12 + $0x6a8] sm:$0xff]  }
0x14d1   : > { %v13505_v17 = vpop.eup %13504  ;;  %v7898_v9 = vadd.f32 1.0, %v13503_v4  ;;  %v7241_v4 = vpack.c.bf16 %v7104_v2, %v7104_v2  ;;  %v7071_v22 = vadd.f32 %v7063_v24, %v16275_v46 }
0x14d2   : > { %v13507_v11 = vpop.eup %13506  ;;  %12498 = vmatpush3.bf16.msra.mxu0 %v13266_v18  ;;  %v7897_v26 = vadd.f32 1.0, %v13505_v17  ;;  %v7904_v25 = vmul.f32 %v7896_v23, %v7840_v35  ;;  %v13276_v18 = vld [vmem:[%s17064_s12 + $0x648] sm:$0xff]   ;;  %v13280_v23 = vld [vmem:[%s17064_s12 + $0x650] sm:$0xff]   ;;  %v7076_v57 = vadd.f32 %v7068_v19, %v16292_v3 }
0x14d3   : > { %12520 = vmatpush3.bf16.msra.mxu1 %v13267_v36  ;;  %12499 = vmatprep.subr.bf16.mxu0 %v13268_v10  ;;  %v7899_v52 = vadd.f32 1.0, %v13507_v11  ;;  %v7906_v31 = vmul.f32 %v7898_v9, %v7842_v41  ;;  %v13277_v36 = vld [vmem:[%s17064_s12 + $0x6c8] sm:$0xff]   ;;  %v7069_v10 = vadd.f32 %v7061_v15, %v16262_v49  ;;  %v13281_v17 = vld [vmem:[%s17064_s12 + $0x6d0] sm:$0xff]   ;;  %v7079_v55 = vmul.f32 0.7978846, %v7071_v22  ;;  %v13284_v41 = vld [vmem:[%s17064_s12 + $0x658] sm:$0xff]  }
0x14d4   : > { %12521 = vmatprep.subr.bf16.mxu1 %v13269_v6  ;;  %v7905_v1 = vmul.f32 %v7897_v26, %v7841_v30  ;;  %v8040_v37 = vpack.c.bf16 %v7904_v25, %v7904_v25  ;;  %v13279_v6 = vld [vmem:[%s17064_s12 + $0x688] sm:$0xff]   ;;  %v13282_v9 = vld [vmem:[%s17064_s12 + $0x610] sm:$0xff]   ;;  %v13285_v30 = vld [vmem:[%s17064_s12 + $0x6d8] sm:$0xff]   ;;  %v7084_v26 = vmul.f32 0.7978846, %v7076_v57  ;;  %v6540_v25 = vrot.slane %v16150_v28, %v14552_v60 }
0x14d5   : > { %v7907_v43 = vmul.f32 %v7899_v52, %v7843_v0  ;;  %v8042_v33 = vpack.c.bf16 %v7906_v31, %v7906_v31  ;;  %v7077_v35 = vmul.f32 0.7978846, %v7069_v10  ;;  %v13283_v11 = vld [vmem:[%s17064_s12 + $0x690] sm:$0xff]   ;;  %v13289_v0 = vld [vmem:[%s17064_s12 + $0x6e0] sm:$0xff]   ;;  %v6532_v52 = vrot.slane %v16150_v28, %v14549_v59  ;;  %v13294_v28 = vld [vmem:[%s17064_s12 + $0x628] sm:$0xff]  }
0x14d6   : > { %12500 = vmatpush3.bf16.msra.mxu0 %v13270_v27  ;;  %v8041_v61 = vpack.c.bf16 %v7905_v1, %v7905_v1  ;;  %v7082_v27 = vmul.f32 0.7978846, %v7074_v39  ;;  %v13292_v1 = vld [vmem:[%s17064_s12 + $0x668] sm:$0xff]   ;;  %v16409_v12 = vadd.f32 %v16128_v48, %v6540_v25  ;;  %v13302_v10 = vld [vmem:[%s17064_s12 + $0x638] sm:$0xff]   ;;  %v13305_v39 = vld [vmem:[%s17064_s12 + $0x7c0] sm:$0xff]  }
0x14d7   : > { %12522 = vmatpush3.bf16.msra.mxu1 %v13271_v54  ;;  %v8043_v7 = vpack.c.bf16 %v7907_v43, %v7907_v43  ;;  %12529 = vmatprep.subr.bf16.mxu0 %v13272_v20  ;;  %13508 = vtanh.f32 %v7077_v35  ;;  %v13288_v54 = vld [vmem:[%s17064_s12 + $0x660] sm:$0xff]   ;;  %v16403_v31 = vadd.f32 %v16126_v34, %v6532_v52  ;;  %v13296_v43 = vld [vmem:[%s17064_s12 + $0x670] sm:$0xff]   ;;  %v13303_v22 = vld [vmem:[%s17064_s12 + $0x6b8] sm:$0xff]  }
0x14d8   : > { %8540 = vmatprep.mubr.bf16.mxu0 %v8041_v61  ;;  %12551 = vmatprep.subr.bf16.mxu1 %v13273_v5  ;;  %13510 = vtanh.f32 %v7079_v55  ;;  %v13290_v20 = vld [vmem:[%s17064_s12 + $0x620] sm:$0xff]   ;;  %v13293_v5 = vld [vmem:[%s17064_s12 + $0x6e8] sm:$0xff]   ;;  %v7051_v24 = vmul.f32 %v16409_v12, %v16409_v12  ;;  %v13313_v25 = vld [vmem:[%s17064_s12 + $0x7d0] sm:$0xff]  }
0x14d9   : > { %8580 = vmatprep.mubr.bf16.mxu1 %v8043_v7  ;;  %8541 = vmatmul.mubr.bf16.vlgmr.msra.gmra.mrb[124].mxu0 %v8040_v37  ;;  %13512 = vtanh.f32 %v7082_v27  ;;  %v7049_v48 = vmul.f32 %v16403_v31, %v16403_v31  ;;  %v13299_v7 = vld [vmem:[%s17064_s12 + $0x6b0] sm:$0xff]   ;;  %v13300_v37 = vld [vmem:[%s17064_s12 + $0x678] sm:$0xff]   ;;  %v13311_v52 = vld [vmem:[%s17064_s12 + $0x788] sm:$0xff]  }
0x14da   : > { %8581 = vmatmul.mubr.bf16.vlgmr.msra.gmra.mrb[104].mxu1 %v8042_v33  ;;  %12530 = vmatpush3.bf16.msra.mxu0 %v13274_v50  ;;  %13514 = vtanh.f32 %v7084_v26  ;;  %v13298_v50 = vld [vmem:[%s17064_s12 + $0x630] sm:$0xff]   ;;  %v13309_v26 = vld [vmem:[%s17064_s12 + $0x7c8] sm:$0xff]  }
0x14db   : > { %12552 = vmatpush3.bf16.msra.mxu1 %v13275_v44  ;;  %9004 = vmatprep.mubr.bf16.mxu0 %v7239_v38  ;;  %v7039_v38 = vmul.f32 0.5, %v16275_v46  ;;  %v13304_v46 = vld [vmem:[%s17064_s12 + $0x740] sm:$0xff]  }
0x14dc   : > { %9044 = vmatprep.mubr.bf16.mxu1 %v7241_v4  ;;  %12531 = vmatprep.subr.bf16.mxu0 %v13276_v18  ;;  %v7037_v18 = vmul.f32 0.5, %v16262_v49 }
0x14dd   : > { %12553 = vmatprep.subr.bf16.mxu1 %v13277_v36  ;;  %v7057_v36 = vmul.f32 %v7049_v48, %v16403_v31  ;;  %v13322_v48 = vld [vmem:[%s17064_s12 + $0x720] sm:$0xff]  }
0x14de   : > { %12532 = vmatpush3.bf16.msra.mxu0 %v13278_v21  ;;  %v7059_v21 = vmul.f32 %v7051_v24, %v16409_v12  ;;  %v13325_v24 = vld [vmem:[%s17064_s12 + $0x7e8] sm:$0xff]  }
0x14df   : > { %12554 = vmatpush3.bf16.msra.mxu1 %v13279_v6  ;;  %12533 = vmatprep.subr.bf16.mxu0 %v13280_v23  ;;  %v7042_v6 = vmul.f32 0.5, %v16286_v16  ;;  %v7065_v35 = vmul.f32 0.044715, %v7057_v36  ;;  %v13307_v16 = vld [vmem:[%s17064_s12 + $0x780] sm:$0xff]   ;;  %v13332_v36 = vld [vmem:[%s17064_s12 + $0x778] sm:$0xff]  }
0x14e0   : > { %12555 = vmatprep.subr.bf16.mxu1 %v13281_v17  ;;  %v7044_v17 = vmul.f32 0.5, %v16292_v3  ;;  %v13308_v3 = vld [vmem:[%s17064_s12 + $0x748] sm:$0xff]  }
0x14e1   : > { %v13509_v34 = vpop.eup %13508 }
0x14e2   : > { %12534 = vmatpush3.bf16.msra.mxu0 %v13282_v9  ;;  %v13511_v15 = vpop.eup %13510  ;;  %v7093_v44 = vadd.f32 1.0, %v13509_v34  ;;  %v13306_v9 = vld [vmem:[%s17064_s12 + $0x700] sm:$0xff]   ;;  %v13318_v34 = vld [vmem:[%s17064_s12 + $0x718] sm:$0xff]  }
0x14e3   : > { %12556 = vmatpush3.bf16.msra.mxu1 %v13283_v11  ;;  %12535 = vmatprep.subr.bf16.mxu0 %v13284_v41  ;;  %v13513_v61 = vpop.eup %13512  ;;  %v7095_v33 = vadd.f32 1.0, %v13511_v15  ;;  %v7067_v11 = vmul.f32 0.044715, %v7059_v21  ;;  %v13320_v15 = vld [vmem:[%s17064_s12 + $0x760] sm:$0xff]  }
0x14e4   : > { %12557 = vmatprep.subr.bf16.mxu1 %v13285_v30  ;;  %v13515_v2 = vpop.eup %13514  ;;  %v7098_v19 = vadd.f32 1.0, %v13513_v61  ;;  %v7101_v49 = vmul.f32 %v7093_v44, %v7037_v18  ;;  %v13321_v61 = vld [vmem:[%s17064_s12 + $0x7e0] sm:$0xff]   ;;  %v13328_v44 = vld [vmem:[%s17064_s12 + $0x770] sm:$0xff]  }
0x14e5   : > { %v7100_v4 = vadd.f32 1.0, %v13515_v2  ;;  %v7103_v23 = vmul.f32 %v7095_v33, %v7039_v38  ;;  %v13324_v2 = vld [vmem:[%s17064_s12 + $0x768] sm:$0xff]   ;;  %v13329_v33 = vld [vmem:[%s17064_s12 + $0x7f0] sm:$0xff]  }
0x14e6   : > { %12536 = vmatpush3.bf16.msra.mxu0 %v13286_v8  ;;  %v7106_v57 = vmul.f32 %v7098_v19, %v7042_v6  ;;  %v7238_v41 = vpack.c.bf16 %v7101_v49, %v7101_v49  ;;  %v7073_v8 = vadd.f32 %v7065_v35, %v16403_v31  ;;  %v13330_v19 = vld [vmem:[%s17064_s12 + $0x730] sm:$0xff]   ;;  %v11779_v49 = vld [vmem:[%s17062_s10 + $0x6a0] sm:$0xff]  ;;  %v11776_v6 = vld [vmem:[%s17062_s10 + $0x648] sm:$0xff] }
0x14e7   : > { %12558 = vmatpush3.bf16.msra.mxu1 %v13287_v45  ;;  %12537 = vmatprep.subr.bf16.mxu0 %v13288_v54  ;;  %v7108_v55 = vmul.f32 %v7100_v4, %v7044_v17  ;;  %v7240_v27 = vpack.c.bf16 %v7103_v23, %v7103_v23  ;;  %v13310_v54 = vld [vmem:[%s17064_s12 + $0x708] sm:$0xff]   ;;  %v13331_v38 = vld [vmem:[%s17064_s12 + $0x7b0] sm:$0xff]   ;;  %v13333_v4 = vld [vmem:[%s17064_s12 + $0x7f8] sm:$0xff]  }
0x14e8   : > { %12559 = vmatprep.subr.bf16.mxu1 %v13289_v0  ;;  %v7243_v30 = vpack.c.bf16 %v7106_v57, %v7106_v57  ;;  %v7075_v0 = vadd.f32 %v7067_v11, %v16409_v12  ;;  %v11780_v23 = vld [vmem:[%s17062_s10 + $0x6a8] sm:$0xff]  ;;  %v13334_v17 = vld [vmem:[%s17064_s12 + $0x738] sm:$0xff]   ;;  %v11787_v11 = vld [vmem:[%s17062_s10 + $0x760] sm:$0xff] }
0x14e9   : > { %v7245_v45 = vpack.c.bf16 %v7108_v55, %v7108_v55  ;;  %v11843_v55 = vcombine.high %v11776_v6, %v11780_v23 }
0x14ea   : > { %12538 = vmatpush3.bf16.msra.mxu0 %v13290_v20  ;;  %v13312_v20 = vld [vmem:[%s17064_s12 + $0x750] sm:$0xff]  }
0x14eb   : > { %12560 = vmatpush3.bf16.msra.mxu1 %v13291_v32  ;;  %12539 = vmatprep.subr.bf16.mxu0 %v13292_v1  ;;  %v7081_v32 = vmul.f32 0.7978846, %v7073_v8  ;;  %v13314_v1 = vld [vmem:[%s17064_s12 + $0x710] sm:$0xff]  }
0x14ec   : > { %12561 = vmatprep.subr.bf16.mxu1 %v13293_v5  ;;  %v7083_v5 = vmul.f32 0.7978846, %v7075_v0  ;;  %v11795_v0 = vld [vmem:[%s17062_s10 + $0x820] sm:$0xff] }
0x14ed   : > { %13516 = vtanh.f32 %v7081_v32 }
0x14ee   : > { %12540 = vmatpush3.bf16.msra.mxu0 %v13294_v28  ;;  %v13315_v28 = vld [vmem:[%s17064_s12 + $0x790] sm:$0xff]   ;;  %13518 = vtanh.f32 %v7083_v5 }
0x14ef   : > { %12562 = vmatpush3.bf16.msra.mxu1 %v13295_v14  ;;  %12541 = vmatprep.subr.bf16.mxu0 %v13296_v43  ;;  %v13316_v14 = vld [vmem:[%s17064_s12 + $0x758] sm:$0xff]  }
0x14f0   : > { %12563 = vmatprep.subr.bf16.mxu1 %v13297_v51  ;;  %v13317_v43 = vld [vmem:[%s17064_s12 + $0x7d8] sm:$0xff]  }
0x14f1   : > { %v13319_v51 = vld [vmem:[%s17064_s12 + $0x798] sm:$0xff]  }
0x14f2   : > { %12542 = vmatpush3.bf16.msra.mxu0 %v13298_v50  ;;  %v13323_v50 = vld [vmem:[%s17064_s12 + $0x7a0] sm:$0xff]  }
0x14f3   : > { %12564 = vmatpush3.bf16.msra.mxu1 %v13299_v7  ;;  %12543 = vmatprep.subr.bf16.mxu0 %v13300_v37  ;;  %v13326_v7 = vld [vmem:[%s17064_s12 + $0x728] sm:$0xff]  }
0x14f4   : > { %12565 = vmatprep.subr.bf16.mxu1 %v13301_v63  ;;  %v13327_v37 = vld [vmem:[%s17064_s12 + $0x7a8] sm:$0xff]  }
0x14f6   : > { %12544 = vmatpush3.bf16.msra.mxu0 %v13302_v10 }
0x14f7   : > { %12566 = vmatpush3.bf16.msra.mxu1 %v13303_v22  ;;  %12573 = vmatprep.subr.bf16.mxu0 %v13304_v46  ;;  %v13517_v63 = vpop.eup %13516  ;;  %v11775_v22 = vld [vmem:[%s17062_s10 + $0x640] sm:$0xff]  ;;  %v7041_v46 = vmul.f32 0.5, %v16403_v31  ;;  %v13335_v31 = vld [vmem:[%s17064_s12 + $0x7b8] sm:$0xff]  }
0x14f8   : > { %12595 = vmatprep.subr.bf16.mxu1 %v13305_v39  ;;  %v13519_v18 = vpop.eup %13518  ;;  %v7097_v10 = vadd.f32 1.0, %v13517_v63  ;;  %v7043_v39 = vmul.f32 0.5, %v16409_v12  ;;  %v11841_v35 = vcombine.high %v11775_v22, %v11779_v49  ;;  %v11783_v12 = vld [vmem:[%s17062_s10 + $0x700] sm:$0xff] }
0x14f9   : > { %9005 = vmatmul.mubr.bf16.vlgmr.msra.gmra.mrb[128].mxu0 %v7238_v41  ;;  %v7099_v21 = vadd.f32 1.0, %v13519_v18  ;;  %v11784_v41 = vld [vmem:[%s17062_s10 + $0x708] sm:$0xff]  ;;  %v11815_v18 = vld [vmem:[%s17062_s10 + $0xa00] sm:$0xff] }
0x14fa   : > { %9045 = vmatmul.mubr.bf16.vlgmr.msra.gmra.mrb[108].mxu1 %v7240_v27  ;;  %12574 = vmatpush3.bf16.msra.mxu0 %v13306_v9  ;;  %v7105_v57 = vmul.f32 %v7097_v10, %v7041_v46  ;;  %v11840_v27 = vcombine.low %v11775_v22, %v11779_v49  ;;  %v11823_v49 = vld [vmem:[%s17062_s10 + $0xac0] sm:$0xff] }
0x14fb   : > { %9084 = vmatprep.mubr.bf16.mxu0 %v7243_v30  ;;  %12596 = vmatpush3.bf16.msra.mxu1 %v13307_v16  ;;  %v7107_v9 = vmul.f32 %v7099_v21, %v7043_v39  ;;  %v11788_v16 = vld [vmem:[%s17062_s10 + $0x768] sm:$0xff]  ;;  %v11842_v30 = vcombine.low %v11776_v6, %v11780_v23  ;;  %v11827_v46 = vld [vmem:[%s17062_s10 + $0xb20] sm:$0xff] }
0x14fc   : > { %9124 = vmatprep.mubr.bf16.mxu1 %v7245_v45  ;;  %12575 = vmatprep.subr.bf16.mxu0 %v13308_v3  ;;  %v7242_v3 = vpack.c.bf16 %v7105_v57, %v7105_v57  ;;  %v11851_v45 = vcombine.high %v11784_v41, %v11788_v16  ;;  %v11850_v32 = vcombine.low %v11784_v41, %v11788_v16  ;;  %v11824_v6 = vld [vmem:[%s17062_s10 + $0xac8] sm:$0xff] }
0x14fd   : > { %12597 = vmatprep.subr.bf16.mxu1 %v13309_v26  ;;  %v11849_v26 = vcombine.high %v11783_v12, %v11787_v11  ;;  %v7244_v8 = vpack.c.bf16 %v7107_v9, %v7107_v9  ;;  %v11828_v23 = vld [vmem:[%s17062_s10 + $0xb28] sm:$0xff]  ;;  %v11835_v9 = vld [vmem:[%s17062_s10 + $0xbe0] sm:$0xff] }
0x14fe   : > { %12576 = vmatpush3.bf16.msra.mxu0 %v13310_v54  ;;  %v11791_v54 = vld [vmem:[%s17062_s10 + $0x7c0] sm:$0xff]  ;;  %v11891_v57 = vcombine.high %v11824_v6, %v11828_v23  ;;  %v11890_v41 = vcombine.low %v11824_v6, %v11828_v23  ;;  %v11817_v6 = vld [vmem:[%s17062_s10 + $0xa10] sm:$0xff] }
0x14ff   : > { %12598 = vmatpush3.bf16.msra.mxu1 %v13311_v52  ;;  %12577 = vmatprep.subr.bf16.mxu0 %v13312_v20  ;;  %v11792_v52 = vld [vmem:[%s17062_s10 + $0x7c8] sm:$0xff]  ;;  %v11821_v23 = vld [vmem:[%s17062_s10 + $0xa70] sm:$0xff] }
0x1500   : > { %12599 = vmatprep.subr.bf16.mxu1 %v13313_v25  ;;  %v11796_v20 = vld [vmem:[%s17062_s10 + $0x828] sm:$0xff]  ;;  %v11848_v25 = vcombine.low %v11783_v12, %v11787_v11  ;;  %v11888_v11 = vcombine.low %v11823_v49, %v11827_v46 }
0x1501   : > { %v11859_v5 = vcombine.high %v11792_v52, %v11796_v20  ;;  %v11836_v12 = vld [vmem:[%s17062_s10 + $0xbe8] sm:$0xff] }
0x1502   : > { %12578 = vmatpush3.bf16.msra.mxu0 %v13314_v1  ;;  %v11857_v1 = vcombine.high %v11791_v54, %v11795_v0 }
0x1503   : > { %12600 = vmatpush3.bf16.msra.mxu1 %v13315_v28  ;;  %12579 = vmatprep.subr.bf16.mxu0 %v13316_v14  ;;  %v11799_v28 = vld [vmem:[%s17062_s10 + $0x880] sm:$0xff] }
0x1504   : > { %12601 = vmatprep.subr.bf16.mxu1 %v13317_v43  ;;  %v11803_v14 = vld [vmem:[%s17062_s10 + $0x8e0] sm:$0xff]  ;;  %v11800_v43 = vld [vmem:[%s17062_s10 + $0x888] sm:$0xff] }
0x1506   : > { %12580 = vmatpush3.bf16.msra.mxu0 %v13318_v34  ;;  %v11804_v34 = vld [vmem:[%s17062_s10 + $0x8e8] sm:$0xff] }
0x1507   : > { %12602 = vmatpush3.bf16.msra.mxu1 %v13319_v51  ;;  %12581 = vmatprep.subr.bf16.mxu0 %v13320_v15  ;;  %v11856_v51 = vcombine.low %v11791_v54, %v11795_v0  ;;  %v11858_v15 = vcombine.low %v11792_v52, %v11796_v20  ;;  %v11785_v20 = vld [vmem:[%s17062_s10 + $0x710] sm:$0xff] }
0x1508   : > { %12603 = vmatprep.subr.bf16.mxu1 %v13321_v61  ;;  %v11865_v61 = vcombine.high %v11799_v28, %v11803_v14 }
0x150a   : > { %12582 = vmatpush3.bf16.msra.mxu0 %v13322_v48  ;;  %v11867_v48 = vcombine.high %v11800_v43, %v11804_v34 }
0x150b   : > { %12604 = vmatpush3.bf16.msra.mxu1 %v13323_v50  ;;  %12583 = vmatprep.subr.bf16.mxu0 %v13324_v2  ;;  %v11807_v50 = vld [vmem:[%s17062_s10 + $0x940] sm:$0xff] }
0x150c   : > { %12605 = vmatprep.subr.bf16.mxu1 %v13325_v24  ;;  %v11811_v2 = vld [vmem:[%s17062_s10 + $0x9a0] sm:$0xff]  ;;  %v11808_v24 = vld [vmem:[%s17062_s10 + $0x948] sm:$0xff] }
0x150d   : > { %v11873_v63 = vcombine.high %v11807_v50, %v11811_v2  ;;  %v11872_v10 = vcombine.low %v11807_v50, %v11811_v2 }
0x150e   : > { %12584 = vmatpush3.bf16.msra.mxu0 %v13326_v7  ;;  %v11812_v7 = vld [vmem:[%s17062_s10 + $0x9a8] sm:$0xff] }
0x150f   : > { %12606 = vmatpush3.bf16.msra.mxu1 %v13327_v37  ;;  %12585 = vmatprep.subr.bf16.mxu0 %v13328_v44  ;;  %v11864_v37 = vcombine.low %v11799_v28, %v11803_v14  ;;  %v11866_v44 = vcombine.low %v11800_v43, %v11804_v34  ;;  %v11793_v34 = vld [vmem:[%s17062_s10 + $0x7d0] sm:$0xff] }
0x1510   : > { %12607 = vmatprep.subr.bf16.mxu1 %v13329_v33  ;;  %v11875_v33 = vcombine.high %v11808_v24, %v11812_v7 }
0x1512   : > { %12586 = vmatpush3.bf16.msra.mxu0 %v13330_v19  ;;  %v11819_v19 = vld [vmem:[%s17062_s10 + $0xa60] sm:$0xff] }
0x1513   : > { %12608 = vmatpush3.bf16.msra.mxu1 %v13331_v38  ;;  %12587 = vmatprep.subr.bf16.mxu0 %v13332_v36  ;;  %v11816_v38 = vld [vmem:[%s17062_s10 + $0xa08] sm:$0xff]  ;;  %v11881_v21 = vcombine.high %v11815_v18, %v11819_v19  ;;  %v11880_v39 = vcombine.low %v11815_v18, %v11819_v19 }
0x1514   : > { %12609 = vmatprep.subr.bf16.mxu1 %v13333_v4  ;;  %v11820_v36 = vld [vmem:[%s17062_s10 + $0xa68] sm:$0xff]  ;;  %v11874_v4 = vcombine.low %v11808_v24, %v11812_v7  ;;  %v11801_v7 = vld [vmem:[%s17062_s10 + $0x890] sm:$0xff] }
0x1515   : > { %v11883_v22 = vcombine.high %v11816_v38, %v11820_v36 }
0x1516   : > { %12588 = vmatpush3.bf16.msra.mxu0 %v13334_v17  ;;  %v11882_v17 = vcombine.low %v11816_v38, %v11820_v36  ;;  %v11809_v36 = vld [vmem:[%s17062_s10 + $0x950] sm:$0xff] }
0x1517   : > { %12610 = vmatpush3.bf16.msra.mxu1 %v13335_v31  ;;  %9558 = vmatprep.subr.bf16.mxu0 %v11841_v35  ;;  %v11889_v31 = vcombine.high %v11823_v49, %v11827_v46  ;;  %v11831_v35 = vld [vmem:[%s17062_s10 + $0xb80] sm:$0xff] }
0x1518   : > { %9599 = vmatprep.subr.bf16.mxu1 %v11843_v55  ;;  %v11832_v55 = vld [vmem:[%s17062_s10 + $0xb88] sm:$0xff]  ;;  %v11897_v16 = vcombine.high %v11831_v35, %v11835_v9 }
0x1519   : > { %9085 = vmatmul.mubr.bf16.vlgmr.msra.gmra.mrb[132].mxu0 %v7242_v3  ;;  %v11777_v3 = vld [vmem:[%s17062_s10 + $0x650] sm:$0xff]  ;;  %v11898_v54 = vcombine.low %v11832_v55, %v11836_v12 }
0x151a   : > { %9125 = vmatmul.mubr.bf16.vlgmr.msra.gmra.mrb[112].mxu1 %v7244_v8  ;;  %9559 = vmatpush1.bf16.msra.mxu0 %v11840_v27  ;;  %v11899_v27 = vcombine.high %v11832_v55, %v11836_v12  ;;  %v11782_v8 = vld [vmem:[%s17062_s10 + $0x6b8] sm:$0xff]  ;;  %v11825_v55 = vld [vmem:[%s17062_s10 + $0xad0] sm:$0xff] }
0x151b   : > { %9600 = vmatpush1.bf16.msra.mxu1 %v11842_v30  ;;  %9560 = vmatprep.subr.bf16.mxu0 %v11849_v26  ;;  %v11781_v30 = vld [vmem:[%s17062_s10 + $0x6b0] sm:$0xff]  ;;  %v11778_v26 = vld [vmem:[%s17062_s10 + $0x658] sm:$0xff] }
0x151c   : > { %9601 = vmatprep.subr.bf16.mxu1 %v11851_v45  ;;  %9590 = vmatprep.mubr.bf16.mxu0 %v13605_v29  ;;  %v11896_v45 = vcombine.low %v11831_v35, %v11835_v9  ;;  %v11845_v0 = vcombine.high %v11777_v3, %v11781_v30  ;;  %v11847_v52 = vcombine.high %v11778_v26, %v11782_v8  ;;  %v11829_v12 = vld [vmem:[%s17062_s10 + $0xb30] sm:$0xff] }
0x151d   : > { %9631 = vmatprep.mubr.bf16.mxu1 %v13605_v29  ;;  %v11846_v28 = vcombine.low %v11778_v26, %v11782_v8  ;;  %v11885_v35 = vcombine.high %v11817_v6, %v11821_v23  ;;  %v11833_v26 = vld [vmem:[%s17062_s10 + $0xb90] sm:$0xff] }
0x151e   : > { %9561 = vmatpush1.bf16.msra.mxu0 %v11848_v25  ;;  %v11789_v25 = vld [vmem:[%s17062_s10 + $0x770] sm:$0xff] }
0x151f   : > { %9602 = vmatpush1.bf16.msra.mxu1 %v11850_v32  ;;  %9562 = vmatprep.subr.bf16.mxu0 %v11857_v1  ;;  %v11786_v32 = vld [vmem:[%s17062_s10 + $0x718] sm:$0xff]  ;;  %v11853_v14 = vcombine.high %v11785_v20, %v11789_v25  ;;  %v11837_v8 = vld [vmem:[%s17062_s10 + $0xbf0] sm:$0xff] }
0x1520   : > { %9603 = vmatprep.subr.bf16.mxu1 %v11859_v5  ;;  %v11790_v1 = vld [vmem:[%s17062_s10 + $0x778] sm:$0xff]  ;;  %v11844_v5 = vcombine.low %v11777_v3, %v11781_v30  ;;  %v11893_v3 = vcombine.high %v11825_v55, %v11829_v12 }
0x1521   : > { %v11855_v43 = vcombine.high %v11786_v32, %v11790_v1  ;;  %v11854_v50 = vcombine.low %v11786_v32, %v11790_v1  ;;  %v11900_v32 = vcombine.low %v11833_v26, %v11837_v8 }
0x1522   : > { %9563 = vmatpush1.bf16.msra.mxu0 %v11856_v51  ;;  %v11797_v51 = vld [vmem:[%s17062_s10 + $0x830] sm:$0xff] }
0x1523   : > { %9604 = vmatpush1.bf16.msra.mxu1 %v11858_v15  ;;  %9564 = vmatprep.subr.bf16.mxu0 %v11865_v61  ;;  %v11794_v15 = vld [vmem:[%s17062_s10 + $0x7d8] sm:$0xff]  ;;  %v11861_v2 = vcombine.high %v11793_v34, %v11797_v51 }
0x1524   : > { %9605 = vmatprep.subr.bf16.mxu1 %v11867_v48  ;;  %v11798_v61 = vld [vmem:[%s17062_s10 + $0x838] sm:$0xff]  ;;  %v11852_v48 = vcombine.low %v11785_v20, %v11789_v25  ;;  %v11901_v20 = vcombine.high %v11833_v26, %v11837_v8  ;;  %v13369_v26 = vld [vmem:[%s17064_s12 + $0xbc0] sm:$0xff]  }
0x1525   : > { %v11863_v24 = vcombine.high %v11794_v15, %v11798_v61  ;;  %v11862_v18 = vcombine.low %v11794_v15, %v11798_v61  ;;  %v13339_v15 = vld [vmem:[%s17064_s12 + $0xa80] sm:$0xff]  }
0x1526   : > { %9565 = vmatpush1.bf16.msra.mxu0 %v11864_v37  ;;  %v11805_v37 = vld [vmem:[%s17062_s10 + $0x8f0] sm:$0xff] }
0x1527   : > { %9606 = vmatpush1.bf16.msra.mxu1 %v11866_v44  ;;  %9566 = vmatprep.subr.bf16.mxu0 %v11873_v63  ;;  %v11802_v44 = vld [vmem:[%s17062_s10 + $0x898] sm:$0xff]  ;;  %v11869_v19 = vcombine.high %v11801_v7, %v11805_v37 }
0x1528   : > { %9607 = vmatprep.subr.bf16.mxu1 %v11875_v33  ;;  %v11806_v63 = vld [vmem:[%s17062_s10 + $0x8f8] sm:$0xff]  ;;  %v11860_v33 = vcombine.low %v11793_v34, %v11797_v51  ;;  %v13338_v51 = vld [vmem:[%s17064_s12 + $0xa00] sm:$0xff]  }
0x1529   : > { %v11871_v38 = vcombine.high %v11802_v44, %v11806_v63 }
0x152a   : > { %9567 = vmatpush1.bf16.msra.mxu0 %v11872_v10  ;;  %v11813_v10 = vld [vmem:[%s17062_s10 + $0x9b0] sm:$0xff] }
0x152b   : > { %9608 = vmatpush1.bf16.msra.mxu1 %v11874_v4  ;;  %9568 = vmatprep.subr.bf16.mxu0 %v11881_v21  ;;  %v11814_v4 = vld [vmem:[%s17062_s10 + $0x9b8] sm:$0xff]  ;;  %v11868_v21 = vcombine.low %v11801_v7, %v11805_v37  ;;  %v11877_v49 = vcombine.high %v11809_v36, %v11813_v10  ;;  %v13340_v37 = vld [vmem:[%s17064_s12 + $0xa48] sm:$0xff]  }
0x152c   : > { %9609 = vmatprep.subr.bf16.mxu1 %v11883_v22  ;;  %v11870_v22 = vcombine.low %v11802_v44, %v11806_v63  ;;  %v13341_v44 = vld [vmem:[%s17064_s12 + $0xac8] sm:$0xff]  }
0x152e   : > { %9569 = vmatpush1.bf16.msra.mxu0 %v11880_v39  ;;  %v11818_v39 = vld [vmem:[%s17062_s10 + $0xa18] sm:$0xff] }
0x152f   : > { %9610 = vmatpush1.bf16.msra.mxu1 %v11882_v17  ;;  %9570 = vmatprep.subr.bf16.mxu0 %v11889_v31  ;;  %v11822_v17 = vld [vmem:[%s17062_s10 + $0xa78] sm:$0xff]  ;;  %v11876_v31 = vcombine.low %v11809_v36, %v11813_v10  ;;  %v13346_v36 = vld [vmem:[%s17064_s12 + $0xa10] sm:$0xff]  }
0x1530   : > { %9611 = vmatprep.subr.bf16.mxu1 %v11891_v57  ;;  %v11887_v9 = vcombine.high %v11818_v39, %v11822_v17  ;;  %v13347_v10 = vld [vmem:[%s17064_s12 + $0xa90] sm:$0xff]  }
0x1532   : > { %9571 = vmatpush1.bf16.msra.mxu0 %v11888_v11  ;;  %v11826_v11 = vld [vmem:[%s17062_s10 + $0xad8] sm:$0xff] }
0x1533   : > { %9612 = vmatpush1.bf16.msra.mxu1 %v11890_v41  ;;  %9572 = vmatprep.subr.bf16.mxu0 %v11897_v16  ;;  %v11830_v41 = vld [vmem:[%s17062_s10 + $0xb38] sm:$0xff]  ;;  %v11884_v16 = vcombine.low %v11817_v6, %v11821_v23  ;;  %v13354_v6 = vld [vmem:[%s17064_s12 + $0xa20] sm:$0xff]  }
0x1534   : > { %9613 = vmatprep.subr.bf16.mxu1 %v11899_v27  ;;  %v11886_v27 = vcombine.low %v11818_v39, %v11822_v17  ;;  %v11895_v30 = vcombine.high %v11826_v11, %v11830_v41  ;;  %v13355_v23 = vld [vmem:[%s17064_s12 + $0xaa0] sm:$0xff]   ;;  %v13356_v39 = vld [vmem:[%s17064_s12 + $0xa68] sm:$0xff]  }
0x1535   : > { %v13357_v17 = vld [vmem:[%s17064_s12 + $0xae8] sm:$0xff]  }
0x1536   : > { %9573 = vmatpush1.bf16.msra.mxu0 %v11896_v45  ;;  %v11834_v45 = vld [vmem:[%s17062_s10 + $0xb98] sm:$0xff] }
0x1537   : > { %9614 = vmatpush1.bf16.msra.mxu1 %v11898_v54  ;;  %9640 = vmatprep.subr.bf16.mxu0 %v11845_v0  ;;  %v11838_v54 = vld [vmem:[%s17062_s10 + $0xbf8] sm:$0xff]  ;;  %v11892_v0 = vcombine.low %v11825_v55, %v11829_v12  ;;  %v13362_v55 = vld [vmem:[%s17064_s12 + $0xa30] sm:$0xff]  }
0x1538   : > { %9681 = vmatprep.subr.bf16.mxu1 %v11847_v52  ;;  %v11894_v52 = vcombine.low %v11826_v11, %v11830_v41  ;;  %v11903_v25 = vcombine.high %v11834_v45, %v11838_v54  ;;  %v11902_v1 = vcombine.low %v11834_v45, %v11838_v54  ;;  %v13363_v12 = vld [vmem:[%s17064_s12 + $0xab0] sm:$0xff]   ;;  %v13364_v11 = vld [vmem:[%s17064_s12 + $0xa78] sm:$0xff]  }
0x1539   : > { %9591 = vmatmul.mubr.bf16.vlgmr.msra.gmra.mrb[136].mxu0 %v15740_v53  ;;  %v13365_v41 = vld [vmem:[%s17064_s12 + $0xaf8] sm:$0xff]  }
0x153a   : > { %9632 = vmatmul.mubr.bf16.vlgmr.msra.gmra.mrb[116].mxu1 %v15740_v53  ;;  %9641 = vmatpush1.bf16.msra.mxu0 %v11844_v5 }
0x153b   : > { %9682 = vmatpush1.bf16.msra.mxu1 %v11846_v28  ;;  %9642 = vmatprep.subr.bf16.mxu0 %v11853_v14  ;;  %v13336_v28 = vld [vmem:[%s17064_s12 + $0xa40] sm:$0xff]  }
0x153c   : > { %9683 = vmatprep.subr.bf16.mxu1 %v11855_v43  ;;  %9672 = vmatprep.mubr.bf16.mxu0 %v13605_v29  ;;  %v13337_v14 = vld [vmem:[%s17064_s12 + $0xac0] sm:$0xff]  }
0x153d   : > { %9713 = vmatprep.mubr.bf16.mxu1 %v13605_v29  ;;  %v11810_v29 = vld [vmem:[%s17062_s10 + $0x958] sm:$0xff] }
0x153e   : > { %9643 = vmatpush1.bf16.msra.mxu0 %v11852_v48  ;;  %v11879_v46 = vcombine.high %v11810_v29, %v11814_v4  ;;  %v11878_v57 = vcombine.low %v11810_v29, %v11814_v4  ;;  %v13348_v29 = vld [vmem:[%s17064_s12 + $0xa58] sm:$0xff]  }
0x153f   : > { %9684 = vmatpush1.bf16.msra.mxu1 %v11854_v50  ;;  %9644 = vmatprep.subr.bf16.mxu0 %v11861_v2  ;;  %v13349_v4 = vld [vmem:[%s17064_s12 + $0xad8] sm:$0xff]  }
0x1540   : > { %9685 = vmatprep.subr.bf16.mxu1 %v11863_v24 }
0x1542   : > { %9645 = vmatpush1.bf16.msra.mxu0 %v11860_v33  ;;  %v13342_v33 = vld [vmem:[%s17064_s12 + $0xa08] sm:$0xff]  }
0x1543   : > { %9686 = vmatpush1.bf16.msra.mxu1 %v11862_v18  ;;  %9646 = vmatprep.subr.bf16.mxu0 %v11869_v19  ;;  %v13343_v18 = vld [vmem:[%s17064_s12 + $0xa88] sm:$0xff]   ;;  %v13344_v19 = vld [vmem:[%s17064_s12 + $0xa50] sm:$0xff]  }
0x1544   : > { %9687 = vmatprep.subr.bf16.mxu1 %v11871_v38  ;;  %v13345_v38 = vld [vmem:[%s17064_s12 + $0xad0] sm:$0xff]  }
0x1546   : > { %9647 = vmatpush1.bf16.msra.mxu0 %v11868_v21  ;;  %v13350_v21 = vld [vmem:[%s17064_s12 + $0xa18] sm:$0xff]  }
0x1547   : > { %9688 = vmatpush1.bf16.msra.mxu1 %v11870_v22  ;;  %9648 = vmatprep.subr.bf16.mxu0 %v11877_v49  ;;  %v13351_v22 = vld [vmem:[%s17064_s12 + $0xa98] sm:$0xff]   ;;  %v13352_v49 = vld [vmem:[%s17064_s12 + $0xa60] sm:$0xff]  }
0x1548   : > { %9689 = vmatprep.subr.bf16.mxu1 %v11879_v46  ;;  %v13353_v46 = vld [vmem:[%s17064_s12 + $0xae0] sm:$0xff]  }
0x154a   : > { %9649 = vmatpush1.bf16.msra.mxu0 %v11876_v31  ;;  %v13358_v31 = vld [vmem:[%s17064_s12 + $0xa28] sm:$0xff]  }
0x154b   : > { %9690 = vmatpush1.bf16.msra.mxu1 %v11878_v57  ;;  %9650 = vmatprep.subr.bf16.mxu0 %v11885_v35  ;;  %v13359_v57 = vld [vmem:[%s17064_s12 + $0xaa8] sm:$0xff]   ;;  %v13360_v35 = vld [vmem:[%s17064_s12 + $0xa70] sm:$0xff]  }
0x154c   : > { %9691 = vmatprep.subr.bf16.mxu1 %v11887_v9  ;;  %v13361_v9 = vld [vmem:[%s17064_s12 + $0xaf0] sm:$0xff]  }
0x154e   : > { %9651 = vmatpush1.bf16.msra.mxu0 %v11884_v16  ;;  %v13366_v16 = vld [vmem:[%s17064_s12 + $0xa38] sm:$0xff]  }
0x154f   : > { %9692 = vmatpush1.bf16.msra.mxu1 %v11886_v27  ;;  %9652 = vmatprep.subr.bf16.mxu0 %v11893_v3  ;;  %v13367_v27 = vld [vmem:[%s17064_s12 + $0xab8] sm:$0xff]  }
0x1550   : > { %9693 = vmatprep.subr.bf16.mxu1 %v11895_v30  ;;  %v13368_v30 = vld [vmem:[%s17064_s12 + $0xb40] sm:$0xff]  }
0x1552   : > { %9653 = vmatpush1.bf16.msra.mxu0 %v11892_v0 }
0x1553   : > { %9694 = vmatpush1.bf16.msra.mxu1 %v11894_v52  ;;  %9654 = vmatprep.subr.bf16.mxu0 %v11901_v20 }
0x1554   : > { %9695 = vmatprep.subr.bf16.mxu1 %v11903_v25 }
0x1556   : > { %9655 = vmatpush1.bf16.msra.mxu0 %v11900_v32 }
0x1557   : > { %9696 = vmatpush1.bf16.msra.mxu1 %v11902_v1  ;;  %12617 = vmatprep.subr.bf16.mxu0 %v13336_v28 }
0x1558   : > { %12639 = vmatprep.subr.bf16.mxu1 %v13337_v14 }
0x1559   : > { %9673 = vmatmul.mubr.bf16.vlgmr.msra.gmra.mrb[140].mxu0 %v15740_v53 }
0x155a   : > { %9714 = vmatmul.mubr.bf16.vlgmr.msra.gmra.mrb[120].mxu1 %v15740_v53  ;;  %12618 = vmatpush3.bf16.msra.mxu0 %v13338_v51 }
0x155b   : > { %12640 = vmatpush3.bf16.msra.mxu1 %v13339_v15  ;;  %12619 = vmatprep.subr.bf16.mxu0 %v13340_v37 }
0x155c   : > { %12641 = vmatprep.subr.bf16.mxu1 %v13341_v44 }
0x155e   : > { %12620 = vmatpush3.bf16.msra.mxu0 %v13342_v33 }
0x155f   : > { %12642 = vmatpush3.bf16.msra.mxu1 %v13343_v18  ;;  %12621 = vmatprep.subr.bf16.mxu0 %v13344_v19 }
0x1560   : > { %12643 = vmatprep.subr.bf16.mxu1 %v13345_v38 }
0x1562   : > { %12622 = vmatpush3.bf16.msra.mxu0 %v13346_v36 }
0x1563   : > { %12644 = vmatpush3.bf16.msra.mxu1 %v13347_v10  ;;  %12623 = vmatprep.subr.bf16.mxu0 %v13348_v29 }
0x1564   : > { %12645 = vmatprep.subr.bf16.mxu1 %v13349_v4 }
0x1566   : > { %12624 = vmatpush3.bf16.msra.mxu0 %v13350_v21 }
0x1567   : > { %12646 = vmatpush3.bf16.msra.mxu1 %v13351_v22  ;;  %12625 = vmatprep.subr.bf16.mxu0 %v13352_v49  ;;  %v16858_v22 = vld [vmem:[%s17063_s11 + $0x28] sm:$0xff] }
0x1568   : > { %12647 = vmatprep.subr.bf16.mxu1 %v13353_v46  ;;  %v9201_v49 = vrot.slane %v16858_v22, %v13861_v40  ;;  %v9209_v46 = vrot.slane %v16858_v22, %v13883_v58 }
0x156a   : > { %12626 = vmatpush3.bf16.msra.mxu0 %v13354_v6  ;;  %v9205_v6 = vrot.slane %v16858_v22, %v13867_v42 }
0x156b   : > { %12648 = vmatpush3.bf16.msra.mxu1 %v13355_v23  ;;  %12627 = vmatprep.subr.bf16.mxu0 %v13356_v39  ;;  %v9213_v23 = vrot.slane %v16858_v22, %v14521_v56 }
0x156c   : > { %12649 = vmatprep.subr.bf16.mxu1 %v13357_v17 }
0x156e   : > { %12628 = vmatpush3.bf16.msra.mxu0 %v13358_v31 }
0x156f   : > { %12650 = vmatpush3.bf16.msra.mxu1 %v13359_v57  ;;  %12629 = vmatprep.subr.bf16.mxu0 %v13360_v35 }
0x1570   : > { %12651 = vmatprep.subr.bf16.mxu1 %v13361_v9 }
0x1572   : > { %12630 = vmatpush3.bf16.msra.mxu0 %v13362_v55 }
0x1573   : > { %12652 = vmatpush3.bf16.msra.mxu1 %v13363_v12  ;;  %12631 = vmatprep.subr.bf16.mxu0 %v13364_v11 }
0x1574   : > { %12653 = vmatprep.subr.bf16.mxu1 %v13365_v41 }
0x1576   : > { %12632 = vmatpush3.bf16.msra.mxu0 %v13366_v16 }
0x1577   : > { %12654 = vmatpush3.bf16.msra.mxu1 %v13367_v27  ;;  %12661 = vmatprep.subr.bf16.mxu0 %v13368_v30 }
0x1578   : > { %12683 = vmatprep.subr.bf16.mxu1 %v13369_v26 }
0x158c   : > { %v12457_v5 = vpop.f32.mrb[120].mxu0 }
0x158d   : > { %v12479_v43 = vpop.f32.mrb[100].mxu1  ;;  %v12458_v34 = vpop.f32.mrb[121].mxu0 }
0x158e   : > { %v12459_v53 = vadd.f32 %v12458_v34, %v12457_v5  ;;  %v12480_v61 = vpop.f32.mrb[101].mxu1  ;;  %v12460_v48 = vpop.f32.mrb[122].mxu0 }
0x158f   : > { %v12481_v50 = vadd.f32 %v12480_v61, %v12479_v43  ;;  %v12482_v2 = vpop.f32.mrb[102].mxu1  ;;  %v12461_v24 = vpop.f32.mrb[123].mxu0 }
0x1590   : > { %v12483_v7 = vpop.f32.mrb[103].mxu1 }
0x1591   : > { %v16766_v63 = vadd.f32 %v12481_v50, %v12459_v53 }
0x15ac   : > { %v12501_v3 = vpop.f32.mrb[124].mxu0 }
0x15ad   : > { %v12523_v8 = vpop.f32.mrb[104].mxu1  ;;  %v12502_v45 = vpop.f32.mrb[125].mxu0 }
0x15ae   : > { %v12503_v54 = vadd.f32 %v12502_v45, %v12501_v3  ;;  %v12524_v0 = vpop.f32.mrb[105].mxu1  ;;  %v12504_v52 = vpop.f32.mrb[126].mxu0 }
0x15af   : > { %v12525_v20 = vadd.f32 %v12524_v0, %v12523_v8  ;;  %v12526_v25 = vpop.f32.mrb[106].mxu1  ;;  %v12505_v32 = vpop.f32.mrb[127].mxu0 }
0x15b0   : > { %v8543_v1 = vadd.f32 %v12503_v54, %v16766_v63  ;;  %v12527_v5 = vpop.f32.mrb[107].mxu1 }
0x15b2   : > { %v8583_v28 = vadd.f32 %v12525_v20, %v8543_v1 }
0x15cc   : > { %v12545_v14 = vpop.f32.mrb[128].mxu0 }
0x15cd   : > { %v12567_v43 = vpop.f32.mrb[108].mxu1  ;;  %v12546_v34 = vpop.f32.mrb[129].mxu0 }
0x15ce   : > { %v12547_v51 = vadd.f32 %v12546_v34, %v12545_v14  ;;  %v12568_v15 = vpop.f32.mrb[109].mxu1  ;;  %v12548_v53 = vpop.f32.mrb[130].mxu0 }
0x15cf   : > { %v12569_v61 = vadd.f32 %v12568_v15, %v12567_v43  ;;  %v12570_v48 = vpop.f32.mrb[110].mxu1  ;;  %v12549_v50 = vpop.f32.mrb[131].mxu0 }
0x15d0   : > { %v9007_v2 = vadd.f32 %v12547_v51, %v8583_v28  ;;  %v12571_v24 = vpop.f32.mrb[111].mxu1 }
0x15d2   : > { %v9047_v7 = vadd.f32 %v12569_v61, %v9007_v2 }
0x15ec   : > { %v12589_v37 = vpop.f32.mrb[132].mxu0 }
0x15ed   : > { %v12611_v44 = vpop.f32.mrb[112].mxu1  ;;  %v12590_v33 = vpop.f32.mrb[133].mxu0 }
0x15ee   : > { %v12591_v18 = vadd.f32 %v12590_v33, %v12589_v37  ;;  %v12612_v19 = vpop.f32.mrb[113].mxu1  ;;  %v12592_v63 = vpop.f32.mrb[134].mxu0 }
0x15ef   : > { %v12613_v38 = vadd.f32 %v12612_v19, %v12611_v44  ;;  %v12614_v36 = vpop.f32.mrb[114].mxu1  ;;  %v12593_v10 = vpop.f32.mrb[135].mxu0 }
0x15f0   : > { %v9087_v29 = vadd.f32 %v12591_v18, %v9047_v7  ;;  %v12615_v4 = vpop.f32.mrb[115].mxu1  ;;  %v9225_v10 = vrot.slane %v16858_v22, %v14552_v60  ;;  %v13372_v60 = vld [vmem:[%s17064_s12 + $0xb48] sm:$0xff]  }
0x15f1   : > { %v13370_v4 = vld [vmem:[%s17064_s12 + $0xb00] sm:$0xff]  }
0x15f2   : > { %v16853_v21 = vadd.f32 %v12613_v38, %v9087_v29  ;;  %v9217_v38 = vrot.slane %v16858_v22, %v14549_v59  ;;  %v9221_v29 = vrot.slane %v16858_v22, %v14555_v62  ;;  %v13371_v59 = vld [vmem:[%s17064_s12 + $0xb80] sm:$0xff]  }
0x160c   : > { %v9592_v39 = vpop.f32.mrb[136].mxu0 }
0x160d   : > { %v9593_v17 = vadd.f32 %v9592_v39, %v9201_v49  ;;  %v9633_v31 = vpop.f32.mrb[116].mxu1  ;;  %v9594_v57 = vpop.f32.mrb[137].mxu0  ;;  %v13373_v39 = vld [vmem:[%s17064_s12 + $0xbc8] sm:$0xff]  }
0x160e   : > { %v9634_v35 = vadd.f32 %v9633_v31, %v9209_v46  ;;  %v9595_v9 = vadd.f32 %v9594_v57, %v9205_v6  ;;  %v9635_v55 = vpop.f32.mrb[117].mxu1  ;;  %v9596_v12 = vpop.f32.mrb[138].mxu0  ;;  %v9229_v6 = vrot.slane %v16858_v22, %v14560_v13 }
0x160f   : > { %v9730_v11 = vmul.f32 %v9593_v17, %v9593_v17  ;;  %v9636_v41 = vadd.f32 %v9635_v55, %v9213_v23  ;;  %v9637_v40 = vpop.f32.mrb[118].mxu1  ;;  %v9597_v16 = vpop.f32.mrb[139].mxu0  ;;  %v9722_v61 = vmul.f32 0.5, %v9593_v17  ;;  %v13374_v55 = vld [vmem:[%s17064_s12 + $0xb08] sm:$0xff]  }
0x1610   : > { %v9732_v27 = vmul.f32 %v9634_v35, %v9634_v35  ;;  %v9731_v58 = vmul.f32 %v9595_v9, %v9595_v9  ;;  %v9638_v3 = vpop.f32.mrb[119].mxu1  ;;  %v9724_v2 = vmul.f32 0.5, %v9634_v35  ;;  %v9723_v24 = vmul.f32 0.5, %v9595_v9  ;;  %v13375_v16 = vld [vmem:[%s17064_s12 + $0xb88] sm:$0xff]  }
0x1611   : > { %v9738_v30 = vmul.f32 %v9730_v11, %v9593_v17  ;;  %v9733_v42 = vmul.f32 %v9636_v41, %v9636_v41  ;;  %v9725_v37 = vmul.f32 0.5, %v9636_v41 }
0x1612   : > { %v9740_v26 = vmul.f32 %v9732_v27, %v9634_v35  ;;  %v9739_v8 = vmul.f32 %v9731_v58, %v9595_v9  ;;  %v13376_v27 = vld [vmem:[%s17064_s12 + $0xb50] sm:$0xff]  }
0x1613   : > { %v9746_v56 = vmul.f32 0.044715, %v9738_v30  ;;  %v9741_v45 = vmul.f32 %v9733_v42, %v9636_v41  ;;  %v13377_v42 = vld [vmem:[%s17064_s12 + $0xbd0] sm:$0xff]  }
0x1614   : > { %v9748_v54 = vmul.f32 0.044715, %v9740_v26  ;;  %v9747_v0 = vmul.f32 0.044715, %v9739_v8 }
0x1615   : > { %v9754_v52 = vadd.f32 %v9746_v56, %v9593_v17  ;;  %v9749_v20 = vmul.f32 0.044715, %v9741_v45 }
0x1616   : > { %v9756_v25 = vadd.f32 %v9748_v54, %v9634_v35  ;;  %v9755_v32 = vadd.f32 %v9747_v0, %v9595_v9  ;;  %v13378_v54 = vld [vmem:[%s17064_s12 + $0xb10] sm:$0xff]  }
0x1617   : > { %v9762_v1 = vmul.f32 0.7978846, %v9754_v52  ;;  %v9757_v5 = vadd.f32 %v9749_v20, %v9636_v41  ;;  %v13379_v20 = vld [vmem:[%s17064_s12 + $0xb90] sm:$0xff]  }
0x1618   : > { %v9764_v28 = vmul.f32 0.7978846, %v9756_v25  ;;  %v9763_v14 = vmul.f32 0.7978846, %v9755_v32  ;;  %v13380_v25 = vld [vmem:[%s17064_s12 + $0xb58] sm:$0xff]  }
0x1619   : > { %13520 = vtanh.f32 %v9762_v1  ;;  %v9765_v43 = vmul.f32 0.7978846, %v9757_v5  ;;  %v13381_v5 = vld [vmem:[%s17064_s12 + $0xbd8] sm:$0xff]  }
0x161a   : > { %13522 = vtanh.f32 %v9764_v28 }
0x161b   : > { %13524 = vtanh.f32 %v9763_v14 }
0x161c   : > { %13526 = vtanh.f32 %v9765_v43 }
0x1623   : > { %v13521_v34 = vpop.eup %13520 }
0x1624   : > { %v13523_v51 = vpop.eup %13522  ;;  %v9778_v15 = vadd.f32 1.0, %v13521_v34 }
0x1625   : > { %v13525_v53 = vpop.eup %13524  ;;  %v9780_v48 = vadd.f32 1.0, %v13523_v51  ;;  %v13382_v51 = vld [vmem:[%s17064_s12 + $0xb18] sm:$0xff]  }
0x1626   : > { %v13527_v50 = vpop.eup %13526  ;;  %v9779_v7 = vadd.f32 1.0, %v13525_v53  ;;  %v9786_v33 = vmul.f32 %v9778_v15, %v9722_v61  ;;  %v13383_v61 = vld [vmem:[%s17064_s12 + $0xb98] sm:$0xff]  }
0x1627   : > { %v9781_v44 = vadd.f32 1.0, %v13527_v50  ;;  %v9788_v19 = vmul.f32 %v9780_v48, %v9724_v2  ;;  %v13384_v48 = vld [vmem:[%s17064_s12 + $0xb60] sm:$0xff]  }
0x1628   : > { %v9787_v18 = vmul.f32 %v9779_v7, %v9723_v24  ;;  %v9922_v46 = vpack.c.bf16 %v9786_v33, %v9786_v33  ;;  %v13385_v24 = vld [vmem:[%s17064_s12 + $0xbe0] sm:$0xff]   ;;  %v13388_v33 = vld [vmem:[%s17064_s12 + $0xb68] sm:$0xff]  }
0x1629   : > { %v9789_v63 = vmul.f32 %v9781_v44, %v9725_v37  ;;  %v9924_v62 = vpack.c.bf16 %v9788_v19, %v9788_v19  ;;  %v13386_v37 = vld [vmem:[%s17064_s12 + $0xb20] sm:$0xff]   ;;  %v13390_v19 = vld [vmem:[%s17064_s12 + $0xb28] sm:$0xff]  }
0x162a   : > { %v9923_v36 = vpack.c.bf16 %v9787_v18, %v9787_v18  ;;  %v13387_v44 = vld [vmem:[%s17064_s12 + $0xba0] sm:$0xff]   ;;  %v13389_v18 = vld [vmem:[%s17064_s12 + $0xbe8] sm:$0xff]  }
0x162b   : > { %v9925_v49 = vpack.c.bf16 %v9789_v63, %v9789_v63  ;;  %v13391_v63 = vld [vmem:[%s17064_s12 + $0xba8] sm:$0xff]  }
0x162c   : > { %10346 = vmatprep.mubr.bf16.mxu0 %v9923_v36  ;;  %v9674_v23 = vpop.f32.mrb[140].mxu0  ;;  %v13393_v36 = vld [vmem:[%s17064_s12 + $0xbf0] sm:$0xff]  }
0x162d   : > { %10386 = vmatprep.mubr.bf16.mxu1 %v9925_v49  ;;  %v16888_v17 = vadd.f32 %v9674_v23, %v9217_v38  ;;  %v9715_v31 = vpop.f32.mrb[120].mxu1  ;;  %10347 = vmatmul.mubr.bf16.vlgmr.msra.gmra.mrb[144].mxu0 %v9922_v46  ;;  %v9676_v13 = vpop.f32.mrb[141].mxu0  ;;  %v13392_v38 = vld [vmem:[%s17064_s12 + $0xb70] sm:$0xff]   ;;  %v13396_v49 = vld [vmem:[%s17064_s12 + $0xb78] sm:$0xff]  }
0x162e   : > { %v16890_v22 = vadd.f32 %v9715_v31, %v9225_v10  ;;  %10387 = vmatmul.mubr.bf16.vlgmr.msra.gmra.mrb[124].mxu1 %v9924_v62  ;;  %v16892_v57 = vadd.f32 %v9676_v13, %v9221_v29  ;;  %v9717_v35 = vpop.f32.mrb[121].mxu1  ;;  %12662 = vmatpush3.bf16.msra.mxu0 %v13370_v4  ;;  %v9678_v9 = vpop.f32.mrb[142].mxu0  ;;  %v13394_v10 = vld [vmem:[%s17064_s12 + $0xb30] sm:$0xff]   ;;  %v13398_v13 = vld [vmem:[%s17064_s12 + $0xb38] sm:$0xff]  }
0x162f   : > { %v9734_v12 = vmul.f32 %v16888_v17, %v16888_v17  ;;  %v16899_v11 = vadd.f32 %v9717_v35, %v9229_v6  ;;  %12684 = vmatpush3.bf16.msra.mxu1 %v13371_v59  ;;  %v9719_v41 = vpop.f32.mrb[122].mxu1  ;;  %v9679_v40 = vpop.f32.mrb[143].mxu0  ;;  %12663 = vmatprep.subr.bf16.mxu0 %v13372_v60  ;;  %v13395_v4 = vld [vmem:[%s17064_s12 + $0xbb0] sm:$0xff]   ;;  %v13397_v6 = vld [vmem:[%s17064_s12 + $0xbf8] sm:$0xff]   ;;  %v9726_v23 = vmul.f32 0.5, %v16888_v17 }
0x1630   : > { %v9736_v58 = vmul.f32 %v16890_v22, %v16890_v22  ;;  %v9735_v3 = vmul.f32 %v16892_v57, %v16892_v57  ;;  %v9720_v30 = vpop.f32.mrb[123].mxu1  ;;  %12685 = vmatprep.subr.bf16.mxu1 %v13373_v39  ;;  %v9728_v31 = vmul.f32 0.5, %v16890_v22  ;;  %v9727_v35 = vmul.f32 0.5, %v16892_v57 }
0x1631   : > { %v9742_v26 = vmul.f32 %v9734_v12, %v16888_v17  ;;  %v9737_v8 = vmul.f32 %v16899_v11, %v16899_v11 }
0x1632   : > { %v9744_v56 = vmul.f32 %v9736_v58, %v16890_v22  ;;  %v9743_v45 = vmul.f32 %v9735_v3, %v16892_v57  ;;  %12664 = vmatpush3.bf16.msra.mxu0 %v13374_v55  ;;  %v13399_v55 = vld [vmem:[%s17064_s12 + $0xbb8] sm:$0xff]  }
0x1633   : > { %v9750_v0 = vmul.f32 0.044715, %v9742_v26  ;;  %v9745_v52 = vmul.f32 %v9737_v8, %v16899_v11  ;;  %12686 = vmatpush3.bf16.msra.mxu1 %v13375_v16  ;;  %12665 = vmatprep.subr.bf16.mxu0 %v13376_v27 }
0x1634   : > { %v9752_v32 = vmul.f32 0.044715, %v9744_v56  ;;  %v9751_v1 = vmul.f32 0.044715, %v9743_v45  ;;  %12687 = vmatprep.subr.bf16.mxu1 %v13377_v42 }
0x1635   : > { %v9758_v28 = vadd.f32 %v9750_v0, %v16888_v17  ;;  %v9753_v14 = vmul.f32 0.044715, %v9745_v52  ;;  %v9729_v17 = vmul.f32 0.5, %v16899_v11 }
0x1636   : > { %v9760_v43 = vadd.f32 %v9752_v32, %v16890_v22  ;;  %v9759_v34 = vadd.f32 %v9751_v1, %v16892_v57  ;;  %12666 = vmatpush3.bf16.msra.mxu0 %v13378_v54 }
0x1637   : > { %v9766_v15 = vmul.f32 0.7978846, %v9758_v28  ;;  %v9761_v53 = vadd.f32 %v9753_v14, %v16899_v11  ;;  %12688 = vmatpush3.bf16.msra.mxu1 %v13379_v20  ;;  %12667 = vmatprep.subr.bf16.mxu0 %v13380_v25 }
0x1638   : > { %v9768_v50 = vmul.f32 0.7978846, %v9760_v43  ;;  %v9767_v2 = vmul.f32 0.7978846, %v9759_v34  ;;  %12689 = vmatprep.subr.bf16.mxu1 %v13381_v5 }
0x1639   : > { %13528 = vtanh.f32 %v9766_v15  ;;  %v9769_v7 = vmul.f32 0.7978846, %v9761_v53 }
0x163a   : > { %13530 = vtanh.f32 %v9768_v50  ;;  %12668 = vmatpush3.bf16.msra.mxu0 %v13382_v51 }
0x163b   : > { %12690 = vmatpush3.bf16.msra.mxu1 %v13383_v61  ;;  %12669 = vmatprep.subr.bf16.mxu0 %v13384_v48  ;;  %13532 = vtanh.f32 %v9767_v2  ;;  %v12097_v48 = vld [vmem:[%s17065_s13 + $0x1] ss:$0 sm:$0xff] }
0x163c   : > { %12691 = vmatprep.subr.bf16.mxu1 %v13385_v24  ;;  %13534 = vtanh.f32 %v9769_v7 }
0x163e   : > { %12670 = vmatpush3.bf16.msra.mxu0 %v13386_v37 }
0x163f   : > { %12692 = vmatpush3.bf16.msra.mxu1 %v13387_v44  ;;  %12671 = vmatprep.subr.bf16.mxu0 %v13388_v33 }
0x1640   : > { %12693 = vmatprep.subr.bf16.mxu1 %v13389_v18 }
0x1642   : > { %12672 = vmatpush3.bf16.msra.mxu0 %v13390_v19 }
0x1643   : > { %v13529_v29 = vpop.eup %13528  ;;  %12694 = vmatpush3.bf16.msra.mxu1 %v13391_v63  ;;  %12673 = vmatprep.subr.bf16.mxu0 %v13392_v38 }
0x1644   : > { %v13531_v46 = vpop.eup %13530  ;;  %12695 = vmatprep.subr.bf16.mxu1 %v13393_v36  ;;  %v9782_v59 = vadd.f32 1.0, %v13529_v29  ;;  %v12101_v36 = vld [vmem:[%s17067_s15 + $0x1] ss:$0 sm:$0xff] }
0x1645   : > { %v13533_v60 = vpop.eup %13532  ;;  %v9784_v62 = vadd.f32 1.0, %v13531_v46 }
0x1646   : > { %v13535_v39 = vpop.eup %13534  ;;  %12674 = vmatpush3.bf16.msra.mxu0 %v13394_v10  ;;  %v9783_v9 = vadd.f32 1.0, %v13533_v60  ;;  %v9790_v41 = vmul.f32 %v9782_v59, %v9726_v23 }
0x1647   : > { %12696 = vmatpush3.bf16.msra.mxu1 %v13395_v4  ;;  %12675 = vmatprep.subr.bf16.mxu0 %v13396_v49  ;;  %v9785_v12 = vadd.f32 1.0, %v13535_v39  ;;  %v9792_v40 = vmul.f32 %v9784_v62, %v9728_v31 }
0x1648   : > { %12697 = vmatprep.subr.bf16.mxu1 %v13397_v6  ;;  %v9791_v22 = vmul.f32 %v9783_v9, %v9727_v35  ;;  %v9926_v57 = vpack.c.bf16 %v9790_v41, %v9790_v41 }
0x1649   : > { %v9793_v16 = vmul.f32 %v9785_v12, %v9729_v17  ;;  %v9928_v3 = vpack.c.bf16 %v9792_v40, %v9792_v40 }
0x164a   : > { %12676 = vmatpush3.bf16.msra.mxu0 %v13398_v13  ;;  %v9927_v27 = vpack.c.bf16 %v9791_v22, %v9791_v22 }
0x164b   : > { %12698 = vmatpush3.bf16.msra.mxu1 %v13399_v55  ;;  %v9929_v58 = vpack.c.bf16 %v9793_v16, %v9793_v16 }
0x164c   : > { %10426 = vmatprep.mubr.bf16.mxu0 %v9927_v27 }
0x164d   : > { %10466 = vmatprep.mubr.bf16.mxu1 %v9929_v58  ;;  %10427 = vmatmul.mubr.bf16.vlgmr.msra.gmra.mrb[148].mxu0 %v9926_v57 }
0x164e   : > { %10467 = vmatmul.mubr.bf16.vlgmr.msra.gmra.mrb[128].mxu1 %v9928_v3 }
0x1700   : > { %v12633_v30 = vpop.f32.mrb[144].mxu0 }
0x1701   : > { %v12655_v42 = vpop.f32.mrb[124].mxu1  ;;  %v12634_v26 = vpop.f32.mrb[145].mxu0 }
0x1702   : > { %v12635_v11 = vadd.f32 %v12634_v26, %v12633_v30  ;;  %v12656_v8 = vpop.f32.mrb[125].mxu1  ;;  %v12636_v56 = vpop.f32.mrb[146].mxu0 }
0x1703   : > { %v12657_v45 = vadd.f32 %v12656_v8, %v12655_v42  ;;  %v12658_v54 = vpop.f32.mrb[126].mxu1  ;;  %v12637_v0 = vpop.f32.mrb[147].mxu0 }
0x1704   : > { %v12659_v52 = vpop.f32.mrb[127].mxu1 }
0x1705   : > { %v10389_v20 = vadd.f32 %v12657_v45, %v12635_v11 }
0x1720   : > { %v12677_v25 = vpop.f32.mrb[148].mxu0 }
0x1721   : > { %v12699_v32 = vpop.f32.mrb[128].mxu1  ;;  %v12678_v1 = vpop.f32.mrb[149].mxu0 }
0x1722   : > { %v12679_v5 = vadd.f32 %v12678_v1, %v12677_v25  ;;  %v12700_v28 = vpop.f32.mrb[129].mxu1  ;;  %v12680_v14 = vpop.f32.mrb[150].mxu0 }
0x1723   : > { %v12701_v43 = vadd.f32 %v12700_v28, %v12699_v32  ;;  %v12702_v34 = vpop.f32.mrb[130].mxu1  ;;  %v12681_v51 = vpop.f32.mrb[151].mxu0 }
0x1724   : > { %v10429_v15 = vadd.f32 %v12679_v5, %v10389_v20  ;;  %v12703_v53 = vpop.f32.mrb[131].mxu1 }
0x1726   : > { %v10469_v61 = vadd.f32 %v12701_v43, %v10429_v15 }
0x1728   : > { %v10474_v50 = vadd.f32 %v10469_v61, %v16853_v21  ;;  %v12100_v21 = vld [vmem:[%s17066_s14 + $0x1] ss:$0 sm:$0xff] }
0x172a   : > { %v10483_v2 = vadd.f32 %v12097_v48, %v10474_v50 }
0x172c   : > { %v10484_v24 = vadd.f32 %v10483_v2, %v15736_v47 }
0x172e   : > { %10489 = vadd.xlane.f32.xlu0 %v10484_v24 }
0x17bb   : > { %v10490_v7 = vpop.xlane.xlu0 %10489 }
0x17bc   : > { %v10491_v37 = vmul.f32 0.0078125, %v10490_v7 }
0x17be   : > { %v10492_v44 = vsub.f32 %v10484_v24, %v10491_v37 }
0x17c0   : > { %v10493_v33 = vmul.f32 %v10492_v44, %v10492_v44 }
0x17c2   : > { %10494 = vadd.xlane.f32.xlu0 %v10493_v33 }
0x184f   : > { %v10495_v18 = vpop.xlane.xlu0 %10494 }
0x1850   : > { %v10496_v19 = vmul.f32 0.0078125, %v10495_v18 }
0x1852   : > { %v10497_v63 = vadd.f32 1e-12, %v10496_v19 }
0x1854   : > { %13536 = vrsqrt.f32 %v10497_v63 }
0x185e   : > { %v13537_v38 = vpop.eup %13536 }
0x185f   : > { %v10499_v47 = vmul.f32 %v13537_v38, %v10492_v44 }
0x1861   : > { %v10506_v10 = vmul.f32 %v12100_v21, %v10499_v47 }
0x1863   : > { %v10513_v29 = vadd.f32 %v12101_v36, %v10506_v10 }
0x1865   : > { %10514 = vst [vmem:[%s523_s1] sm:$0xff] %v10513_v29 }
0x1866   : > { %13552 = shalt.err (!%p13549_p3)
}
0x1867   : > { %s13553_s26 = scalar_lea.hbm %s17010_s2, 128  ;;  %s13557_s27 = scalar_lea.hbm %s17068_s16, 256 }
0x1868   : > { %p13554_p4 = scmp.ne.s32.totalorder %s17010_s2, %s13553_s26  ;;  %p13558_p9 = scmp.lt.u32.totalorder %s17010_s2, %s17068_s16 }
0x1869   : > { %p13559_p10 = scmp.lt.u32.totalorder %s13557_s27, %s13553_s26  ;;  %p13561_p12 = scmp.lt.u32.totalorder %s13553_s26, %s17010_s2 }
0x186a   : > { %p13555_p7 = pnand %p13554_p4, %p13733_p5 }
0x186b   : > { %p13560_p11 = por %p13559_p10, %p13558_p9 }
0x186c   : > { %p13556_p8 = pneg %p13555_p7 }
0x186d   : > { %p13562_p13 = por %p13561_p12, %p13560_p11 }
0x186f   : > { %p13563_p0 = pnand %p13562_p13, %p13556_p8 }
0x1871   : > { %13566 = shalt.err (!%p13563_p0)
}
0x1872   : > { %12889 = dma.vmem_to_hbm [thread:$0]  (%p13733_p5), %s17012_s18, 128, %s17010_s2, %s10516_s30  }
0x1873 PF: > { %s17096_s20 = sld [smem:[#allocation5_spill]]  ;;  %p12895_p1 = scmp.ge.s32.totalorder %s13601_s24, 2 }
0x1875   : > { %p12892_p2 = pnand %p12895_p1, %p13737_p6 }
0x1879   : > { %s10541_s25 = sand.u32 1, %s17096_s20  }
0x187a   : > { %s10542_s17 = scalar_lea.sflag [#allocation3], %s10541_s25 }
0x187b   : > { %13584 = dma.done.wait (!%p12892_p2), %s10542_s17, 128  }
0x187c   : > { %13586 = vsyncadd (!%p12892_p2), %s10542_s17, 4294967168  ;;  %s17098_s24 = sld [smem:[#allocation7_spill]]  ;;  %s17099_s28 = sld [smem:[#allocation6_spill]] }
0x187d   : > { %s17100_s23 = sld [smem:[#allocation8_spill]]  ;;  %s17101_s21 = smov %s13593_s22 }
0x1882   : > { %p26_p3 = scmp.ge.s32.totalorder %s17098_s24, 4   ;;  %s17102_s22 = smov %s17099_s28 }
0x1884   :  { %28 = sbr.rel (!%p26_p3) target bundleno = 7 (0x7), region = 134 }
0x188b   :  { %10547 = vsyncpa [#allocation3], 1 }
0x188c   :  { %10549 = vsyncpa [#allocation3 + $0x1], 1 }

</bundles_post_ra>
